<compile_context>
chip_gen: v7x
topology: tpu7x:2x2x1
jax: 0.10.0
libtpu: 0.0.40
codegen_flags: <defaults>
</compile_context>

<pallas_src>
import functools
import math

import jax
import jax.numpy as jnp
from jax.experimental import pallas as pl
from jax.experimental.pallas import tpu as pltpu


_VMEM_LIMIT = 48 * 1024 * 1024   # stays under v7x's 64 MiB physical VMEM


# ------------------------------ conv kernel ---------------------------------

def _conv_kernel(x_ref, w_ref, b_ref, *refs, hout, wout, mode, pool):
    """Whole-image KxK conv (stride 1) + bias with fused ReLU / tap / 2x2 maxpool.

    x_ref : (1, Hout+K-1, Wout+K-1, Cin)  padded image            (bf16)
    w_ref : (K, K, Cin, Cout)             weights, resident VMEM  (bf16)
    b_ref : (1, Cout)                     bias                    (f32)
    refs  : output ref(s) (+ a VMEM pool scratch when pool=True)
    """
    kh, kw = w_ref.shape[0], w_ref.shape[1]
    cin = x_ref.shape[3]
    cout = w_ref.shape[3]

    x = x_ref[0]                                        # (Hin, Win, Cin)
    acc = jnp.zeros((hout * wout, cout), jnp.float32)
    for dy in range(kh):
        for dx in range(kw):
            xs = x[dy:dy + hout, dx:dx + wout, :].reshape(hout * wout, cin)
            acc = acc + jnp.dot(xs, w_ref[dy, dx],
                                preferred_element_type=jnp.float32)
    acc = acc + b_ref[...]                              # f32 bias epilogue

    if mode == "linear":
        refs[0][0] = acc.reshape(hout, wout, cout).astype(refs[0].dtype)
        return

    if mode == "tap":                                   # pre-ReLU feature tap
        refs[0][0] = acc.reshape(hout, wout, cout).astype(refs[0].dtype)
        act_ref = refs[1]
    elif mode == "relu":
        act_ref = refs[0]
    else:
        raise ValueError(f"unknown mode: {mode!r}")

    relu = jnp.maximum(acc, 0.0)
    if not pool:
        act_ref[0] = relu.reshape(hout, wout, cout).astype(act_ref.dtype)
        return

    # Fused 2x2 / stride-2 maxpool: the full-res ReLU output never leaves VMEM.
    # H pairs via an order-preserving reshape + max; W pairs via stride-2
    # sublane loads from a small f32 VMEM scratch.
    hp, wp = hout // 2, wout // 2
    scr = refs[-1]                                      # (hp*wout, cout) f32
    r = relu.reshape(hp, 2, wout, cout)
    scr[...] = jnp.maximum(r[:, 0], r[:, 1]).reshape(hp * wout, cout)
    pooled = jnp.maximum(scr[pl.ds(0, hp * wp, stride=2), :],
                         scr[pl.ds(1, hp * wp, stride=2), :])
    act_ref[0] = pooled.reshape(hp, wp, cout).astype(act_ref.dtype)


def conv2d(x, w, b, *, mode, pool=False):
    """KxK conv (K in {1,3}), stride 1, 'same' spatial size, NHWC.

    mode: "relu"   -> (relu(conv),)            [pooled if pool=True]
          "tap"    -> (conv, relu(conv))       [2nd pooled if pool=True]
          "linear" -> (conv,)
    """
    if mode not in ("relu", "tap", "linear"):
        raise ValueError(f"unknown mode: {mode!r}")
    n, hh, ww, cin = x.shape
    kh, kw, wcin, cout = w.shape
    assert (kh, kw) in ((1, 1), (3, 3)) and wcin == cin
    if pool:
        assert mode in ("relu", "tap") and hh % 2 == 0 and ww % 2 == 0

    x_bf = x.astype(jnp.bfloat16)
    if kh == 3:
        x_bf = jnp.pad(x_bf, ((0, 0), (1, 1), (1, 1), (0, 0)))
    hin, win = x_bf.shape[1], x_bf.shape[2]
    w_bf = w.astype(jnp.bfloat16)
    b_row = b.reshape(1, cout).astype(jnp.float32)
    hp, wp = hh // 2, ww // 2

    out_shapes, out_specs = [], []
    if mode in ("tap", "linear"):          # pre-activation tap (full resolution)
        out_shapes.append(jax.ShapeDtypeStruct((n, hh, ww, cout), jnp.bfloat16))
        out_specs.append(pl.BlockSpec((1, hh, ww, cout), lambda i: (i, 0, 0, 0)))
    if mode in ("tap", "relu"):            # ReLU'd activation (maybe pooled)
        oh, owd = (hp, wp) if pool else (hh, ww)
        out_shapes.append(jax.ShapeDtypeStruct((n, oh, owd, cout), jnp.bfloat16))
        out_specs.append(pl.BlockSpec((1, oh, owd, cout), lambda i: (i, 0, 0, 0)))
    scratch = [pltpu.VMEM((hp * ww, cout), jnp.float32)] if pool else []

    flops = 2 * n * hh * ww * kh * kw * cin * cout
    bytes_accessed = (x_bf.size * 2 + w_bf.size * 2 + b_row.size * 4
                      + sum(math.prod(s.shape) * 2 for s in out_shapes))

    outs = pl.pallas_call(
        functools.partial(_conv_kernel, hout=hh, wout=ww, mode=mode, pool=pool),
        out_shape=tuple(out_shapes),
        grid=(n,),
        in_specs=[pl.BlockSpec((1, hin, win, cin), lambda i: (i, 0, 0, 0)),
                  pl.BlockSpec((kh, kw, cin, cout), lambda i: (0, 0, 0, 0)),
                  pl.BlockSpec((1, cout), lambda i: (0, 0))],
        out_specs=tuple(out_specs),
        scratch_shapes=scratch,
        compiler_params=pltpu.CompilerParams(
            dimension_semantics=("parallel",),
            vmem_limit_bytes=_VMEM_LIMIT),
        cost_estimate=pl.CostEstimate(flops=flops, transcendentals=0,
                                      bytes_accessed=int(bytes_accessed)),
    )(x_bf, w_bf, b_row)
    return outs


# ------------------------------- L1 kernel ----------------------------------

_L1_LANES = 512            # lane-dense last dim (multiple of 128)
_L1_TILE_ROWS = 256
_L1_PARTS = 2              # independent partial sums -> parallel axis for v7x 2 TCs


def _l1_partial_kernel(a_ref, b_ref, o_ref):
    @pl.when(pl.program_id(1) == 0)
    def _():
        o_ref[...] = jnp.zeros_like(o_ref)
    d = jnp.abs(a_ref[...].astype(jnp.float32) - b_ref[...].astype(jnp.float32))
    o_ref[...] = o_ref[...] + jnp.sum(d, keepdims=True)


def l1_loss(a, b):
    """mean(|a - b|) over all elements (f32 accumulation, tiled Pallas reduce)."""
    assert a.shape == b.shape
    n_true = a.size
    fa, fb = a.reshape(-1), b.reshape(-1)
    pad = (-fa.size) % _L1_LANES
    if pad:                               # zero padding adds 0 to the |a-b| sum
        fa = jnp.pad(fa, (0, pad))
        fb = jnp.pad(fb, (0, pad))
    rows = fa.size // _L1_LANES
    per_part = -(-rows // _L1_PARTS)
    tr = min(_L1_TILE_ROWS, -(-per_part // 8) * 8)      # sublane-aligned tile rows
    tiles_per_part = -(-per_part // tr)
    total_rows = _L1_PARTS * tiles_per_part * tr

    fa = fa.reshape(rows, _L1_LANES)
    fb = fb.reshape(rows, _L1_LANES)
    if total_rows != rows:
        fa = jnp.pad(fa, ((0, total_rows - rows), (0, 0)))
        fb = jnp.pad(fb, ((0, total_rows - rows), (0, 0)))

    imap = lambda p, t: (p * tiles_per_part + t, 0)
    out = pl.pallas_call(
        _l1_partial_kernel,
        out_shape=jax.ShapeDtypeStruct((_L1_PARTS, 1, 1), jnp.float32),
        grid=(_L1_PARTS, tiles_per_part),
        in_specs=[pl.BlockSpec((tr, _L1_LANES), imap),
                  pl.BlockSpec((tr, _L1_LANES), imap)],
        out_specs=pl.BlockSpec((1, 1, 1), lambda p, t: (p, 0, 0)),
        compiler_params=pltpu.CompilerParams(
            dimension_semantics=("parallel", "arbitrary"),
            vmem_limit_bytes=_VMEM_LIMIT),
    )(fa, fb)
    return jnp.sum(out) / jnp.float32(n_true)


# -------------------------------- JAX glue -----------------------------------

_IMAGENET_MEAN = jnp.array([0.485, 0.456, 0.406], jnp.float32)
_IMAGENET_STD = jnp.array([0.229, 0.224, 0.225], jnp.float32)


def _im2col3x3(x):
    """(N, H, W, C) -> (N, H, W, 9*C): 3x3 same-padding patches, (dy, dx, c) order."""
    n, h, w, c = x.shape
    xp = jnp.pad(x, ((0, 0), (1, 1), (1, 1), (0, 0)))
    cols = [xp[:, dy:dy + h, dx:dx + w, :] for dy in range(3) for dx in range(3)]
    return jnp.concatenate(cols, axis=-1)


def init_vgg_params(key):
    # VGG19 conv layers up to features[16]: 3x3 kernels, (Cin, Cout) per conv.
    # TODO(synk): pretrained ImageNet VGG19 weights cannot be loaded here (no
    # file / network access); deterministic random init with identical shapes.
    cfg = [(3, 64), (64, 64), (64, 128), (128, 128),
           (128, 256), (256, 256), (256, 256), (256, 256)]
    params = []
    for i, (cin, cout) in enumerate(cfg):
        k_w, k_b = jax.random.split(jax.random.fold_in(key, i))
        wgt = jax.random.normal(k_w, (3, 3, cin, cout), jnp.float32) * (2.0 / (9 * cin)) ** 0.5
        bias = jax.random.normal(k_b, (cout,), jnp.float32) * 0.01
        params.append((wgt, bias))
    return params


def vgg_features(x_nhwc, params):
    """Features after VGG19.features indices 2, 7, 16 (conv outputs, pre-ReLU)."""
    x = ((x_nhwc + 1.0) * 0.5 - _IMAGENET_MEAN) / _IMAGENET_STD
    (w0, b0), (w2, b2), (w5, b5), (w7, b7), \
        (w10, b10), (w12, b12), (w14, b14), (w16, b16) = params

    # Layer 0 has Cin=3 (K=3 would waste >97% of MXU depth): fold the 27 taps
    # into a single (H*W, 27) x (27, 64) matmul via a cheap glue-side im2col.
    x27 = _im2col3x3(x.astype(jnp.bfloat16))
    h, = conv2d(x27, w0.reshape(1, 1, 27, 64), b0, mode="relu")   # conv[0] + ReLU[1]
    f1, h = conv2d(h, w2, b2, mode="tap", pool=True)   # conv[2] tap + ReLU[3] + MaxPool[4]
    h, = conv2d(h, w5, b5, mode="relu")                # conv[5] + ReLU[6]
    f2, h = conv2d(h, w7, b7, mode="tap", pool=True)   # conv[7] tap + ReLU[8] + MaxPool[9]
    h, = conv2d(h, w10, b10, mode="relu")              # conv[10] + ReLU[11]
    h, = conv2d(h, w12, b12, mode="relu")              # conv[12] + ReLU[13]
    h, = conv2d(h, w14, b14, mode="relu")              # conv[14] + ReLU[15]
    f3, = conv2d(h, w16, b16, mode="linear")           # conv[16] tap
    return f1, f2, f3


def sr_loss(sr_nchw, hr_nchw, params, lam_pix=1.0, lam_perc=0.15):
    """Returns (l1, perceptual, total); inputs NCHW in (-1, 1)."""
    l1 = l1_loss(sr_nchw, hr_nchw)

    # Batch SR and HR through ONE VGG pass: half the kernel launches / weight
    # DMA, and the batch grid axis stays even for v7x's two TensorCores.
    n = sr_nchw.shape[0]
    both = jnp.concatenate([sr_nchw, hr_nchw], axis=0)
    both_nhwc = jnp.transpose(both, (0, 2, 3, 1))
    # TODO(synk): if hr is static across training steps, hoist its VGG features
    # (the f[n:] halves) out of the jitted step to halve the VGG compute.
    feats = vgg_features(both_nhwc, params)

    perc = jnp.float32(0.0)            # layer_weights default to 1.0 each,
    for f in feats:                    # spatial shapes always match (no interp)
        perc = perc + l1_loss(f[:n], f[n:])

    total = lam_pix * l1 + lam_perc * perc
    return l1, perc, total


# ---------------------------------- main --------------------------------------

if __name__ == "__main__":
    key = jax.random.PRNGKey(0)
    k_sr, k_hr, k_params = jax.random.split(key, 3)

    N, C, H, W = 2, 3, 16, 16
    sr = jax.random.uniform(k_sr, (N, C, H, W), jnp.float32, minval=-1.0, maxval=1.0)
    hr = jax.random.uniform(k_hr, (N, C, H, W), jnp.float32, minval=-1.0, maxval=1.0)
    params = init_vgg_params(k_params)

    l1, perc, total = jax.jit(sr_loss)(sr, hr, params)
    jax.block_until_ready((l1, perc, total))
    print("KERNEL_OK")
</pallas_src>

<mosaic_0001>
module attributes {stable_mosaic.version = 11 : i64} {
  func.func @_conv_kernel(%arg0: i32, %arg1: memref<1x16x16x27xbf16, #tpu.memory_space<vmem>>, %arg2: memref<1x1x27x64xbf16, #tpu.memory_space<vmem>>, %arg3: memref<1x64xf32, #tpu.memory_space<vmem>>, %arg4: memref<1x16x16x64xbf16, #tpu.memory_space<vmem>>) attributes {dimension_semantics = [#tpu.dimension_semantics<parallel>], iteration_bounds = array<i64: 4>, scalar_prefetch = 0 : i64, scratch_operands = 0 : i64, tpu.core_type = #tpu.core_type<tc>, window_params = [{transform_indices = @transform_0, window_bounds = array<i64: 1, 16, 16, 27>}, {pipeline_mode = #tpu.pipeline_mode<synchronous>, transform_indices = @transform_1, window_bounds = array<i64: 1, 1, 27, 64>}, {pipeline_mode = #tpu.pipeline_mode<synchronous>, transform_indices = @transform_2, window_bounds = array<i64: 1, 64>}, {transform_indices = @transform_3, window_bounds = array<i64: 1, 16, 16, 64>}]} {
    %c0 = arith.constant 0 : index
    %c0_0 = arith.constant 0 : index
    %c0_1 = arith.constant 0 : index
    %c0_2 = arith.constant 0 : index
    %0 = vector.load %arg1[%c0, %c0_0, %c0_1, %c0_2] : memref<1x16x16x27xbf16, #tpu.memory_space<vmem>>, vector<1x16x16x27xbf16>
    %1 = vector.shape_cast %0 : vector<1x16x16x27xbf16> to vector<16x16x27xbf16>
    %cst = arith.constant 0.000000e+00 : f32
    %2 = vector.broadcast %cst : f32 to vector<256x64xf32>
    %3 = vector.shape_cast %1 : vector<16x16x27xbf16> to vector<256x27xbf16>
    %c0_3 = arith.constant 0 : index
    %c0_4 = arith.constant 0 : index
    %c0_5 = arith.constant 0 : index
    %c0_6 = arith.constant 0 : index
    %4 = vector.load %arg2[%c0_3, %c0_4, %c0_5, %c0_6] : memref<1x1x27x64xbf16, #tpu.memory_space<vmem>>, vector<1x1x27x64xbf16>
    %5 = vector.shape_cast %4 : vector<1x1x27x64xbf16> to vector<27x64xbf16>
    %cst_7 = arith.constant dense<0.000000e+00> : vector<256x64xf32>
    %6 = tpu.matmul %3, %5, %cst_7 {dimension_numbers = #tpu.dot_dimension_numbers<[1], [0], [0], [1], [0, 0, 1, 1], [], []>} : vector<256x27xbf16>, vector<27x64xbf16>, vector<256x64xf32> -> vector<256x64xf32>
    %7 = arith.addf %2, %6 : vector<256x64xf32>
    %c0_8 = arith.constant 0 : index
    %c0_9 = arith.constant 0 : index
    %8 = vector.load %arg3[%c0_8, %c0_9] : memref<1x64xf32, #tpu.memory_space<vmem>>, vector<1x64xf32>
    %9 = vector.broadcast %8 : vector<1x64xf32> to vector<256x64xf32>
    %10 = arith.addf %7, %9 : vector<256x64xf32>
    %cst_10 = arith.constant 0.000000e+00 : f32
    %11 = vector.broadcast %cst_10 : f32 to vector<256x64xf32>
    %12 = arith.maximumf %10, %11 : vector<256x64xf32>
    %13 = vector.shape_cast %12 : vector<256x64xf32> to vector<16x16x64xf32>
    %14 = arith.truncf %13 : vector<16x16x64xf32> to vector<16x16x64xbf16>
    %c0_11 = arith.constant 0 : index
    %c0_12 = arith.constant 0 : index
    %c0_13 = arith.constant 0 : index
    %c0_14 = arith.constant 0 : index
    %15 = vector.load %arg4[%c0_11, %c0_12, %c0_13, %c0_14] : memref<1x16x16x64xbf16, #tpu.memory_space<vmem>>, vector<1x16x16x64xbf16>
    %16 = vector.shape_cast %15 : vector<1x16x16x64xbf16> to vector<16x16x64xbf16>
    %17 = vector.shape_cast %14 : vector<16x16x64xbf16> to vector<1x16x16x64xbf16>
    tpu.vector_store %arg4[%c0_11, %c0_12, %c0_13, %c0_14], %17 {strides = array<i32>} : memref<1x16x16x64xbf16, #tpu.memory_space<vmem>>, vector<1x16x16x64xbf16>,
    return
  }
  func.func @transform_0(%arg0: i32) -> (i32, i32, i32, i32) {
    %c0_i32 = arith.constant 0 : i32
    %c0_i32_0 = arith.constant 0 : i32
    %c0_i32_1 = arith.constant 0 : i32
    %c0_i32_2 = arith.constant 0 : i32
    return %arg0, %c0_i32, %c0_i32_0, %c0_i32_1 : i32, i32, i32, i32
  }
  func.func @transform_1(%arg0: i32) -> (i32, i32, i32, i32) {
    %c0_i32 = arith.constant 0 : i32
    %c0_i32_0 = arith.constant 0 : i32
    %c0_i32_1 = arith.constant 0 : i32
    %c0_i32_2 = arith.constant 0 : i32
    %c0_i32_3 = arith.constant 0 : i32
    return %c0_i32, %c0_i32_0, %c0_i32_1, %c0_i32_2 : i32, i32, i32, i32
  }
  func.func @transform_2(%arg0: i32) -> (i32, i32) {
    %c0_i32 = arith.constant 0 : i32
    %c0_i32_0 = arith.constant 0 : i32
    %c0_i32_1 = arith.constant 0 : i32
    return %c0_i32, %c0_i32_0 : i32, i32
  }
  func.func @transform_3(%arg0: i32) -> (i32, i32, i32, i32) {
    %c0_i32 = arith.constant 0 : i32
    %c0_i32_0 = arith.constant 0 : i32
    %c0_i32_1 = arith.constant 0 : i32
    %c0_i32_2 = arith.constant 0 : i32
    return %arg0, %c0_i32, %c0_i32_0, %c0_i32_1 : i32, i32, i32, i32
  }
}

module attributes {stable_mosaic.version = 11 : i64} {
  func.func @_conv_kernel(%arg0: i32, %arg1: memref<1x18x18x64xbf16, #tpu.memory_space<vmem>>, %arg2: memref<3x3x64x64xbf16, #tpu.memory_space<vmem>>, %arg3: memref<1x64xf32, #tpu.memory_space<vmem>>, %arg4: memref<1x16x16x64xbf16, #tpu.memory_space<vmem>>, %arg5: memref<1x8x8x64xbf16, #tpu.memory_space<vmem>>, %arg6: memref<128x64xf32, #tpu.memory_space<vmem>>) attributes {dimension_semantics = [#tpu.dimension_semantics<parallel>], iteration_bounds = array<i64: 4>, scalar_prefetch = 0 : i64, scratch_operands = 1 : i64, tpu.core_type = #tpu.core_type<tc>, window_params = [{transform_indices = @transform_0, window_bounds = array<i64: 1, 18, 18, 64>}, {pipeline_mode = #tpu.pipeline_mode<synchronous>, transform_indices = @transform_1, window_bounds = array<i64: 3, 3, 64, 64>}, {pipeline_mode = #tpu.pipeline_mode<synchronous>, transform_indices = @transform_2, window_bounds = array<i64: 1, 64>}, {transform_indices = @transform_3, window_bounds = array<i64: 1, 16, 16, 64>}, {transform_indices = @transform_4, window_bounds = array<i64: 1, 8, 8, 64>}]} {
    %c0 = arith.constant 0 : index
    %c0_0 = arith.constant 0 : index
    %c0_1 = arith.constant 0 : index
    %c0_2 = arith.constant 0 : index
    %0 = vector.load %arg1[%c0, %c0_0, %c0_1, %c0_2] : memref<1x18x18x64xbf16, #tpu.memory_space<vmem>>, vector<1x18x18x64xbf16>
    %1 = vector.shape_cast %0 : vector<1x18x18x64xbf16> to vector<18x18x64xbf16>
    %cst = arith.constant 0.000000e+00 : f32
    %2 = vector.broadcast %cst : f32 to vector<256x64xf32>
    %3 = vector.extract_strided_slice %1 {offsets = [0, 0, 0], sizes = [16, 16, 64], strides = [1, 1, 1]} : vector<18x18x64xbf16> to vector<16x16x64xbf16>
    %4 = vector.shape_cast %3 : vector<16x16x64xbf16> to vector<256x64xbf16>
    %c0_3 = arith.constant 0 : index
    %c0_4 = arith.constant 0 : index
    %c0_5 = arith.constant 0 : index
    %c0_6 = arith.constant 0 : index
    %5 = vector.load %arg2[%c0_3, %c0_4, %c0_5, %c0_6] : memref<3x3x64x64xbf16, #tpu.memory_space<vmem>>, vector<1x1x64x64xbf16>
    %6 = vector.shape_cast %5 : vector<1x1x64x64xbf16> to vector<64x64xbf16>
    %cst_7 = arith.constant dense<0.000000e+00> : vector<256x64xf32>
    %7 = tpu.matmul %4, %6, %cst_7 {dimension_numbers = #tpu.dot_dimension_numbers<[1], [0], [0], [1], [0, 0, 1, 1], [], []>} : vector<256x64xbf16>, vector<64x64xbf16>, vector<256x64xf32> -> vector<256x64xf32>
    %8 = arith.addf %2, %7 : vector<256x64xf32>
    %9 = vector.extract_strided_slice %1 {offsets = [0, 1, 0], sizes = [16, 16, 64], strides = [1, 1, 1]} : vector<18x18x64xbf16> to vector<16x16x64xbf16>
    %10 = vector.shape_cast %9 : vector<16x16x64xbf16> to vector<256x64xbf16>
    %c0_8 = arith.constant 0 : index
    %c1 = arith.constant 1 : index
    %c0_9 = arith.constant 0 : index
    %c0_10 = arith.constant 0 : index
    %11 = vector.load %arg2[%c0_8, %c1, %c0_9, %c0_10] : memref<3x3x64x64xbf16, #tpu.memory_space<vmem>>, vector<1x1x64x64xbf16>
    %12 = vector.shape_cast %11 : vector<1x1x64x64xbf16> to vector<64x64xbf16>
    %cst_11 = arith.constant dense<0.000000e+00> : vector<256x64xf32>
    %13 = tpu.matmul %10, %12, %cst_11 {dimension_numbers = #tpu.dot_dimension_numbers<[1], [0], [0], [1], [0, 0, 1, 1], [], []>} : vector<256x64xbf16>, vector<64x64xbf16>, vector<256x64xf32> -> vector<256x64xf32>
    %14 = arith.addf %8, %13 : vector<256x64xf32>
    %15 = vector.extract_strided_slice %1 {offsets = [0, 2, 0], sizes = [16, 16, 64], strides = [1, 1, 1]} : vector<18x18x64xbf16> to vector<16x16x64xbf16>
    %16 = vector.shape_cast %15 : vector<16x16x64xbf16> to vector<256x64xbf16>
    %c0_12 = arith.constant 0 : index
    %c2 = arith.constant 2 : index
    %c0_13 = arith.constant 0 : index
    %c0_14 = arith.constant 0 : index
    %17 = vector.load %arg2[%c0_12, %c2, %c0_13, %c0_14] : memref<3x3x64x64xbf16, #tpu.memory_space<vmem>>, vector<1x1x64x64xbf16>
    %18 = vector.shape_cast %17 : vector<1x1x64x64xbf16> to vector<64x64xbf16>
    %cst_15 = arith.constant dense<0.000000e+00> : vector<256x64xf32>
    %19 = tpu.matmul %16, %18, %cst_15 {dimension_numbers = #tpu.dot_dimension_numbers<[1], [0], [0], [1], [0, 0, 1, 1], [], []>} : vector<256x64xbf16>, vector<64x64xbf16>, vector<256x64xf32> -> vector<256x64xf32>
    %20 = arith.addf %14, %19 : vector<256x64xf32>
    %21 = vector.extract_strided_slice %1 {offsets = [1, 0, 0], sizes = [16, 16, 64], strides = [1, 1, 1]} : vector<18x18x64xbf16> to vector<16x16x64xbf16>
    %22 = vector.shape_cast %21 : vector<16x16x64xbf16> to vector<256x64xbf16>
    %c1_16 = arith.constant 1 : index
    %c0_17 = arith.constant 0 : index
    %c0_18 = arith.constant 0 : index
    %c0_19 = arith.constant 0 : index
    %23 = vector.load %arg2[%c1_16, %c0_17, %c0_18, %c0_19] : memref<3x3x64x64xbf16, #tpu.memory_space<vmem>>, vector<1x1x64x64xbf16>
    %24 = vector.shape_cast %23 : vector<1x1x64x64xbf16> to vector<64x64xbf16>
    %cst_20 = arith.constant dense<0.000000e+00> : vector<256x64xf32>
    %25 = tpu.matmul %22, %24, %cst_20 {dimension_numbers = #tpu.dot_dimension_numbers<[1], [0], [0], [1], [0, 0, 1, 1], [], []>} : vector<256x64xbf16>, vector<64x64xbf16>, vector<256x64xf32> -> vector<256x64xf32>
    %26 = arith.addf %20, %25 : vector<256x64xf32>
    %27 = vector.extract_strided_slice %1 {offsets = [1, 1, 0], sizes = [16, 16, 64], strides = [1, 1, 1]} : vector<18x18x64xbf16> to vector<16x16x64xbf16>
    %28 = vector.shape_cast %27 : vector<16x16x64xbf16> to vector<256x64xbf16>
    %c1_21 = arith.constant 1 : index
    %c1_22 = arith.constant 1 : index
    %c0_23 = arith.constant 0 : index
    %c0_24 = arith.constant 0 : index
    %29 = vector.load %arg2[%c1_21, %c1_22, %c0_23, %c0_24] : memref<3x3x64x64xbf16, #tpu.memory_space<vmem>>, vector<1x1x64x64xbf16>
    %30 = vector.shape_cast %29 : vector<1x1x64x64xbf16> to vector<64x64xbf16>
    %cst_25 = arith.constant dense<0.000000e+00> : vector<256x64xf32>
    %31 = tpu.matmul %28, %30, %cst_25 {dimension_numbers = #tpu.dot_dimension_numbers<[1], [0], [0], [1], [0, 0, 1, 1], [], []>} : vector<256x64xbf16>, vector<64x64xbf16>, vector<256x64xf32> -> vector<256x64xf32>
    %32 = arith.addf %26, %31 : vector<256x64xf32>
    %33 = vector.extract_strided_slice %1 {offsets = [1, 2, 0], sizes = [16, 16, 64], strides = [1, 1, 1]} : vector<18x18x64xbf16> to vector<16x16x64xbf16>
    %34 = vector.shape_cast %33 : vector<16x16x64xbf16> to vector<256x64xbf16>
    %c1_26 = arith.constant 1 : index
    %c2_27 = arith.constant 2 : index
    %c0_28 = arith.constant 0 : index
    %c0_29 = arith.constant 0 : index
    %35 = vector.load %arg2[%c1_26, %c2_27, %c0_28, %c0_29] : memref<3x3x64x64xbf16, #tpu.memory_space<vmem>>, vector<1x1x64x64xbf16>
    %36 = vector.shape_cast %35 : vector<1x1x64x64xbf16> to vector<64x64xbf16>
    %cst_30 = arith.constant dense<0.000000e+00> : vector<256x64xf32>
    %37 = tpu.matmul %34, %36, %cst_30 {dimension_numbers = #tpu.dot_dimension_numbers<[1], [0], [0], [1], [0, 0, 1, 1], [], []>} : vector<256x64xbf16>, vector<64x64xbf16>, vector<256x64xf32> -> vector<256x64xf32>
    %38 = arith.addf %32, %37 : vector<256x64xf32>
    %39 = vector.extract_strided_slice %1 {offsets = [2, 0, 0], sizes = [16, 16, 64], strides = [1, 1, 1]} : vector<18x18x64xbf16> to vector<16x16x64xbf16>
    %40 = vector.shape_cast %39 : vector<16x16x64xbf16> to vector<256x64xbf16>
    %c2_31 = arith.constant 2 : index
    %c0_32 = arith.constant 0 : index
    %c0_33 = arith.constant 0 : index
    %c0_34 = arith.constant 0 : index
    %41 = vector.load %arg2[%c2_31, %c0_32, %c0_33, %c0_34] : memref<3x3x64x64xbf16, #tpu.memory_space<vmem>>, vector<1x1x64x64xbf16>
    %42 = vector.shape_cast %41 : vector<1x1x64x64xbf16> to vector<64x64xbf16>
    %cst_35 = arith.constant dense<0.000000e+00> : vector<256x64xf32>
    %43 = tpu.matmul %40, %42, %cst_35 {dimension_numbers = #tpu.dot_dimension_numbers<[1], [0], [0], [1], [0, 0, 1, 1], [], []>} : vector<256x64xbf16>, vector<64x64xbf16>, vector<256x64xf32> -> vector<256x64xf32>
    %44 = arith.addf %38, %43 : vector<256x64xf32>
    %45 = vector.extract_strided_slice %1 {offsets = [2, 1, 0], sizes = [16, 16, 64], strides = [1, 1, 1]} : vector<18x18x64xbf16> to vector<16x16x64xbf16>
    %46 = vector.shape_cast %45 : vector<16x16x64xbf16> to vector<256x64xbf16>
    %c2_36 = arith.constant 2 : index
    %c1_37 = arith.constant 1 : index
    %c0_38 = arith.constant 0 : index
    %c0_39 = arith.constant 0 : index
    %47 = vector.load %arg2[%c2_36, %c1_37, %c0_38, %c0_39] : memref<3x3x64x64xbf16, #tpu.memory_space<vmem>>, vector<1x1x64x64xbf16>
    %48 = vector.shape_cast %47 : vector<1x1x64x64xbf16> to vector<64x64xbf16>
    %cst_40 = arith.constant dense<0.000000e+00> : vector<256x64xf32>
    %49 = tpu.matmul %46, %48, %cst_40 {dimension_numbers = #tpu.dot_dimension_numbers<[1], [0], [0], [1], [0, 0, 1, 1], [], []>} : vector<256x64xbf16>, vector<64x64xbf16>, vector<256x64xf32> -> vector<256x64xf32>
    %50 = arith.addf %44, %49 : vector<256x64xf32>
    %51 = vector.extract_strided_slice %1 {offsets = [2, 2, 0], sizes = [16, 16, 64], strides = [1, 1, 1]} : vector<18x18x64xbf16> to vector<16x16x64xbf16>
    %52 = vector.shape_cast %51 : vector<16x16x64xbf16> to vector<256x64xbf16>
    %c2_41 = arith.constant 2 : index
    %c2_42 = arith.constant 2 : index
    %c0_43 = arith.constant 0 : index
    %c0_44 = arith.constant 0 : index
    %53 = vector.load %arg2[%c2_41, %c2_42, %c0_43, %c0_44] : memref<3x3x64x64xbf16, #tpu.memory_space<vmem>>, vector<1x1x64x64xbf16>
    %54 = vector.shape_cast %53 : vector<1x1x64x64xbf16> to vector<64x64xbf16>
    %cst_45 = arith.constant dense<0.000000e+00> : vector<256x64xf32>
    %55 = tpu.matmul %52, %54, %cst_45 {dimension_numbers = #tpu.dot_dimension_numbers<[1], [0], [0], [1], [0, 0, 1, 1], [], []>} : vector<256x64xbf16>, vector<64x64xbf16>, vector<256x64xf32> -> vector<256x64xf32>
    %56 = arith.addf %50, %55 : vector<256x64xf32>
    %c0_46 = arith.constant 0 : index
    %c0_47 = arith.constant 0 : index
    %57 = vector.load %arg3[%c0_46, %c0_47] : memref<1x64xf32, #tpu.memory_space<vmem>>, vector<1x64xf32>
    %58 = vector.broadcast %57 : vector<1x64xf32> to vector<256x64xf32>
    %59 = arith.addf %56, %58 : vector<256x64xf32>
    %60 = vector.shape_cast %59 : vector<256x64xf32> to vector<16x16x64xf32>
    %61 = arith.truncf %60 : vector<16x16x64xf32> to vector<16x16x64xbf16>
    %c0_48 = arith.constant 0 : index
    %c0_49 = arith.constant 0 : index
    %c0_50 = arith.constant 0 : index
    %c0_51 = arith.constant 0 : index
    %62 = vector.load %arg4[%c0_48, %c0_49, %c0_50, %c0_51] : memref<1x16x16x64xbf16, #tpu.memory_space<vmem>>, vector<1x16x16x64xbf16>
    %63 = vector.shape_cast %62 : vector<1x16x16x64xbf16> to vector<16x16x64xbf16>
    %64 = vector.shape_cast %61 : vector<16x16x64xbf16> to vector<1x16x16x64xbf16>
    tpu.vector_store %arg4[%c0_48, %c0_49, %c0_50, %c0_51], %64 {strides = array<i32>} : memref<1x16x16x64xbf16, #tpu.memory_space<vmem>>, vector<1x16x16x64xbf16>,
    %cst_52 = arith.constant 0.000000e+00 : f32
    %65 = vector.broadcast %cst_52 : f32 to vector<256x64xf32>
    %66 = arith.maximumf %59, %65 : vector<256x64xf32>
    %67 = vector.shape_cast %66 : vector<256x64xf32> to vector<8x2x16x64xf32>
    %68 = vector.extract_strided_slice %67 {offsets = [0, 0, 0, 0], sizes = [8, 1, 16, 64], strides = [1, 1, 1, 1]} : vector<8x2x16x64xf32> to vector<8x1x16x64xf32>
    %69 = vector.shape_cast %68 : vector<8x1x16x64xf32> to vector<8x16x64xf32>
    %70 = vector.extract_strided_slice %67 {offsets = [0, 1, 0, 0], sizes = [8, 1, 16, 64], strides = [1, 1, 1, 1]} : vector<8x2x16x64xf32> to vector<8x1x16x64xf32>
    %71 = vector.shape_cast %70 : vector<8x1x16x64xf32> to vector<8x16x64xf32>
    %72 = arith.maximumf %69, %71 : vector<8x16x64xf32>
    %73 = vector.shape_cast %72 : vector<8x16x64xf32> to vector<128x64xf32>
    %c0_53 = arith.constant 0 : index
    %c0_54 = arith.constant 0 : index
    %74 = vector.load %arg6[%c0_53, %c0_54] : memref<128x64xf32, #tpu.memory_space<vmem>>, vector<128x64xf32>
    tpu.vector_store %arg6[%c0_53, %c0_54], %73 {strides = array<i32>} : memref<128x64xf32, #tpu.memory_space<vmem>>, vector<128x64xf32>,
    %c0_55 = arith.constant 0 : index
    %c0_56 = arith.constant 0 : index
    %75 = tpu.strided_load %arg6[%c0_55, %c0_56] {strides = array<i32: 2, 1>} : memref<128x64xf32, #tpu.memory_space<vmem>>, vector<64x64xf32>
    %c1_57 = arith.constant 1 : index
    %c0_58 = arith.constant 0 : index
    %76 = tpu.strided_load %arg6[%c1_57, %c0_58] {strides = array<i32: 2, 1>} : memref<128x64xf32, #tpu.memory_space<vmem>>, vector<64x64xf32>
    %77 = arith.maximumf %75, %76 : vector<64x64xf32>
    %78 = vector.shape_cast %77 : vector<64x64xf32> to vector<8x8x64xf32>
    %79 = arith.truncf %78 : vector<8x8x64xf32> to vector<8x8x64xbf16>
    %c0_59 = arith.constant 0 : index
    %c0_60 = arith.constant 0 : index
    %c0_61 = arith.constant 0 : index
    %c0_62 = arith.constant 0 : index
    %80 = vector.load %arg5[%c0_59, %c0_60, %c0_61, %c0_62] : memref<1x8x8x64xbf16, #tpu.memory_space<vmem>>, vector<1x8x8x64xbf16>
    %81 = vector.shape_cast %80 : vector<1x8x8x64xbf16> to vector<8x8x64xbf16>
    %82 = vector.shape_cast %79 : vector<8x8x64xbf16> to vector<1x8x8x64xbf16>
    tpu.vector_store %arg5[%c0_59, %c0_60, %c0_61, %c0_62], %82 {strides = array<i32>} : memref<1x8x8x64xbf16, #tpu.memory_space<vmem>>, vector<1x8x8x64xbf16>,
    return
  }
  func.func @transform_0(%arg0: i32) -> (i32, i32, i32, i32) {
    %c0_i32 = arith.constant 0 : i32
    %c0_i32_0 = arith.constant 0 : i32
    %c0_i32_1 = arith.constant 0 : i32
    %c0_i32_2 = arith.constant 0 : i32
    return %arg0, %c0_i32, %c0_i32_0, %c0_i32_1 : i32, i32, i32, i32
  }
  func.func @transform_1(%arg0: i32) -> (i32, i32, i32, i32) {
    %c0_i32 = arith.constant 0 : i32
    %c0_i32_0 = arith.constant 0 : i32
    %c0_i32_1 = arith.constant 0 : i32
    %c0_i32_2 = arith.constant 0 : i32
    %c0_i32_3 = arith.constant 0 : i32
    return %c0_i32, %c0_i32_0, %c0_i32_1, %c0_i32_2 : i32, i32, i32, i32
  }
  func.func @transform_2(%arg0: i32) -> (i32, i32) {
    %c0_i32 = arith.constant 0 : i32
    %c0_i32_0 = arith.constant 0 : i32
    %c0_i32_1 = arith.constant 0 : i32
    return %c0_i32, %c0_i32_0 : i32, i32
  }
  func.func @transform_3(%arg0: i32) -> (i32, i32, i32, i32) {
    %c0_i32 = arith.constant 0 : i32
    %c0_i32_0 = arith.constant 0 : i32
    %c0_i32_1 = arith.constant 0 : i32
    %c0_i32_2 = arith.constant 0 : i32
    return %arg0, %c0_i32, %c0_i32_0, %c0_i32_1 : i32, i32, i32, i32
  }
  func.func @transform_4(%arg0: i32) -> (i32, i32, i32, i32) {
    %c0_i32 = arith.constant 0 : i32
    %c0_i32_0 = arith.constant 0 : i32
    %c0_i32_1 = arith.constant 0 : i32
    %c0_i32_2 = arith.constant 0 : i32
    return %arg0, %c0_i32, %c0_i32_0, %c0_i32_1 : i32, i32, i32, i32
  }
}

module attributes {stable_mosaic.version = 11 : i64} {
  func.func @_conv_kernel(%arg0: i32, %arg1: memref<1x10x10x64xbf16, #tpu.memory_space<vmem>>, %arg2: memref<3x3x64x128xbf16, #tpu.memory_space<vmem>>, %arg3: memref<1x128xf32, #tpu.memory_space<vmem>>, %arg4: memref<1x8x8x128xbf16, #tpu.memory_space<vmem>>) attributes {dimension_semantics = [#tpu.dimension_semantics<parallel>], iteration_bounds = array<i64: 4>, scalar_prefetch = 0 : i64, scratch_operands = 0 : i64, tpu.core_type = #tpu.core_type<tc>, window_params = [{transform_indices = @transform_0, window_bounds = array<i64: 1, 10, 10, 64>}, {pipeline_mode = #tpu.pipeline_mode<synchronous>, transform_indices = @transform_1, window_bounds = array<i64: 3, 3, 64, 128>}, {pipeline_mode = #tpu.pipeline_mode<synchronous>, transform_indices = @transform_2, window_bounds = array<i64: 1, 128>}, {transform_indices = @transform_3, window_bounds = array<i64: 1, 8, 8, 128>}]} {
    %c0 = arith.constant 0 : index
    %c0_0 = arith.constant 0 : index
    %c0_1 = arith.constant 0 : index
    %c0_2 = arith.constant 0 : index
    %0 = vector.load %arg1[%c0, %c0_0, %c0_1, %c0_2] : memref<1x10x10x64xbf16, #tpu.memory_space<vmem>>, vector<1x10x10x64xbf16>
    %1 = vector.shape_cast %0 : vector<1x10x10x64xbf16> to vector<10x10x64xbf16>
    %cst = arith.constant 0.000000e+00 : f32
    %2 = vector.broadcast %cst : f32 to vector<64x128xf32>
    %3 = vector.extract_strided_slice %1 {offsets = [0, 0, 0], sizes = [8, 8, 64], strides = [1, 1, 1]} : vector<10x10x64xbf16> to vector<8x8x64xbf16>
    %4 = vector.shape_cast %3 : vector<8x8x64xbf16> to vector<64x64xbf16>
    %c0_3 = arith.constant 0 : index
    %c0_4 = arith.constant 0 : index
    %c0_5 = arith.constant 0 : index
    %c0_6 = arith.constant 0 : index
    %5 = vector.load %arg2[%c0_3, %c0_4, %c0_5, %c0_6] : memref<3x3x64x128xbf16, #tpu.memory_space<vmem>>, vector<1x1x64x128xbf16>
    %6 = vector.shape_cast %5 : vector<1x1x64x128xbf16> to vector<64x128xbf16>
    %cst_7 = arith.constant dense<0.000000e+00> : vector<64x128xf32>
    %7 = tpu.matmul %4, %6, %cst_7 {dimension_numbers = #tpu.dot_dimension_numbers<[1], [0], [0], [1], [0, 0, 1, 1], [], []>} : vector<64x64xbf16>, vector<64x128xbf16>, vector<64x128xf32> -> vector<64x128xf32>
    %8 = arith.addf %2, %7 : vector<64x128xf32>
    %9 = vector.extract_strided_slice %1 {offsets = [0, 1, 0], sizes = [8, 8, 64], strides = [1, 1, 1]} : vector<10x10x64xbf16> to vector<8x8x64xbf16>
    %10 = vector.shape_cast %9 : vector<8x8x64xbf16> to vector<64x64xbf16>
    %c0_8 = arith.constant 0 : index
    %c1 = arith.constant 1 : index
    %c0_9 = arith.constant 0 : index
    %c0_10 = arith.constant 0 : index
    %11 = vector.load %arg2[%c0_8, %c1, %c0_9, %c0_10] : memref<3x3x64x128xbf16, #tpu.memory_space<vmem>>, vector<1x1x64x128xbf16>
    %12 = vector.shape_cast %11 : vector<1x1x64x128xbf16> to vector<64x128xbf16>
    %cst_11 = arith.constant dense<0.000000e+00> : vector<64x128xf32>
    %13 = tpu.matmul %10, %12, %cst_11 {dimension_numbers = #tpu.dot_dimension_numbers<[1], [0], [0], [1], [0, 0, 1, 1], [], []>} : vector<64x64xbf16>, vector<64x128xbf16>, vector<64x128xf32> -> vector<64x128xf32>
    %14 = arith.addf %8, %13 : vector<64x128xf32>
    %15 = vector.extract_strided_slice %1 {offsets = [0, 2, 0], sizes = [8, 8, 64], strides = [1, 1, 1]} : vector<10x10x64xbf16> to vector<8x8x64xbf16>
    %16 = vector.shape_cast %15 : vector<8x8x64xbf16> to vector<64x64xbf16>
    %c0_12 = arith.constant 0 : index
    %c2 = arith.constant 2 : index
    %c0_13 = arith.constant 0 : index
    %c0_14 = arith.constant 0 : index
    %17 = vector.load %arg2[%c0_12, %c2, %c0_13, %c0_14] : memref<3x3x64x128xbf16, #tpu.memory_space<vmem>>, vector<1x1x64x128xbf16>
    %18 = vector.shape_cast %17 : vector<1x1x64x128xbf16> to vector<64x128xbf16>
    %cst_15 = arith.constant dense<0.000000e+00> : vector<64x128xf32>
    %19 = tpu.matmul %16, %18, %cst_15 {dimension_numbers = #tpu.dot_dimension_numbers<[1], [0], [0], [1], [0, 0, 1, 1], [], []>} : vector<64x64xbf16>, vector<64x128xbf16>, vector<64x128xf32> -> vector<64x128xf32>
    %20 = arith.addf %14, %19 : vector<64x128xf32>
    %21 = vector.extract_strided_slice %1 {offsets = [1, 0, 0], sizes = [8, 8, 64], strides = [1, 1, 1]} : vector<10x10x64xbf16> to vector<8x8x64xbf16>
    %22 = vector.shape_cast %21 : vector<8x8x64xbf16> to vector<64x64xbf16>
    %c1_16 = arith.constant 1 : index
    %c0_17 = arith.constant 0 : index
    %c0_18 = arith.constant 0 : index
    %c0_19 = arith.constant 0 : index
    %23 = vector.load %arg2[%c1_16, %c0_17, %c0_18, %c0_19] : memref<3x3x64x128xbf16, #tpu.memory_space<vmem>>, vector<1x1x64x128xbf16>
    %24 = vector.shape_cast %23 : vector<1x1x64x128xbf16> to vector<64x128xbf16>
    %cst_20 = arith.constant dense<0.000000e+00> : vector<64x128xf32>
    %25 = tpu.matmul %22, %24, %cst_20 {dimension_numbers = #tpu.dot_dimension_numbers<[1], [0], [0], [1], [0, 0, 1, 1], [], []>} : vector<64x64xbf16>, vector<64x128xbf16>, vector<64x128xf32> -> vector<64x128xf32>
    %26 = arith.addf %20, %25 : vector<64x128xf32>
    %27 = vector.extract_strided_slice %1 {offsets = [1, 1, 0], sizes = [8, 8, 64], strides = [1, 1, 1]} : vector<10x10x64xbf16> to vector<8x8x64xbf16>
    %28 = vector.shape_cast %27 : vector<8x8x64xbf16> to vector<64x64xbf16>
    %c1_21 = arith.constant 1 : index
    %c1_22 = arith.constant 1 : index
    %c0_23 = arith.constant 0 : index
    %c0_24 = arith.constant 0 : index
    %29 = vector.load %arg2[%c1_21, %c1_22, %c0_23, %c0_24] : memref<3x3x64x128xbf16, #tpu.memory_space<vmem>>, vector<1x1x64x128xbf16>
    %30 = vector.shape_cast %29 : vector<1x1x64x128xbf16> to vector<64x128xbf16>
    %cst_25 = arith.constant dense<0.000000e+00> : vector<64x128xf32>
    %31 = tpu.matmul %28, %30, %cst_25 {dimension_numbers = #tpu.dot_dimension_numbers<[1], [0], [0], [1], [0, 0, 1, 1], [], []>} : vector<64x64xbf16>, vector<64x128xbf16>, vector<64x128xf32> -> vector<64x128xf32>
    %32 = arith.addf %26, %31 : vector<64x128xf32>
    %33 = vector.extract_strided_slice %1 {offsets = [1, 2, 0], sizes = [8, 8, 64], strides = [1, 1, 1]} : vector<10x10x64xbf16> to vector<8x8x64xbf16>
    %34 = vector.shape_cast %33 : vector<8x8x64xbf16> to vector<64x64xbf16>
    %c1_26 = arith.constant 1 : index
    %c2_27 = arith.constant 2 : index
    %c0_28 = arith.constant 0 : index
    %c0_29 = arith.constant 0 : index
    %35 = vector.load %arg2[%c1_26, %c2_27, %c0_28, %c0_29] : memref<3x3x64x128xbf16, #tpu.memory_space<vmem>>, vector<1x1x64x128xbf16>
    %36 = vector.shape_cast %35 : vector<1x1x64x128xbf16> to vector<64x128xbf16>
    %cst_30 = arith.constant dense<0.000000e+00> : vector<64x128xf32>
    %37 = tpu.matmul %34, %36, %cst_30 {dimension_numbers = #tpu.dot_dimension_numbers<[1], [0], [0], [1], [0, 0, 1, 1], [], []>} : vector<64x64xbf16>, vector<64x128xbf16>, vector<64x128xf32> -> vector<64x128xf32>
    %38 = arith.addf %32, %37 : vector<64x128xf32>
    %39 = vector.extract_strided_slice %1 {offsets = [2, 0, 0], sizes = [8, 8, 64], strides = [1, 1, 1]} : vector<10x10x64xbf16> to vector<8x8x64xbf16>
    %40 = vector.shape_cast %39 : vector<8x8x64xbf16> to vector<64x64xbf16>
    %c2_31 = arith.constant 2 : index
    %c0_32 = arith.constant 0 : index
    %c0_33 = arith.constant 0 : index
    %c0_34 = arith.constant 0 : index
    %41 = vector.load %arg2[%c2_31, %c0_32, %c0_33, %c0_34] : memref<3x3x64x128xbf16, #tpu.memory_space<vmem>>, vector<1x1x64x128xbf16>
    %42 = vector.shape_cast %41 : vector<1x1x64x128xbf16> to vector<64x128xbf16>
    %cst_35 = arith.constant dense<0.000000e+00> : vector<64x128xf32>
    %43 = tpu.matmul %40, %42, %cst_35 {dimension_numbers = #tpu.dot_dimension_numbers<[1], [0], [0], [1], [0, 0, 1, 1], [], []>} : vector<64x64xbf16>, vector<64x128xbf16>, vector<64x128xf32> -> vector<64x128xf32>
    %44 = arith.addf %38, %43 : vector<64x128xf32>
    %45 = vector.extract_strided_slice %1 {offsets = [2, 1, 0], sizes = [8, 8, 64], strides = [1, 1, 1]} : vector<10x10x64xbf16> to vector<8x8x64xbf16>
    %46 = vector.shape_cast %45 : vector<8x8x64xbf16> to vector<64x64xbf16>
    %c2_36 = arith.constant 2 : index
    %c1_37 = arith.constant 1 : index
    %c0_38 = arith.constant 0 : index
    %c0_39 = arith.constant 0 : index
    %47 = vector.load %arg2[%c2_36, %c1_37, %c0_38, %c0_39] : memref<3x3x64x128xbf16, #tpu.memory_space<vmem>>, vector<1x1x64x128xbf16>
    %48 = vector.shape_cast %47 : vector<1x1x64x128xbf16> to vector<64x128xbf16>
    %cst_40 = arith.constant dense<0.000000e+00> : vector<64x128xf32>
    %49 = tpu.matmul %46, %48, %cst_40 {dimension_numbers = #tpu.dot_dimension_numbers<[1], [0], [0], [1], [0, 0, 1, 1], [], []>} : vector<64x64xbf16>, vector<64x128xbf16>, vector<64x128xf32> -> vector<64x128xf32>
    %50 = arith.addf %44, %49 : vector<64x128xf32>
    %51 = vector.extract_strided_slice %1 {offsets = [2, 2, 0], sizes = [8, 8, 64], strides = [1, 1, 1]} : vector<10x10x64xbf16> to vector<8x8x64xbf16>
    %52 = vector.shape_cast %51 : vector<8x8x64xbf16> to vector<64x64xbf16>
    %c2_41 = arith.constant 2 : index
    %c2_42 = arith.constant 2 : index
    %c0_43 = arith.constant 0 : index
    %c0_44 = arith.constant 0 : index
    %53 = vector.load %arg2[%c2_41, %c2_42, %c0_43, %c0_44] : memref<3x3x64x128xbf16, #tpu.memory_space<vmem>>, vector<1x1x64x128xbf16>
    %54 = vector.shape_cast %53 : vector<1x1x64x128xbf16> to vector<64x128xbf16>
    %cst_45 = arith.constant dense<0.000000e+00> : vector<64x128xf32>
    %55 = tpu.matmul %52, %54, %cst_45 {dimension_numbers = #tpu.dot_dimension_numbers<[1], [0], [0], [1], [0, 0, 1, 1], [], []>} : vector<64x64xbf16>, vector<64x128xbf16>, vector<64x128xf32> -> vector<64x128xf32>
    %56 = arith.addf %50, %55 : vector<64x128xf32>
    %c0_46 = arith.constant 0 : index
    %c0_47 = arith.constant 0 : index
    %57 = vector.load %arg3[%c0_46, %c0_47] : memref<1x128xf32, #tpu.memory_space<vmem>>, vector<1x128xf32>
    %58 = vector.broadcast %57 : vector<1x128xf32> to vector<64x128xf32>
    %59 = arith.addf %56, %58 : vector<64x128xf32>
    %cst_48 = arith.constant 0.000000e+00 : f32
    %60 = vector.broadcast %cst_48 : f32 to vector<64x128xf32>
    %61 = arith.maximumf %59, %60 : vector<64x128xf32>
    %62 = vector.shape_cast %61 : vector<64x128xf32> to vector<8x8x128xf32>
    %63 = arith.truncf %62 : vector<8x8x128xf32> to vector<8x8x128xbf16>
    %c0_49 = arith.constant 0 : index
    %c0_50 = arith.constant 0 : index
    %c0_51 = arith.constant 0 : index
    %c0_52 = arith.constant 0 : index
    %64 = vector.load %arg4[%c0_49, %c0_50, %c0_51, %c0_52] : memref<1x8x8x128xbf16, #tpu.memory_space<vmem>>, vector<1x8x8x128xbf16>
    %65 = vector.shape_cast %64 : vector<1x8x8x128xbf16> to vector<8x8x128xbf16>
    %66 = vector.shape_cast %63 : vector<8x8x128xbf16> to vector<1x8x8x128xbf16>
    tpu.vector_store %arg4[%c0_49, %c0_50, %c0_51, %c0_52], %66 {strides = array<i32>} : memref<1x8x8x128xbf16, #tpu.memory_space<vmem>>, vector<1x8x8x128xbf16>,
    return
  }
  func.func @transform_0(%arg0: i32) -> (i32, i32, i32, i32) {
    %c0_i32 = arith.constant 0 : i32
    %c0_i32_0 = arith.constant 0 : i32
    %c0_i32_1 = arith.constant 0 : i32
    %c0_i32_2 = arith.constant 0 : i32
    return %arg0, %c0_i32, %c0_i32_0, %c0_i32_1 : i32, i32, i32, i32
  }
  func.func @transform_1(%arg0: i32) -> (i32, i32, i32, i32) {
    %c0_i32 = arith.constant 0 : i32
    %c0_i32_0 = arith.constant 0 : i32
    %c0_i32_1 = arith.constant 0 : i32
    %c0_i32_2 = arith.constant 0 : i32
    %c0_i32_3 = arith.constant 0 : i32
    return %c0_i32, %c0_i32_0, %c0_i32_1, %c0_i32_2 : i32, i32, i32, i32
  }
  func.func @transform_2(%arg0: i32) -> (i32, i32) {
    %c0_i32 = arith.constant 0 : i32
    %c0_i32_0 = arith.constant 0 : i32
    %c0_i32_1 = arith.constant 0 : i32
    return %c0_i32, %c0_i32_0 : i32, i32
  }
  func.func @transform_3(%arg0: i32) -> (i32, i32, i32, i32) {
    %c0_i32 = arith.constant 0 : i32
    %c0_i32_0 = arith.constant 0 : i32
    %c0_i32_1 = arith.constant 0 : i32
    %c0_i32_2 = arith.constant 0 : i32
    return %arg0, %c0_i32, %c0_i32_0, %c0_i32_1 : i32, i32, i32, i32
  }
}

module attributes {stable_mosaic.version = 11 : i64} {
  func.func @_conv_kernel(%arg0: i32, %arg1: memref<1x10x10x128xbf16, #tpu.memory_space<vmem>>, %arg2: memref<3x3x128x128xbf16, #tpu.memory_space<vmem>>, %arg3: memref<1x128xf32, #tpu.memory_space<vmem>>, %arg4: memref<1x8x8x128xbf16, #tpu.memory_space<vmem>>, %arg5: memref<1x4x4x128xbf16, #tpu.memory_space<vmem>>, %arg6: memref<32x128xf32, #tpu.memory_space<vmem>>) attributes {dimension_semantics = [#tpu.dimension_semantics<parallel>], iteration_bounds = array<i64: 4>, scalar_prefetch = 0 : i64, scratch_operands = 1 : i64, tpu.core_type = #tpu.core_type<tc>, window_params = [{transform_indices = @transform_0, window_bounds = array<i64: 1, 10, 10, 128>}, {pipeline_mode = #tpu.pipeline_mode<synchronous>, transform_indices = @transform_1, window_bounds = array<i64: 3, 3, 128, 128>}, {pipeline_mode = #tpu.pipeline_mode<synchronous>, transform_indices = @transform_2, window_bounds = array<i64: 1, 128>}, {transform_indices = @transform_3, window_bounds = array<i64: 1, 8, 8, 128>}, {transform_indices = @transform_4, window_bounds = array<i64: 1, 4, 4, 128>}]} {
    %c0 = arith.constant 0 : index
    %c0_0 = arith.constant 0 : index
    %c0_1 = arith.constant 0 : index
    %c0_2 = arith.constant 0 : index
    %0 = vector.load %arg1[%c0, %c0_0, %c0_1, %c0_2] : memref<1x10x10x128xbf16, #tpu.memory_space<vmem>>, vector<1x10x10x128xbf16>
    %1 = vector.shape_cast %0 : vector<1x10x10x128xbf16> to vector<10x10x128xbf16>
    %cst = arith.constant 0.000000e+00 : f32
    %2 = vector.broadcast %cst : f32 to vector<64x128xf32>
    %3 = vector.extract_strided_slice %1 {offsets = [0, 0, 0], sizes = [8, 8, 128], strides = [1, 1, 1]} : vector<10x10x128xbf16> to vector<8x8x128xbf16>
    %4 = vector.shape_cast %3 : vector<8x8x128xbf16> to vector<64x128xbf16>
    %c0_3 = arith.constant 0 : index
    %c0_4 = arith.constant 0 : index
    %c0_5 = arith.constant 0 : index
    %c0_6 = arith.constant 0 : index
    %5 = vector.load %arg2[%c0_3, %c0_4, %c0_5, %c0_6] : memref<3x3x128x128xbf16, #tpu.memory_space<vmem>>, vector<1x1x128x128xbf16>
    %6 = vector.shape_cast %5 : vector<1x1x128x128xbf16> to vector<128x128xbf16>
    %cst_7 = arith.constant dense<0.000000e+00> : vector<64x128xf32>
    %7 = tpu.matmul %4, %6, %cst_7 {dimension_numbers = #tpu.dot_dimension_numbers<[1], [0], [0], [1], [0, 0, 1, 1], [], []>} : vector<64x128xbf16>, vector<128x128xbf16>, vector<64x128xf32> -> vector<64x128xf32>
    %8 = arith.addf %2, %7 : vector<64x128xf32>
    %9 = vector.extract_strided_slice %1 {offsets = [0, 1, 0], sizes = [8, 8, 128], strides = [1, 1, 1]} : vector<10x10x128xbf16> to vector<8x8x128xbf16>
    %10 = vector.shape_cast %9 : vector<8x8x128xbf16> to vector<64x128xbf16>
    %c0_8 = arith.constant 0 : index
    %c1 = arith.constant 1 : index
    %c0_9 = arith.constant 0 : index
    %c0_10 = arith.constant 0 : index
    %11 = vector.load %arg2[%c0_8, %c1, %c0_9, %c0_10] : memref<3x3x128x128xbf16, #tpu.memory_space<vmem>>, vector<1x1x128x128xbf16>
    %12 = vector.shape_cast %11 : vector<1x1x128x128xbf16> to vector<128x128xbf16>
    %cst_11 = arith.constant dense<0.000000e+00> : vector<64x128xf32>
    %13 = tpu.matmul %10, %12, %cst_11 {dimension_numbers = #tpu.dot_dimension_numbers<[1], [0], [0], [1], [0, 0, 1, 1], [], []>} : vector<64x128xbf16>, vector<128x128xbf16>, vector<64x128xf32> -> vector<64x128xf32>
    %14 = arith.addf %8, %13 : vector<64x128xf32>
    %15 = vector.extract_strided_slice %1 {offsets = [0, 2, 0], sizes = [8, 8, 128], strides = [1, 1, 1]} : vector<10x10x128xbf16> to vector<8x8x128xbf16>
    %16 = vector.shape_cast %15 : vector<8x8x128xbf16> to vector<64x128xbf16>
    %c0_12 = arith.constant 0 : index
    %c2 = arith.constant 2 : index
    %c0_13 = arith.constant 0 : index
    %c0_14 = arith.constant 0 : index
    %17 = vector.load %arg2[%c0_12, %c2, %c0_13, %c0_14] : memref<3x3x128x128xbf16, #tpu.memory_space<vmem>>, vector<1x1x128x128xbf16>
    %18 = vector.shape_cast %17 : vector<1x1x128x128xbf16> to vector<128x128xbf16>
    %cst_15 = arith.constant dense<0.000000e+00> : vector<64x128xf32>
    %19 = tpu.matmul %16, %18, %cst_15 {dimension_numbers = #tpu.dot_dimension_numbers<[1], [0], [0], [1], [0, 0, 1, 1], [], []>} : vector<64x128xbf16>, vector<128x128xbf16>, vector<64x128xf32> -> vector<64x128xf32>
    %20 = arith.addf %14, %19 : vector<64x128xf32>
    %21 = vector.extract_strided_slice %1 {offsets = [1, 0, 0], sizes = [8, 8, 128], strides = [1, 1, 1]} : vector<10x10x128xbf16> to vector<8x8x128xbf16>
    %22 = vector.shape_cast %21 : vector<8x8x128xbf16> to vector<64x128xbf16>
    %c1_16 = arith.constant 1 : index
    %c0_17 = arith.constant 0 : index
    %c0_18 = arith.constant 0 : index
    %c0_19 = arith.constant 0 : index
    %23 = vector.load %arg2[%c1_16, %c0_17, %c0_18, %c0_19] : memref<3x3x128x128xbf16, #tpu.memory_space<vmem>>, vector<1x1x128x128xbf16>
    %24 = vector.shape_cast %23 : vector<1x1x128x128xbf16> to vector<128x128xbf16>
    %cst_20 = arith.constant dense<0.000000e+00> : vector<64x128xf32>
    %25 = tpu.matmul %22, %24, %cst_20 {dimension_numbers = #tpu.dot_dimension_numbers<[1], [0], [0], [1], [0, 0, 1, 1], [], []>} : vector<64x128xbf16>, vector<128x128xbf16>, vector<64x128xf32> -> vector<64x128xf32>
    %26 = arith.addf %20, %25 : vector<64x128xf32>
    %27 = vector.extract_strided_slice %1 {offsets = [1, 1, 0], sizes = [8, 8, 128], strides = [1, 1, 1]} : vector<10x10x128xbf16> to vector<8x8x128xbf16>
    %28 = vector.shape_cast %27 : vector<8x8x128xbf16> to vector<64x128xbf16>
    %c1_21 = arith.constant 1 : index
    %c1_22 = arith.constant 1 : index
    %c0_23 = arith.constant 0 : index
    %c0_24 = arith.constant 0 : index
    %29 = vector.load %arg2[%c1_21, %c1_22, %c0_23, %c0_24] : memref<3x3x128x128xbf16, #tpu.memory_space<vmem>>, vector<1x1x128x128xbf16>
    %30 = vector.shape_cast %29 : vector<1x1x128x128xbf16> to vector<128x128xbf16>
    %cst_25 = arith.constant dense<0.000000e+00> : vector<64x128xf32>
    %31 = tpu.matmul %28, %30, %cst_25 {dimension_numbers = #tpu.dot_dimension_numbers<[1], [0], [0], [1], [0, 0, 1, 1], [], []>} : vector<64x128xbf16>, vector<128x128xbf16>, vector<64x128xf32> -> vector<64x128xf32>
    %32 = arith.addf %26, %31 : vector<64x128xf32>
    %33 = vector.extract_strided_slice %1 {offsets = [1, 2, 0], sizes = [8, 8, 128], strides = [1, 1, 1]} : vector<10x10x128xbf16> to vector<8x8x128xbf16>
    %34 = vector.shape_cast %33 : vector<8x8x128xbf16> to vector<64x128xbf16>
    %c1_26 = arith.constant 1 : index
    %c2_27 = arith.constant 2 : index
    %c0_28 = arith.constant 0 : index
    %c0_29 = arith.constant 0 : index
    %35 = vector.load %arg2[%c1_26, %c2_27, %c0_28, %c0_29] : memref<3x3x128x128xbf16, #tpu.memory_space<vmem>>, vector<1x1x128x128xbf16>
    %36 = vector.shape_cast %35 : vector<1x1x128x128xbf16> to vector<128x128xbf16>
    %cst_30 = arith.constant dense<0.000000e+00> : vector<64x128xf32>
    %37 = tpu.matmul %34, %36, %cst_30 {dimension_numbers = #tpu.dot_dimension_numbers<[1], [0], [0], [1], [0, 0, 1, 1], [], []>} : vector<64x128xbf16>, vector<128x128xbf16>, vector<64x128xf32> -> vector<64x128xf32>
    %38 = arith.addf %32, %37 : vector<64x128xf32>
    %39 = vector.extract_strided_slice %1 {offsets = [2, 0, 0], sizes = [8, 8, 128], strides = [1, 1, 1]} : vector<10x10x128xbf16> to vector<8x8x128xbf16>
    %40 = vector.shape_cast %39 : vector<8x8x128xbf16> to vector<64x128xbf16>
    %c2_31 = arith.constant 2 : index
    %c0_32 = arith.constant 0 : index
    %c0_33 = arith.constant 0 : index
    %c0_34 = arith.constant 0 : index
    %41 = vector.load %arg2[%c2_31, %c0_32, %c0_33, %c0_34] : memref<3x3x128x128xbf16, #tpu.memory_space<vmem>>, vector<1x1x128x128xbf16>
    %42 = vector.shape_cast %41 : vector<1x1x128x128xbf16> to vector<128x128xbf16>
    %cst_35 = arith.constant dense<0.000000e+00> : vector<64x128xf32>
    %43 = tpu.matmul %40, %42, %cst_35 {dimension_numbers = #tpu.dot_dimension_numbers<[1], [0], [0], [1], [0, 0, 1, 1], [], []>} : vector<64x128xbf16>, vector<128x128xbf16>, vector<64x128xf32> -> vector<64x128xf32>
    %44 = arith.addf %38, %43 : vector<64x128xf32>
    %45 = vector.extract_strided_slice %1 {offsets = [2, 1, 0], sizes = [8, 8, 128], strides = [1, 1, 1]} : vector<10x10x128xbf16> to vector<8x8x128xbf16>
    %46 = vector.shape_cast %45 : vector<8x8x128xbf16> to vector<64x128xbf16>
    %c2_36 = arith.constant 2 : index
    %c1_37 = arith.constant 1 : index
    %c0_38 = arith.constant 0 : index
    %c0_39 = arith.constant 0 : index
    %47 = vector.load %arg2[%c2_36, %c1_37, %c0_38, %c0_39] : memref<3x3x128x128xbf16, #tpu.memory_space<vmem>>, vector<1x1x128x128xbf16>
    %48 = vector.shape_cast %47 : vector<1x1x128x128xbf16> to vector<128x128xbf16>
    %cst_40 = arith.constant dense<0.000000e+00> : vector<64x128xf32>
    %49 = tpu.matmul %46, %48, %cst_40 {dimension_numbers = #tpu.dot_dimension_numbers<[1], [0], [0], [1], [0, 0, 1, 1], [], []>} : vector<64x128xbf16>, vector<128x128xbf16>, vector<64x128xf32> -> vector<64x128xf32>
    %50 = arith.addf %44, %49 : vector<64x128xf32>
    %51 = vector.extract_strided_slice %1 {offsets = [2, 2, 0], sizes = [8, 8, 128], strides = [1, 1, 1]} : vector<10x10x128xbf16> to vector<8x8x128xbf16>
    %52 = vector.shape_cast %51 : vector<8x8x128xbf16> to vector<64x128xbf16>
    %c2_41 = arith.constant 2 : index
    %c2_42 = arith.constant 2 : index
    %c0_43 = arith.constant 0 : index
    %c0_44 = arith.constant 0 : index
    %53 = vector.load %arg2[%c2_41, %c2_42, %c0_43, %c0_44] : memref<3x3x128x128xbf16, #tpu.memory_space<vmem>>, vector<1x1x128x128xbf16>
    %54 = vector.shape_cast %53 : vector<1x1x128x128xbf16> to vector<128x128xbf16>
    %cst_45 = arith.constant dense<0.000000e+00> : vector<64x128xf32>
    %55 = tpu.matmul %52, %54, %cst_45 {dimension_numbers = #tpu.dot_dimension_numbers<[1], [0], [0], [1], [0, 0, 1, 1], [], []>} : vector<64x128xbf16>, vector<128x128xbf16>, vector<64x128xf32> -> vector<64x128xf32>
    %56 = arith.addf %50, %55 : vector<64x128xf32>
    %c0_46 = arith.constant 0 : index
    %c0_47 = arith.constant 0 : index
    %57 = vector.load %arg3[%c0_46, %c0_47] : memref<1x128xf32, #tpu.memory_space<vmem>>, vector<1x128xf32>
    %58 = vector.broadcast %57 : vector<1x128xf32> to vector<64x128xf32>
    %59 = arith.addf %56, %58 : vector<64x128xf32>
    %60 = vector.shape_cast %59 : vector<64x128xf32> to vector<8x8x128xf32>
    %61 = arith.truncf %60 : vector<8x8x128xf32> to vector<8x8x128xbf16>
    %c0_48 = arith.constant 0 : index
    %c0_49 = arith.constant 0 : index
    %c0_50 = arith.constant 0 : index
    %c0_51 = arith.constant 0 : index
    %62 = vector.load %arg4[%c0_48, %c0_49, %c0_50, %c0_51] : memref<1x8x8x128xbf16, #tpu.memory_space<vmem>>, vector<1x8x8x128xbf16>
    %63 = vector.shape_cast %62 : vector<1x8x8x128xbf16> to vector<8x8x128xbf16>
    %64 = vector.shape_cast %61 : vector<8x8x128xbf16> to vector<1x8x8x128xbf16>
    tpu.vector_store %arg4[%c0_48, %c0_49, %c0_50, %c0_51], %64 {strides = array<i32>} : memref<1x8x8x128xbf16, #tpu.memory_space<vmem>>, vector<1x8x8x128xbf16>,
    %cst_52 = arith.constant 0.000000e+00 : f32
    %65 = vector.broadcast %cst_52 : f32 to vector<64x128xf32>
    %66 = arith.maximumf %59, %65 : vector<64x128xf32>
    %67 = vector.shape_cast %66 : vector<64x128xf32> to vector<4x2x8x128xf32>
    %68 = vector.extract_strided_slice %67 {offsets = [0, 0, 0, 0], sizes = [4, 1, 8, 128], strides = [1, 1, 1, 1]} : vector<4x2x8x128xf32> to vector<4x1x8x128xf32>
    %69 = vector.shape_cast %68 : vector<4x1x8x128xf32> to vector<4x8x128xf32>
    %70 = vector.extract_strided_slice %67 {offsets = [0, 1, 0, 0], sizes = [4, 1, 8, 128], strides = [1, 1, 1, 1]} : vector<4x2x8x128xf32> to vector<4x1x8x128xf32>
    %71 = vector.shape_cast %70 : vector<4x1x8x128xf32> to vector<4x8x128xf32>
    %72 = arith.maximumf %69, %71 : vector<4x8x128xf32>
    %73 = vector.shape_cast %72 : vector<4x8x128xf32> to vector<32x128xf32>
    %c0_53 = arith.constant 0 : index
    %c0_54 = arith.constant 0 : index
    %74 = vector.load %arg6[%c0_53, %c0_54] : memref<32x128xf32, #tpu.memory_space<vmem>>, vector<32x128xf32>
    tpu.vector_store %arg6[%c0_53, %c0_54], %73 {strides = array<i32>} : memref<32x128xf32, #tpu.memory_space<vmem>>, vector<32x128xf32>,
    %c0_55 = arith.constant 0 : index
    %c0_56 = arith.constant 0 : index
    %75 = tpu.strided_load %arg6[%c0_55, %c0_56] {strides = array<i32: 2, 1>} : memref<32x128xf32, #tpu.memory_space<vmem>>, vector<16x128xf32>
    %c1_57 = arith.constant 1 : index
    %c0_58 = arith.constant 0 : index
    %76 = tpu.strided_load %arg6[%c1_57, %c0_58] {strides = array<i32: 2, 1>} : memref<32x128xf32, #tpu.memory_space<vmem>>, vector<16x128xf32>
    %77 = arith.maximumf %75, %76 : vector<16x128xf32>
    %78 = vector.shape_cast %77 : vector<16x128xf32> to vector<4x4x128xf32>
    %79 = arith.truncf %78 : vector<4x4x128xf32> to vector<4x4x128xbf16>
    %c0_59 = arith.constant 0 : index
    %c0_60 = arith.constant 0 : index
    %c0_61 = arith.constant 0 : index
    %c0_62 = arith.constant 0 : index
    %80 = vector.load %arg5[%c0_59, %c0_60, %c0_61, %c0_62] : memref<1x4x4x128xbf16, #tpu.memory_space<vmem>>, vector<1x4x4x128xbf16>
    %81 = vector.shape_cast %80 : vector<1x4x4x128xbf16> to vector<4x4x128xbf16>
    %82 = vector.shape_cast %79 : vector<4x4x128xbf16> to vector<1x4x4x128xbf16>
    tpu.vector_store %arg5[%c0_59, %c0_60, %c0_61, %c0_62], %82 {strides = array<i32>} : memref<1x4x4x128xbf16, #tpu.memory_space<vmem>>, vector<1x4x4x128xbf16>,
    return
  }
  func.func @transform_0(%arg0: i32) -> (i32, i32, i32, i32) {
    %c0_i32 = arith.constant 0 : i32
    %c0_i32_0 = arith.constant 0 : i32
    %c0_i32_1 = arith.constant 0 : i32
    %c0_i32_2 = arith.constant 0 : i32
    return %arg0, %c0_i32, %c0_i32_0, %c0_i32_1 : i32, i32, i32, i32
  }
  func.func @transform_1(%arg0: i32) -> (i32, i32, i32, i32) {
    %c0_i32 = arith.constant 0 : i32
    %c0_i32_0 = arith.constant 0 : i32
    %c0_i32_1 = arith.constant 0 : i32
    %c0_i32_2 = arith.constant 0 : i32
    %c0_i32_3 = arith.constant 0 : i32
    return %c0_i32, %c0_i32_0, %c0_i32_1, %c0_i32_2 : i32, i32, i32, i32
  }
  func.func @transform_2(%arg0: i32) -> (i32, i32) {
    %c0_i32 = arith.constant 0 : i32
    %c0_i32_0 = arith.constant 0 : i32
    %c0_i32_1 = arith.constant 0 : i32
    return %c0_i32, %c0_i32_0 : i32, i32
  }
  func.func @transform_3(%arg0: i32) -> (i32, i32, i32, i32) {
    %c0_i32 = arith.constant 0 : i32
    %c0_i32_0 = arith.constant 0 : i32
    %c0_i32_1 = arith.constant 0 : i32
    %c0_i32_2 = arith.constant 0 : i32
    return %arg0, %c0_i32, %c0_i32_0, %c0_i32_1 : i32, i32, i32, i32
  }
  func.func @transform_4(%arg0: i32) -> (i32, i32, i32, i32) {
    %c0_i32 = arith.constant 0 : i32
    %c0_i32_0 = arith.constant 0 : i32
    %c0_i32_1 = arith.constant 0 : i32
    %c0_i32_2 = arith.constant 0 : i32
    return %arg0, %c0_i32, %c0_i32_0, %c0_i32_1 : i32, i32, i32, i32
  }
}

module attributes {stable_mosaic.version = 11 : i64} {
  func.func @_conv_kernel(%arg0: i32, %arg1: memref<1x6x6x128xbf16, #tpu.memory_space<vmem>>, %arg2: memref<3x3x128x256xbf16, #tpu.memory_space<vmem>>, %arg3: memref<1x256xf32, #tpu.memory_space<vmem>>, %arg4: memref<1x4x4x256xbf16, #tpu.memory_space<vmem>>) attributes {dimension_semantics = [#tpu.dimension_semantics<parallel>], iteration_bounds = array<i64: 4>, scalar_prefetch = 0 : i64, scratch_operands = 0 : i64, tpu.core_type = #tpu.core_type<tc>, window_params = [{transform_indices = @transform_0, window_bounds = array<i64: 1, 6, 6, 128>}, {pipeline_mode = #tpu.pipeline_mode<synchronous>, transform_indices = @transform_1, window_bounds = array<i64: 3, 3, 128, 256>}, {pipeline_mode = #tpu.pipeline_mode<synchronous>, transform_indices = @transform_2, window_bounds = array<i64: 1, 256>}, {transform_indices = @transform_3, window_bounds = array<i64: 1, 4, 4, 256>}]} {
    %c0 = arith.constant 0 : index
    %c0_0 = arith.constant 0 : index
    %c0_1 = arith.constant 0 : index
    %c0_2 = arith.constant 0 : index
    %0 = vector.load %arg1[%c0, %c0_0, %c0_1, %c0_2] : memref<1x6x6x128xbf16, #tpu.memory_space<vmem>>, vector<1x6x6x128xbf16>
    %1 = vector.shape_cast %0 : vector<1x6x6x128xbf16> to vector<6x6x128xbf16>
    %cst = arith.constant 0.000000e+00 : f32
    %2 = vector.broadcast %cst : f32 to vector<16x256xf32>
    %3 = vector.extract_strided_slice %1 {offsets = [0, 0, 0], sizes = [4, 4, 128], strides = [1, 1, 1]} : vector<6x6x128xbf16> to vector<4x4x128xbf16>
    %4 = vector.shape_cast %3 : vector<4x4x128xbf16> to vector<16x128xbf16>
    %c0_3 = arith.constant 0 : index
    %c0_4 = arith.constant 0 : index
    %c0_5 = arith.constant 0 : index
    %c0_6 = arith.constant 0 : index
    %5 = vector.load %arg2[%c0_3, %c0_4, %c0_5, %c0_6] : memref<3x3x128x256xbf16, #tpu.memory_space<vmem>>, vector<1x1x128x256xbf16>
    %6 = vector.shape_cast %5 : vector<1x1x128x256xbf16> to vector<128x256xbf16>
    %cst_7 = arith.constant dense<0.000000e+00> : vector<16x256xf32>
    %7 = tpu.matmul %4, %6, %cst_7 {dimension_numbers = #tpu.dot_dimension_numbers<[1], [0], [0], [1], [0, 0, 1, 1], [], []>} : vector<16x128xbf16>, vector<128x256xbf16>, vector<16x256xf32> -> vector<16x256xf32>
    %8 = arith.addf %2, %7 : vector<16x256xf32>
    %9 = vector.extract_strided_slice %1 {offsets = [0, 1, 0], sizes = [4, 4, 128], strides = [1, 1, 1]} : vector<6x6x128xbf16> to vector<4x4x128xbf16>
    %10 = vector.shape_cast %9 : vector<4x4x128xbf16> to vector<16x128xbf16>
    %c0_8 = arith.constant 0 : index
    %c1 = arith.constant 1 : index
    %c0_9 = arith.constant 0 : index
    %c0_10 = arith.constant 0 : index
    %11 = vector.load %arg2[%c0_8, %c1, %c0_9, %c0_10] : memref<3x3x128x256xbf16, #tpu.memory_space<vmem>>, vector<1x1x128x256xbf16>
    %12 = vector.shape_cast %11 : vector<1x1x128x256xbf16> to vector<128x256xbf16>
    %cst_11 = arith.constant dense<0.000000e+00> : vector<16x256xf32>
    %13 = tpu.matmul %10, %12, %cst_11 {dimension_numbers = #tpu.dot_dimension_numbers<[1], [0], [0], [1], [0, 0, 1, 1], [], []>} : vector<16x128xbf16>, vector<128x256xbf16>, vector<16x256xf32> -> vector<16x256xf32>
    %14 = arith.addf %8, %13 : vector<16x256xf32>
    %15 = vector.extract_strided_slice %1 {offsets = [0, 2, 0], sizes = [4, 4, 128], strides = [1, 1, 1]} : vector<6x6x128xbf16> to vector<4x4x128xbf16>
    %16 = vector.shape_cast %15 : vector<4x4x128xbf16> to vector<16x128xbf16>
    %c0_12 = arith.constant 0 : index
    %c2 = arith.constant 2 : index
    %c0_13 = arith.constant 0 : index
    %c0_14 = arith.constant 0 : index
    %17 = vector.load %arg2[%c0_12, %c2, %c0_13, %c0_14] : memref<3x3x128x256xbf16, #tpu.memory_space<vmem>>, vector<1x1x128x256xbf16>
    %18 = vector.shape_cast %17 : vector<1x1x128x256xbf16> to vector<128x256xbf16>
    %cst_15 = arith.constant dense<0.000000e+00> : vector<16x256xf32>
    %19 = tpu.matmul %16, %18, %cst_15 {dimension_numbers = #tpu.dot_dimension_numbers<[1], [0], [0], [1], [0, 0, 1, 1], [], []>} : vector<16x128xbf16>, vector<128x256xbf16>, vector<16x256xf32> -> vector<16x256xf32>
    %20 = arith.addf %14, %19 : vector<16x256xf32>
    %21 = vector.extract_strided_slice %1 {offsets = [1, 0, 0], sizes = [4, 4, 128], strides = [1, 1, 1]} : vector<6x6x128xbf16> to vector<4x4x128xbf16>
    %22 = vector.shape_cast %21 : vector<4x4x128xbf16> to vector<16x128xbf16>
    %c1_16 = arith.constant 1 : index
    %c0_17 = arith.constant 0 : index
    %c0_18 = arith.constant 0 : index
    %c0_19 = arith.constant 0 : index
    %23 = vector.load %arg2[%c1_16, %c0_17, %c0_18, %c0_19] : memref<3x3x128x256xbf16, #tpu.memory_space<vmem>>, vector<1x1x128x256xbf16>
    %24 = vector.shape_cast %23 : vector<1x1x128x256xbf16> to vector<128x256xbf16>
    %cst_20 = arith.constant dense<0.000000e+00> : vector<16x256xf32>
    %25 = tpu.matmul %22, %24, %cst_20 {dimension_numbers = #tpu.dot_dimension_numbers<[1], [0], [0], [1], [0, 0, 1, 1], [], []>} : vector<16x128xbf16>, vector<128x256xbf16>, vector<16x256xf32> -> vector<16x256xf32>
    %26 = arith.addf %20, %25 : vector<16x256xf32>
    %27 = vector.extract_strided_slice %1 {offsets = [1, 1, 0], sizes = [4, 4, 128], strides = [1, 1, 1]} : vector<6x6x128xbf16> to vector<4x4x128xbf16>
    %28 = vector.shape_cast %27 : vector<4x4x128xbf16> to vector<16x128xbf16>
    %c1_21 = arith.constant 1 : index
    %c1_22 = arith.constant 1 : index
    %c0_23 = arith.constant 0 : index
    %c0_24 = arith.constant 0 : index
    %29 = vector.load %arg2[%c1_21, %c1_22, %c0_23, %c0_24] : memref<3x3x128x256xbf16, #tpu.memory_space<vmem>>, vector<1x1x128x256xbf16>
    %30 = vector.shape_cast %29 : vector<1x1x128x256xbf16> to vector<128x256xbf16>
    %cst_25 = arith.constant dense<0.000000e+00> : vector<16x256xf32>
    %31 = tpu.matmul %28, %30, %cst_25 {dimension_numbers = #tpu.dot_dimension_numbers<[1], [0], [0], [1], [0, 0, 1, 1], [], []>} : vector<16x128xbf16>, vector<128x256xbf16>, vector<16x256xf32> -> vector<16x256xf32>
    %32 = arith.addf %26, %31 : vector<16x256xf32>
    %33 = vector.extract_strided_slice %1 {offsets = [1, 2, 0], sizes = [4, 4, 128], strides = [1, 1, 1]} : vector<6x6x128xbf16> to vector<4x4x128xbf16>
    %34 = vector.shape_cast %33 : vector<4x4x128xbf16> to vector<16x128xbf16>
    %c1_26 = arith.constant 1 : index
    %c2_27 = arith.constant 2 : index
    %c0_28 = arith.constant 0 : index
    %c0_29 = arith.constant 0 : index
    %35 = vector.load %arg2[%c1_26, %c2_27, %c0_28, %c0_29] : memref<3x3x128x256xbf16, #tpu.memory_space<vmem>>, vector<1x1x128x256xbf16>
    %36 = vector.shape_cast %35 : vector<1x1x128x256xbf16> to vector<128x256xbf16>
    %cst_30 = arith.constant dense<0.000000e+00> : vector<16x256xf32>
    %37 = tpu.matmul %34, %36, %cst_30 {dimension_numbers = #tpu.dot_dimension_numbers<[1], [0], [0], [1], [0, 0, 1, 1], [], []>} : vector<16x128xbf16>, vector<128x256xbf16>, vector<16x256xf32> -> vector<16x256xf32>
    %38 = arith.addf %32, %37 : vector<16x256xf32>
    %39 = vector.extract_strided_slice %1 {offsets = [2, 0, 0], sizes = [4, 4, 128], strides = [1, 1, 1]} : vector<6x6x128xbf16> to vector<4x4x128xbf16>
    %40 = vector.shape_cast %39 : vector<4x4x128xbf16> to vector<16x128xbf16>
    %c2_31 = arith.constant 2 : index
    %c0_32 = arith.constant 0 : index
    %c0_33 = arith.constant 0 : index
    %c0_34 = arith.constant 0 : index
    %41 = vector.load %arg2[%c2_31, %c0_32, %c0_33, %c0_34] : memref<3x3x128x256xbf16, #tpu.memory_space<vmem>>, vector<1x1x128x256xbf16>
    %42 = vector.shape_cast %41 : vector<1x1x128x256xbf16> to vector<128x256xbf16>
    %cst_35 = arith.constant dense<0.000000e+00> : vector<16x256xf32>
    %43 = tpu.matmul %40, %42, %cst_35 {dimension_numbers = #tpu.dot_dimension_numbers<[1], [0], [0], [1], [0, 0, 1, 1], [], []>} : vector<16x128xbf16>, vector<128x256xbf16>, vector<16x256xf32> -> vector<16x256xf32>
    %44 = arith.addf %38, %43 : vector<16x256xf32>
    %45 = vector.extract_strided_slice %1 {offsets = [2, 1, 0], sizes = [4, 4, 128], strides = [1, 1, 1]} : vector<6x6x128xbf16> to vector<4x4x128xbf16>
    %46 = vector.shape_cast %45 : vector<4x4x128xbf16> to vector<16x128xbf16>
    %c2_36 = arith.constant 2 : index
    %c1_37 = arith.constant 1 : index
    %c0_38 = arith.constant 0 : index
    %c0_39 = arith.constant 0 : index
    %47 = vector.load %arg2[%c2_36, %c1_37, %c0_38, %c0_39] : memref<3x3x128x256xbf16, #tpu.memory_space<vmem>>, vector<1x1x128x256xbf16>
    %48 = vector.shape_cast %47 : vector<1x1x128x256xbf16> to vector<128x256xbf16>
    %cst_40 = arith.constant dense<0.000000e+00> : vector<16x256xf32>
    %49 = tpu.matmul %46, %48, %cst_40 {dimension_numbers = #tpu.dot_dimension_numbers<[1], [0], [0], [1], [0, 0, 1, 1], [], []>} : vector<16x128xbf16>, vector<128x256xbf16>, vector<16x256xf32> -> vector<16x256xf32>
    %50 = arith.addf %44, %49 : vector<16x256xf32>
    %51 = vector.extract_strided_slice %1 {offsets = [2, 2, 0], sizes = [4, 4, 128], strides = [1, 1, 1]} : vector<6x6x128xbf16> to vector<4x4x128xbf16>
    %52 = vector.shape_cast %51 : vector<4x4x128xbf16> to vector<16x128xbf16>
    %c2_41 = arith.constant 2 : index
    %c2_42 = arith.constant 2 : index
    %c0_43 = arith.constant 0 : index
    %c0_44 = arith.constant 0 : index
    %53 = vector.load %arg2[%c2_41, %c2_42, %c0_43, %c0_44] : memref<3x3x128x256xbf16, #tpu.memory_space<vmem>>, vector<1x1x128x256xbf16>
    %54 = vector.shape_cast %53 : vector<1x1x128x256xbf16> to vector<128x256xbf16>
    %cst_45 = arith.constant dense<0.000000e+00> : vector<16x256xf32>
    %55 = tpu.matmul %52, %54, %cst_45 {dimension_numbers = #tpu.dot_dimension_numbers<[1], [0], [0], [1], [0, 0, 1, 1], [], []>} : vector<16x128xbf16>, vector<128x256xbf16>, vector<16x256xf32> -> vector<16x256xf32>
    %56 = arith.addf %50, %55 : vector<16x256xf32>
    %c0_46 = arith.constant 0 : index
    %c0_47 = arith.constant 0 : index
    %57 = vector.load %arg3[%c0_46, %c0_47] : memref<1x256xf32, #tpu.memory_space<vmem>>, vector<1x256xf32>
    %58 = vector.broadcast %57 : vector<1x256xf32> to vector<16x256xf32>
    %59 = arith.addf %56, %58 : vector<16x256xf32>
    %cst_48 = arith.constant 0.000000e+00 : f32
    %60 = vector.broadcast %cst_48 : f32 to vector<16x256xf32>
    %61 = arith.maximumf %59, %60 : vector<16x256xf32>
    %62 = vector.shape_cast %61 : vector<16x256xf32> to vector<4x4x256xf32>
    %63 = arith.truncf %62 : vector<4x4x256xf32> to vector<4x4x256xbf16>
    %c0_49 = arith.constant 0 : index
    %c0_50 = arith.constant 0 : index
    %c0_51 = arith.constant 0 : index
    %c0_52 = arith.constant 0 : index
    %64 = vector.load %arg4[%c0_49, %c0_50, %c0_51, %c0_52] : memref<1x4x4x256xbf16, #tpu.memory_space<vmem>>, vector<1x4x4x256xbf16>
    %65 = vector.shape_cast %64 : vector<1x4x4x256xbf16> to vector<4x4x256xbf16>
    %66 = vector.shape_cast %63 : vector<4x4x256xbf16> to vector<1x4x4x256xbf16>
    tpu.vector_store %arg4[%c0_49, %c0_50, %c0_51, %c0_52], %66 {strides = array<i32>} : memref<1x4x4x256xbf16, #tpu.memory_space<vmem>>, vector<1x4x4x256xbf16>,
    return
  }
  func.func @transform_0(%arg0: i32) -> (i32, i32, i32, i32) {
    %c0_i32 = arith.constant 0 : i32
    %c0_i32_0 = arith.constant 0 : i32
    %c0_i32_1 = arith.constant 0 : i32
    %c0_i32_2 = arith.constant 0 : i32
    return %arg0, %c0_i32, %c0_i32_0, %c0_i32_1 : i32, i32, i32, i32
  }
  func.func @transform_1(%arg0: i32) -> (i32, i32, i32, i32) {
    %c0_i32 = arith.constant 0 : i32
    %c0_i32_0 = arith.constant 0 : i32
    %c0_i32_1 = arith.constant 0 : i32
    %c0_i32_2 = arith.constant 0 : i32
    %c0_i32_3 = arith.constant 0 : i32
    return %c0_i32, %c0_i32_0, %c0_i32_1, %c0_i32_2 : i32, i32, i32, i32
  }
  func.func @transform_2(%arg0: i32) -> (i32, i32) {
    %c0_i32 = arith.constant 0 : i32
    %c0_i32_0 = arith.constant 0 : i32
    %c0_i32_1 = arith.constant 0 : i32
    return %c0_i32, %c0_i32_0 : i32, i32
  }
  func.func @transform_3(%arg0: i32) -> (i32, i32, i32, i32) {
    %c0_i32 = arith.constant 0 : i32
    %c0_i32_0 = arith.constant 0 : i32
    %c0_i32_1 = arith.constant 0 : i32
    %c0_i32_2 = arith.constant 0 : i32
    return %arg0, %c0_i32, %c0_i32_0, %c0_i32_1 : i32, i32, i32, i32
  }
}

module attributes {stable_mosaic.version = 11 : i64} {
  func.func @_conv_kernel(%arg0: i32, %arg1: memref<1x6x6x256xbf16, #tpu.memory_space<vmem>>, %arg2: memref<3x3x256x256xbf16, #tpu.memory_space<vmem>>, %arg3: memref<1x256xf32, #tpu.memory_space<vmem>>, %arg4: memref<1x4x4x256xbf16, #tpu.memory_space<vmem>>) attributes {dimension_semantics = [#tpu.dimension_semantics<parallel>], iteration_bounds = array<i64: 4>, scalar_prefetch = 0 : i64, scratch_operands = 0 : i64, tpu.core_type = #tpu.core_type<tc>, window_params = [{transform_indices = @transform_0, window_bounds = array<i64: 1, 6, 6, 256>}, {pipeline_mode = #tpu.pipeline_mode<synchronous>, transform_indices = @transform_1, window_bounds = array<i64: 3, 3, 256, 256>}, {pipeline_mode = #tpu.pipeline_mode<synchronous>, transform_indices = @transform_2, window_bounds = array<i64: 1, 256>}, {transform_indices = @transform_3, window_bounds = array<i64: 1, 4, 4, 256>}]} {
    %c0 = arith.constant 0 : index
    %c0_0 = arith.constant 0 : index
    %c0_1 = arith.constant 0 : index
    %c0_2 = arith.constant 0 : index
    %0 = vector.load %arg1[%c0, %c0_0, %c0_1, %c0_2] : memref<1x6x6x256xbf16, #tpu.memory_space<vmem>>, vector<1x6x6x256xbf16>
    %1 = vector.shape_cast %0 : vector<1x6x6x256xbf16> to vector<6x6x256xbf16>
    %cst = arith.constant 0.000000e+00 : f32
    %2 = vector.broadcast %cst : f32 to vector<16x256xf32>
    %3 = vector.extract_strided_slice %1 {offsets = [0, 0, 0], sizes = [4, 4, 256], strides = [1, 1, 1]} : vector<6x6x256xbf16> to vector<4x4x256xbf16>
    %4 = vector.shape_cast %3 : vector<4x4x256xbf16> to vector<16x256xbf16>
    %c0_3 = arith.constant 0 : index
    %c0_4 = arith.constant 0 : index
    %c0_5 = arith.constant 0 : index
    %c0_6 = arith.constant 0 : index
    %5 = vector.load %arg2[%c0_3, %c0_4, %c0_5, %c0_6] : memref<3x3x256x256xbf16, #tpu.memory_space<vmem>>, vector<1x1x256x256xbf16>
    %6 = vector.shape_cast %5 : vector<1x1x256x256xbf16> to vector<256x256xbf16>
    %cst_7 = arith.constant dense<0.000000e+00> : vector<16x256xf32>
    %7 = tpu.matmul %4, %6, %cst_7 {dimension_numbers = #tpu.dot_dimension_numbers<[1], [0], [0], [1], [0, 0, 1, 1], [], []>} : vector<16x256xbf16>, vector<256x256xbf16>, vector<16x256xf32> -> vector<16x256xf32>
    %8 = arith.addf %2, %7 : vector<16x256xf32>
    %9 = vector.extract_strided_slice %1 {offsets = [0, 1, 0], sizes = [4, 4, 256], strides = [1, 1, 1]} : vector<6x6x256xbf16> to vector<4x4x256xbf16>
    %10 = vector.shape_cast %9 : vector<4x4x256xbf16> to vector<16x256xbf16>
    %c0_8 = arith.constant 0 : index
    %c1 = arith.constant 1 : index
    %c0_9 = arith.constant 0 : index
    %c0_10 = arith.constant 0 : index
    %11 = vector.load %arg2[%c0_8, %c1, %c0_9, %c0_10] : memref<3x3x256x256xbf16, #tpu.memory_space<vmem>>, vector<1x1x256x256xbf16>
    %12 = vector.shape_cast %11 : vector<1x1x256x256xbf16> to vector<256x256xbf16>
    %cst_11 = arith.constant dense<0.000000e+00> : vector<16x256xf32>
    %13 = tpu.matmul %10, %12, %cst_11 {dimension_numbers = #tpu.dot_dimension_numbers<[1], [0], [0], [1], [0, 0, 1, 1], [], []>} : vector<16x256xbf16>, vector<256x256xbf16>, vector<16x256xf32> -> vector<16x256xf32>
    %14 = arith.addf %8, %13 : vector<16x256xf32>
    %15 = vector.extract_strided_slice %1 {offsets = [0, 2, 0], sizes = [4, 4, 256], strides = [1, 1, 1]} : vector<6x6x256xbf16> to vector<4x4x256xbf16>
    %16 = vector.shape_cast %15 : vector<4x4x256xbf16> to vector<16x256xbf16>
    %c0_12 = arith.constant 0 : index
    %c2 = arith.constant 2 : index
    %c0_13 = arith.constant 0 : index
    %c0_14 = arith.constant 0 : index
    %17 = vector.load %arg2[%c0_12, %c2, %c0_13, %c0_14] : memref<3x3x256x256xbf16, #tpu.memory_space<vmem>>, vector<1x1x256x256xbf16>
    %18 = vector.shape_cast %17 : vector<1x1x256x256xbf16> to vector<256x256xbf16>
    %cst_15 = arith.constant dense<0.000000e+00> : vector<16x256xf32>
    %19 = tpu.matmul %16, %18, %cst_15 {dimension_numbers = #tpu.dot_dimension_numbers<[1], [0], [0], [1], [0, 0, 1, 1], [], []>} : vector<16x256xbf16>, vector<256x256xbf16>, vector<16x256xf32> -> vector<16x256xf32>
    %20 = arith.addf %14, %19 : vector<16x256xf32>
    %21 = vector.extract_strided_slice %1 {offsets = [1, 0, 0], sizes = [4, 4, 256], strides = [1, 1, 1]} : vector<6x6x256xbf16> to vector<4x4x256xbf16>
    %22 = vector.shape_cast %21 : vector<4x4x256xbf16> to vector<16x256xbf16>
    %c1_16 = arith.constant 1 : index
    %c0_17 = arith.constant 0 : index
    %c0_18 = arith.constant 0 : index
    %c0_19 = arith.constant 0 : index
    %23 = vector.load %arg2[%c1_16, %c0_17, %c0_18, %c0_19] : memref<3x3x256x256xbf16, #tpu.memory_space<vmem>>, vector<1x1x256x256xbf16>
    %24 = vector.shape_cast %23 : vector<1x1x256x256xbf16> to vector<256x256xbf16>
    %cst_20 = arith.constant dense<0.000000e+00> : vector<16x256xf32>
    %25 = tpu.matmul %22, %24, %cst_20 {dimension_numbers = #tpu.dot_dimension_numbers<[1], [0], [0], [1], [0, 0, 1, 1], [], []>} : vector<16x256xbf16>, vector<256x256xbf16>, vector<16x256xf32> -> vector<16x256xf32>
    %26 = arith.addf %20, %25 : vector<16x256xf32>
    %27 = vector.extract_strided_slice %1 {offsets = [1, 1, 0], sizes = [4, 4, 256], strides = [1, 1, 1]} : vector<6x6x256xbf16> to vector<4x4x256xbf16>
    %28 = vector.shape_cast %27 : vector<4x4x256xbf16> to vector<16x256xbf16>
    %c1_21 = arith.constant 1 : index
    %c1_22 = arith.constant 1 : index
    %c0_23 = arith.constant 0 : index
    %c0_24 = arith.constant 0 : index
    %29 = vector.load %arg2[%c1_21, %c1_22, %c0_23, %c0_24] : memref<3x3x256x256xbf16, #tpu.memory_space<vmem>>, vector<1x1x256x256xbf16>
    %30 = vector.shape_cast %29 : vector<1x1x256x256xbf16> to vector<256x256xbf16>
    %cst_25 = arith.constant dense<0.000000e+00> : vector<16x256xf32>
    %31 = tpu.matmul %28, %30, %cst_25 {dimension_numbers = #tpu.dot_dimension_numbers<[1], [0], [0], [1], [0, 0, 1, 1], [], []>} : vector<16x256xbf16>, vector<256x256xbf16>, vector<16x256xf32> -> vector<16x256xf32>
    %32 = arith.addf %26, %31 : vector<16x256xf32>
    %33 = vector.extract_strided_slice %1 {offsets = [1, 2, 0], sizes = [4, 4, 256], strides = [1, 1, 1]} : vector<6x6x256xbf16> to vector<4x4x256xbf16>
    %34 = vector.shape_cast %33 : vector<4x4x256xbf16> to vector<16x256xbf16>
    %c1_26 = arith.constant 1 : index
    %c2_27 = arith.constant 2 : index
    %c0_28 = arith.constant 0 : index
    %c0_29 = arith.constant 0 : index
    %35 = vector.load %arg2[%c1_26, %c2_27, %c0_28, %c0_29] : memref<3x3x256x256xbf16, #tpu.memory_space<vmem>>, vector<1x1x256x256xbf16>
    %36 = vector.shape_cast %35 : vector<1x1x256x256xbf16> to vector<256x256xbf16>
    %cst_30 = arith.constant dense<0.000000e+00> : vector<16x256xf32>
    %37 = tpu.matmul %34, %36, %cst_30 {dimension_numbers = #tpu.dot_dimension_numbers<[1], [0], [0], [1], [0, 0, 1, 1], [], []>} : vector<16x256xbf16>, vector<256x256xbf16>, vector<16x256xf32> -> vector<16x256xf32>
    %38 = arith.addf %32, %37 : vector<16x256xf32>
    %39 = vector.extract_strided_slice %1 {offsets = [2, 0, 0], sizes = [4, 4, 256], strides = [1, 1, 1]} : vector<6x6x256xbf16> to vector<4x4x256xbf16>
    %40 = vector.shape_cast %39 : vector<4x4x256xbf16> to vector<16x256xbf16>
    %c2_31 = arith.constant 2 : index
    %c0_32 = arith.constant 0 : index
    %c0_33 = arith.constant 0 : index
    %c0_34 = arith.constant 0 : index
    %41 = vector.load %arg2[%c2_31, %c0_32, %c0_33, %c0_34] : memref<3x3x256x256xbf16, #tpu.memory_space<vmem>>, vector<1x1x256x256xbf16>
    %42 = vector.shape_cast %41 : vector<1x1x256x256xbf16> to vector<256x256xbf16>
    %cst_35 = arith.constant dense<0.000000e+00> : vector<16x256xf32>
    %43 = tpu.matmul %40, %42, %cst_35 {dimension_numbers = #tpu.dot_dimension_numbers<[1], [0], [0], [1], [0, 0, 1, 1], [], []>} : vector<16x256xbf16>, vector<256x256xbf16>, vector<16x256xf32> -> vector<16x256xf32>
    %44 = arith.addf %38, %43 : vector<16x256xf32>
    %45 = vector.extract_strided_slice %1 {offsets = [2, 1, 0], sizes = [4, 4, 256], strides = [1, 1, 1]} : vector<6x6x256xbf16> to vector<4x4x256xbf16>
    %46 = vector.shape_cast %45 : vector<4x4x256xbf16> to vector<16x256xbf16>
    %c2_36 = arith.constant 2 : index
    %c1_37 = arith.constant 1 : index
    %c0_38 = arith.constant 0 : index
    %c0_39 = arith.constant 0 : index
    %47 = vector.load %arg2[%c2_36, %c1_37, %c0_38, %c0_39] : memref<3x3x256x256xbf16, #tpu.memory_space<vmem>>, vector<1x1x256x256xbf16>
    %48 = vector.shape_cast %47 : vector<1x1x256x256xbf16> to vector<256x256xbf16>
    %cst_40 = arith.constant dense<0.000000e+00> : vector<16x256xf32>
    %49 = tpu.matmul %46, %48, %cst_40 {dimension_numbers = #tpu.dot_dimension_numbers<[1], [0], [0], [1], [0, 0, 1, 1], [], []>} : vector<16x256xbf16>, vector<256x256xbf16>, vector<16x256xf32> -> vector<16x256xf32>
    %50 = arith.addf %44, %49 : vector<16x256xf32>
    %51 = vector.extract_strided_slice %1 {offsets = [2, 2, 0], sizes = [4, 4, 256], strides = [1, 1, 1]} : vector<6x6x256xbf16> to vector<4x4x256xbf16>
    %52 = vector.shape_cast %51 : vector<4x4x256xbf16> to vector<16x256xbf16>
    %c2_41 = arith.constant 2 : index
    %c2_42 = arith.constant 2 : index
    %c0_43 = arith.constant 0 : index
    %c0_44 = arith.constant 0 : index
    %53 = vector.load %arg2[%c2_41, %c2_42, %c0_43, %c0_44] : memref<3x3x256x256xbf16, #tpu.memory_space<vmem>>, vector<1x1x256x256xbf16>
    %54 = vector.shape_cast %53 : vector<1x1x256x256xbf16> to vector<256x256xbf16>
    %cst_45 = arith.constant dense<0.000000e+00> : vector<16x256xf32>
    %55 = tpu.matmul %52, %54, %cst_45 {dimension_numbers = #tpu.dot_dimension_numbers<[1], [0], [0], [1], [0, 0, 1, 1], [], []>} : vector<16x256xbf16>, vector<256x256xbf16>, vector<16x256xf32> -> vector<16x256xf32>
    %56 = arith.addf %50, %55 : vector<16x256xf32>
    %c0_46 = arith.constant 0 : index
    %c0_47 = arith.constant 0 : index
    %57 = vector.load %arg3[%c0_46, %c0_47] : memref<1x256xf32, #tpu.memory_space<vmem>>, vector<1x256xf32>
    %58 = vector.broadcast %57 : vector<1x256xf32> to vector<16x256xf32>
    %59 = arith.addf %56, %58 : vector<16x256xf32>
    %cst_48 = arith.constant 0.000000e+00 : f32
    %60 = vector.broadcast %cst_48 : f32 to vector<16x256xf32>
    %61 = arith.maximumf %59, %60 : vector<16x256xf32>
    %62 = vector.shape_cast %61 : vector<16x256xf32> to vector<4x4x256xf32>
    %63 = arith.truncf %62 : vector<4x4x256xf32> to vector<4x4x256xbf16>
    %c0_49 = arith.constant 0 : index
    %c0_50 = arith.constant 0 : index
    %c0_51 = arith.constant 0 : index
    %c0_52 = arith.constant 0 : index
    %64 = vector.load %arg4[%c0_49, %c0_50, %c0_51, %c0_52] : memref<1x4x4x256xbf16, #tpu.memory_space<vmem>>, vector<1x4x4x256xbf16>
    %65 = vector.shape_cast %64 : vector<1x4x4x256xbf16> to vector<4x4x256xbf16>
    %66 = vector.shape_cast %63 : vector<4x4x256xbf16> to vector<1x4x4x256xbf16>
    tpu.vector_store %arg4[%c0_49, %c0_50, %c0_51, %c0_52], %66 {strides = array<i32>} : memref<1x4x4x256xbf16, #tpu.memory_space<vmem>>, vector<1x4x4x256xbf16>,
    return
  }
  func.func @transform_0(%arg0: i32) -> (i32, i32, i32, i32) {
    %c0_i32 = arith.constant 0 : i32
    %c0_i32_0 = arith.constant 0 : i32
    %c0_i32_1 = arith.constant 0 : i32
    %c0_i32_2 = arith.constant 0 : i32
    return %arg0, %c0_i32, %c0_i32_0, %c0_i32_1 : i32, i32, i32, i32
  }
  func.func @transform_1(%arg0: i32) -> (i32, i32, i32, i32) {
    %c0_i32 = arith.constant 0 : i32
    %c0_i32_0 = arith.constant 0 : i32
    %c0_i32_1 = arith.constant 0 : i32
    %c0_i32_2 = arith.constant 0 : i32
    %c0_i32_3 = arith.constant 0 : i32
    return %c0_i32, %c0_i32_0, %c0_i32_1, %c0_i32_2 : i32, i32, i32, i32
  }
  func.func @transform_2(%arg0: i32) -> (i32, i32) {
    %c0_i32 = arith.constant 0 : i32
    %c0_i32_0 = arith.constant 0 : i32
    %c0_i32_1 = arith.constant 0 : i32
    return %c0_i32, %c0_i32_0 : i32, i32
  }
  func.func @transform_3(%arg0: i32) -> (i32, i32, i32, i32) {
    %c0_i32 = arith.constant 0 : i32
    %c0_i32_0 = arith.constant 0 : i32
    %c0_i32_1 = arith.constant 0 : i32
    %c0_i32_2 = arith.constant 0 : i32
    return %arg0, %c0_i32, %c0_i32_0, %c0_i32_1 : i32, i32, i32, i32
  }
}

module attributes {stable_mosaic.version = 11 : i64} {
  func.func @_conv_kernel(%arg0: i32, %arg1: memref<1x6x6x256xbf16, #tpu.memory_space<vmem>>, %arg2: memref<3x3x256x256xbf16, #tpu.memory_space<vmem>>, %arg3: memref<1x256xf32, #tpu.memory_space<vmem>>, %arg4: memref<1x4x4x256xbf16, #tpu.memory_space<vmem>>) attributes {dimension_semantics = [#tpu.dimension_semantics<parallel>], iteration_bounds = array<i64: 4>, scalar_prefetch = 0 : i64, scratch_operands = 0 : i64, tpu.core_type = #tpu.core_type<tc>, window_params = [{transform_indices = @transform_0, window_bounds = array<i64: 1, 6, 6, 256>}, {pipeline_mode = #tpu.pipeline_mode<synchronous>, transform_indices = @transform_1, window_bounds = array<i64: 3, 3, 256, 256>}, {pipeline_mode = #tpu.pipeline_mode<synchronous>, transform_indices = @transform_2, window_bounds = array<i64: 1, 256>}, {transform_indices = @transform_3, window_bounds = array<i64: 1, 4, 4, 256>}]} {
    %c0 = arith.constant 0 : index
    %c0_0 = arith.constant 0 : index
    %c0_1 = arith.constant 0 : index
    %c0_2 = arith.constant 0 : index
    %0 = vector.load %arg1[%c0, %c0_0, %c0_1, %c0_2] : memref<1x6x6x256xbf16, #tpu.memory_space<vmem>>, vector<1x6x6x256xbf16>
    %1 = vector.shape_cast %0 : vector<1x6x6x256xbf16> to vector<6x6x256xbf16>
    %cst = arith.constant 0.000000e+00 : f32
    %2 = vector.broadcast %cst : f32 to vector<16x256xf32>
    %3 = vector.extract_strided_slice %1 {offsets = [0, 0, 0], sizes = [4, 4, 256], strides = [1, 1, 1]} : vector<6x6x256xbf16> to vector<4x4x256xbf16>
    %4 = vector.shape_cast %3 : vector<4x4x256xbf16> to vector<16x256xbf16>
    %c0_3 = arith.constant 0 : index
    %c0_4 = arith.constant 0 : index
    %c0_5 = arith.constant 0 : index
    %c0_6 = arith.constant 0 : index
    %5 = vector.load %arg2[%c0_3, %c0_4, %c0_5, %c0_6] : memref<3x3x256x256xbf16, #tpu.memory_space<vmem>>, vector<1x1x256x256xbf16>
    %6 = vector.shape_cast %5 : vector<1x1x256x256xbf16> to vector<256x256xbf16>
    %cst_7 = arith.constant dense<0.000000e+00> : vector<16x256xf32>
    %7 = tpu.matmul %4, %6, %cst_7 {dimension_numbers = #tpu.dot_dimension_numbers<[1], [0], [0], [1], [0, 0, 1, 1], [], []>} : vector<16x256xbf16>, vector<256x256xbf16>, vector<16x256xf32> -> vector<16x256xf32>
    %8 = arith.addf %2, %7 : vector<16x256xf32>
    %9 = vector.extract_strided_slice %1 {offsets = [0, 1, 0], sizes = [4, 4, 256], strides = [1, 1, 1]} : vector<6x6x256xbf16> to vector<4x4x256xbf16>
    %10 = vector.shape_cast %9 : vector<4x4x256xbf16> to vector<16x256xbf16>
    %c0_8 = arith.constant 0 : index
    %c1 = arith.constant 1 : index
    %c0_9 = arith.constant 0 : index
    %c0_10 = arith.constant 0 : index
    %11 = vector.load %arg2[%c0_8, %c1, %c0_9, %c0_10] : memref<3x3x256x256xbf16, #tpu.memory_space<vmem>>, vector<1x1x256x256xbf16>
    %12 = vector.shape_cast %11 : vector<1x1x256x256xbf16> to vector<256x256xbf16>
    %cst_11 = arith.constant dense<0.000000e+00> : vector<16x256xf32>
    %13 = tpu.matmul %10, %12, %cst_11 {dimension_numbers = #tpu.dot_dimension_numbers<[1], [0], [0], [1], [0, 0, 1, 1], [], []>} : vector<16x256xbf16>, vector<256x256xbf16>, vector<16x256xf32> -> vector<16x256xf32>
    %14 = arith.addf %8, %13 : vector<16x256xf32>
    %15 = vector.extract_strided_slice %1 {offsets = [0, 2, 0], sizes = [4, 4, 256], strides = [1, 1, 1]} : vector<6x6x256xbf16> to vector<4x4x256xbf16>
    %16 = vector.shape_cast %15 : vector<4x4x256xbf16> to vector<16x256xbf16>
    %c0_12 = arith.constant 0 : index
    %c2 = arith.constant 2 : index
    %c0_13 = arith.constant 0 : index
    %c0_14 = arith.constant 0 : index
    %17 = vector.load %arg2[%c0_12, %c2, %c0_13, %c0_14] : memref<3x3x256x256xbf16, #tpu.memory_space<vmem>>, vector<1x1x256x256xbf16>
    %18 = vector.shape_cast %17 : vector<1x1x256x256xbf16> to vector<256x256xbf16>
    %cst_15 = arith.constant dense<0.000000e+00> : vector<16x256xf32>
    %19 = tpu.matmul %16, %18, %cst_15 {dimension_numbers = #tpu.dot_dimension_numbers<[1], [0], [0], [1], [0, 0, 1, 1], [], []>} : vector<16x256xbf16>, vector<256x256xbf16>, vector<16x256xf32> -> vector<16x256xf32>
    %20 = arith.addf %14, %19 : vector<16x256xf32>
    %21 = vector.extract_strided_slice %1 {offsets = [1, 0, 0], sizes = [4, 4, 256], strides = [1, 1, 1]} : vector<6x6x256xbf16> to vector<4x4x256xbf16>
    %22 = vector.shape_cast %21 : vector<4x4x256xbf16> to vector<16x256xbf16>
    %c1_16 = arith.constant 1 : index
    %c0_17 = arith.constant 0 : index
    %c0_18 = arith.constant 0 : index
    %c0_19 = arith.constant 0 : index
    %23 = vector.load %arg2[%c1_16, %c0_17, %c0_18, %c0_19] : memref<3x3x256x256xbf16, #tpu.memory_space<vmem>>, vector<1x1x256x256xbf16>
    %24 = vector.shape_cast %23 : vector<1x1x256x256xbf16> to vector<256x256xbf16>
    %cst_20 = arith.constant dense<0.000000e+00> : vector<16x256xf32>
    %25 = tpu.matmul %22, %24, %cst_20 {dimension_numbers = #tpu.dot_dimension_numbers<[1], [0], [0], [1], [0, 0, 1, 1], [], []>} : vector<16x256xbf16>, vector<256x256xbf16>, vector<16x256xf32> -> vector<16x256xf32>
    %26 = arith.addf %20, %25 : vector<16x256xf32>
    %27 = vector.extract_strided_slice %1 {offsets = [1, 1, 0], sizes = [4, 4, 256], strides = [1, 1, 1]} : vector<6x6x256xbf16> to vector<4x4x256xbf16>
    %28 = vector.shape_cast %27 : vector<4x4x256xbf16> to vector<16x256xbf16>
    %c1_21 = arith.constant 1 : index
    %c1_22 = arith.constant 1 : index
    %c0_23 = arith.constant 0 : index
    %c0_24 = arith.constant 0 : index
    %29 = vector.load %arg2[%c1_21, %c1_22, %c0_23, %c0_24] : memref<3x3x256x256xbf16, #tpu.memory_space<vmem>>, vector<1x1x256x256xbf16>
    %30 = vector.shape_cast %29 : vector<1x1x256x256xbf16> to vector<256x256xbf16>
    %cst_25 = arith.constant dense<0.000000e+00> : vector<16x256xf32>
    %31 = tpu.matmul %28, %30, %cst_25 {dimension_numbers = #tpu.dot_dimension_numbers<[1], [0], [0], [1], [0, 0, 1, 1], [], []>} : vector<16x256xbf16>, vector<256x256xbf16>, vector<16x256xf32> -> vector<16x256xf32>
    %32 = arith.addf %26, %31 : vector<16x256xf32>
    %33 = vector.extract_strided_slice %1 {offsets = [1, 2, 0], sizes = [4, 4, 256], strides = [1, 1, 1]} : vector<6x6x256xbf16> to vector<4x4x256xbf16>
    %34 = vector.shape_cast %33 : vector<4x4x256xbf16> to vector<16x256xbf16>
    %c1_26 = arith.constant 1 : index
    %c2_27 = arith.constant 2 : index
    %c0_28 = arith.constant 0 : index
    %c0_29 = arith.constant 0 : index
    %35 = vector.load %arg2[%c1_26, %c2_27, %c0_28, %c0_29] : memref<3x3x256x256xbf16, #tpu.memory_space<vmem>>, vector<1x1x256x256xbf16>
    %36 = vector.shape_cast %35 : vector<1x1x256x256xbf16> to vector<256x256xbf16>
    %cst_30 = arith.constant dense<0.000000e+00> : vector<16x256xf32>
    %37 = tpu.matmul %34, %36, %cst_30 {dimension_numbers = #tpu.dot_dimension_numbers<[1], [0], [0], [1], [0, 0, 1, 1], [], []>} : vector<16x256xbf16>, vector<256x256xbf16>, vector<16x256xf32> -> vector<16x256xf32>
    %38 = arith.addf %32, %37 : vector<16x256xf32>
    %39 = vector.extract_strided_slice %1 {offsets = [2, 0, 0], sizes = [4, 4, 256], strides = [1, 1, 1]} : vector<6x6x256xbf16> to vector<4x4x256xbf16>
    %40 = vector.shape_cast %39 : vector<4x4x256xbf16> to vector<16x256xbf16>
    %c2_31 = arith.constant 2 : index
    %c0_32 = arith.constant 0 : index
    %c0_33 = arith.constant 0 : index
    %c0_34 = arith.constant 0 : index
    %41 = vector.load %arg2[%c2_31, %c0_32, %c0_33, %c0_34] : memref<3x3x256x256xbf16, #tpu.memory_space<vmem>>, vector<1x1x256x256xbf16>
    %42 = vector.shape_cast %41 : vector<1x1x256x256xbf16> to vector<256x256xbf16>
    %cst_35 = arith.constant dense<0.000000e+00> : vector<16x256xf32>
    %43 = tpu.matmul %40, %42, %cst_35 {dimension_numbers = #tpu.dot_dimension_numbers<[1], [0], [0], [1], [0, 0, 1, 1], [], []>} : vector<16x256xbf16>, vector<256x256xbf16>, vector<16x256xf32> -> vector<16x256xf32>
    %44 = arith.addf %38, %43 : vector<16x256xf32>
    %45 = vector.extract_strided_slice %1 {offsets = [2, 1, 0], sizes = [4, 4, 256], strides = [1, 1, 1]} : vector<6x6x256xbf16> to vector<4x4x256xbf16>
    %46 = vector.shape_cast %45 : vector<4x4x256xbf16> to vector<16x256xbf16>
    %c2_36 = arith.constant 2 : index
    %c1_37 = arith.constant 1 : index
    %c0_38 = arith.constant 0 : index
    %c0_39 = arith.constant 0 : index
    %47 = vector.load %arg2[%c2_36, %c1_37, %c0_38, %c0_39] : memref<3x3x256x256xbf16, #tpu.memory_space<vmem>>, vector<1x1x256x256xbf16>
    %48 = vector.shape_cast %47 : vector<1x1x256x256xbf16> to vector<256x256xbf16>
    %cst_40 = arith.constant dense<0.000000e+00> : vector<16x256xf32>
    %49 = tpu.matmul %46, %48, %cst_40 {dimension_numbers = #tpu.dot_dimension_numbers<[1], [0], [0], [1], [0, 0, 1, 1], [], []>} : vector<16x256xbf16>, vector<256x256xbf16>, vector<16x256xf32> -> vector<16x256xf32>
    %50 = arith.addf %44, %49 : vector<16x256xf32>
    %51 = vector.extract_strided_slice %1 {offsets = [2, 2, 0], sizes = [4, 4, 256], strides = [1, 1, 1]} : vector<6x6x256xbf16> to vector<4x4x256xbf16>
    %52 = vector.shape_cast %51 : vector<4x4x256xbf16> to vector<16x256xbf16>
    %c2_41 = arith.constant 2 : index
    %c2_42 = arith.constant 2 : index
    %c0_43 = arith.constant 0 : index
    %c0_44 = arith.constant 0 : index
    %53 = vector.load %arg2[%c2_41, %c2_42, %c0_43, %c0_44] : memref<3x3x256x256xbf16, #tpu.memory_space<vmem>>, vector<1x1x256x256xbf16>
    %54 = vector.shape_cast %53 : vector<1x1x256x256xbf16> to vector<256x256xbf16>
    %cst_45 = arith.constant dense<0.000000e+00> : vector<16x256xf32>
    %55 = tpu.matmul %52, %54, %cst_45 {dimension_numbers = #tpu.dot_dimension_numbers<[1], [0], [0], [1], [0, 0, 1, 1], [], []>} : vector<16x256xbf16>, vector<256x256xbf16>, vector<16x256xf32> -> vector<16x256xf32>
    %56 = arith.addf %50, %55 : vector<16x256xf32>
    %c0_46 = arith.constant 0 : index
    %c0_47 = arith.constant 0 : index
    %57 = vector.load %arg3[%c0_46, %c0_47] : memref<1x256xf32, #tpu.memory_space<vmem>>, vector<1x256xf32>
    %58 = vector.broadcast %57 : vector<1x256xf32> to vector<16x256xf32>
    %59 = arith.addf %56, %58 : vector<16x256xf32>
    %60 = vector.shape_cast %59 : vector<16x256xf32> to vector<4x4x256xf32>
    %61 = arith.truncf %60 : vector<4x4x256xf32> to vector<4x4x256xbf16>
    %c0_48 = arith.constant 0 : index
    %c0_49 = arith.constant 0 : index
    %c0_50 = arith.constant 0 : index
    %c0_51 = arith.constant 0 : index
    %62 = vector.load %arg4[%c0_48, %c0_49, %c0_50, %c0_51] : memref<1x4x4x256xbf16, #tpu.memory_space<vmem>>, vector<1x4x4x256xbf16>
    %63 = vector.shape_cast %62 : vector<1x4x4x256xbf16> to vector<4x4x256xbf16>
    %64 = vector.shape_cast %61 : vector<4x4x256xbf16> to vector<1x4x4x256xbf16>
    tpu.vector_store %arg4[%c0_48, %c0_49, %c0_50, %c0_51], %64 {strides = array<i32>} : memref<1x4x4x256xbf16, #tpu.memory_space<vmem>>, vector<1x4x4x256xbf16>,
    return
  }
  func.func @transform_0(%arg0: i32) -> (i32, i32, i32, i32) {
    %c0_i32 = arith.constant 0 : i32
    %c0_i32_0 = arith.constant 0 : i32
    %c0_i32_1 = arith.constant 0 : i32
    %c0_i32_2 = arith.constant 0 : i32
    return %arg0, %c0_i32, %c0_i32_0, %c0_i32_1 : i32, i32, i32, i32
  }
  func.func @transform_1(%arg0: i32) -> (i32, i32, i32, i32) {
    %c0_i32 = arith.constant 0 : i32
    %c0_i32_0 = arith.constant 0 : i32
    %c0_i32_1 = arith.constant 0 : i32
    %c0_i32_2 = arith.constant 0 : i32
    %c0_i32_3 = arith.constant 0 : i32
    return %c0_i32, %c0_i32_0, %c0_i32_1, %c0_i32_2 : i32, i32, i32, i32
  }
  func.func @transform_2(%arg0: i32) -> (i32, i32) {
    %c0_i32 = arith.constant 0 : i32
    %c0_i32_0 = arith.constant 0 : i32
    %c0_i32_1 = arith.constant 0 : i32
    return %c0_i32, %c0_i32_0 : i32, i32
  }
  func.func @transform_3(%arg0: i32) -> (i32, i32, i32, i32) {
    %c0_i32 = arith.constant 0 : i32
    %c0_i32_0 = arith.constant 0 : i32
    %c0_i32_1 = arith.constant 0 : i32
    %c0_i32_2 = arith.constant 0 : i32
    return %arg0, %c0_i32, %c0_i32_0, %c0_i32_1 : i32, i32, i32, i32
  }
}

module attributes {stable_mosaic.version = 11 : i64} {
  func.func @_l1_partial_kernel(%arg0: i32, %arg1: i32, %arg2: memref<8x512xbf16, #tpu.memory_space<vmem>>, %arg3: memref<8x512xbf16, #tpu.memory_space<vmem>>, %arg4: memref<1x1x1xf32, #tpu.memory_space<vmem>>) attributes {dimension_semantics = [#tpu.dimension_semantics<parallel>, #tpu.dimension_semantics<arbitrary>], iteration_bounds = array<i64: 2, 1>, scalar_prefetch = 0 : i64, scratch_operands = 0 : i64, tpu.core_type = #tpu.core_type<tc>, window_params = [{transform_indices = @transform_0, window_bounds = array<i64: 8, 512>}, {transform_indices = @transform_1, window_bounds = array<i64: 8, 512>}, {transform_indices = @transform_2, window_bounds = array<i64: 1, 1, 1>}]} {
    %c0_i32 = arith.constant 0 : i32
    %0 = arith.cmpi eq, %arg1, %c0_i32 : i32
    %1 = arith.extui %0 : i1 to i32
    %c0_i32_0 = arith.constant 0 : i32
    %2 = arith.cmpi ne, %1, %c0_i32_0 : i32
    scf.if %2 {
      %cst_10 = arith.constant 0.000000e+00 : f32
      %18 = vector.broadcast %cst_10 : f32 to vector<1x1x1xf32>
      %c0_11 = arith.constant 0 : index
      %c0_12 = arith.constant 0 : index
      %c0_13 = arith.constant 0 : index
      %19 = vector.load %arg4[%c0_11, %c0_12, %c0_13] : memref<1x1x1xf32, #tpu.memory_space<vmem>>, vector<1x1x1xf32>
      tpu.vector_store %arg4[%c0_11, %c0_12, %c0_13], %18 {strides = array<i32>} : memref<1x1x1xf32, #tpu.memory_space<vmem>>, vector<1x1x1xf32>,
    } else {
    }
    %c0 = arith.constant 0 : index
    %c0_1 = arith.constant 0 : index
    %3 = vector.load %arg2[%c0, %c0_1] : memref<8x512xbf16, #tpu.memory_space<vmem>>, vector<8x512xbf16>
    %4 = arith.extf %3 : vector<8x512xbf16> to vector<8x512xf32>
    %c0_2 = arith.constant 0 : index
    %c0_3 = arith.constant 0 : index
    %5 = vector.load %arg3[%c0_2, %c0_3] : memref<8x512xbf16, #tpu.memory_space<vmem>>, vector<8x512xbf16>
    %6 = arith.extf %5 : vector<8x512xbf16> to vector<8x512xf32>
    %7 = arith.subf %4, %6 : vector<8x512xf32>
    %8 = math.absf %7 : vector<8x512xf32>
    %c0_4 = arith.constant 0 : index
    %c0_5 = arith.constant 0 : index
    %c0_6 = arith.constant 0 : index
    %9 = vector.load %arg4[%c0_4, %c0_5, %c0_6] : memref<1x1x1xf32, #tpu.memory_space<vmem>>, vector<1x1x1xf32>
    %10 = vector.shape_cast %8 : vector<8x512xf32> to vector<1x8x512xf32>
    %cst = arith.constant dense<0.000000e+00> : vector<1xf32>
    %11 = vector.multi_reduction <add>, %10, %cst [1, 2] : vector<1x8x512xf32> to vector<1xf32>
    %12 = vector.shape_cast %11 : vector<1xf32> to vector<1x1x1xf32>
    %13 = vector.extract %12[0, 0, 0] : f32 from vector<1x1x1xf32>
    %14 = vector.broadcast %13 : f32 to vector<1x1xf32>
    %15 = vector.shape_cast %14 : vector<1x1xf32> to vector<1x1x1xf32>
    %16 = arith.addf %9, %15 : vector<1x1x1xf32>
    %c0_7 = arith.constant 0 : index
    %c0_8 = arith.constant 0 : index
    %c0_9 = arith.constant 0 : index
    %17 = vector.load %arg4[%c0_7, %c0_8, %c0_9] : memref<1x1x1xf32, #tpu.memory_space<vmem>>, vector<1x1x1xf32>
    tpu.vector_store %arg4[%c0_7, %c0_8, %c0_9], %16 {strides = array<i32>} : memref<1x1x1xf32, #tpu.memory_space<vmem>>, vector<1x1x1xf32>,
    return
  }
  func.func @transform_0(%arg0: i32, %arg1: i32) -> (i32, i32) {
    %c1_i32 = arith.constant 1 : i32
    %0 = arith.muli %arg0, %c1_i32 : i32
    %1 = arith.addi %0, %arg1 : i32
    %c0_i32 = arith.constant 0 : i32
    %c0_i32_0 = arith.constant 0 : i32
    return %1, %c0_i32 : i32, i32
  }
  func.func @transform_1(%arg0: i32, %arg1: i32) -> (i32, i32) {
    %c1_i32 = arith.constant 1 : i32
    %0 = arith.muli %arg0, %c1_i32 : i32
    %1 = arith.addi %0, %arg1 : i32
    %c0_i32 = arith.constant 0 : i32
    %c0_i32_0 = arith.constant 0 : i32
    return %1, %c0_i32 : i32, i32
  }
  func.func @transform_2(%arg0: i32, %arg1: i32) -> (i32, i32, i32) {
    %c0_i32 = arith.constant 0 : i32
    %c0_i32_0 = arith.constant 0 : i32
    %c0_i32_1 = arith.constant 0 : i32
    return %arg0, %c0_i32, %c0_i32_0 : i32, i32, i32
  }
}

module attributes {stable_mosaic.version = 11 : i64} {
  func.func @_l1_partial_kernel(%arg0: i32, %arg1: i32, %arg2: memref<16x512xbf16, #tpu.memory_space<vmem>>, %arg3: memref<16x512xbf16, #tpu.memory_space<vmem>>, %arg4: memref<1x1x1xf32, #tpu.memory_space<vmem>>) attributes {dimension_semantics = [#tpu.dimension_semantics<parallel>, #tpu.dimension_semantics<arbitrary>], iteration_bounds = array<i64: 2, 1>, scalar_prefetch = 0 : i64, scratch_operands = 0 : i64, tpu.core_type = #tpu.core_type<tc>, window_params = [{transform_indices = @transform_0, window_bounds = array<i64: 16, 512>}, {transform_indices = @transform_1, window_bounds = array<i64: 16, 512>}, {transform_indices = @transform_2, window_bounds = array<i64: 1, 1, 1>}]} {
    %c0_i32 = arith.constant 0 : i32
    %0 = arith.cmpi eq, %arg1, %c0_i32 : i32
    %1 = arith.extui %0 : i1 to i32
    %c0_i32_0 = arith.constant 0 : i32
    %2 = arith.cmpi ne, %1, %c0_i32_0 : i32
    scf.if %2 {
      %cst_10 = arith.constant 0.000000e+00 : f32
      %18 = vector.broadcast %cst_10 : f32 to vector<1x1x1xf32>
      %c0_11 = arith.constant 0 : index
      %c0_12 = arith.constant 0 : index
      %c0_13 = arith.constant 0 : index
      %19 = vector.load %arg4[%c0_11, %c0_12, %c0_13] : memref<1x1x1xf32, #tpu.memory_space<vmem>>, vector<1x1x1xf32>
      tpu.vector_store %arg4[%c0_11, %c0_12, %c0_13], %18 {strides = array<i32>} : memref<1x1x1xf32, #tpu.memory_space<vmem>>, vector<1x1x1xf32>,
    } else {
    }
    %c0 = arith.constant 0 : index
    %c0_1 = arith.constant 0 : index
    %3 = vector.load %arg2[%c0, %c0_1] : memref<16x512xbf16, #tpu.memory_space<vmem>>, vector<16x512xbf16>
    %4 = arith.extf %3 : vector<16x512xbf16> to vector<16x512xf32>
    %c0_2 = arith.constant 0 : index
    %c0_3 = arith.constant 0 : index
    %5 = vector.load %arg3[%c0_2, %c0_3] : memref<16x512xbf16, #tpu.memory_space<vmem>>, vector<16x512xbf16>
    %6 = arith.extf %5 : vector<16x512xbf16> to vector<16x512xf32>
    %7 = arith.subf %4, %6 : vector<16x512xf32>
    %8 = math.absf %7 : vector<16x512xf32>
    %c0_4 = arith.constant 0 : index
    %c0_5 = arith.constant 0 : index
    %c0_6 = arith.constant 0 : index
    %9 = vector.load %arg4[%c0_4, %c0_5, %c0_6] : memref<1x1x1xf32, #tpu.memory_space<vmem>>, vector<1x1x1xf32>
    %10 = vector.shape_cast %8 : vector<16x512xf32> to vector<1x16x512xf32>
    %cst = arith.constant dense<0.000000e+00> : vector<1xf32>
    %11 = vector.multi_reduction <add>, %10, %cst [1, 2] : vector<1x16x512xf32> to vector<1xf32>
    %12 = vector.shape_cast %11 : vector<1xf32> to vector<1x1x1xf32>
    %13 = vector.extract %12[0, 0, 0] : f32 from vector<1x1x1xf32>
    %14 = vector.broadcast %13 : f32 to vector<1x1xf32>
    %15 = vector.shape_cast %14 : vector<1x1xf32> to vector<1x1x1xf32>
    %16 = arith.addf %9, %15 : vector<1x1x1xf32>
    %c0_7 = arith.constant 0 : index
    %c0_8 = arith.constant 0 : index
    %c0_9 = arith.constant 0 : index
    %17 = vector.load %arg4[%c0_7, %c0_8, %c0_9] : memref<1x1x1xf32, #tpu.memory_space<vmem>>, vector<1x1x1xf32>
    tpu.vector_store %arg4[%c0_7, %c0_8, %c0_9], %16 {strides = array<i32>} : memref<1x1x1xf32, #tpu.memory_space<vmem>>, vector<1x1x1xf32>,
    return
  }
  func.func @transform_0(%arg0: i32, %arg1: i32) -> (i32, i32) {
    %c1_i32 = arith.constant 1 : i32
    %0 = arith.muli %arg0, %c1_i32 : i32
    %1 = arith.addi %0, %arg1 : i32
    %c0_i32 = arith.constant 0 : i32
    %c0_i32_0 = arith.constant 0 : i32
    return %1, %c0_i32 : i32, i32
  }
  func.func @transform_1(%arg0: i32, %arg1: i32) -> (i32, i32) {
    %c1_i32 = arith.constant 1 : i32
    %0 = arith.muli %arg0, %c1_i32 : i32
    %1 = arith.addi %0, %arg1 : i32
    %c0_i32 = arith.constant 0 : i32
    %c0_i32_0 = arith.constant 0 : i32
    return %1, %c0_i32 : i32, i32
  }
  func.func @transform_2(%arg0: i32, %arg1: i32) -> (i32, i32, i32) {
    %c0_i32 = arith.constant 0 : i32
    %c0_i32_0 = arith.constant 0 : i32
    %c0_i32_1 = arith.constant 0 : i32
    return %arg0, %c0_i32, %c0_i32_0 : i32, i32, i32
  }
}

module attributes {stable_mosaic.version = 11 : i64} {
  func.func @_l1_partial_kernel(%arg0: i32, %arg1: i32, %arg2: memref<32x512xbf16, #tpu.memory_space<vmem>>, %arg3: memref<32x512xbf16, #tpu.memory_space<vmem>>, %arg4: memref<1x1x1xf32, #tpu.memory_space<vmem>>) attributes {dimension_semantics = [#tpu.dimension_semantics<parallel>, #tpu.dimension_semantics<arbitrary>], iteration_bounds = array<i64: 2, 1>, scalar_prefetch = 0 : i64, scratch_operands = 0 : i64, tpu.core_type = #tpu.core_type<tc>, window_params = [{transform_indices = @transform_0, window_bounds = array<i64: 32, 512>}, {transform_indices = @transform_1, window_bounds = array<i64: 32, 512>}, {transform_indices = @transform_2, window_bounds = array<i64: 1, 1, 1>}]} {
    %c0_i32 = arith.constant 0 : i32
    %0 = arith.cmpi eq, %arg1, %c0_i32 : i32
    %1 = arith.extui %0 : i1 to i32
    %c0_i32_0 = arith.constant 0 : i32
    %2 = arith.cmpi ne, %1, %c0_i32_0 : i32
    scf.if %2 {
      %cst_10 = arith.constant 0.000000e+00 : f32
      %18 = vector.broadcast %cst_10 : f32 to vector<1x1x1xf32>
      %c0_11 = arith.constant 0 : index
      %c0_12 = arith.constant 0 : index
      %c0_13 = arith.constant 0 : index
      %19 = vector.load %arg4[%c0_11, %c0_12, %c0_13] : memref<1x1x1xf32, #tpu.memory_space<vmem>>, vector<1x1x1xf32>
      tpu.vector_store %arg4[%c0_11, %c0_12, %c0_13], %18 {strides = array<i32>} : memref<1x1x1xf32, #tpu.memory_space<vmem>>, vector<1x1x1xf32>,
    } else {
    }
    %c0 = arith.constant 0 : index
    %c0_1 = arith.constant 0 : index
    %3 = vector.load %arg2[%c0, %c0_1] : memref<32x512xbf16, #tpu.memory_space<vmem>>, vector<32x512xbf16>
    %4 = arith.extf %3 : vector<32x512xbf16> to vector<32x512xf32>
    %c0_2 = arith.constant 0 : index
    %c0_3 = arith.constant 0 : index
    %5 = vector.load %arg3[%c0_2, %c0_3] : memref<32x512xbf16, #tpu.memory_space<vmem>>, vector<32x512xbf16>
    %6 = arith.extf %5 : vector<32x512xbf16> to vector<32x512xf32>
    %7 = arith.subf %4, %6 : vector<32x512xf32>
    %8 = math.absf %7 : vector<32x512xf32>
    %c0_4 = arith.constant 0 : index
    %c0_5 = arith.constant 0 : index
    %c0_6 = arith.constant 0 : index
    %9 = vector.load %arg4[%c0_4, %c0_5, %c0_6] : memref<1x1x1xf32, #tpu.memory_space<vmem>>, vector<1x1x1xf32>
    %10 = vector.shape_cast %8 : vector<32x512xf32> to vector<1x32x512xf32>
    %cst = arith.constant dense<0.000000e+00> : vector<1xf32>
    %11 = vector.multi_reduction <add>, %10, %cst [1, 2] : vector<1x32x512xf32> to vector<1xf32>
    %12 = vector.shape_cast %11 : vector<1xf32> to vector<1x1x1xf32>
    %13 = vector.extract %12[0, 0, 0] : f32 from vector<1x1x1xf32>
    %14 = vector.broadcast %13 : f32 to vector<1x1xf32>
    %15 = vector.shape_cast %14 : vector<1x1xf32> to vector<1x1x1xf32>
    %16 = arith.addf %9, %15 : vector<1x1x1xf32>
    %c0_7 = arith.constant 0 : index
    %c0_8 = arith.constant 0 : index
    %c0_9 = arith.constant 0 : index
    %17 = vector.load %arg4[%c0_7, %c0_8, %c0_9] : memref<1x1x1xf32, #tpu.memory_space<vmem>>, vector<1x1x1xf32>
    tpu.vector_store %arg4[%c0_7, %c0_8, %c0_9], %16 {strides = array<i32>} : memref<1x1x1xf32, #tpu.memory_space<vmem>>, vector<1x1x1xf32>,
    return
  }
  func.func @transform_0(%arg0: i32, %arg1: i32) -> (i32, i32) {
    %c1_i32 = arith.constant 1 : i32
    %0 = arith.muli %arg0, %c1_i32 : i32
    %1 = arith.addi %0, %arg1 : i32
    %c0_i32 = arith.constant 0 : i32
    %c0_i32_0 = arith.constant 0 : i32
    return %1, %c0_i32 : i32, i32
  }
  func.func @transform_1(%arg0: i32, %arg1: i32) -> (i32, i32) {
    %c1_i32 = arith.constant 1 : i32
    %0 = arith.muli %arg0, %c1_i32 : i32
    %1 = arith.addi %0, %arg1 : i32
    %c0_i32 = arith.constant 0 : i32
    %c0_i32_0 = arith.constant 0 : i32
    return %1, %c0_i32 : i32, i32
  }
  func.func @transform_2(%arg0: i32, %arg1: i32) -> (i32, i32, i32) {
    %c0_i32 = arith.constant 0 : i32
    %c0_i32_0 = arith.constant 0 : i32
    %c0_i32_1 = arith.constant 0 : i32
    return %arg0, %c0_i32, %c0_i32_0 : i32, i32, i32
  }
}

module attributes {stable_mosaic.version = 11 : i64} {
  func.func @_l1_partial_kernel(%arg0: i32, %arg1: i32, %arg2: memref<8x512xf32, #tpu.memory_space<vmem>>, %arg3: memref<8x512xf32, #tpu.memory_space<vmem>>, %arg4: memref<1x1x1xf32, #tpu.memory_space<vmem>>) attributes {dimension_semantics = [#tpu.dimension_semantics<parallel>, #tpu.dimension_semantics<arbitrary>], iteration_bounds = array<i64: 2, 1>, scalar_prefetch = 0 : i64, scratch_operands = 0 : i64, tpu.core_type = #tpu.core_type<tc>, window_params = [{transform_indices = @transform_0, window_bounds = array<i64: 8, 512>}, {transform_indices = @transform_1, window_bounds = array<i64: 8, 512>}, {transform_indices = @transform_2, window_bounds = array<i64: 1, 1, 1>}]} {
    %c0_i32 = arith.constant 0 : i32
    %0 = arith.cmpi eq, %arg1, %c0_i32 : i32
    %1 = arith.extui %0 : i1 to i32
    %c0_i32_0 = arith.constant 0 : i32
    %2 = arith.cmpi ne, %1, %c0_i32_0 : i32
    scf.if %2 {
      %cst_10 = arith.constant 0.000000e+00 : f32
      %16 = vector.broadcast %cst_10 : f32 to vector<1x1x1xf32>
      %c0_11 = arith.constant 0 : index
      %c0_12 = arith.constant 0 : index
      %c0_13 = arith.constant 0 : index
      %17 = vector.load %arg4[%c0_11, %c0_12, %c0_13] : memref<1x1x1xf32, #tpu.memory_space<vmem>>, vector<1x1x1xf32>
      tpu.vector_store %arg4[%c0_11, %c0_12, %c0_13], %16 {strides = array<i32>} : memref<1x1x1xf32, #tpu.memory_space<vmem>>, vector<1x1x1xf32>,
    } else {
    }
    %c0 = arith.constant 0 : index
    %c0_1 = arith.constant 0 : index
    %3 = vector.load %arg2[%c0, %c0_1] : memref<8x512xf32, #tpu.memory_space<vmem>>, vector<8x512xf32>
    %c0_2 = arith.constant 0 : index
    %c0_3 = arith.constant 0 : index
    %4 = vector.load %arg3[%c0_2, %c0_3] : memref<8x512xf32, #tpu.memory_space<vmem>>, vector<8x512xf32>
    %5 = arith.subf %3, %4 : vector<8x512xf32>
    %6 = math.absf %5 : vector<8x512xf32>
    %c0_4 = arith.constant 0 : index
    %c0_5 = arith.constant 0 : index
    %c0_6 = arith.constant 0 : index
    %7 = vector.load %arg4[%c0_4, %c0_5, %c0_6] : memref<1x1x1xf32, #tpu.memory_space<vmem>>, vector<1x1x1xf32>
    %8 = vector.shape_cast %6 : vector<8x512xf32> to vector<1x8x512xf32>
    %cst = arith.constant dense<0.000000e+00> : vector<1xf32>
    %9 = vector.multi_reduction <add>, %8, %cst [1, 2] : vector<1x8x512xf32> to vector<1xf32>
    %10 = vector.shape_cast %9 : vector<1xf32> to vector<1x1x1xf32>
    %11 = vector.extract %10[0, 0, 0] : f32 from vector<1x1x1xf32>
    %12 = vector.broadcast %11 : f32 to vector<1x1xf32>
    %13 = vector.shape_cast %12 : vector<1x1xf32> to vector<1x1x1xf32>
    %14 = arith.addf %7, %13 : vector<1x1x1xf32>
    %c0_7 = arith.constant 0 : index
    %c0_8 = arith.constant 0 : index
    %c0_9 = arith.constant 0 : index
    %15 = vector.load %arg4[%c0_7, %c0_8, %c0_9] : memref<1x1x1xf32, #tpu.memory_space<vmem>>, vector<1x1x1xf32>
    tpu.vector_store %arg4[%c0_7, %c0_8, %c0_9], %14 {strides = array<i32>} : memref<1x1x1xf32, #tpu.memory_space<vmem>>, vector<1x1x1xf32>,
    return
  }
  func.func @transform_0(%arg0: i32, %arg1: i32) -> (i32, i32) {
    %c1_i32 = arith.constant 1 : i32
    %0 = arith.muli %arg0, %c1_i32 : i32
    %1 = arith.addi %0, %arg1 : i32
    %c0_i32 = arith.constant 0 : i32
    %c0_i32_0 = arith.constant 0 : i32
    return %1, %c0_i32 : i32, i32
  }
  func.func @transform_1(%arg0: i32, %arg1: i32) -> (i32, i32) {
    %c1_i32 = arith.constant 1 : i32
    %0 = arith.muli %arg0, %c1_i32 : i32
    %1 = arith.addi %0, %arg1 : i32
    %c0_i32 = arith.constant 0 : i32
    %c0_i32_0 = arith.constant 0 : i32
    return %1, %c0_i32 : i32, i32
  }
  func.func @transform_2(%arg0: i32, %arg1: i32) -> (i32, i32, i32) {
    %c0_i32 = arith.constant 0 : i32
    %c0_i32_0 = arith.constant 0 : i32
    %c0_i32_1 = arith.constant 0 : i32
    return %arg0, %c0_i32, %c0_i32_0 : i32, i32, i32
  }
}

</mosaic_0001>

<bundles_post_ra>
// kernel: sr_loss.13
= control target key start
LH: loop header
LB: loop body
LE: loop exit
PB: predicated region body
PF: predicated region fallthrough
CT: control target
= control target key end

     0   :  { %s997_s12 = smov 0   ;;  %s1164_s0 = inlined_call_operand.vmem [shape: bf16[4,16,16,27], index: 0, kind: input, shape index: {}]   ;;  %s1165_s1 = inlined_call_operand.vmem [shape: bf16[1,1,27,64], index: 1, kind: input, shape index: {}]   ;;  %s1166_s2 = inlined_call_operand.vmem [shape: f32[1,64], index: 2, kind: input, shape index: {}]   ;;  %s1167_s3 = inlined_call_operand.vmem [shape: bf16[4,16,16,64], index: 3, kind: output, shape index: {}]  }
   0x1 LB: > { %s771_s13 = sadd.s32 4294967295, %s974_s12   ;;  %p775_p0 = scmp.ge.s32.totalorder %s974_s12, 1  ;;  %s974_s12 = sphi %s997_s12, %s13_s12  }
   0x2   : > { %p137_p1 = scmp.lt.s32.totalorder %s974_s12, 5 }
   0x4   : > { %p138_p2 = pnand %p775_p0, %p137_p1 }
   0x5   : > { %v950_v0 = vld [vmem:[%s1165_s1] sm:$0xff] (!%p138_p2)   ;;  %vm355_vm0 = vcmask (!%p138_p2), 1044480   ;;  %v951_v1 = vld [vmem:[%s1165_s1 + $0x8] sm:$0x3f] (!%p138_p2)   ;;  %vm356_vm1 = vcmask (!%p138_p2), 1045504   ;;  %p161_p3 = scmp.lt.s32.totalorder (!%p138_p2), %s771_s13, 3 }
   0x6   : > { %141 = sbr.rel (%p138_p2) target bundleno = 265 (0x109), region = 32  ;;  %901 = vmatprep.subr.bf16.mxu0 (!%p138_p2), %v950_v0  ;;  %937 = vmatprep.subr.bf16.mxu1 (!%p138_p2), %v950_v0  ;;  %v976_v2 = vmov (!%p138_p2), 65535   ;;  %vm306_vm2 = vcmask (!%p138_p2), 220160   ;;  %v1056_v22 = vld [vmem:[%s1166_s2] ss:$0 sm:$0xff] (!%p138_p2)  ;;  %vm683_vm3 = vcmask (!%p138_p2), 519168  }
   0x7   : > { %902 = vmatpush3.bf16.msra.mxu0 (!%p138_p2), %v950_v0  ;;  %939 = vmatpush3.bf16.msra.mxu1 (!%p138_p2), %v950_v0  ;;  %v357_v3 = vsel (!%p138_p2), %vm355_vm0, 4294967295, %v976_v2 }
   0x8   : > { %v358_v4 = vsel (!%p138_p2), %vm356_vm1, %v357_v3, 0 }
   0x9   : > { %v360_v5 = vand.u32 (!%p138_p2), %v951_v1, %v358_v4 }
   0xb   : > { %903 = vmatprep.subr.bf16.mxu0 (!%p138_p2), %v360_v5  ;;  %938 = vmatprep.subr.bf16.mxu1 (!%p138_p2), %v360_v5 }
   0xc   : > { %904 = vmatpush3.bf16.msra.mxu0 (!%p138_p2), %v360_v5  ;;  %940 = vmatpush3.bf16.msra.mxu1 (!%p138_p2), %v360_v5 }
   0xd   : > { %s1169_s13 = smov (!%p161_p3, %s771_s13), 3 }
   0xe   : > { %s849_s18 = sshll.u32 %s1169_s13, 7 }
   0xf   : > { %s1019_s21 = scalar_lea.vmem %s1164_s0, %s849_s18  ;;  %s1068_s26 = scalar_lea.vmem %s1167_s3, %s849_s18 }
  0x10   : > { %v952_v6 = vld [vmem:[%s1019_s21] sm:$0xff]   ;;  %v954_v8 = vld [vmem:[%s1019_s21 + $0x8] sm:$0xff]   ;;  %v956_v10 = vld [vmem:[%s1019_s21 + $0x10] sm:$0xff]  }
  0x11   : > { %v953_v7 = vld [vmem:[%s1019_s21 + $0x40] sm:$0xff]   ;;  %905 = vmatprep.mubr.msk.bf16.mxu0 %vm306_vm2, %v952_v6  ;;  %v955_v9 = vld [vmem:[%s1019_s21 + $0x48] sm:$0xff]   ;;  %v957_v11 = vld [vmem:[%s1019_s21 + $0x50] sm:$0xff]  }
  0x12   : > { %921 = vmatprep.mubr.msk.bf16.mxu1 %vm306_vm2, %v953_v7  ;;  %906 = vmatmul.mubr.msk.bf16.vlgmr.msra.gmra.mrb[0].mxu0 %vm306_vm2, %v954_v8  ;;  %v958_v12 = vld [vmem:[%s1019_s21 + $0x18] sm:$0xff]   ;;  %v960_v14 = vld [vmem:[%s1019_s21 + $0x20] sm:$0xff]   ;;  %v962_v16 = vld [vmem:[%s1019_s21 + $0x28] sm:$0xff]  }
  0x13   : > { %922 = vmatmul.mubr.msk.bf16.vlgmr.msra.gmra.mrb[0].mxu1 %vm306_vm2, %v955_v9  ;;  %909 = vmatprep.mubr.msk.bf16.mxu0 %vm306_vm2, %v956_v10  ;;  %v959_v13 = vld [vmem:[%s1019_s21 + $0x58] sm:$0xff]   ;;  %v961_v15 = vld [vmem:[%s1019_s21 + $0x60] sm:$0xff]   ;;  %v963_v17 = vld [vmem:[%s1019_s21 + $0x68] sm:$0xff]  }
  0x14   : > { %925 = vmatprep.mubr.msk.bf16.mxu1 %vm306_vm2, %v957_v11  ;;  %v964_v18 = vld [vmem:[%s1019_s21 + $0x30] sm:$0xff]   ;;  %v966_v20 = vld [vmem:[%s1019_s21 + $0x38] sm:$0xff]  }
  0x15   : > { %v965_v19 = vld [vmem:[%s1019_s21 + $0x70] sm:$0xff]   ;;  %v967_v21 = vld [vmem:[%s1019_s21 + $0x78] sm:$0xff]  }
  0x1a   : > { %910 = vmatmul.mubr.msk.bf16.gmra.mrb[4].mxu0 %vm306_vm2, %v958_v12 }
  0x1b   : > { %926 = vmatmul.mubr.msk.bf16.gmra.mrb[4].mxu1 %vm306_vm2, %v959_v13  ;;  %913 = vmatprep.mubr.msk.bf16.mxu0 %vm306_vm2, %v960_v14 }
  0x1c   : > { %929 = vmatprep.mubr.msk.bf16.mxu1 %vm306_vm2, %v961_v15 }
  0x22   : > { %914 = vmatmul.mubr.msk.bf16.gmra.mrb[8].mxu0 %vm306_vm2, %v962_v16 }
  0x23   : > { %930 = vmatmul.mubr.msk.bf16.gmra.mrb[8].mxu1 %vm306_vm2, %v963_v17  ;;  %917 = vmatprep.mubr.msk.bf16.mxu0 %vm306_vm2, %v964_v18 }
  0x24   : > { %933 = vmatprep.mubr.msk.bf16.mxu1 %vm306_vm2, %v965_v19 }
  0x2a   : > { %918 = vmatmul.mubr.msk.bf16.gmra.mrb[12].mxu0 %vm306_vm2, %v966_v20 }
  0x2b   : > { %934 = vmatmul.mubr.msk.bf16.gmra.mrb[12].mxu1 %vm306_vm2, %v967_v21 }
  0xe5   : > { %v907_v23 = vpop.f32.mrb[0].mxu0 }
  0xe6   : > { %v405_v24 = vadd.f32 %v907_v23, %v1056_v22  ;;  %v923_v25 = vpop.f32.mrb[0].mxu1  ;;  %v396_v26 = vpop.f32.mrb[1].mxu0 }
  0xe7   : > { %v469_v27 = vadd.f32 %v923_v25, %v1056_v22  ;;  %v397_v28 = vadd.f32 %v1056_v22, %v396_v26  ;;  %v460_v29 = vpop.f32.mrb[1].mxu1  ;;  %v908_v30 = vpop.f32.mrb[2].mxu0 }
  0xe8   : > { %v525_v31 = vmax.f32 %v405_v24, 0.0  ;;  %v461_v32 = vadd.f32 %v1056_v22, %v460_v29  ;;  %v408_v33 = vadd.f32 %v908_v30, %v1056_v22  ;;  %v924_v34 = vpop.f32.mrb[2].mxu1  ;;  %v399_v35 = vpop.f32.mrb[3].mxu0 }
  0xe9   : > { %v541_v36 = vmax.f32 %v469_v27, 0.0  ;;  %v523_v37 = vmax.f32 %v397_v28, 0.0  ;;  %v472_v38 = vadd.f32 %v924_v34, %v1056_v22  ;;  %v400_v39 = vadd.f32 %v1056_v22, %v399_v35  ;;  %v463_v40 = vpop.f32.mrb[3].mxu1 }
  0xea   : > { %v853_v41 = vpack.c.bf16 %v525_v31, %v525_v31  ;;  %v539_v42 = vmax.f32 %v461_v32, 0.0  ;;  %v526_v43 = vmax.f32 %v408_v33, 0.0  ;;  %v464_v44 = vadd.f32 %v1056_v22, %v463_v40 }
  0xeb   : > { %v869_v45 = vpack.c.bf16 %v541_v36, %v541_v36  ;;  %v851_v46 = vpack.c.bf16 %v523_v37, %v523_v37  ;;  %v542_v47 = vmax.f32 %v472_v38, 0.0  ;;  %v524_v48 = vmax.f32 %v400_v39, 0.0 }
  0xec   : > { %686 = vst.msk [vmem:[%s1068_s26 + $0x8] sm:$0xf] %vm683_vm3, %v853_v41  ;;  %v867_v49 = vpack.c.bf16 %v539_v42, %v539_v42  ;;  %v854_v50 = vpack.c.bf16 %v526_v43, %v526_v43  ;;  %v540_v51 = vmax.f32 %v464_v44, 0.0 }
  0xed   : > { %702 = vst.msk [vmem:[%s1068_s26 + $0x48] sm:$0xf] %vm683_vm3, %v869_v45  ;;  %684 = vst.msk [vmem:[%s1068_s26] sm:$0xf] %vm683_vm3, %v851_v46  ;;  %v870_v52 = vpack.c.bf16 %v542_v47, %v542_v47  ;;  %v852_v53 = vpack.c.bf16 %v524_v48, %v524_v48  ;;  %v911_v54 = vpop.f32.mrb[4].mxu0 }
  0xee   : > { %700 = vst.msk [vmem:[%s1068_s26 + $0x40] sm:$0xf] %vm683_vm3, %v867_v49  ;;  %687 = vst.msk [vmem:[%s1068_s26 + $0xc] sm:$0xf] %vm683_vm3, %v854_v50  ;;  %v868_v55 = vpack.c.bf16 %v540_v51, %v540_v51  ;;  %v421_v56 = vadd.f32 %v911_v54, %v1056_v22  ;;  %v927_v57 = vpop.f32.mrb[4].mxu1  ;;  %v412_v58 = vpop.f32.mrb[5].mxu0 }
  0xef   : > { %703 = vst.msk [vmem:[%s1068_s26 + $0x4c] sm:$0xf] %vm683_vm3, %v870_v52  ;;  %685 = vst.msk [vmem:[%s1068_s26 + $0x4] sm:$0xf] %vm683_vm3, %v852_v53  ;;  %v485_v59 = vadd.f32 %v927_v57, %v1056_v22  ;;  %v413_v60 = vadd.f32 %v1056_v22, %v412_v58  ;;  %v476_v61 = vpop.f32.mrb[5].mxu1  ;;  %v912_v62 = vpop.f32.mrb[6].mxu0 }
  0xf0   : > { %701 = vst.msk [vmem:[%s1068_s26 + $0x44] sm:$0xf] %vm683_vm3, %v868_v55  ;;  %v529_v63 = vmax.f32 %v421_v56, 0.0  ;;  %v477_v0 = vadd.f32 %v1056_v22, %v476_v61  ;;  %v424_v1 = vadd.f32 %v912_v62, %v1056_v22  ;;  %v928_v2 = vpop.f32.mrb[6].mxu1  ;;  %v415_v3 = vpop.f32.mrb[7].mxu0 }
  0xf1   : > { %v545_v4 = vmax.f32 %v485_v59, 0.0  ;;  %v527_v5 = vmax.f32 %v413_v60, 0.0  ;;  %v488_v6 = vadd.f32 %v928_v2, %v1056_v22  ;;  %v416_v7 = vadd.f32 %v1056_v22, %v415_v3  ;;  %v479_v8 = vpop.f32.mrb[7].mxu1 }
  0xf2   : > { %v857_v9 = vpack.c.bf16 %v529_v63, %v529_v63  ;;  %v543_v10 = vmax.f32 %v477_v0, 0.0  ;;  %v530_v11 = vmax.f32 %v424_v1, 0.0  ;;  %v480_v12 = vadd.f32 %v1056_v22, %v479_v8 }
  0xf3   : > { %v873_v13 = vpack.c.bf16 %v545_v4, %v545_v4  ;;  %v855_v14 = vpack.c.bf16 %v527_v5, %v527_v5  ;;  %v546_v15 = vmax.f32 %v488_v6, 0.0  ;;  %v528_v16 = vmax.f32 %v416_v7, 0.0 }
  0xf4   : > { %690 = vst.msk [vmem:[%s1068_s26 + $0x18] sm:$0xf] %vm683_vm3, %v857_v9  ;;  %v871_v17 = vpack.c.bf16 %v543_v10, %v543_v10  ;;  %v858_v18 = vpack.c.bf16 %v530_v11, %v530_v11  ;;  %v544_v19 = vmax.f32 %v480_v12, 0.0 }
  0xf5   : > { %706 = vst.msk [vmem:[%s1068_s26 + $0x58] sm:$0xf] %vm683_vm3, %v873_v13  ;;  %688 = vst.msk [vmem:[%s1068_s26 + $0x10] sm:$0xf] %vm683_vm3, %v855_v14  ;;  %v874_v20 = vpack.c.bf16 %v546_v15, %v546_v15  ;;  %v856_v21 = vpack.c.bf16 %v528_v16, %v528_v16  ;;  %v915_v23 = vpop.f32.mrb[8].mxu0 }
  0xf6   : > { %704 = vst.msk [vmem:[%s1068_s26 + $0x50] sm:$0xf] %vm683_vm3, %v871_v17  ;;  %691 = vst.msk [vmem:[%s1068_s26 + $0x1c] sm:$0xf] %vm683_vm3, %v858_v18  ;;  %v872_v24 = vpack.c.bf16 %v544_v19, %v544_v19  ;;  %v437_v25 = vadd.f32 %v915_v23, %v1056_v22  ;;  %v931_v26 = vpop.f32.mrb[8].mxu1  ;;  %v428_v27 = vpop.f32.mrb[9].mxu0 }
  0xf7   : > { %707 = vst.msk [vmem:[%s1068_s26 + $0x5c] sm:$0xf] %vm683_vm3, %v874_v20  ;;  %689 = vst.msk [vmem:[%s1068_s26 + $0x14] sm:$0xf] %vm683_vm3, %v856_v21  ;;  %v501_v28 = vadd.f32 %v931_v26, %v1056_v22  ;;  %v429_v29 = vadd.f32 %v1056_v22, %v428_v27  ;;  %v492_v30 = vpop.f32.mrb[9].mxu1  ;;  %v916_v31 = vpop.f32.mrb[10].mxu0 }
  0xf8   : > { %705 = vst.msk [vmem:[%s1068_s26 + $0x54] sm:$0xf] %vm683_vm3, %v872_v24  ;;  %v533_v32 = vmax.f32 %v437_v25, 0.0  ;;  %v493_v33 = vadd.f32 %v1056_v22, %v492_v30  ;;  %v440_v34 = vadd.f32 %v916_v31, %v1056_v22  ;;  %v932_v35 = vpop.f32.mrb[10].mxu1  ;;  %v431_v36 = vpop.f32.mrb[11].mxu0 }
  0xf9   : > { %v549_v37 = vmax.f32 %v501_v28, 0.0  ;;  %v531_v38 = vmax.f32 %v429_v29, 0.0  ;;  %v504_v39 = vadd.f32 %v932_v35, %v1056_v22  ;;  %v432_v40 = vadd.f32 %v1056_v22, %v431_v36  ;;  %v495_v41 = vpop.f32.mrb[11].mxu1 }
  0xfa   : > { %v861_v42 = vpack.c.bf16 %v533_v32, %v533_v32  ;;  %v547_v43 = vmax.f32 %v493_v33, 0.0  ;;  %v534_v44 = vmax.f32 %v440_v34, 0.0  ;;  %v496_v45 = vadd.f32 %v1056_v22, %v495_v41 }
  0xfb   : > { %v877_v46 = vpack.c.bf16 %v549_v37, %v549_v37  ;;  %v859_v47 = vpack.c.bf16 %v531_v38, %v531_v38  ;;  %v550_v48 = vmax.f32 %v504_v39, 0.0  ;;  %v532_v49 = vmax.f32 %v432_v40, 0.0 }
  0xfc   : > { %694 = vst.msk [vmem:[%s1068_s26 + $0x28] sm:$0xf] %vm683_vm3, %v861_v42  ;;  %v875_v50 = vpack.c.bf16 %v547_v43, %v547_v43  ;;  %v862_v51 = vpack.c.bf16 %v534_v44, %v534_v44  ;;  %v548_v52 = vmax.f32 %v496_v45, 0.0 }
  0xfd   : > { %710 = vst.msk [vmem:[%s1068_s26 + $0x68] sm:$0xf] %vm683_vm3, %v877_v46  ;;  %692 = vst.msk [vmem:[%s1068_s26 + $0x20] sm:$0xf] %vm683_vm3, %v859_v47  ;;  %v878_v53 = vpack.c.bf16 %v550_v48, %v550_v48  ;;  %v860_v54 = vpack.c.bf16 %v532_v49, %v532_v49  ;;  %v919_v55 = vpop.f32.mrb[12].mxu0 }
  0xfe   : > { %708 = vst.msk [vmem:[%s1068_s26 + $0x60] sm:$0xf] %vm683_vm3, %v875_v50  ;;  %695 = vst.msk [vmem:[%s1068_s26 + $0x2c] sm:$0xf] %vm683_vm3, %v862_v51  ;;  %v876_v56 = vpack.c.bf16 %v548_v52, %v548_v52  ;;  %v453_v57 = vadd.f32 %v919_v55, %v1056_v22  ;;  %v935_v58 = vpop.f32.mrb[12].mxu1  ;;  %v444_v59 = vpop.f32.mrb[13].mxu0 }
  0xff   : > { %711 = vst.msk [vmem:[%s1068_s26 + $0x6c] sm:$0xf] %vm683_vm3, %v878_v53  ;;  %693 = vst.msk [vmem:[%s1068_s26 + $0x24] sm:$0xf] %vm683_vm3, %v860_v54  ;;  %v517_v60 = vadd.f32 %v935_v58, %v1056_v22  ;;  %v445_v61 = vadd.f32 %v1056_v22, %v444_v59  ;;  %v508_v62 = vpop.f32.mrb[13].mxu1  ;;  %v920_v63 = vpop.f32.mrb[14].mxu0 }
 0x100   : > { %709 = vst.msk [vmem:[%s1068_s26 + $0x64] sm:$0xf] %vm683_vm3, %v876_v56  ;;  %v537_v0 = vmax.f32 %v453_v57, 0.0  ;;  %v509_v1 = vadd.f32 %v1056_v22, %v508_v62  ;;  %v456_v2 = vadd.f32 %v920_v63, %v1056_v22  ;;  %v936_v3 = vpop.f32.mrb[14].mxu1  ;;  %v447_v4 = vpop.f32.mrb[15].mxu0 }
 0x101   : > { %v553_v5 = vmax.f32 %v517_v60, 0.0  ;;  %v535_v6 = vmax.f32 %v445_v61, 0.0  ;;  %v520_v7 = vadd.f32 %v936_v3, %v1056_v22  ;;  %v448_v8 = vadd.f32 %v1056_v22, %v447_v4  ;;  %v511_v9 = vpop.f32.mrb[15].mxu1 }
 0x102   : > { %v865_v10 = vpack.c.bf16 %v537_v0, %v537_v0  ;;  %v551_v11 = vmax.f32 %v509_v1, 0.0  ;;  %v538_v12 = vmax.f32 %v456_v2, 0.0  ;;  %v512_v13 = vadd.f32 %v1056_v22, %v511_v9 }
 0x103   : > { %v881_v14 = vpack.c.bf16 %v553_v5, %v553_v5  ;;  %v863_v15 = vpack.c.bf16 %v535_v6, %v535_v6  ;;  %v554_v16 = vmax.f32 %v520_v7, 0.0  ;;  %v536_v17 = vmax.f32 %v448_v8, 0.0 }
 0x104   : > { %698 = vst.msk [vmem:[%s1068_s26 + $0x38] sm:$0xf] %vm683_vm3, %v865_v10  ;;  %v879_v18 = vpack.c.bf16 %v551_v11, %v551_v11  ;;  %v866_v19 = vpack.c.bf16 %v538_v12, %v538_v12  ;;  %v552_v20 = vmax.f32 %v512_v13, 0.0 }
 0x105   : > { %714 = vst.msk [vmem:[%s1068_s26 + $0x78] sm:$0xf] %vm683_vm3, %v881_v14  ;;  %696 = vst.msk [vmem:[%s1068_s26 + $0x30] sm:$0xf] %vm683_vm3, %v863_v15  ;;  %v882_v21 = vpack.c.bf16 %v554_v16, %v554_v16  ;;  %v864_v23 = vpack.c.bf16 %v536_v17, %v536_v17 }
 0x106   : > { %712 = vst.msk [vmem:[%s1068_s26 + $0x70] sm:$0xf] %vm683_vm3, %v879_v18  ;;  %699 = vst.msk [vmem:[%s1068_s26 + $0x3c] sm:$0xf] %vm683_vm3, %v866_v19  ;;  %v880_v22 = vpack.c.bf16 %v552_v20, %v552_v20 }
 0x107   : > { %715 = vst.msk [vmem:[%s1068_s26 + $0x7c] sm:$0xf] %vm683_vm3, %v882_v21  ;;  %697 = vst.msk [vmem:[%s1068_s26 + $0x34] sm:$0xf] %vm683_vm3, %v864_v23 }
 0x108   : > { %713 = vst.msk [vmem:[%s1068_s26 + $0x74] sm:$0xf] %vm683_vm3, %v880_v22 }
 0x109 PF: > { %s13_s12 = sadd.s32 1, %s974_s12  }
 0x10a   : > { %p10_p4 = scmp.ge.s32.totalorder %s13_s12, 6  }
 0x10c   :  { %12 = sbr.rel (!%p10_p4) target bundleno = 1 (0x1), region = 62 }

// kernel: sr_loss.14
= control target key start
LH: loop header
LB: loop body
LE: loop exit
PB: predicated region body
PF: predicated region fallthrough
CT: control target
= control target key end

     0   :  { %s4887_s15 = smov 0   ;;  %s6092_s0 = inlined_call_operand.vmem [shape: bf16[4,18,18,64], index: 0, kind: input, shape index: {}]   ;;  %s6093_s1 = inlined_call_operand.vmem [shape: bf16[3,3,64,64], index: 1, kind: input, shape index: {}]   ;;  %s6094_s2 = inlined_call_operand.vmem [shape: f32[1,64], index: 2, kind: input, shape index: {}]   ;;  %s6095_s3 = inlined_call_operand.vmem [shape: bf16[4,16,16,64], index: 3, kind: output, shape index: {0}]   ;;  %s6096_s4 = inlined_call_operand.vmem [shape: bf16[4,8,8,64], index: 4, kind: output, shape index: {1}]  }
   0x1 LB: > { %s3585_s16 = sadd.s32 4294967295, %s4860_s15   ;;  %p3589_p0 = scmp.ge.s32.totalorder %s4860_s15, 1  ;;  %s4860_s15 = sphi %s4887_s15, %s15_s15  }
   0x2   : > { %p165_p1 = scmp.lt.s32.totalorder %s4860_s15, 5 }
   0x4   : > { %p166_p2 = pnand %p3589_p0, %p165_p1 }
   0x6   : > { %169 = sbr.rel (%p166_p2) target bundleno = 568 (0x238), region = 32 }
   0xd   : > { %v4793_v0 = vld [vmem:[%s6093_s1 + $0x20] sm:$0xff]   ;;  %p196_p3 = scmp.lt.s32.totalorder %s3585_s16, 3  ;;  %v4795_v2 = vld [vmem:[%s6093_s1 + $0x28] sm:$0xff]   ;;  %v4797_v4 = vld [vmem:[%s6093_s1 + $0x30] sm:$0xff]   ;;  %vm274_vm0 = vsmask.f32 3328 }
   0xe   : > { %v4794_v1 = vld [vmem:[%s6093_s1 + $0x80] sm:$0xff]   ;;  %4160 = vmatprep.subr.bf16.mxu1 %v4793_v0  ;;  %v4796_v3 = vld [vmem:[%s6093_s1 + $0x88] sm:$0xff]   ;;  %v4798_v5 = vld [vmem:[%s6093_s1 + $0x90] sm:$0xff]   ;;  %vm275_vm1 = vsmask.f32 7440  ;;  %vm742_vm2 = vcmask 523264  }
   0xf   : > { %s6172_s16 = smov (!%p196_p3, %s3585_s16), 3  ;;  %4320 = vmatprep.subr.bf16.mxu0 %v4794_v1  ;;  %4161 = vmatpush3.bf16.msra.mxu1 %v4793_v0  ;;  %v4799_v6 = vld [vmem:[%s6093_s1 + $0x38] sm:$0xff]   ;;  %v4941_v18 = vld [vmem:[%s6093_s1] sm:$0xff]   ;;  %vm4961_vm3 = vmor %vm274_vm0, %vm275_vm1  ;;  %vm1281_vm4 = vcmask 1042432   ;;  %vm1282_vm5 = vcmask 1046532   ;;  %vm3345_vm7 = vcmask 519168  }
  0x10   : > { %4321 = vmatpush3.bf16.msra.mxu0 %v4794_v1  ;;  %4162 = vmatprep.subr.bf16.mxu1 %v4795_v2  ;;  %s4784_s27 = smul.u32 216, %s6172_s16  ;;  %v4800_v7 = vld [vmem:[%s6093_s1 + $0x98] sm:$0xff]   ;;  %v4949_v23 = vld [vmem:[%s6093_s1 + $0xa0] sm:$0xff]   ;;  %vm5168_vm6 = vmor %vm1281_vm4, %vm1282_vm5  ;;  %s3946_s6 = sshll.u32 %s6172_s16, 7 }
  0x11   : > { %4322 = vmatprep.subr.bf16.mxu0 %v4796_v3  ;;  %s5946_s10 = scalar_lea.vmem %s6095_s3, %s3946_s6  ;;  %s3947_s11 = sshll.u32 %s6172_s16, 5 }
  0x12   : > { %s4922_s8 = scalar_lea.vmem %s6092_s0, %s4784_s27  ;;  %s5985_s13 = scalar_lea.vmem %s6096_s4, %s3947_s11 }
  0x13   : > { %4163 = vmatpush3.bf16.msra.mxu1 %v4795_v2  ;;  %v4928_v8 = vld [vmem:[%s4922_s8] sm:$0xf]  ;;  %v4931_v9 = vld [vmem:[%s4922_s8 + $0x4] sm:$0xf]  ;;  %v214_v10 = vld [vmem:[%s4922_s8 + $0x8] sm:$0x1] }
  0x14   : > { %4323 = vmatpush3.bf16.msra.mxu0 %v4796_v3  ;;  %4164 = vmatprep.subr.bf16.mxu1 %v4797_v4  ;;  %v278_v11 = vshrl.u32 %v4928_v8, 16  ;;  %v281_v12 = vshll.u32 %v4928_v8, 16  ;;  %v287_v13 = vshll.u32 %v4931_v9, 16  ;;  %v291_v14 = vshrl.u32 %v4931_v9, 16  ;;  %v4944_v22 = vld [vmem:[%s4922_s8 + $0xc] sm:$0xf] }
  0x15   : > { %4324 = vmatprep.subr.bf16.mxu0 %v4798_v5  ;;  %v297_v15 = vshll.u32 %v214_v10, 16  ;;  %v4952_v25 = vld [vmem:[%s4922_s8 + $0x10] sm:$0xf]  ;;  %v4955_v26 = vld [vmem:[%s4922_s8 + $0x14] sm:$0x1]  ;;  %v302_v27 = vshrl.u32 %v4944_v22, 16 }
  0x16   : > { %v280_v16 = vrot.slane %v278_v11, 4  ;;  %v283_v17 = vrot.slane %v281_v12, 5  ;;  %v289_v19 = vrot.slane %v287_v13, 5  ;;  %v293_v20 = vrot.slane %v291_v14, 4  ;;  %v4974_v42 = vld [vmem:[%s4922_s8 + $0x18] sm:$0xf] }
  0x17   : > { %4165 = vmatpush3.bf16.msra.mxu1 %v4797_v4  ;;  %v299_v21 = vrot.slane %v297_v15, 5  ;;  %v305_v28 = vshll.u32 %v4944_v22, 16  ;;  %v311_v31 = vshll.u32 %v4952_v25, 16  ;;  %v315_v32 = vshrl.u32 %v4952_v25, 16  ;;  %v4981_v46 = vld [vmem:[%s4922_s8 + $0x1c] sm:$0xf] }
  0x18   : > { %4325 = vmatpush3.bf16.msra.mxu0 %v4798_v5  ;;  %4166 = vmatprep.subr.bf16.mxu1 %v4799_v6  ;;  %v284_v24 = vor.u32 %v283_v17, %v280_v16  ;;  %v294_v30 = vor.u32 %v293_v20, %v289_v19  ;;  %v321_v33 = vshll.u32 %v4955_v26, 16  ;;  %v304_v35 = vrot.slane %v302_v27, 4  ;;  %v4984_v47 = vld [vmem:[%s4922_s8 + $0x20] sm:$0x1]  ;;  %v4992_v53 = vld [vmem:[%s4922_s8 + $0x24] sm:$0xf] }
  0x19   : > { %4326 = vmatprep.subr.bf16.mxu0 %v4800_v7  ;;  %v307_v36 = vrot.slane %v305_v28, 5  ;;  %v4970_v37 = vcombine.low %v4944_v22, %v4952_v25  ;;  %v313_v39 = vrot.slane %v311_v31, 5  ;;  %v317_v40 = vrot.slane %v315_v32, 4  ;;  %v4995_v54 = vld [vmem:[%s4922_s8 + $0x28] sm:$0xf] }
  0x1a   : > { %v285_v34 = vrot.slane %v284_v24, 4  ;;  %v295_v38 = vrot.slane %v294_v30, 4  ;;  %v323_v41 = vrot.slane %v321_v33, 5  ;;  %v1296_v45 = vrot.slane %v4955_v26, 5  ;;  %v4999_v59 = vld [vmem:[%s4922_s8 + $0x2c] sm:$0x1] }
  0x1b   : > { %4167 = vmatpush3.bf16.msra.mxu1 %v4799_v6  ;;  %v308_v44 = vor.u32 %v307_v36, %v304_v35  ;;  %v326_v48 = vshrl.u32 %v4974_v42, 16  ;;  %v318_v50 = vor.u32 %v317_v40, %v313_v39  ;;  %v329_v51 = vshll.u32 %v4974_v42, 16  ;;  %v5011_v10 = vld [vmem:[%s4922_s8 + $0x30] sm:$0xf]  ;;  %v4805_v11 = vld [vmem:[%s6093_s1 + $0x8] sm:$0xff]  }
  0x1c   : > { %4327 = vmatpush3.bf16.msra.mxu0 %v4800_v7  ;;  %4200 = vmatprep.subr.bf16.mxu1 %v4941_v18  ;;  %v290_v43 = vsel %vm4961_vm3, %v285_v34, %v289_v19  ;;  %v300_v49 = vsel %vm4961_vm3, %v295_v38, %v299_v21  ;;  %v335_v52 = vshll.u32 %v4981_v46, 16  ;;  %v339_v58 = vshrl.u32 %v4981_v46, 16  ;;  %v5019_v16 = vld [vmem:[%s4922_s8 + $0x34] sm:$0xf]  ;;  %v5026_v30 = vld [vmem:[%s4922_s8 + $0x38] sm:$0x1] }
  0x1d   : > { %4360 = vmatprep.subr.bf16.mxu0 %v4949_v23  ;;  %v3603_v55 = vcombine.low %v290_v43, %v300_v49  ;;  %v309_v56 = vrot.slane %v308_v44, 4  ;;  %v328_v57 = vrot.slane %v326_v48, 4  ;;  %v319_v60 = vrot.slane %v318_v50, 4  ;;  %v5034_v36 = vld [vmem:[%s4922_s8 + $0x3c] sm:$0xf]  ;;  %v4804_v40 = vld [vmem:[%s6093_s1 + $0xa8] sm:$0xff]  }
  0x1e   : > { %v331_v61 = vrot.slane %v329_v51, 5  ;;  %v337_v62 = vrot.slane %v335_v52, 5  ;;  %v345_v63 = vshll.u32 %v4984_v47, 16  ;;  %v341_v1 = vrot.slane %v339_v58, 4  ;;  %v4808_v43 = vld [vmem:[%s6093_s1 + $0x10] sm:$0xff]  }
  0x1f   : > { %4168 = vmatprep.mubr.msk.bf16.mxu1 %vm742_vm2, %v3603_v55  ;;  %v314_v0 = vsel %vm4961_vm3, %v309_v56, %v313_v39  ;;  %v1300_v2 = vrot.slane %v4981_v46, 5  ;;  %v1303_v3 = vrot.slane %v4984_v47, 5  ;;  %v324_v4 = vsel %vm4961_vm3, %v319_v60, %v323_v41  ;;  %v5049_v51 = vld [vmem:[%s4922_s8 + $0x40] sm:$0xf] }
  0x20   : > { %v332_v5 = vor.u32 %v331_v61, %v328_v57  ;;  %v347_v6 = vrot.slane %v345_v63, 5  ;;  %v350_v7 = vshrl.u32 %v4992_v53, 16  ;;  %v3604_v12 = vcombine.low %v314_v0, %v324_v4 }
  0x21   : > { %v342_v13 = vor.u32 %v341_v1, %v337_v62  ;;  %v353_v14 = vshll.u32 %v4992_v53, 16  ;;  %v359_v15 = vshll.u32 %v4995_v54, 16  ;;  %v363_v20 = vshrl.u32 %v4995_v54, 16 }
  0x22   : > { %v333_v17 = vrot.slane %v332_v5, 4  ;;  %v352_v19 = vrot.slane %v350_v7, 4  ;;  %v369_v21 = vshll.u32 %v4999_v59, 16  ;;  %4328 = vmatprep.mubr.msk.bf16.mxu0 %vm742_vm2, %v3604_v12  ;;  %4169 = vmatmul.mubr.msk.bf16.vlgmr.msra.gmra.mrb[0].mxu1 %vm742_vm2, %v3604_v12  ;;  %v374_v31 = vshrl.u32 %v5011_v10, 16 }
  0x23   : > { %v343_v24 = vrot.slane %v342_v13, 4  ;;  %v355_v27 = vrot.slane %v353_v14, 5  ;;  %v361_v28 = vrot.slane %v359_v15, 5  ;;  %4201 = vmatpush3.bf16.msra.mxu1 %v4941_v18  ;;  %v365_v33 = vrot.slane %v363_v20, 4  ;;  %v5074_v15 = vld [vmem:[%s4922_s8 + $0x4c] sm:$0xf] }
  0x24   : > { %v338_v32 = vsel %vm4961_vm3, %v333_v17, %v337_v62  ;;  %v371_v34 = vrot.slane %v369_v21, 5  ;;  %v377_v35 = vshll.u32 %v5011_v10, 16  ;;  %v376_v41 = vrot.slane %v374_v31, 4  ;;  %4202 = vmatprep.subr.bf16.mxu1 %v4805_v11  ;;  %v5058_v62 = vld [vmem:[%s4922_s8 + $0x44] sm:$0x1]  ;;  %v4810_v21 = vld [vmem:[%s6093_s1 + $0x18] sm:$0xff]  }
  0x25   : > { %v348_v38 = vsel %vm4961_vm3, %v343_v24, %v347_v6  ;;  %v356_v39 = vor.u32 %v355_v27, %v352_v19  ;;  %v383_v18 = vshll.u32 %v5019_v16, 16  ;;  %v366_v48 = vor.u32 %v365_v33, %v361_v28  ;;  %v5066_v6 = vld [vmem:[%s4922_s8 + $0x48] sm:$0xf]  ;;  %v5086_v31 = vld [vmem:[%s4922_s8 + $0x50] sm:$0x1] }
  0x26   : > { %v5045_v44 = vcombine.low %v338_v32, %v348_v38  ;;  %v379_v49 = vrot.slane %v377_v35, 5  ;;  %v387_v50 = vshrl.u32 %v5019_v16, 16  ;;  %v393_v56 = vshll.u32 %v5026_v30, 16 }
  0x27   : > { %v357_v52 = vrot.slane %v356_v39, 4  ;;  %v385_v55 = vrot.slane %v383_v18, 5  ;;  %v398_v57 = vshrl.u32 %v5034_v36, 16  ;;  %v367_v58 = vrot.slane %v366_v48, 4  ;;  %4203 = vmatpush3.bf16.msra.mxu1 %v4805_v11  ;;  %v5096_v39 = vld [vmem:[%s4922_s8 + $0x54] sm:$0xf] }
  0x28   : > { %6129 = vst [vmem:[#allocation3_spill] sm:$0xff] %v5045_v44  ;;  %4329 = vmatmul.mubr.msk.bf16.vlgmr.msra.gmra.mrb[0].mxu0 %vm742_vm2, %v5045_v44  ;;  %4172 = vmatprep.mubr.msk.bf16.mxu1 %vm742_vm2, %v5045_v44  ;;  %v380_v60 = vor.u32 %v379_v49, %v376_v41  ;;  %v389_v61 = vrot.slane %v387_v50, 4  ;;  %v401_v63 = vshll.u32 %v5034_v36, 16  ;;  %v395_v1 = vrot.slane %v393_v56, 5  ;;  %6131 = vst [vmem:[#allocation5_spill] sm:$0xff] %v5096_v39  ;;  %v4807_v41 = vld [vmem:[%s6093_s1 + $0xb8] sm:$0xff]  }
  0x29   : > { %4361 = vmatpush3.bf16.msra.mxu0 %v4949_v23  ;;  %v362_v0 = vsel %vm4961_vm3, %v357_v52, %v361_v28  ;;  %v400_v4 = vrot.slane %v398_v57, 4  ;;  %v407_v5 = vshll.u32 %v5049_v51, 16  ;;  %v372_v7 = vsel %vm4961_vm3, %v367_v58, %v371_v34  ;;  %v4806_v23 = vld [vmem:[%s6093_s1 + $0xb0] sm:$0xff]   ;;  %4204 = vmatprep.subr.bf16.mxu1 %v4808_v43  ;;  %v5105_v52 = vld [vmem:[%s4922_s8 + $0x58] sm:$0xf] }
  0x2a   : > { %4362 = vmatprep.subr.bf16.mxu0 %v4804_v40  ;;  %v381_v12 = vrot.slane %v380_v60, 4  ;;  %v390_v13 = vor.u32 %v389_v61, %v385_v55  ;;  %v403_v14 = vrot.slane %v401_v63, 5  ;;  %v5076_v17 = vcombine.low %v362_v0, %v372_v7  ;;  %v5115_v61 = vld [vmem:[%s4922_s8 + $0x5c] sm:$0x1] }
  0x2b   : > { %v409_v11 = vrot.slane %v407_v5, 5  ;;  %v411_v19 = vshrl.u32 %v5049_v51, 16  ;;  %v417_v20 = vshll.u32 %v5058_v62, 16  ;;  %v422_v32 = vshrl.u32 %v5066_v6, 16  ;;  %4205 = vmatpush3.bf16.msra.mxu1 %v4808_v43 }
  0x2c   : > { %6130 = vst [vmem:[#allocation4_spill] sm:$0xff] %v5076_v17  ;;  %v386_v24 = vsel %vm4961_vm3, %v381_v12, %v385_v55  ;;  %v391_v27 = vrot.slane %v390_v13, 4  ;;  %v404_v28 = vor.u32 %v403_v14, %v400_v4  ;;  %4332 = vmatprep.mubr.msk.bf16.mxu0 %vm742_vm2, %v5076_v17  ;;  %4173 = vmatmul.mubr.msk.bf16.gmra.mrb[4].mxu1 %vm742_vm2, %v5076_v17  ;;  %v425_v35 = vshll.u32 %v5066_v6, 16  ;;  %v5110_v55 = vld [vmem:[%s6093_s1 + $0x40] sm:$0xff]  }
  0x2d   : > { %v413_v33 = vrot.slane %v411_v19, 4  ;;  %v419_v34 = vrot.slane %v417_v20, 5  ;;  %v431_v38 = vshll.u32 %v5074_v15, 16  ;;  %4363 = vmatpush3.bf16.msra.mxu0 %v4804_v40  ;;  %v424_v49 = vrot.slane %v422_v32, 4  ;;  %4206 = vmatprep.subr.bf16.mxu1 %v4810_v21  ;;  %v5129_v19 = vld [vmem:[%s4922_s8 + $0x60] sm:$0xf] }
  0x2e   : > { %v396_v18 = vsel %vm4961_vm3, %v391_v27, %v395_v1  ;;  %v405_v48 = vrot.slane %v404_v28, 4  ;;  %v435_v50 = vshrl.u32 %v5074_v15, 16  ;;  %4364 = vmatprep.subr.bf16.mxu0 %v4806_v23  ;;  %v427_v58 = vrot.slane %v425_v35, 5  ;;  %v5134_v32 = vld [vmem:[%s4922_s8 + $0x64] sm:$0xf] }
  0x2f   : > { %v5112_v56 = vcombine.low %v386_v24, %v396_v18  ;;  %v414_v57 = vor.u32 %v413_v33, %v409_v11  ;;  %v433_v60 = vrot.slane %v431_v38, 5  ;;  %v441_v43 = vshll.u32 %v5086_v31, 16  ;;  %4207 = vmatpush3.bf16.msra.mxu1 %v4810_v21  ;;  %v5143_v21 = vld [vmem:[%s6093_s1 + $0xc0] sm:$0xff]  }
  0x30   : > { %v410_v40 = vsel %vm4961_vm3, %v405_v48, %v409_v11  ;;  %v437_v63 = vrot.slane %v435_v50, 4  ;;  %v446_v0 = vshrl.u32 %v5096_v39, 16  ;;  %v428_v4 = vor.u32 %v427_v58, %v424_v49  ;;  %4240 = vmatprep.subr.bf16.mxu1 %v5110_v55  ;;  %v5148_v48 = vld [vmem:[%s4922_s8 + $0x68] sm:$0x1] }
  0x31   : > { %6132 = vst [vmem:[#allocation6_spill] sm:$0xff] %v5112_v56  ;;  %4333 = vmatmul.mubr.msk.bf16.gmra.mrb[4].mxu0 %vm742_vm2, %v5112_v56  ;;  %4176 = vmatprep.mubr.msk.bf16.mxu1 %vm742_vm2, %v5112_v56  ;;  %v415_v1 = vrot.slane %v414_v57, 4  ;;  %v449_v5 = vshll.u32 %v5096_v39, 16  ;;  %v455_v7 = vshll.u32 %v5105_v52, 16  ;;  %v443_v13 = vrot.slane %v441_v43, 5 }
  0x32   : > { %v438_v12 = vor.u32 %v437_v63, %v433_v60  ;;  %4365 = vmatpush3.bf16.msra.mxu0 %v4806_v23  ;;  %v448_v14 = vrot.slane %v446_v0, 4  ;;  %v459_v11 = vshrl.u32 %v5105_v52, 16  ;;  %v429_v24 = vrot.slane %v428_v4, 4  ;;  %v5162_v4 = vld [vmem:[%s4922_s8 + $0x6c] sm:$0xf] }
  0x33   : > { %v420_v20 = vsel %vm4961_vm3, %v415_v1, %v419_v34  ;;  %v451_v27 = vrot.slane %v449_v5, 5  ;;  %v457_v28 = vrot.slane %v455_v7, 5  ;;  %4366 = vmatprep.subr.bf16.mxu0 %v4807_v41  ;;  %v465_v38 = vshll.u32 %v5115_v61, 16 }
  0x34   : > { %v5137_v33 = vcombine.low %v410_v40, %v420_v20  ;;  %v439_v23 = vrot.slane %v438_v12, 4  ;;  %v461_v35 = vrot.slane %v459_v11, 4  ;;  %v434_v34 = vsel %vm4961_vm3, %v429_v24, %v433_v60 }
  0x35   : > { %v452_v18 = vor.u32 %v451_v27, %v448_v14  ;;  %v470_v49 = vshrl.u32 %v5129_v19, 16  ;;  %v473_v50 = vshll.u32 %v5129_v19, 16  ;;  %v467_v40 = vrot.slane %v465_v38, 5  ;;  %v5182_v27 = vld [vmem:[%s4922_s8 + $0x70] sm:$0xf] }
  0x36   : > { %6133 = vst [vmem:[#allocation7_spill] sm:$0xff] %v5137_v33  ;;  %4336 = vmatprep.mubr.msk.bf16.mxu0 %vm742_vm2, %v5137_v33  ;;  %4177 = vmatmul.mubr.msk.bf16.gmra.mrb[8].mxu1 %vm742_vm2, %v5137_v33  ;;  %v444_v57 = vsel %vm4961_vm3, %v439_v23, %v443_v13  ;;  %v462_v58 = vor.u32 %v461_v35, %v457_v28  ;;  %v479_v60 = vshll.u32 %v5134_v32, 16  ;;  %v483_v12 = vshrl.u32 %v5134_v32, 16 }
  0x37   : > { %v5159_v63 = vcombine.low %v434_v34, %v444_v57  ;;  %v453_v43 = vrot.slane %v452_v18, 4  ;;  %v472_v0 = vrot.slane %v470_v49, 4  ;;  %v475_v1 = vrot.slane %v473_v50, 5  ;;  %4367 = vmatpush3.bf16.msra.mxu0 %v4807_v41  ;;  %v5187_v34 = vld [vmem:[%s4922_s8 + $0x74] sm:$0x1] }
  0x38   : > { %v463_v5 = vrot.slane %v462_v58, 4  ;;  %v481_v7 = vrot.slane %v479_v60, 5  ;;  %v489_v13 = vshll.u32 %v5148_v48, 16  ;;  %4400 = vmatprep.subr.bf16.mxu0 %v5143_v21  ;;  %v3676_v20 = vrot.slane %v4944_v22, 9 }
  0x39   : > { %6134 = vst [vmem:[#allocation8_spill] sm:$0xff] %v5159_v63  ;;  %4337 = vmatmul.mubr.msk.bf16.gmra.mrb[8].mxu0 %vm742_vm2, %v5159_v63  ;;  %4180 = vmatprep.mubr.msk.bf16.mxu1 %vm742_vm2, %v5159_v63  ;;  %v458_v41 = vsel %vm4961_vm3, %v453_v43, %v457_v28  ;;  %v476_v11 = vor.u32 %v475_v1, %v472_v0  ;;  %v1293_v24 = vrot.slane %v4952_v25, 5  ;;  %v485_v35 = vrot.slane %v483_v12, 4 }
  0x3a   : > { %v468_v23 = vsel %vm4961_vm3, %v463_v5, %v467_v40  ;;  %v491_v38 = vrot.slane %v489_v13, 5  ;;  %v494_v18 = vshrl.u32 %v5162_v4, 16  ;;  %v497_v58 = vshll.u32 %v5162_v4, 16  ;;  %v5207_v5 = vld [vmem:[%s4922_s8 + $0x78] sm:$0xf] }
  0x3b   : > { %v5190_v49 = vcombine.low %v458_v41, %v468_v23  ;;  %v477_v28 = vrot.slane %v476_v11, 4  ;;  %v1294_v22 = vsel %vm5168_vm6, %v3676_v20, %v1293_v24  ;;  %v1295_v50 = vrot.slane %v1293_v24, 4 }
  0x3c   : > { %v486_v25 = vor.u32 %v485_v35, %v481_v7  ;;  %v496_v57 = vrot.slane %v494_v18, 4  ;;  %v503_v40 = vshll.u32 %v5182_v27, 16  ;;  %v507_v0 = vshrl.u32 %v5182_v27, 16  ;;  %v5219_v35 = vld [vmem:[%s4922_s8 + $0x7c] sm:$0xf] }
  0x3d   : > { %6137 = vst [vmem:[#allocation9_spill] sm:$0xff] %v5190_v49  ;;  %4340 = vmatprep.mubr.msk.bf16.mxu0 %vm742_vm2, %v5190_v49  ;;  %v482_v60 = vsel %vm4961_vm3, %v477_v28, %v481_v7  ;;  %v1297_v43 = vsel %vm5168_vm6, %v1295_v50, %v1296_v45  ;;  %v513_v1 = vshll.u32 %v5187_v34, 16  ;;  %v499_v7 = vrot.slane %v497_v58, 5  ;;  %v5222_v18 = vld [vmem:[%s4922_s8 + $0x80] sm:$0x1] }
  0x3e   : > { %4181 = vmatmul.mubr.msk.bf16.gmra.mrb[12].mxu1 %vm742_vm2, %v5190_v49  ;;  %v487_v12 = vrot.slane %v486_v25, 4  ;;  %v5211_v13 = vcombine.low %v1294_v22, %v1297_v43  ;;  %v505_v41 = vrot.slane %v503_v40, 5  ;;  %v509_v26 = vrot.slane %v507_v0, 4 }
  0x3f   : > { %v515_v11 = vrot.slane %v513_v1, 5  ;;  %v3677_v20 = vrot.slane %v4974_v42, 9  ;;  %v1302_v45 = vrot.slane %v1300_v2, 4  ;;  %v500_v23 = vor.u32 %v499_v7, %v496_v57  ;;  %v5239_v1 = vld [vmem:[%s4922_s8 + $0x84] sm:$0xf] }
  0x40   : > { %6138 = vst [vmem:[#allocation10_spill] sm:$0xff] %v5211_v13  ;;  %v492_v24 = vsel %vm4961_vm3, %v487_v12, %v491_v38  ;;  %v518_v28 = vshrl.u32 %v5207_v5, 16  ;;  %v521_v22 = vshll.u32 %v5207_v5, 16  ;;  %v510_v25 = vor.u32 %v509_v26, %v505_v41  ;;  %v5249_v12 = vld [vmem:[%s4922_s8 + $0x88] sm:$0xf] }
  0x41   : > { %v5226_v50 = vcombine.low %v482_v60, %v492_v24  ;;  %v1301_v58 = vsel %vm5168_vm6, %v3677_v20, %v1300_v2  ;;  %v1304_v38 = vsel %vm5168_vm6, %v1302_v45, %v1303_v3  ;;  %v501_v57 = vrot.slane %v500_v23, 4  ;;  %v5252_v7 = vld [vmem:[%s4922_s8 + $0x8c] sm:$0x1] }
  0x42   : > { %v5236_v40 = vcombine.low %v1301_v58, %v1304_v38  ;;  %v520_v43 = vrot.slane %v518_v28, 4  ;;  %v523_v0 = vrot.slane %v521_v22, 5  ;;  %v511_v60 = vrot.slane %v510_v25, 4 }
  0x43   : > { %6139 = vst [vmem:[#allocation11_spill] sm:$0xff] %v5226_v50  ;;  %4341 = vmatmul.mubr.msk.bf16.gmra.mrb[12].mxu0 %vm742_vm2, %v5226_v50  ;;  %4184 = vmatprep.mubr.msk.bf16.mxu1 %vm742_vm2, %v5226_v50  ;;  %v527_v2 = vshll.u32 %v5219_v35, 16  ;;  %v531_v47 = vshrl.u32 %v5219_v35, 16  ;;  %v537_v3 = vshll.u32 %v5222_v18, 16  ;;  %v506_v26 = vsel %vm4961_vm3, %v501_v57, %v505_v41 }
  0x44   : > { %6140 = vst [vmem:[#allocation12_spill] sm:$0xff] %v5236_v40  ;;  %4368 = vmatprep.mubr.msk.bf16.mxu0 %vm742_vm2, %v5211_v13  ;;  %v524_v20 = vor.u32 %v523_v0, %v520_v43  ;;  %v3678_v45 = vrot.slane %v4992_v53, 9  ;;  %v1307_v24 = vrot.slane %v4995_v54, 5  ;;  %v516_v23 = vsel %vm4961_vm3, %v511_v60, %v515_v11 }
  0x45   : > { %v529_v28 = vrot.slane %v527_v2, 5  ;;  %v533_v22 = vrot.slane %v531_v47, 4  ;;  %v539_v25 = vrot.slane %v537_v3, 5  ;;  %v5262_v58 = vcombine.low %v506_v26, %v516_v23 }
  0x46   : > { %v525_v38 = vrot.slane %v524_v20, 4  ;;  %v1308_v50 = vsel %vm5168_vm6, %v3678_v45, %v1307_v24  ;;  %v1309_v49 = vrot.slane %v1307_v24, 4  ;;  %v1310_v57 = vrot.slane %v4999_v59, 5  ;;  %v5279_v45 = vld [vmem:[%s4922_s8 + $0x90] sm:$0xf]  ;;  %v4811_v24 = vld [vmem:[%s6093_s1 + $0xc8] sm:$0xff]  }
  0x47   : > { %6141 = vst [vmem:[#allocation13_spill] sm:$0xff] %v5262_v58  ;;  %v534_v41 = vor.u32 %v533_v22, %v529_v28  ;;  %v542_v43 = vshrl.u32 %v5239_v1, 16  ;;  %v545_v0 = vshll.u32 %v5239_v1, 16  ;;  %4185 = vmatmul.mubr.msk.bf16.gmra.mrb[16].mxu1 %vm742_vm2, %v5262_v58  ;;  %v551_v60 = vshll.u32 %v5249_v12, 16  ;;  %v5287_v58 = vld [vmem:[%s4922_s8 + $0x94] sm:$0xf] }
  0x48   : > { %v530_v11 = vsel %vm4961_vm3, %v525_v38, %v529_v28  ;;  %v555_v2 = vshrl.u32 %v5249_v12, 16  ;;  %v561_v47 = vshll.u32 %v5252_v7, 16  ;;  %v1311_v59 = vsel %vm5168_vm6, %v1309_v49, %v1310_v57 }
  0x49   : > { %v535_v3 = vrot.slane %v534_v41, 4  ;;  %v544_v26 = vrot.slane %v542_v43, 4  ;;  %v547_v20 = vrot.slane %v545_v0, 5  ;;  %v5284_v23 = vcombine.low %v1308_v50, %v1311_v59  ;;  %v5296_v0 = vld [vmem:[%s4922_s8 + $0x98] sm:$0x1] }
  0x4a   : > { %v553_v28 = vrot.slane %v551_v60, 5  ;;  %v557_v22 = vrot.slane %v555_v2, 4  ;;  %v563_v38 = vrot.slane %v561_v47, 5  ;;  %v3679_v57 = vrot.slane %v5011_v10, 9 }
  0x4b   : > { %6142 = vst [vmem:[#allocation14_spill] sm:$0xff] %v5284_v23  ;;  %4369 = vmatmul.mubr.msk.bf16.vlgmr.msra.gmra.mrb[0].mxu0 %vm742_vm2, %v5236_v40  ;;  %v540_v49 = vsel %vm4961_vm3, %v535_v3, %v539_v25  ;;  %v548_v41 = vor.u32 %v547_v20, %v544_v26  ;;  %v1314_v43 = vrot.slane %v5019_v16, 5  ;;  %v1317_v2 = vrot.slane %v5026_v30, 5  ;;  %v5406_v40 = vld [vmem:[%s4922_s8 + $0xbc] sm:$0x1] }
  0x4c   : > { %4401 = vmatpush3.bf16.msra.mxu0 %v5143_v21  ;;  %v5299_v50 = vcombine.low %v530_v11, %v540_v49  ;;  %4372 = vmatprep.mubr.msk.bf16.mxu0 %vm742_vm2, %v5284_v23  ;;  %v558_v60 = vor.u32 %v557_v22, %v553_v28  ;;  %v566_v25 = vshrl.u32 %v5279_v45, 16  ;;  %v569_v26 = vshll.u32 %v5279_v45, 16  ;;  %v5309_v21 = vld [vmem:[%s4922_s8 + $0x9c] sm:$0xf]  ;;  %v4814_v11 = vld [vmem:[%s6093_s1 + $0xd0] sm:$0xff]  }
  0x4d   : > { %v549_v47 = vrot.slane %v548_v41, 4  ;;  %v1315_v3 = vsel %vm5168_vm6, %v3679_v57, %v1314_v43  ;;  %v1316_v59 = vrot.slane %v1314_v43, 4  ;;  %4402 = vmatprep.subr.bf16.mxu0 %v4811_v24  ;;  %v575_v22 = vshll.u32 %v5287_v58, 16  ;;  %v5319_v41 = vld [vmem:[%s4922_s8 + $0xa0] sm:$0xf] }
  0x4e   : > { %6143 = vst [vmem:[#allocation15_spill] sm:$0xff] %v5299_v50  ;;  %4188 = vmatprep.mubr.msk.bf16.mxu1 %vm742_vm2, %v5299_v50  ;;  %v559_v30 = vrot.slane %v558_v60, 4  ;;  %v568_v20 = vrot.slane %v566_v25, 4  ;;  %v579_v49 = vshrl.u32 %v5287_v58, 16  ;;  %v571_v63 = vrot.slane %v569_v26, 5  ;;  %v4819_v60 = vld [vmem:[%s6093_s1 + $0xd8] sm:$0xff]  }
  0x4f   : > { %v554_v57 = vsel %vm4961_vm3, %v549_v47, %v553_v28  ;;  %v1318_v43 = vsel %vm5168_vm6, %v1316_v59, %v1317_v2  ;;  %v585_v33 = vshll.u32 %v5296_v0, 16  ;;  %v577_v56 = vrot.slane %v575_v22, 5  ;;  %v5337_v59 = vld [vmem:[%s4922_s8 + $0xa4] sm:$0x1] }
  0x50   : > { %v564_v25 = vsel %vm4961_vm3, %v559_v30, %v563_v38  ;;  %v5331_v50 = vcombine.low %v1315_v3, %v1318_v43  ;;  %v581_v17 = vrot.slane %v579_v49, 4  ;;  %4403 = vmatpush3.bf16.msra.mxu0 %v4811_v24  ;;  %v572_v28 = vor.u32 %v571_v63, %v568_v20 }
  0x51   : > { %v5333_v44 = vcombine.low %v554_v57, %v564_v25  ;;  %v587_v2 = vrot.slane %v585_v33, 5  ;;  %v3680_v47 = vrot.slane %v5034_v36, 9  ;;  %4404 = vmatprep.subr.bf16.mxu0 %v4814_v11  ;;  %v1321_v23 = vrot.slane %v5049_v51, 5 }
  0x52   : > { %6144 = vst [vmem:[#allocation16_spill] sm:$0xff] %v5331_v50  ;;  %v582_v26 = vor.u32 %v581_v17, %v577_v56  ;;  %v1324_v38 = vrot.slane %v5058_v62, 5  ;;  %v590_v3 = vshrl.u32 %v5309_v21, 16  ;;  %v573_v63 = vrot.slane %v572_v28, 4  ;;  %v5350_v17 = vld [vmem:[%s4922_s8 + $0xa8] sm:$0xf] }
  0x53   : > { %6145 = vst [vmem:[#allocation17_spill] sm:$0xff] %v5333_v44  ;;  %4189 = vmatmul.mubr.msk.bf16.gmra.mrb[20].mxu1 %vm742_vm2, %v5333_v44  ;;  %4373 = vmatmul.mubr.msk.bf16.gmra.mrb[4].mxu0 %vm742_vm2, %v5331_v50  ;;  %v593_v33 = vshll.u32 %v5309_v21, 16  ;;  %v599_v24 = vshll.u32 %v5319_v41, 16  ;;  %v603_v30 = vshrl.u32 %v5319_v41, 16  ;;  %v1322_v62 = vsel %vm5168_vm6, %v3680_v47, %v1321_v23  ;;  %v5359_v44 = vld [vmem:[%s6093_s1 + $0xe0] sm:$0xff]  }
  0x54   : > { %v583_v20 = vrot.slane %v582_v26, 4  ;;  %v1323_v22 = vrot.slane %v1321_v23, 4  ;;  %v592_v49 = vrot.slane %v590_v3, 4  ;;  %4405 = vmatpush3.bf16.msra.mxu0 %v4814_v11  ;;  %v578_v57 = vsel %vm4961_vm3, %v573_v63, %v577_v56  ;;  %6146 = vst [vmem:[#allocation18_spill] sm:$0xff] %v5359_v44  ;;  %v5368_v56 = vld [vmem:[%s4922_s8 + $0xac] sm:$0xf] }
  0x55   : > { %v595_v43 = vrot.slane %v593_v33, 5  ;;  %v601_v25 = vrot.slane %v599_v24, 5  ;;  %v605_v28 = vrot.slane %v603_v30, 4  ;;  %4406 = vmatprep.subr.bf16.mxu0 %v4819_v60  ;;  %v609_v11 = vshll.u32 %v5337_v59, 16  ;;  %v5375_v30 = vld [vmem:[%s4922_s8 + $0xb0] sm:$0x1] }
  0x56   : > { %v588_v26 = vsel %vm4961_vm3, %v583_v20, %v587_v2  ;;  %v1325_v23 = vsel %vm5168_vm6, %v1323_v22, %v1324_v38  ;;  %v3681_v47 = vrot.slane %v5066_v6, 9  ;;  %v1328_v2 = vrot.slane %v5074_v15, 5 }
  0x57   : > { %v5370_v3 = vcombine.low %v578_v57, %v588_v26  ;;  %v5372_v63 = vcombine.low %v1322_v62, %v1325_v23  ;;  %v596_v33 = vor.u32 %v595_v43, %v592_v49  ;;  %v606_v24 = vor.u32 %v605_v28, %v601_v25  ;;  %v5387_v43 = vld [vmem:[%s4922_s8 + $0xb4] sm:$0xf] }
  0x58   : > { %v611_v50 = vrot.slane %v609_v11, 5  ;;  %v1331_v38 = vrot.slane %v5086_v31, 5  ;;  %v614_v20 = vshrl.u32 %v5350_v17, 16  ;;  %4407 = vmatpush3.bf16.msra.mxu0 %v4819_v60  ;;  %v617_v49 = vshll.u32 %v5350_v17, 16 }
  0x59   : > { %6147 = vst [vmem:[#allocation19_spill] sm:$0xff] %v5370_v3  ;;  %6148 = vst [vmem:[#allocation20_spill] sm:$0xff] %v5372_v63  ;;  %4192 = vmatprep.mubr.msk.bf16.mxu1 %vm742_vm2, %v5370_v3  ;;  %4376 = vmatprep.mubr.msk.bf16.mxu0 %vm742_vm2, %v5372_v63  ;;  %v597_v62 = vrot.slane %v596_v33, 4  ;;  %v607_v22 = vrot.slane %v606_v24, 4  ;;  %v623_v57 = vshll.u32 %v5368_v56, 16  ;;  %v1329_v31 = vsel %vm5168_vm6, %v3681_v47, %v1328_v2 }
  0x5a   : > { %v1330_v60 = vrot.slane %v1328_v2, 4  ;;  %v616_v28 = vrot.slane %v614_v20, 4  ;;  %v627_v26 = vshrl.u32 %v5368_v56, 16  ;;  %4440 = vmatprep.subr.bf16.mxu0 %v5359_v44  ;;  %v619_v33 = vrot.slane %v617_v49, 5  ;;  %v5398_v3 = vld [vmem:[%s4922_s8 + $0xb8] sm:$0xf] }
  0x5b   : > { %v602_v23 = vsel %vm4961_vm3, %v597_v62, %v601_v25  ;;  %v612_v11 = vsel %vm4961_vm3, %v607_v22, %v611_v50  ;;  %v625_v24 = vrot.slane %v623_v57, 5  ;;  %v633_v20 = vshll.u32 %v5375_v30, 16 }
  0x5c   : > { %v5400_v63 = vcombine.low %v602_v23, %v612_v11  ;;  %v1332_v47 = vsel %vm5168_vm6, %v1330_v60, %v1331_v38  ;;  %v629_v2 = vrot.slane %v627_v26, 4  ;;  %v620_v25 = vor.u32 %v619_v33, %v616_v28 }
  0x5d   : > { %v5408_v13 = vcombine.low %v1329_v31, %v1332_v47  ;;  %v3682_v62 = vrot.slane %v5096_v39, 9  ;;  %v1335_v50 = vrot.slane %v5105_v52, 5  ;;  %v635_v49 = vrot.slane %v633_v20, 5 }
  0x5e   : > { %6149 = vst [vmem:[#allocation21_spill] sm:$0xff] %v5400_v63  ;;  %4193 = vmatmul.mubr.msk.bf16.gmra.mrb[24].mxu1 %vm742_vm2, %v5400_v63  ;;  %v630_v22 = vor.u32 %v629_v2, %v625_v24  ;;  %v1338_v57 = vrot.slane %v5115_v61, 5  ;;  %v638_v38 = vshrl.u32 %v5387_v43, 16  ;;  %v621_v60 = vrot.slane %v620_v25, 4 }
  0x5f   : > { %6150 = vst [vmem:[#allocation22_spill] sm:$0xff] %v5408_v13  ;;  %4377 = vmatmul.mubr.msk.bf16.gmra.mrb[8].mxu0 %vm742_vm2, %v5408_v13  ;;  %v1336_v31 = vsel %vm5168_vm6, %v3682_v62, %v1335_v50  ;;  %v1337_v28 = vrot.slane %v1335_v50, 4  ;;  %v641_v26 = vshll.u32 %v5387_v43, 16  ;;  %v647_v33 = vshll.u32 %v5398_v3, 16 }
  0x60   : > { %v631_v23 = vrot.slane %v630_v22, 4  ;;  %v640_v11 = vrot.slane %v638_v38, 4  ;;  %v651_v47 = vshrl.u32 %v5398_v3, 16  ;;  %v626_v61 = vsel %vm4961_vm3, %v621_v60, %v625_v24 }
  0x61   : > { %v1339_v2 = vsel %vm5168_vm6, %v1337_v28, %v1338_v57  ;;  %v643_v20 = vrot.slane %v641_v26, 5  ;;  %v657_v25 = vshll.u32 %v5406_v40, 16  ;;  %v649_v22 = vrot.slane %v647_v33, 5 }
  0x62   : > { %v636_v62 = vsel %vm4961_vm3, %v631_v23, %v635_v49  ;;  %v5430_v50 = vcombine.low %v1336_v31, %v1339_v2  ;;  %v653_v38 = vrot.slane %v651_v47, 4  ;;  %v3683_v39 = vrot.slane %v5129_v19, 9 }
  0x63   : > { %v5432_v63 = vcombine.low %v626_v61, %v636_v62  ;;  %v644_v13 = vor.u32 %v643_v20, %v640_v11  ;;  %v659_v44 = vrot.slane %v657_v25, 5  ;;  %v1342_v57 = vrot.slane %v5134_v32, 5 }
  0x64   : > { %4380 = vmatprep.mubr.msk.bf16.mxu0 %vm742_vm2, %v5430_v50  ;;  %v654_v24 = vor.u32 %v653_v38, %v649_v22  ;;  %v1345_v60 = vrot.slane %v5148_v48, 5  ;;  %v3684_v49 = vrot.slane %v5162_v4, 9  ;;  %v3639_v28 = vcombine.low %v4928_v8, %v4931_v9 }
  0x65   : > { %4196 = vmatprep.mubr.msk.bf16.mxu1 %vm742_vm2, %v5432_v63  ;;  %v645_v31 = vrot.slane %v644_v13, 4  ;;  %v1349_v26 = vrot.slane %v5182_v27, 5  ;;  %v1352_v23 = vrot.slane %v5187_v34, 5  ;;  %v1343_v33 = vsel %vm5168_vm6, %v3683_v39, %v1342_v57 }
  0x66   : > { %v655_v11 = vrot.slane %v654_v24, 4  ;;  %v1344_v47 = vrot.slane %v1342_v57, 4  ;;  %v1356_v48 = vrot.slane %v5219_v35, 5  ;;  %v3685_v8 = vrot.slane %v5207_v5, 9 }
  0x67   : > { %v650_v61 = vsel %vm4961_vm3, %v645_v31, %v649_v22  ;;  %v1350_v13 = vsel %vm5168_vm6, %v3684_v49, %v1349_v26  ;;  %v1351_v2 = vrot.slane %v1349_v26, 4  ;;  %v1359_v39 = vrot.slane %v5222_v18, 5 }
  0x68   : > { %v660_v9 = vsel %vm4961_vm3, %v655_v11, %v659_v44  ;;  %v1346_v34 = vsel %vm5168_vm6, %v1344_v47, %v1345_v60  ;;  %v1358_v20 = vrot.slane %v1356_v48, 4  ;;  %v3686_v24 = vrot.slane %v5239_v1, 9 }
  0x69   : > { %v5459_v25 = vcombine.low %v650_v61, %v660_v9  ;;  %v5461_v62 = vcombine.low %v1343_v33, %v1346_v34  ;;  %v1353_v22 = vsel %vm5168_vm6, %v1351_v2, %v1352_v23  ;;  %v1363_v57 = vrot.slane %v5249_v12, 5  ;;  %v4818_v2 = vld [vmem:[%s6093_s1 + $0x48] sm:$0xff]  }
  0x6a   : > { %v5465_v38 = vcombine.low %v1350_v13, %v1353_v22  ;;  %v1366_v44 = vrot.slane %v5252_v7, 5  ;;  %v1357_v18 = vsel %vm5168_vm6, %v3685_v8, %v1356_v48  ;;  %v1360_v60 = vsel %vm5168_vm6, %v1358_v20, %v1359_v39 }
  0x6b   : > { %4197 = vmatmul.mubr.msk.bf16.gmra.mrb[28].mxu1 %vm742_vm2, %v5459_v25  ;;  %4381 = vmatmul.mubr.msk.bf16.gmra.mrb[12].mxu0 %vm742_vm2, %v5461_v62  ;;  %v1365_v49 = vrot.slane %v1363_v57, 4  ;;  %v1370_v31 = vrot.slane %v5287_v58, 5  ;;  %v1377_v26 = vrot.slane %v5319_v41, 5  ;;  %v1364_v23 = vsel %vm5168_vm6, %v3686_v24, %v1363_v57 }
  0x6c   : > { %4208 = vmatprep.mubr.msk.bf16.mxu1 %vm742_vm2, %v3639_v28  ;;  %4384 = vmatprep.mubr.msk.bf16.mxu0 %vm742_vm2, %v5465_v38  ;;  %v5487_v28 = vcombine.low %v1357_v18, %v1360_v60  ;;  %v3687_v11 = vrot.slane %v5279_v45, 9  ;;  %v1373_v47 = vrot.slane %v5296_v0, 5  ;;  %v5493_v48 = vcombine.low %v4974_v42, %v4981_v46 }
  0x6d   : > { %v1367_v7 = vsel %vm5168_vm6, %v1365_v49, %v1366_v44  ;;  %v1372_v33 = vrot.slane %v1370_v31, 4  ;;  %v3688_v61 = vrot.slane %v5309_v21, 9  ;;  %v1379_v8 = vrot.slane %v1377_v26, 4 }
  0x6e   : > { %v5496_v13 = vcombine.low %v1364_v23, %v1367_v7  ;;  %v1380_v9 = vrot.slane %v5337_v59, 5  ;;  %v1384_v34 = vrot.slane %v5368_v56, 5  ;;  %v1371_v42 = vsel %vm5168_vm6, %v3687_v11, %v1370_v31  ;;  %v5612_v31 = vld [vmem:[%s6093_s1 + $0x60] sm:$0xff]  }
  0x6f   : > { %v1374_v46 = vsel %vm5168_vm6, %v1372_v33, %v1373_v47  ;;  %v5516_v0 = vcombine.low %v4992_v53, %v4995_v54  ;;  %v1378_v59 = vsel %vm5168_vm6, %v3688_v61, %v1377_v26  ;;  %v5522_v20 = vcombine.low %v5129_v19, %v5134_v32  ;;  %v4824_v53 = vld [vmem:[%s6093_s1 + $0x50] sm:$0xff]  }
  0x70   : > { %v3689_v39 = vrot.slane %v5350_v17, 9  ;;  %v1391_v22 = vrot.slane %v5398_v3, 5  ;;  %v5535_v54 = vcombine.low %v5162_v4, %v5182_v27  ;;  %v5537_v19 = vcombine.low %v1371_v42, %v1374_v46 }
  0x71   : > { %v1386_v32 = vrot.slane %v1384_v34, 4  ;;  %v1387_v24 = vrot.slane %v5375_v30, 5  ;;  %v5542_v57 = vcombine.low %v5207_v5, %v5219_v35  ;;  %v5546_v44 = vcombine.low %v5239_v1, %v5249_v12  ;;  %v262_v30 = vld [vmem:[%s4922_s8 + $0xc8] sm:$0x1] }
  0x72   : > { %v5550_v18 = vcombine.low %v5279_v45, %v5287_v58  ;;  %v5554_v4 = vcombine.low %v5309_v21, %v5319_v41  ;;  %v5558_v27 = vcombine.low %v5350_v17, %v5368_v56  ;;  %v5562_v5 = vcombine.low %v5011_v10, %v5019_v16  ;;  %v5573_v21 = vld [vmem:[%s4922_s8 + $0xc4] sm:$0xf]  ;;  %v4830_v10 = vld [vmem:[%s6093_s1 + $0x58] sm:$0xff]  }
  0x73   : > { %4209 = vmatmul.mubr.msk.bf16.vlgmr.msra.gmra.mrb[0].mxu1 %vm742_vm2, %v4970_v37  ;;  %4385 = vmatmul.mubr.msk.bf16.gmra.mrb[16].mxu0 %vm742_vm2, %v5487_v28  ;;  %v5568_v1 = vcombine.low %v5387_v43, %v5398_v3  ;;  %v3690_v12 = vrot.slane %v5387_v43, 9  ;;  %v1393_v58 = vrot.slane %v1391_v22, 4  ;;  %v1394_v45 = vrot.slane %v5406_v40, 5  ;;  %v5596_v3 = vld [vmem:[%s4922_s8 + $0xc0] sm:$0xf] }
  0x74   : > { %4241 = vmatpush3.bf16.msra.mxu1 %v5110_v55  ;;  %4212 = vmatprep.mubr.msk.bf16.mxu1 %vm742_vm2, %v5493_v48  ;;  %v1381_v55 = vsel %vm5168_vm6, %v1379_v8, %v1380_v9  ;;  %v1385_v16 = vsel %vm5168_vm6, %v3689_v39, %v1384_v34  ;;  %v1388_v41 = vsel %vm5168_vm6, %v1386_v32, %v1387_v24  ;;  %v2211_v40 = vrot.slane %v5573_v21, 5 }
  0x75   : > { %4388 = vmatprep.mubr.msk.bf16.mxu0 %vm742_vm2, %v5496_v13  ;;  %4242 = vmatprep.subr.bf16.mxu1 %v4818_v2  ;;  %v5564_v35 = vcombine.low %v1378_v59, %v1381_v55  ;;  %v1392_v17 = vsel %vm5168_vm6, %v3690_v12, %v1391_v22  ;;  %v1395_v56 = vsel %vm5168_vm6, %v1393_v58, %v1394_v45  ;;  %v1953_v26 = vshrl.u32 %v5596_v3, 16  ;;  %v6151_v22 = vld [vmem:[#allocation5_spill] sm:$0xff]  ;;  %v6152_v45 = vld [vmem:[#allocation18_spill] sm:$0xff] }
  0x76   : > { %v5601_v43 = vcombine.low %v5034_v36, %v5049_v51  ;;  %v5603_v60 = vcombine.low %v1385_v16, %v1388_v41  ;;  %v5607_v49 = vcombine.low %v5066_v6, %v5074_v15  ;;  %v1956_v23 = vshll.u32 %v5596_v3, 16  ;;  %v4838_v16 = vld [vmem:[%s6093_s1 + $0xf8] sm:$0xff]   ;;  %v4847_v41 = vld [vmem:[%s4922_s8 + $0x4] sm:$0xf] }
  0x77   : > { %v1962_v7 = vshll.u32 %v5573_v21, 16  ;;  %v1966_v36 = vshrl.u32 %v5573_v21, 16  ;;  %v5618_v51 = vcombine.low %v1392_v17, %v1395_v56  ;;  %v3793_v11 = vrot.slane %v5596_v3, 9  ;;  %v4842_v17 = vld [vmem:[%s6093_s1 + $0x100] sm:$0xff]   ;;  %v4848_v56 = vld [vmem:[%s4922_s8 + $0x8] sm:$0x1] }
  0x78   : > { %4243 = vmatpush3.bf16.msra.mxu1 %v4818_v2  ;;  %v2213_v6 = vrot.slane %v2211_v40, 4  ;;  %v2214_v15 = vrot.slane %v262_v30, 5  ;;  %v1955_v33 = vrot.slane %v1953_v26, 4  ;;  %v1958_v47 = vrot.slane %v1956_v23, 5  ;;  %v4849_v26 = vld [vmem:[%s4922_s8] sm:$0xf] }
  0x79   : > { %4244 = vmatprep.subr.bf16.mxu1 %v4824_v53  ;;  %v1964_v61 = vrot.slane %v1962_v7, 5  ;;  %v1968_v2 = vrot.slane %v1966_v36, 4  ;;  %v1972_v34 = vshll.u32 %v262_v30, 16  ;;  %v2212_v42 = vsel %vm5168_vm6, %v3793_v11, %v2211_v40 }
  0x7a   : > { %v1959_v8 = vor.u32 %v1958_v47, %v1955_v33  ;;  %v2215_v46 = vsel %vm5168_vm6, %v2213_v6, %v2214_v15  ;;  %v1286_v40 = vrot.slane %v4847_v41, 5  ;;  %v1289_v30 = vrot.slane %v4848_v56, 5  ;;  %v4837_v15 = vld [vmem:[%s6093_s1 + $0x68] sm:$0xff]   ;;  %v6153_v33 = vld [vmem:[#allocation10_spill] sm:$0xff]  ;;  %v6165_v41 = vld [vmem:[#allocation11_spill] sm:$0xff] }
  0x7b   : > { %4213 = vmatmul.mubr.msk.bf16.gmra.mrb[4].mxu1 %vm742_vm2, %v5516_v0  ;;  %4389 = vmatmul.mubr.msk.bf16.gmra.mrb[20].mxu0 %vm742_vm2, %v5537_v19  ;;  %v1969_v9 = vor.u32 %v1968_v2, %v1964_v61  ;;  %v1974_v39 = vrot.slane %v1972_v34, 5  ;;  %v5638_v32 = vcombine.low %v2212_v42, %v2215_v46  ;;  %v3675_v23 = vrot.slane %v4849_v26, 9  ;;  %v6154_v47 = vld [vmem:[#allocation12_spill] sm:$0xff]  ;;  %v4843_v2 = vld [vmem:[%s6093_s1 + $0x78] sm:$0xff]   ;;  %v4850_v34 = vld [vmem:[%s6093_s1 + $0x80] sm:$0xff]  }
  0x7c   : > { %4216 = vmatprep.mubr.msk.bf16.mxu1 %vm742_vm2, %v5562_v5  ;;  %4392 = vmatprep.mubr.msk.bf16.mxu0 %vm742_vm2, %v5564_v35  ;;  %v1960_v59 = vrot.slane %v1959_v8, 4  ;;  %v1288_v7 = vrot.slane %v1286_v40, 4  ;;  %v6155_v8 = vld [vmem:[#allocation14_spill] sm:$0xff]  ;;  %v6157_v42 = vld [vmem:[#allocation20_spill] sm:$0xff]  ;;  %v6168_v56 = vld [vmem:[#allocation17_spill] sm:$0xff] }
  0x7d   : > { %4245 = vmatpush3.bf16.msra.mxu1 %v4824_v53  ;;  %v1970_v55 = vrot.slane %v1969_v9, 4  ;;  %v5636_v53 = vcombine.low %v6151_v22, %v5105_v52  ;;  %v4831_v52 = vld [vmem:[%s6093_s1 + $0xe8] sm:$0xff]   ;;  %v1287_v36 = vsel %vm5168_vm6, %v3675_v23, %v1286_v40  ;;  %v5733_v9 = vcombine.low %v5596_v3, %v5573_v21  ;;  %v6158_v46 = vld [vmem:[#allocation22_spill] sm:$0xff]  ;;  %v5750_v3 = vld [vmem:[%s4922_s8 + $0xd0] sm:$0xf] }
  0x7e   : > { %4246 = vmatprep.subr.bf16.mxu1 %v4830_v10  ;;  %v1965_v24 = vsel %vm4961_vm3, %v1960_v59, %v1964_v61  ;;  %v1290_v11 = vsel %vm5168_vm6, %v1288_v7, %v1289_v30  ;;  %v4841_v61 = vld [vmem:[%s6093_s1 + $0x70] sm:$0xff]   ;;  %v5747_v21 = vld [vmem:[%s4922_s8 + $0xcc] sm:$0xf]  ;;  %v2696_v23 = vshrl.u32 %v5750_v3, 16  ;;  %v6169_v7 = vld [vmem:[#allocation19_spill] sm:$0xff]  ;;  %v2941_v29 = vrot.slane %v5750_v3, 5 }
  0x7f   : > { %v1975_v12 = vsel %vm4961_vm3, %v1970_v55, %v1974_v39  ;;  %v3699_v6 = vcombine.low %v1287_v36, %v1290_v11  ;;  %v3831_v59 = vcombine.low %v5747_v21, %v5750_v3  ;;  %v6159_v55 = vld [vmem:[#allocation3_spill] sm:$0xff]  ;;  %v4844_v39 = vld [vmem:[%s6093_s1 + $0x108] sm:$0xff]   ;;  %v6166_v40 = vld [vmem:[#allocation13_spill] sm:$0xff]  ;;  %v2683_v30 = vshrl.u32 %v5747_v21, 16 }
  0x80   : > { %v5644_v58 = vcombine.low %v1965_v24, %v1975_v12  ;;  %v6160_v22 = vld [vmem:[#allocation4_spill] sm:$0xff]  ;;  %v6161_v24 = vld [vmem:[#allocation6_spill] sm:$0xff]  ;;  %v4845_v12 = vld [vmem:[%s6093_s1 + $0x110] sm:$0xff]   ;;  %v2686_v26 = vshll.u32 %v5747_v21, 16 }
  0x81   : > { %4247 = vmatpush3.bf16.msra.mxu1 %v4830_v10  ;;  %v4836_v10 = vld [vmem:[%s6093_s1 + $0xf0] sm:$0xff]   ;;  %v2685_v36 = vrot.slane %v2683_v30, 4 }
  0x82   : > { %4280 = vmatprep.subr.bf16.mxu1 %v5612_v31  ;;  %v2688_v11 = vrot.slane %v2686_v26, 5 }
  0x83   : > { %4217 = vmatmul.mubr.msk.bf16.gmra.mrb[8].mxu1 %vm742_vm2, %v5601_v43  ;;  %4393 = vmatmul.mubr.msk.bf16.gmra.mrb[24].mxu0 %vm742_vm2, %v5603_v60 }
  0x84   : > { %4220 = vmatprep.mubr.msk.bf16.mxu1 %vm742_vm2, %v5607_v49  ;;  %4396 = vmatprep.mubr.msk.bf16.mxu0 %vm742_vm2, %v5618_v51 }
  0x8b   : > { %4221 = vmatmul.mubr.msk.bf16.gmra.mrb[12].mxu1 %vm742_vm2, %v5636_v53  ;;  %4397 = vmatmul.mubr.msk.bf16.gmra.mrb[28].mxu0 %vm742_vm2, %v5638_v32 }
  0x8c   : > { %4224 = vmatprep.mubr.msk.bf16.mxu1 %vm742_vm2, %v5522_v20  ;;  %4408 = vmatprep.mubr.msk.bf16.mxu0 %vm742_vm2, %v5493_v48 }
  0x93   : > { %4225 = vmatmul.mubr.msk.bf16.gmra.mrb[16].mxu1 %vm742_vm2, %v5535_v54  ;;  %4409 = vmatmul.mubr.msk.bf16.vlgmr.msra.gmra.mrb[0].mxu0 %vm742_vm2, %v5516_v0 }
  0x94   : > { %4441 = vmatpush3.bf16.msra.mxu0 %v6152_v45  ;;  %4228 = vmatprep.mubr.msk.bf16.mxu1 %vm742_vm2, %v5542_v57  ;;  %v6162_v45 = vld [vmem:[#allocation7_spill] sm:$0xff] }
  0x95   : > { %4412 = vmatprep.mubr.msk.bf16.mxu0 %vm742_vm2, %v5562_v5  ;;  %4442 = vmatprep.subr.bf16.mxu0 %v4831_v52 }
  0x98   : > { %4443 = vmatpush3.bf16.msra.mxu0 %v4831_v52  ;;  %v4846_v52 = vld [vmem:[%s6093_s1 + $0x118] sm:$0xff]  }
  0x99   : > { %4444 = vmatprep.subr.bf16.mxu0 %v4836_v10 }
  0x9b   : > { %4229 = vmatmul.mubr.msk.bf16.gmra.mrb[20].mxu1 %vm742_vm2, %v5546_v44  ;;  %4413 = vmatmul.mubr.msk.bf16.gmra.mrb[4].mxu0 %vm742_vm2, %v5601_v43 }
  0x9c   : > { %4232 = vmatprep.mubr.msk.bf16.mxu1 %vm742_vm2, %v5550_v18  ;;  %4416 = vmatprep.mubr.msk.bf16.mxu0 %vm742_vm2, %v5607_v49 }
  0x9d   : > { %4445 = vmatpush3.bf16.msra.mxu0 %v4836_v10  ;;  %v6163_v10 = vld [vmem:[#allocation8_spill] sm:$0xff] }
  0x9e   : > { %4446 = vmatprep.subr.bf16.mxu0 %v4838_v16 }
  0xa1   : > { %4447 = vmatpush3.bf16.msra.mxu0 %v4838_v16  ;;  %v6164_v16 = vld [vmem:[#allocation9_spill] sm:$0xff] }
  0xa2   : > { %4480 = vmatprep.subr.bf16.mxu0 %v4842_v17 }
  0xa3   : > { %4233 = vmatmul.mubr.msk.bf16.gmra.mrb[24].mxu1 %vm742_vm2, %v5554_v4  ;;  %4417 = vmatmul.mubr.msk.bf16.gmra.mrb[8].mxu0 %vm742_vm2, %v5636_v53 }
  0xa4   : > { %4236 = vmatprep.mubr.msk.bf16.mxu1 %vm742_vm2, %v5558_v27  ;;  %4420 = vmatprep.mubr.msk.bf16.mxu0 %vm742_vm2, %v5522_v20 }
  0xab   : > { %4237 = vmatmul.mubr.msk.bf16.gmra.mrb[28].mxu1 %vm742_vm2, %v5568_v1  ;;  %4421 = vmatmul.mubr.msk.bf16.gmra.mrb[12].mxu0 %vm742_vm2, %v5535_v54 }
  0xac   : > { %4248 = vmatprep.mubr.msk.bf16.mxu1 %vm742_vm2, %v3699_v6  ;;  %4424 = vmatprep.mubr.msk.bf16.mxu0 %vm742_vm2, %v5542_v57 }
  0xb3   : > { %4249 = vmatmul.mubr.msk.bf16.vlgmr.msra.gmra.mrb[0].mxu1 %vm742_vm2, %v6153_v33  ;;  %4425 = vmatmul.mubr.msk.bf16.gmra.mrb[16].mxu0 %vm742_vm2, %v5546_v44  ;;  %v5818_v33 = vld [vmem:[%s4922_s8 + $0xd4] sm:$0x1] }
  0xb4   : > { %4281 = vmatpush3.bf16.msra.mxu1 %v5612_v31  ;;  %4252 = vmatprep.mubr.msk.bf16.mxu1 %vm742_vm2, %v6154_v47  ;;  %v6156_v31 = vld [vmem:[#allocation16_spill] sm:$0xff] }
  0xb5   : > { %4428 = vmatprep.mubr.msk.bf16.mxu0 %vm742_vm2, %v5550_v18  ;;  %4282 = vmatprep.subr.bf16.mxu1 %v4837_v15 }
  0xb8   : > { %4283 = vmatpush3.bf16.msra.mxu1 %v4837_v15  ;;  %v2698_v15 = vrot.slane %v2696_v23, 4 }
  0xb9   : > { %4284 = vmatprep.subr.bf16.mxu1 %v4841_v61 }
  0xbb   : > { %4253 = vmatmul.mubr.msk.bf16.gmra.mrb[4].mxu1 %vm742_vm2, %v6155_v8  ;;  %4429 = vmatmul.mubr.msk.bf16.gmra.mrb[20].mxu0 %vm742_vm2, %v5554_v4 }
  0xbc   : > { %4256 = vmatprep.mubr.msk.bf16.mxu1 %vm742_vm2, %v6156_v31  ;;  %4432 = vmatprep.mubr.msk.bf16.mxu0 %vm742_vm2, %v5558_v27 }
  0xbd   : > { %4285 = vmatpush3.bf16.msra.mxu1 %v4841_v61  ;;  %v6170_v61 = vld [vmem:[#allocation21_spill] sm:$0xff] }
  0xbe   : > { %4286 = vmatprep.subr.bf16.mxu1 %v4843_v2 }
  0xc1   : > { %4287 = vmatpush3.bf16.msra.mxu1 %v4843_v2  ;;  %v2689_v2 = vor.u32 %v2688_v11, %v2685_v36 }
  0xc2   : > { %4520 = vmatprep.subr.bf16.mxu1 %v4850_v34 }
  0xc3   : > { %4257 = vmatmul.mubr.msk.bf16.gmra.mrb[8].mxu1 %vm742_vm2, %v6157_v42  ;;  %4433 = vmatmul.mubr.msk.bf16.gmra.mrb[24].mxu0 %vm742_vm2, %v5568_v1 }
  0xc4   : > { %4260 = vmatprep.mubr.msk.bf16.mxu1 %vm742_vm2, %v6158_v46  ;;  %4436 = vmatprep.mubr.msk.bf16.mxu0 %vm742_vm2, %v5733_v9 }
  0xcb   : > { %4261 = vmatmul.mubr.msk.bf16.gmra.mrb[12].mxu1 %vm742_vm2, %v5430_v50  ;;  %4437 = vmatmul.mubr.msk.bf16.gmra.mrb[28].mxu0 %vm742_vm2, %v3831_v59  ;;  %v2702_v59 = vshll.u32 %v5818_v33, 16 }
  0xcc   : > { %4264 = vmatprep.mubr.msk.bf16.mxu1 %vm742_vm2, %v5461_v62  ;;  %4448 = vmatprep.mubr.msk.bf16.mxu0 %vm742_vm2, %v6159_v55  ;;  %v4853_v55 = vld [vmem:[%s6093_s1 + $0x98] sm:$0xff]  }
  0xd3   : > { %4265 = vmatmul.mubr.msk.bf16.gmra.mrb[16].mxu1 %vm742_vm2, %v5465_v38  ;;  %4449 = vmatmul.mubr.msk.bf16.vlgmr.msra.gmra.mrb[0].mxu0 %vm742_vm2, %v6160_v22  ;;  %v2704_v22 = vrot.slane %v2702_v59, 5 }
  0xd4   : > { %4481 = vmatpush3.bf16.msra.mxu0 %v4842_v17  ;;  %4268 = vmatprep.mubr.msk.bf16.mxu1 %vm742_vm2, %v5487_v28  ;;  %v6167_v17 = vld [vmem:[#allocation15_spill] sm:$0xff] }
  0xd5   : > { %4452 = vmatprep.mubr.msk.bf16.mxu0 %vm742_vm2, %v6161_v24  ;;  %4482 = vmatprep.subr.bf16.mxu0 %v4844_v39 }
  0xd8   : > { %4483 = vmatpush3.bf16.msra.mxu0 %v4844_v39 }
  0xd9   : > { %4484 = vmatprep.subr.bf16.mxu0 %v4845_v12 }
  0xdb   : > { %4269 = vmatmul.mubr.msk.bf16.gmra.mrb[20].mxu1 %vm742_vm2, %v5496_v13  ;;  %4453 = vmatmul.mubr.msk.bf16.gmra.mrb[4].mxu0 %vm742_vm2, %v6162_v45 }
  0xdc   : > { %4272 = vmatprep.mubr.msk.bf16.mxu1 %vm742_vm2, %v5537_v19  ;;  %4456 = vmatprep.mubr.msk.bf16.mxu0 %vm742_vm2, %v6163_v10 }
  0xdd   : > { %4485 = vmatpush3.bf16.msra.mxu0 %v4845_v12 }
  0xde   : > { %4486 = vmatprep.subr.bf16.mxu0 %v4846_v52 }
  0xe1   : > { %4487 = vmatpush3.bf16.msra.mxu0 %v4846_v52 }
  0xe3   : > { %4273 = vmatmul.mubr.msk.bf16.gmra.mrb[24].mxu1 %vm742_vm2, %v5564_v35  ;;  %4457 = vmatmul.mubr.msk.bf16.gmra.mrb[8].mxu0 %vm742_vm2, %v6164_v16 }
  0xe4   : > { %4276 = vmatprep.mubr.msk.bf16.mxu1 %vm742_vm2, %v5603_v60  ;;  %4460 = vmatprep.mubr.msk.bf16.mxu0 %vm742_vm2, %v6165_v41 }
  0xeb   : > { %4277 = vmatmul.mubr.msk.bf16.gmra.mrb[28].mxu1 %vm742_vm2, %v5618_v51  ;;  %4461 = vmatmul.mubr.msk.bf16.gmra.mrb[12].mxu0 %vm742_vm2, %v6166_v40 }
  0xec   : > { %4288 = vmatprep.mubr.msk.bf16.mxu1 %vm742_vm2, %v4970_v37  ;;  %4464 = vmatprep.mubr.msk.bf16.mxu0 %vm742_vm2, %v6167_v17  ;;  %v2692_v37 = vshll.u32 %v5750_v3, 16 }
  0xee   : > { %v2694_v6 = vrot.slane %v2692_v37, 5 }
  0xf3   : > { %4289 = vmatmul.mubr.msk.bf16.vlgmr.msra.gmra.mrb[0].mxu1 %vm742_vm2, %v5493_v48  ;;  %4465 = vmatmul.mubr.msk.bf16.gmra.mrb[16].mxu0 %vm742_vm2, %v6168_v56  ;;  %v4851_v48 = vld [vmem:[%s6093_s1 + $0x88] sm:$0xff]  }
  0xf4   : > { %4524 = vmatpush3.bf16.msra.mxu1 %v4850_v34  ;;  %4292 = vmatprep.mubr.msk.bf16.mxu1 %vm742_vm2, %v5516_v0  ;;  %v4852_v0 = vld [vmem:[%s6093_s1 + $0x90] sm:$0xff]   ;;  %v2699_v34 = vor.u32 %v2698_v15, %v2694_v6 }
  0xf5   : > { %4468 = vmatprep.mubr.msk.bf16.mxu0 %vm742_vm2, %v6169_v7  ;;  %4521 = vmatprep.subr.bf16.mxu1 %v4851_v48 }
  0xf6   : > { %v2700_v39 = vrot.slane %v2699_v34, 4 }
  0xf8   : > { %4525 = vmatpush3.bf16.msra.mxu1 %v4851_v48  ;;  %v2705_v24 = vsel %vm4961_vm3, %v2700_v39, %v2704_v22 }
  0xf9   : > { %4522 = vmatprep.subr.bf16.mxu1 %v4852_v0 }
  0xfb   : > { %4293 = vmatmul.mubr.msk.bf16.gmra.mrb[4].mxu1 %vm742_vm2, %v5562_v5  ;;  %4469 = vmatmul.mubr.msk.bf16.gmra.mrb[20].mxu0 %vm742_vm2, %v6170_v61  ;;  %v2690_v5 = vrot.slane %v2689_v2, 4 }
  0xfc   : > { %4296 = vmatprep.mubr.msk.bf16.mxu1 %vm742_vm2, %v5601_v43  ;;  %4472 = vmatprep.mubr.msk.bf16.mxu0 %vm742_vm2, %v5432_v63 }
  0xfd   : > { %4526 = vmatpush3.bf16.msra.mxu1 %v4852_v0  ;;  %v2695_v43 = vsel %vm4961_vm3, %v2690_v5, %v2694_v6 }
  0xfe   : > { %4523 = vmatprep.subr.bf16.mxu1 %v4853_v55  ;;  %v3860_v12 = vcombine.low %v2695_v43, %v2705_v24 }
 0x101   : > { %4527 = vmatpush3.bf16.msra.mxu1 %v4853_v55 }
 0x103   : > { %4297 = vmatmul.mubr.msk.bf16.gmra.mrb[8].mxu1 %vm742_vm2, %v5607_v49  ;;  %4473 = vmatmul.mubr.msk.bf16.gmra.mrb[24].mxu0 %vm742_vm2, %v5459_v25 }
 0x104   : > { %4300 = vmatprep.mubr.msk.bf16.mxu1 %vm742_vm2, %v5636_v53  ;;  %4476 = vmatprep.mubr.msk.bf16.mxu0 %vm742_vm2, %v5644_v58 }
 0x10b   : > { %4301 = vmatmul.mubr.msk.bf16.gmra.mrb[12].mxu1 %vm742_vm2, %v5522_v20  ;;  %4477 = vmatmul.mubr.msk.bf16.gmra.mrb[28].mxu0 %vm742_vm2, %v3860_v12 }
 0x10c   : > { %4304 = vmatprep.mubr.msk.bf16.mxu1 %vm742_vm2, %v5535_v54  ;;  %4488 = vmatprep.mubr.msk.bf16.mxu0 %vm742_vm2, %v6154_v47 }
 0x113   : > { %4305 = vmatmul.mubr.msk.bf16.gmra.mrb[16].mxu1 %vm742_vm2, %v5542_v57  ;;  %4489 = vmatmul.mubr.msk.bf16.vlgmr.msra.gmra.mrb[0].mxu0 %vm742_vm2, %v6155_v8 }
 0x114   : > { %4308 = vmatprep.mubr.msk.bf16.mxu1 %vm742_vm2, %v5546_v44  ;;  %4492 = vmatprep.mubr.msk.bf16.mxu0 %vm742_vm2, %v6156_v31 }
 0x11b   : > { %4309 = vmatmul.mubr.msk.bf16.gmra.mrb[20].mxu1 %vm742_vm2, %v5550_v18  ;;  %4493 = vmatmul.mubr.msk.bf16.gmra.mrb[4].mxu0 %vm742_vm2, %v6157_v42 }
 0x11c   : > { %4312 = vmatprep.mubr.msk.bf16.mxu1 %vm742_vm2, %v5554_v4  ;;  %4496 = vmatprep.mubr.msk.bf16.mxu0 %vm742_vm2, %v6158_v46 }
 0x123   : > { %4313 = vmatmul.mubr.msk.bf16.gmra.mrb[24].mxu1 %vm742_vm2, %v5558_v27  ;;  %4497 = vmatmul.mubr.msk.bf16.gmra.mrb[8].mxu0 %vm742_vm2, %v5430_v50  ;;  %v3881_v50 = vrot.slane %v5747_v21, 9 }
 0x124   : > { %4316 = vmatprep.mubr.msk.bf16.mxu1 %vm742_vm2, %v5568_v1  ;;  %4500 = vmatprep.mubr.msk.bf16.mxu0 %vm742_vm2, %v5461_v62  ;;  %v2943_v62 = vrot.slane %v2941_v29, 4 }
 0x12b   : > { %4317 = vmatmul.mubr.msk.bf16.gmra.mrb[28].mxu1 %vm742_vm2, %v5733_v9  ;;  %4501 = vmatmul.mubr.msk.bf16.gmra.mrb[12].mxu0 %vm742_vm2, %v5465_v38  ;;  %v2944_v38 = vrot.slane %v5818_v33, 5 }
 0x12c   : > { %4344 = vmatprep.mubr.msk.bf16.mxu1 %vm742_vm2, %v6166_v40  ;;  %4504 = vmatprep.mubr.msk.bf16.mxu0 %vm742_vm2, %v5487_v28  ;;  %v2942_v28 = vsel %vm5168_vm6, %v3881_v50, %v2941_v29 }
 0x133   : > { %4345 = vmatmul.mubr.msk.bf16.vlgmr.msra.gmra.mrb[16].mxu1 %vm742_vm2, %v6167_v17  ;;  %4505 = vmatmul.mubr.msk.bf16.gmra.mrb[16].mxu0 %vm742_vm2, %v5496_v13  ;;  %v2945_v13 = vsel %vm5168_vm6, %v2943_v62, %v2944_v38 }
 0x134   : > { %4348 = vmatprep.mubr.msk.bf16.mxu1 %vm742_vm2, %v6168_v56  ;;  %4508 = vmatprep.mubr.msk.bf16.mxu0 %vm742_vm2, %v5537_v19  ;;  %v3890_v20 = vcombine.low %v2942_v28, %v2945_v13 }
 0x13b   : > { %4349 = vmatmul.mubr.msk.bf16.gmra.mrb[20].mxu1 %vm742_vm2, %v6169_v7  ;;  %4509 = vmatmul.mubr.msk.bf16.gmra.mrb[20].mxu0 %vm742_vm2, %v5564_v35 }
 0x13c   : > { %4352 = vmatprep.mubr.msk.bf16.mxu1 %vm742_vm2, %v6170_v61  ;;  %4512 = vmatprep.mubr.msk.bf16.mxu0 %vm742_vm2, %v5603_v60 }
 0x143   : > { %4353 = vmatmul.mubr.msk.bf16.gmra.mrb[24].mxu1 %vm742_vm2, %v5432_v63  ;;  %4513 = vmatmul.mubr.msk.bf16.gmra.mrb[24].mxu0 %vm742_vm2, %v5618_v51 }
 0x144   : > { %4356 = vmatprep.mubr.msk.bf16.mxu1 %vm742_vm2, %v5459_v25  ;;  %4516 = vmatprep.mubr.msk.bf16.mxu0 %vm742_vm2, %v5638_v32 }
 0x14b   : > { %4357 = vmatmul.mubr.msk.bf16.gmra.mrb[28].mxu1 %vm742_vm2, %v5644_v58  ;;  %4517 = vmatmul.mubr.msk.bf16.gmra.mrb[28].mxu0 %vm742_vm2, %v3890_v20  ;;  %v5939_v58 = vld [vmem:[%s6094_s2] ss:$0 sm:$0xff] }
 0x1c6   : > { %v4290_v63 = vpop.f32.mrb[0].mxu1 }
 0x1c7   : > { %v1793_v54 = vpop.f32.mrb[1].mxu1 }
 0x1c8   : > { %v4291_v19 = vpop.f32.mrb[2].mxu1 }
 0x1c9   : > { %v1796_v25 = vpop.f32.mrb[3].mxu1 }
 0x1ce   : > { %v4294_v57 = vpop.f32.mrb[4].mxu1 }
 0x1cf   : > { %v1809_v44 = vpop.f32.mrb[5].mxu1 }
 0x1d0   : > { %v4295_v18 = vpop.f32.mrb[6].mxu1 }
 0x1d1   : > { %v1812_v4 = vpop.f32.mrb[7].mxu1 }
 0x1d6   : > { %v5920_v27 = vpop.f32.mrb[8].mxu1 }
 0x1d7   : > { %v5922_v35 = vpop.f32.mrb[9].mxu1 }
 0x1d8   : > { %v5924_v14 = vpop.f32.mrb[10].mxu1 }
 0x1d9   : > { %v5926_v1 = vpop.f32.mrb[11].mxu1 }
 0x1de   : > { %v5928_v60 = vpop.f32.mrb[12].mxu1 }
 0x1df   : > { %v5930_v49 = vpop.f32.mrb[13].mxu1 }
 0x1e0   : > { %v5932_v51 = vpop.f32.mrb[14].mxu1 }
 0x1e1   : > { %v5934_v53 = vpop.f32.mrb[15].mxu1 }
 0x1e6   : > { %v4490_v32 = vpop.f32.mrb[0].mxu0 }
 0x1e7   : > { %v4528_v47 = vadd.f32 %v4490_v32, %v4290_v63  ;;  %v3019_v8 = vpop.f32.mrb[1].mxu0 }
 0x1e8   : > { %v4529_v31 = vadd.f32 %v3019_v8, %v1793_v54  ;;  %v4491_v9 = vpop.f32.mrb[2].mxu0 }
 0x1e9   : > { %v3187_v42 = vadd.f32 %v4528_v47, %v5939_v58  ;;  %v4530_v46 = vadd.f32 %v4491_v9, %v4291_v19  ;;  %v3022_v21 = vpop.f32.mrb[3].mxu0 }
 0x1ea   : > { %v3185_v3 = vadd.f32 %v4529_v31, %v5939_v58  ;;  %v4531_v52 = vadd.f32 %v3022_v21, %v1796_v25 }
 0x1eb   : > { %v3950_v45 = vpack.c.bf16 %v3187_v42, %v3187_v42  ;;  %v3380_v10 = vmax.f32 %v3187_v42, 0.0  ;;  %v3188_v16 = vadd.f32 %v4530_v46, %v5939_v58 }
 0x1ec   : > { %v3948_v41 = vpack.c.bf16 %v3185_v3, %v3185_v3  ;;  %v3378_v40 = vmax.f32 %v3185_v3, 0.0  ;;  %v3186_v17 = vadd.f32 %v4531_v52, %v5939_v58 }
 0x1ed   : > { %3348 = vst.msk [vmem:[%s5946_s10 + $0x8] sm:$0xf] %vm3345_vm7, %v3950_v45  ;;  %v3951_v56 = vpack.c.bf16 %v3188_v16, %v3188_v16  ;;  %v3381_v30 = vmax.f32 %v3188_v16, 0.0 }
 0x1ee   : > { %3346 = vst.msk [vmem:[%s5946_s10] sm:$0xf] %vm3345_vm7, %v3948_v41  ;;  %v3410_v26 = vmax.f32 %v3378_v40, %v3380_v10  ;;  %v3949_v23 = vpack.c.bf16 %v3186_v17, %v3186_v17  ;;  %v3379_v37 = vmax.f32 %v3186_v17, 0.0  ;;  %v4494_v7 = vpop.f32.mrb[4].mxu0 }
 0x1ef   : > { %3349 = vst.msk [vmem:[%s5946_s10 + $0xc] sm:$0xf] %vm3345_vm7, %v3951_v56  ;;  %v4532_v48 = vadd.f32 %v4494_v7, %v4294_v57  ;;  %v3035_v36 = vpop.f32.mrb[5].mxu0 }
 0x1f0   : > { %3426 = vst.msk [vmem:[#allocation2] sm:$0xff] %vm742_vm2, %v3410_v26  ;;  %v3411_v11 = vmax.f32 %v3379_v37, %v3381_v30  ;;  %v4533_v6 = vadd.f32 %v3035_v36, %v1809_v44  ;;  %v4495_v15 = vpop.f32.mrb[6].mxu0 }
 0x1f1   : > { %3347 = vst.msk [vmem:[%s5946_s10 + $0x4] sm:$0xf] %vm3345_vm7, %v3949_v23  ;;  %v3191_v33 = vadd.f32 %v4532_v48, %v5939_v58  ;;  %v4534_v0 = vadd.f32 %v4495_v15, %v4295_v18  ;;  %v3038_v61 = vpop.f32.mrb[7].mxu0 }
 0x1f2   : > { %3427 = vst.msk [vmem:[#allocation2 + $0x8] sm:$0xff] %vm742_vm2, %v3411_v11  ;;  %v3189_v2 = vadd.f32 %v4533_v6, %v5939_v58  ;;  %v4535_v34 = vadd.f32 %v3038_v61, %v1812_v4 }
 0x1f3   : > { %v3954_v59 = vpack.c.bf16 %v3191_v33, %v3191_v33  ;;  %v3384_v55 = vmax.f32 %v3191_v33, 0.0  ;;  %v3192_v5 = vadd.f32 %v4534_v0, %v5939_v58 }
 0x1f4   : > { %v3952_v39 = vpack.c.bf16 %v3189_v2, %v3189_v2  ;;  %v3382_v22 = vmax.f32 %v3189_v2, 0.0  ;;  %v3190_v43 = vadd.f32 %v4535_v34, %v5939_v58 }
 0x1f5   : > { %3352 = vst.msk [vmem:[%s5946_s10 + $0x18] sm:$0xf] %vm3345_vm7, %v3954_v59  ;;  %v3955_v24 = vpack.c.bf16 %v3192_v5, %v3192_v5  ;;  %v3385_v12 = vmax.f32 %v3192_v5, 0.0 }
 0x1f6   : > { %3350 = vst.msk [vmem:[%s5946_s10 + $0x10] sm:$0xf] %vm3345_vm7, %v3952_v39  ;;  %v3412_v29 = vmax.f32 %v3382_v22, %v3384_v55  ;;  %v3953_v50 = vpack.c.bf16 %v3190_v43, %v3190_v43  ;;  %v3383_v62 = vmax.f32 %v3190_v43, 0.0  ;;  %v4498_v38 = vpop.f32.mrb[8].mxu0 }
 0x1f7   : > { %3353 = vst.msk [vmem:[%s5946_s10 + $0x1c] sm:$0xf] %vm3345_vm7, %v3955_v24  ;;  %v4536_v28 = vadd.f32 %v4498_v38, %v5920_v27  ;;  %v3051_v13 = vpop.f32.mrb[9].mxu0 }
 0x1f8   : > { %3428 = vst.msk [vmem:[#allocation2 + $0x10] sm:$0xff] %vm742_vm2, %v3412_v29  ;;  %v3413_v20 = vmax.f32 %v3383_v62, %v3385_v12  ;;  %v4537_v63 = vadd.f32 %v3051_v13, %v5922_v35  ;;  %v4499_v54 = vpop.f32.mrb[10].mxu0 }
 0x1f9   : > { %3351 = vst.msk [vmem:[%s5946_s10 + $0x14] sm:$0xf] %vm3345_vm7, %v3953_v50  ;;  %v3442_v19 = vld [vmem:[#allocation2] ss:$2 sm:$0xff]  ;;  %v3458_v25 = vld [vmem:[#allocation2 + $0x1] ss:$2 sm:$0xff]  ;;  %v3195_v57 = vadd.f32 %v4536_v28, %v5939_v58  ;;  %v4538_v44 = vadd.f32 %v4499_v54, %v5924_v14 }
 0x1fa   : > { %v3054_v18 = vpop.f32.mrb[11].mxu0  ;;  %v3473_v4 = vmax.f32 %v3442_v19, %v3458_v25  ;;  %3429 = vst.msk [vmem:[#allocation2 + $0x18] sm:$0xff] %vm742_vm2, %v3413_v20  ;;  %v3193_v27 = vadd.f32 %v4537_v63, %v5939_v58 }
 0x1fb   : > { %v4539_v32 = vadd.f32 %v3054_v18, %v5926_v1  ;;  %v3958_v35 = vpack.c.bf16 %v3195_v57, %v3195_v57  ;;  %v3388_v47 = vmax.f32 %v3195_v57, 0.0  ;;  %v3196_v14 = vadd.f32 %v4538_v44, %v5939_v58 }
 0x1fc   : > { %v3481_v8 = vpack.c.bf16 %v3473_v4, %v3473_v4  ;;  %v3956_v31 = vpack.c.bf16 %v3193_v27, %v3193_v27  ;;  %v3386_v9 = vmax.f32 %v3193_v27, 0.0 }
 0x1fd   : > { %v3194_v42 = vadd.f32 %v4539_v32, %v5939_v58  ;;  %3356 = vst.msk [vmem:[%s5946_s10 + $0x28] sm:$0xf] %vm3345_vm7, %v3958_v35  ;;  %v3959_v1 = vpack.c.bf16 %v3196_v14, %v3196_v14  ;;  %v3389_v46 = vmax.f32 %v3196_v14, 0.0 }
 0x1fe   : > { %3489 = vst.msk [vmem:[%s5985_s13] sm:$0xf] %vm3345_vm7, %v3481_v8  ;;  %3354 = vst.msk [vmem:[%s5946_s10 + $0x20] sm:$0xf] %vm3345_vm7, %v3956_v31  ;;  %v3414_v21 = vmax.f32 %v3386_v9, %v3388_v47  ;;  %v4502_v45 = vpop.f32.mrb[12].mxu0 }
 0x1ff   : > { %v3957_v3 = vpack.c.bf16 %v3194_v42, %v3194_v42  ;;  %v3387_v52 = vmax.f32 %v3194_v42, 0.0  ;;  %3357 = vst.msk [vmem:[%s5946_s10 + $0x2c] sm:$0xf] %vm3345_vm7, %v3959_v1  ;;  %v4540_v10 = vadd.f32 %v4502_v45, %v5928_v60  ;;  %v3067_v16 = vpop.f32.mrb[13].mxu0 }
 0x200   : > { %3430 = vst.msk [vmem:[#allocation2 + $0x20] sm:$0xff] %vm742_vm2, %v3414_v21  ;;  %v4541_v40 = vadd.f32 %v3067_v16, %v5930_v49  ;;  %v4503_v17 = vpop.f32.mrb[14].mxu0 }
 0x201   : > { %3355 = vst.msk [vmem:[%s5946_s10 + $0x24] sm:$0xf] %vm3345_vm7, %v3957_v3  ;;  %v3415_v41 = vmax.f32 %v3387_v52, %v3389_v46  ;;  %v3444_v56 = vld [vmem:[#allocation2 + $0x10] ss:$2 sm:$0xff]  ;;  %v3460_v30 = vld [vmem:[#allocation2 + $0x11] ss:$2 sm:$0xff]  ;;  %v3199_v26 = vadd.f32 %v4540_v10, %v5939_v58  ;;  %v4542_v23 = vadd.f32 %v4503_v17, %v5932_v51 }
 0x202   : > { %v3070_v37 = vpop.f32.mrb[15].mxu0  ;;  %v3474_v60 = vmax.f32 %v3444_v56, %v3460_v30  ;;  %v3197_v7 = vadd.f32 %v4541_v40, %v5939_v58 }
 0x203   : > { %3431 = vst.msk [vmem:[#allocation2 + $0x28] sm:$0xff] %vm742_vm2, %v3415_v41  ;;  %v4543_v48 = vadd.f32 %v3070_v37, %v5934_v53  ;;  %v3962_v36 = vpack.c.bf16 %v3199_v26, %v3199_v26  ;;  %v3392_v49 = vmax.f32 %v3199_v26, 0.0  ;;  %v3200_v11 = vadd.f32 %v4542_v23, %v5939_v58 }
 0x204   : > { %v3482_v6 = vpack.c.bf16 %v3474_v60, %v3474_v60  ;;  %v3960_v15 = vpack.c.bf16 %v3197_v7, %v3197_v7  ;;  %v3390_v33 = vmax.f32 %v3197_v7, 0.0 }
 0x205   : > { %v3198_v51 = vadd.f32 %v4543_v48, %v5939_v58  ;;  %3360 = vst.msk [vmem:[%s5946_s10 + $0x38] sm:$0xf] %vm3345_vm7, %v3962_v36  ;;  %v3963_v0 = vpack.c.bf16 %v3200_v11, %v3200_v11  ;;  %v3393_v61 = vmax.f32 %v3200_v11, 0.0 }
 0x206   : > { %3490 = vst.msk [vmem:[%s5985_s13 + $0x4] sm:$0xf] %vm3345_vm7, %v3482_v6  ;;  %3358 = vst.msk [vmem:[%s5946_s10 + $0x30] sm:$0xf] %vm3345_vm7, %v3960_v15  ;;  %v3416_v53 = vmax.f32 %v3390_v33, %v3392_v49  ;;  %v4346_v59 = vpop.f32.mrb[16].mxu1  ;;  %v4506_v55 = vpop.f32.mrb[16].mxu0 }
 0x207   : > { %v3961_v2 = vpack.c.bf16 %v3198_v51, %v3198_v51  ;;  %v3391_v34 = vmax.f32 %v3198_v51, 0.0  ;;  %3361 = vst.msk [vmem:[%s5946_s10 + $0x3c] sm:$0xf] %vm3345_vm7, %v3963_v0  ;;  %v4544_v5 = vadd.f32 %v4506_v55, %v4346_v59  ;;  %v2113_v39 = vpop.f32.mrb[17].mxu1  ;;  %v3083_v22 = vpop.f32.mrb[17].mxu0 }
 0x208   : > { %3432 = vst.msk [vmem:[#allocation2 + $0x30] sm:$0xff] %vm742_vm2, %v3416_v53  ;;  %v4545_v24 = vadd.f32 %v3083_v22, %v2113_v39  ;;  %v4347_v12 = vpop.f32.mrb[18].mxu1  ;;  %v4507_v29 = vpop.f32.mrb[18].mxu0 }
 0x209   : > { %3359 = vst.msk [vmem:[%s5946_s10 + $0x34] sm:$0xf] %vm3345_vm7, %v3961_v2  ;;  %v3417_v43 = vmax.f32 %v3391_v34, %v3393_v61  ;;  %v3203_v38 = vadd.f32 %v4544_v5, %v5939_v58  ;;  %v4546_v28 = vadd.f32 %v4507_v29, %v4347_v12  ;;  %v2116_v13 = vpop.f32.mrb[19].mxu1  ;;  %v3086_v20 = vpop.f32.mrb[19].mxu0 }
 0x20a   : > { %v3446_v50 = vld [vmem:[#allocation2 + $0x20] ss:$2 sm:$0xff]  ;;  %v3462_v62 = vld [vmem:[#allocation2 + $0x21] ss:$2 sm:$0xff]  ;;  %v3201_v54 = vadd.f32 %v4545_v24, %v5939_v58  ;;  %v4547_v19 = vadd.f32 %v3086_v20, %v2116_v13 }
 0x20b   : > { %v3475_v63 = vmax.f32 %v3446_v50, %v3462_v62  ;;  %3433 = vst.msk [vmem:[#allocation2 + $0x38] sm:$0xff] %vm742_vm2, %v3417_v43  ;;  %v3966_v25 = vpack.c.bf16 %v3203_v38, %v3203_v38  ;;  %v3396_v57 = vmax.f32 %v3203_v38, 0.0  ;;  %v3204_v44 = vadd.f32 %v4546_v28, %v5939_v58 }
 0x20c   : > { %v3964_v4 = vpack.c.bf16 %v3201_v54, %v3201_v54  ;;  %v3394_v27 = vmax.f32 %v3201_v54, 0.0  ;;  %v3202_v32 = vadd.f32 %v4547_v19, %v5939_v58 }
 0x20d   : > { %v3483_v18 = vpack.c.bf16 %v3475_v63, %v3475_v63  ;;  %3364 = vst.msk [vmem:[%s5946_s10 + $0x48] sm:$0xf] %vm3345_vm7, %v3966_v25  ;;  %v3967_v35 = vpack.c.bf16 %v3204_v44, %v3204_v44  ;;  %v3397_v47 = vmax.f32 %v3204_v44, 0.0 }
 0x20e   : > { %3362 = vst.msk [vmem:[%s5946_s10 + $0x40] sm:$0xf] %vm3345_vm7, %v3964_v4  ;;  %v3418_v14 = vmax.f32 %v3394_v27, %v3396_v57  ;;  %v3965_v8 = vpack.c.bf16 %v3202_v32, %v3202_v32  ;;  %v3395_v31 = vmax.f32 %v3202_v32, 0.0  ;;  %v4350_v9 = vpop.f32.mrb[20].mxu1  ;;  %v4510_v42 = vpop.f32.mrb[20].mxu0 }
 0x20f   : > { %3491 = vst.msk [vmem:[%s5985_s13 + $0x8] sm:$0xf] %vm3345_vm7, %v3483_v18  ;;  %3365 = vst.msk [vmem:[%s5946_s10 + $0x4c] sm:$0xf] %vm3345_vm7, %v3967_v35  ;;  %v4548_v1 = vadd.f32 %v4510_v42, %v4350_v9  ;;  %v2129_v46 = vpop.f32.mrb[21].mxu1  ;;  %v3099_v21 = vpop.f32.mrb[21].mxu0 }
 0x210   : > { %3434 = vst.msk [vmem:[#allocation2 + $0x40] sm:$0xff] %vm742_vm2, %v3418_v14  ;;  %v3419_v3 = vmax.f32 %v3395_v31, %v3397_v47  ;;  %v4549_v52 = vadd.f32 %v3099_v21, %v2129_v46  ;;  %v4351_v45 = vpop.f32.mrb[22].mxu1  ;;  %v4511_v10 = vpop.f32.mrb[22].mxu0 }
 0x211   : > { %3363 = vst.msk [vmem:[%s5946_s10 + $0x44] sm:$0xf] %vm3345_vm7, %v3965_v8  ;;  %v3207_v40 = vadd.f32 %v4548_v1, %v5939_v58  ;;  %v4550_v17 = vadd.f32 %v4511_v10, %v4351_v45  ;;  %v2132_v56 = vpop.f32.mrb[23].mxu1  ;;  %v3102_v30 = vpop.f32.mrb[23].mxu0 }
 0x212   : > { %v3448_v16 = vld [vmem:[#allocation2 + $0x30] ss:$2 sm:$0xff]  ;;  %v3464_v41 = vld [vmem:[#allocation2 + $0x31] ss:$2 sm:$0xff]  ;;  %3435 = vst.msk [vmem:[#allocation2 + $0x48] sm:$0xff] %vm742_vm2, %v3419_v3  ;;  %v3205_v23 = vadd.f32 %v4549_v52, %v5939_v58  ;;  %v4551_v37 = vadd.f32 %v3102_v30, %v2132_v56 }
 0x213   : > { %v3476_v26 = vmax.f32 %v3448_v16, %v3464_v41  ;;  %v3970_v60 = vpack.c.bf16 %v3207_v40, %v3207_v40  ;;  %v3400_v7 = vmax.f32 %v3207_v40, 0.0  ;;  %v3208_v48 = vadd.f32 %v4550_v17, %v5939_v58 }
 0x214   : > { %v3968_v49 = vpack.c.bf16 %v3205_v23, %v3205_v23  ;;  %v3398_v11 = vmax.f32 %v3205_v23, 0.0  ;;  %v3206_v6 = vadd.f32 %v4551_v37, %v5939_v58 }
 0x215   : > { %v3484_v36 = vpack.c.bf16 %v3476_v26, %v3476_v26  ;;  %3368 = vst.msk [vmem:[%s5946_s10 + $0x58] sm:$0xf] %vm3345_vm7, %v3970_v60  ;;  %v3971_v15 = vpack.c.bf16 %v3208_v48, %v3208_v48  ;;  %v3401_v33 = vmax.f32 %v3208_v48, 0.0 }
 0x216   : > { %3366 = vst.msk [vmem:[%s5946_s10 + $0x50] sm:$0xf] %vm3345_vm7, %v3968_v49  ;;  %v3420_v51 = vmax.f32 %v3398_v11, %v3400_v7  ;;  %v3969_v0 = vpack.c.bf16 %v3206_v6, %v3206_v6  ;;  %v3399_v61 = vmax.f32 %v3206_v6, 0.0  ;;  %v4354_v53 = vpop.f32.mrb[24].mxu1  ;;  %v4514_v2 = vpop.f32.mrb[24].mxu0 }
 0x217   : > { %3492 = vst.msk [vmem:[%s5985_s13 + $0xc] sm:$0xf] %vm3345_vm7, %v3484_v36  ;;  %3369 = vst.msk [vmem:[%s5946_s10 + $0x5c] sm:$0xf] %vm3345_vm7, %v3971_v15  ;;  %v4552_v34 = vadd.f32 %v4514_v2, %v4354_v53  ;;  %v2145_v59 = vpop.f32.mrb[25].mxu1  ;;  %v3115_v55 = vpop.f32.mrb[25].mxu0 }
 0x218   : > { %3436 = vst.msk [vmem:[#allocation2 + $0x50] sm:$0xff] %vm742_vm2, %v3420_v51  ;;  %v3421_v5 = vmax.f32 %v3399_v61, %v3401_v33  ;;  %v4553_v39 = vadd.f32 %v3115_v55, %v2145_v59  ;;  %v4355_v22 = vpop.f32.mrb[26].mxu1  ;;  %v4515_v43 = vpop.f32.mrb[26].mxu0 }
 0x219   : > { %3367 = vst.msk [vmem:[%s5946_s10 + $0x54] sm:$0xf] %vm3345_vm7, %v3969_v0  ;;  %v3450_v24 = vld [vmem:[#allocation2 + $0x40] ss:$2 sm:$0xff]  ;;  %v3466_v12 = vld [vmem:[#allocation2 + $0x41] ss:$2 sm:$0xff]  ;;  %v3211_v29 = vadd.f32 %v4552_v34, %v5939_v58  ;;  %v4554_v50 = vadd.f32 %v4515_v43, %v4355_v22 }
 0x21a   : > { %v2148_v62 = vpop.f32.mrb[27].mxu1  ;;  %v3118_v38 = vpop.f32.mrb[27].mxu0  ;;  %v3477_v28 = vmax.f32 %v3450_v24, %v3466_v12  ;;  %3437 = vst.msk [vmem:[#allocation2 + $0x58] sm:$0xff] %vm742_vm2, %v3421_v5  ;;  %v3209_v13 = vadd.f32 %v4553_v39, %v5939_v58 }
 0x21b   : > { %v4555_v20 = vadd.f32 %v3118_v38, %v2148_v62  ;;  %v3974_v63 = vpack.c.bf16 %v3211_v29, %v3211_v29  ;;  %v3404_v54 = vmax.f32 %v3211_v29, 0.0  ;;  %v3212_v19 = vadd.f32 %v4554_v50, %v5939_v58 }
 0x21c   : > { %v3485_v25 = vpack.c.bf16 %v3477_v28, %v3477_v28  ;;  %v3972_v57 = vpack.c.bf16 %v3209_v13, %v3209_v13  ;;  %v3402_v44 = vmax.f32 %v3209_v13, 0.0 }
 0x21d   : > { %v3210_v18 = vadd.f32 %v4555_v20, %v5939_v58  ;;  %3372 = vst.msk [vmem:[%s5946_s10 + $0x68] sm:$0xf] %vm3345_vm7, %v3974_v63  ;;  %v3975_v4 = vpack.c.bf16 %v3212_v19, %v3212_v19  ;;  %v3405_v27 = vmax.f32 %v3212_v19, 0.0 }
 0x21e   : > { %3493 = vst.msk [vmem:[%s5985_s13 + $0x10] sm:$0xf] %vm3345_vm7, %v3485_v25  ;;  %3370 = vst.msk [vmem:[%s5946_s10 + $0x60] sm:$0xf] %vm3345_vm7, %v3972_v57  ;;  %v3422_v32 = vmax.f32 %v3402_v44, %v3404_v54  ;;  %v4358_v14 = vpop.f32.mrb[28].mxu1  ;;  %v4518_v8 = vpop.f32.mrb[28].mxu0 }
 0x21f   : > { %v3973_v35 = vpack.c.bf16 %v3210_v18, %v3210_v18  ;;  %v3403_v47 = vmax.f32 %v3210_v18, 0.0  ;;  %3373 = vst.msk [vmem:[%s5946_s10 + $0x6c] sm:$0xf] %vm3345_vm7, %v3975_v4  ;;  %v4556_v31 = vadd.f32 %v4518_v8, %v4358_v14  ;;  %v2161_v9 = vpop.f32.mrb[29].mxu1  ;;  %v3131_v42 = vpop.f32.mrb[29].mxu0 }
 0x220   : > { %3438 = vst.msk [vmem:[#allocation2 + $0x60] sm:$0xff] %vm742_vm2, %v3422_v32  ;;  %v4557_v46 = vadd.f32 %v3131_v42, %v2161_v9  ;;  %v4359_v21 = vpop.f32.mrb[30].mxu1  ;;  %v4519_v3 = vpop.f32.mrb[30].mxu0 }
 0x221   : > { %3371 = vst.msk [vmem:[%s5946_s10 + $0x64] sm:$0xf] %vm3345_vm7, %v3973_v35  ;;  %v3423_v1 = vmax.f32 %v3403_v47, %v3405_v27  ;;  %v3452_v52 = vld [vmem:[#allocation2 + $0x50] ss:$2 sm:$0xff]  ;;  %v3468_v45 = vld [vmem:[#allocation2 + $0x51] ss:$2 sm:$0xff]  ;;  %v3215_v10 = vadd.f32 %v4556_v31, %v5939_v58  ;;  %v4558_v16 = vadd.f32 %v4519_v3, %v4359_v21 }
 0x222   : > { %v2164_v41 = vpop.f32.mrb[31].mxu1  ;;  %v3134_v40 = vpop.f32.mrb[31].mxu0  ;;  %v3478_v17 = vmax.f32 %v3452_v52, %v3468_v45  ;;  %v3213_v56 = vadd.f32 %v4557_v46, %v5939_v58 }
 0x223   : > { %3439 = vst.msk [vmem:[#allocation2 + $0x68] sm:$0xff] %vm742_vm2, %v3423_v1  ;;  %v4559_v30 = vadd.f32 %v3134_v40, %v2164_v41  ;;  %v3978_v26 = vpack.c.bf16 %v3215_v10, %v3215_v10  ;;  %v3408_v23 = vmax.f32 %v3215_v10, 0.0  ;;  %v3216_v37 = vadd.f32 %v4558_v16, %v5939_v58 }
 0x224   : > { %v3486_v60 = vpack.c.bf16 %v3478_v17, %v3478_v17  ;;  %v3976_v7 = vpack.c.bf16 %v3213_v56, %v3213_v56  ;;  %v3406_v48 = vmax.f32 %v3213_v56, 0.0 }
 0x225   : > { %v3214_v36 = vadd.f32 %v4559_v30, %v5939_v58  ;;  %3376 = vst.msk [vmem:[%s5946_s10 + $0x78] sm:$0xf] %vm3345_vm7, %v3978_v26  ;;  %v3979_v49 = vpack.c.bf16 %v3216_v37, %v3216_v37  ;;  %v3409_v11 = vmax.f32 %v3216_v37, 0.0 }
 0x226   : > { %3494 = vst.msk [vmem:[%s5985_s13 + $0x14] sm:$0xf] %vm3345_vm7, %v3486_v60  ;;  %3374 = vst.msk [vmem:[%s5946_s10 + $0x70] sm:$0xf] %vm3345_vm7, %v3976_v7  ;;  %v3424_v6 = vmax.f32 %v3406_v48, %v3408_v23 }
 0x227   : > { %v3977_v15 = vpack.c.bf16 %v3214_v36, %v3214_v36  ;;  %v3407_v33 = vmax.f32 %v3214_v36, 0.0  ;;  %3377 = vst.msk [vmem:[%s5946_s10 + $0x7c] sm:$0xf] %vm3345_vm7, %v3979_v49 }
 0x228   : > { %3440 = vst.msk [vmem:[#allocation2 + $0x70] sm:$0xff] %vm742_vm2, %v3424_v6 }
 0x229   : > { %3375 = vst.msk [vmem:[%s5946_s10 + $0x74] sm:$0xf] %vm3345_vm7, %v3977_v15  ;;  %v3425_v58 = vmax.f32 %v3407_v33, %v3409_v11 }
 0x22a   : > { %v3454_v51 = vld [vmem:[#allocation2 + $0x60] ss:$2 sm:$0xff]  ;;  %v3470_v0 = vld [vmem:[#allocation2 + $0x61] ss:$2 sm:$0xff] }
 0x22b   : > { %v3479_v61 = vmax.f32 %v3454_v51, %v3470_v0  ;;  %3441 = vst.msk [vmem:[#allocation2 + $0x78] sm:$0xff] %vm742_vm2, %v3425_v58 }
 0x22d   : > { %v3487_v53 = vpack.c.bf16 %v3479_v61, %v3479_v61 }
 0x22f   : > { %3495 = vst.msk [vmem:[%s5985_s13 + $0x18] sm:$0xf] %vm3345_vm7, %v3487_v53 }
 0x232   : > { %v3456_v2 = vld [vmem:[#allocation2 + $0x70] ss:$2 sm:$0xff]  ;;  %v3472_v34 = vld [vmem:[#allocation2 + $0x71] ss:$2 sm:$0xff] }
 0x233   : > { %v3480_v59 = vmax.f32 %v3456_v2, %v3472_v34 }
 0x235   : > { %v3488_v55 = vpack.c.bf16 %v3480_v59, %v3480_v59 }
 0x237   : > { %3496 = vst.msk [vmem:[%s5985_s13 + $0x1c] sm:$0xf] %vm3345_vm7, %v3488_v55 }
 0x238 PF: > { %s15_s15 = sadd.s32 1, %s4860_s15  }
 0x239   : > { %p12_p4 = scmp.ge.s32.totalorder %s15_s15, 6  }
 0x23b   :  { %14 = sbr.rel (!%p12_p4) target bundleno = 1 (0x1), region = 97 }

// kernel: sr_loss.15
= control target key start
LH: loop header
LB: loop body
LE: loop exit
PB: predicated region body
PF: predicated region fallthrough
CT: control target
= control target key end

     0   :  { %s2146_s12 = smov 0   ;;  %s2567_s0 = inlined_call_operand.vmem [shape: bf16[4,10,10,64], index: 0, kind: input, shape index: {}]   ;;  %s2568_s1 = inlined_call_operand.vmem [shape: bf16[3,3,64,128], index: 1, kind: input, shape index: {}]   ;;  %s2569_s2 = inlined_call_operand.vmem [shape: f32[1,128], index: 2, kind: input, shape index: {}]   ;;  %s2570_s3 = inlined_call_operand.vmem [shape: bf16[4,8,8,128], index: 3, kind: output, shape index: {}]  }
   0x1 LB: > { %s1568_s13 = sadd.s32 4294967295, %s2124_s12   ;;  %p1572_p0 = scmp.ge.s32.totalorder %s2124_s12, 1  ;;  %s2124_s12 = sphi %s2146_s12, %s13_s12  }
   0x2   : > { %p137_p1 = scmp.lt.s32.totalorder %s2124_s12, 5 }
   0x4   : > { %p138_p2 = pnand %p1572_p0, %p137_p1 }
   0x5   : > { %v2073_v0 = vld [vmem:[%s2568_s1 + $0x20] sm:$0xff] (!%p138_p2)   ;;  %p161_p3 = scmp.lt.s32.totalorder (!%p138_p2), %s1568_s13, 3  ;;  %v2075_v2 = vld [vmem:[%s2568_s1 + $0x28] sm:$0xff] (!%p138_p2)   ;;  %v2077_v4 = vld [vmem:[%s2568_s1 + $0x30] sm:$0xff] (!%p138_p2)   ;;  %vm200_vm0 = vsmask.f32 (!%p138_p2), 3328 }
   0x6   : > { %141 = sbr.rel (%p138_p2) target bundleno = 327 (0x147), region = 32  ;;  %v2074_v1 = vld [vmem:[%s2568_s1 + $0x80] sm:$0xff] (!%p138_p2)   ;;  %1848 = vmatprep.subr.bf16.mxu1 (!%p138_p2), %v2073_v0  ;;  %v2076_v3 = vld [vmem:[%s2568_s1 + $0x88] sm:$0xff] (!%p138_p2)   ;;  %v2078_v5 = vld [vmem:[%s2568_s1 + $0x90] sm:$0xff] (!%p138_p2)   ;;  %vm201_vm1 = vsmask.f32 (!%p138_p2), 7440 }
   0x7   : > { %1912 = vmatprep.subr.bf16.mxu0 (!%p138_p2), %v2074_v1  ;;  %1849 = vmatpush3.bf16.msra.mxu1 (!%p138_p2), %v2073_v0  ;;  %v2079_v6 = vld [vmem:[%s2568_s1 + $0x38] sm:$0xff] (!%p138_p2)   ;;  %v2207_v22 = vld [vmem:[%s2568_s1] sm:$0xff] (!%p138_p2)   ;;  %vm2231_vm2 = vmor (!%p138_p2), %vm200_vm0, %vm201_vm1  ;;  %vm360_vm3 = vcmask (!%p138_p2), 523264   ;;  %vm567_vm4 = vcmask (!%p138_p2), 1042432   ;;  %vm568_vm5 = vcmask (!%p138_p2), 1046532  }
   0x8   : > { %1913 = vmatpush3.bf16.msra.mxu0 (!%p138_p2), %v2074_v1  ;;  %1850 = vmatprep.subr.bf16.mxu1 (!%p138_p2), %v2075_v2  ;;  %v2080_v10 = vld [vmem:[%s2568_s1 + $0x98] sm:$0xff] (!%p138_p2)   ;;  %v2212_v23 = vld [vmem:[%s2568_s1 + $0xa0] sm:$0xff] (!%p138_p2)   ;;  %vm2328_vm6 = vmor (!%p138_p2), %vm567_vm4, %vm568_vm5 }
   0x9   : > { %1914 = vmatprep.subr.bf16.mxu0 (!%p138_p2), %v2076_v3 }
   0xb   : > { %1851 = vmatpush3.bf16.msra.mxu1 (!%p138_p2), %v2075_v2 }
   0xc   : > { %1915 = vmatpush3.bf16.msra.mxu0 (!%p138_p2), %v2076_v3  ;;  %1852 = vmatprep.subr.bf16.mxu1 (!%p138_p2), %v2077_v4 }
   0xd   : > { %s2576_s13 = smov (!%p161_p3, %s1568_s13), 3  ;;  %1916 = vmatprep.subr.bf16.mxu0 %v2078_v5 }
   0xe   : > { %s2064_s24 = smul.u32 80, %s2576_s13  ;;  %s1752_s17 = sshll.u32 %s2576_s13, 5 }
   0xf   : > { %1853 = vmatpush3.bf16.msra.mxu1 %v2077_v4  ;;  %s170_s20 = scalar_lea.vmem %s2570_s3, %s1752_s17 }
  0x10   : > { %s2178_s29 = scalar_lea.vmem %s2567_s0, %s2064_s24  ;;  %1917 = vmatpush3.bf16.msra.mxu0 %v2078_v5  ;;  %1854 = vmatprep.subr.bf16.mxu1 %v2079_v6 }
  0x11   : > { %v2184_v7 = vld [vmem:[%s2178_s29] sm:$0xf]  ;;  %v2187_v8 = vld [vmem:[%s2178_s29 + $0x4] sm:$0x1]  ;;  %v2190_v9 = vld [vmem:[%s2178_s29 + $0x8] sm:$0xf]  ;;  %1918 = vmatprep.subr.bf16.mxu0 %v2080_v10 }
  0x12   : > { %v2196_v11 = vld [vmem:[%s2178_s29 + $0xc] sm:$0x1]  ;;  %v204_v12 = vshrl.u32 %v2184_v7, 16  ;;  %v207_v13 = vshll.u32 %v2184_v7, 16  ;;  %v213_v14 = vshll.u32 %v2187_v8, 16  ;;  %v218_v15 = vshrl.u32 %v2190_v9, 16 }
  0x13   : > { %v221_v16 = vshll.u32 %v2190_v9, 16  ;;  %v227_v17 = vshll.u32 %v2196_v11, 16  ;;  %v2215_v26 = vld [vmem:[%s2178_s29 + $0x10] sm:$0xf]  ;;  %v2218_v27 = vld [vmem:[%s2178_s29 + $0x14] sm:$0x1]  ;;  %1855 = vmatpush3.bf16.msra.mxu1 %v2079_v6 }
  0x14   : > { %v206_v18 = vrot.slane %v204_v12, 4  ;;  %v209_v19 = vrot.slane %v207_v13, 5  ;;  %v215_v20 = vrot.slane %v213_v14, 5  ;;  %v220_v21 = vrot.slane %v218_v15, 4  ;;  %v2221_v29 = vld [vmem:[%s2178_s29 + $0x18] sm:$0xf]  ;;  %1919 = vmatpush3.bf16.msra.mxu0 %v2080_v10  ;;  %1864 = vmatprep.subr.bf16.mxu1 %v2207_v22 }
  0x15   : > { %v223_v24 = vrot.slane %v221_v16, 5  ;;  %v229_v25 = vrot.slane %v227_v17, 5  ;;  %v2224_v30 = vld [vmem:[%s2178_s29 + $0x1c] sm:$0x1]  ;;  %v2227_v31 = vld [vmem:[%s2178_s29 + $0x20] sm:$0xf]  ;;  %1928 = vmatprep.subr.bf16.mxu0 %v2212_v23 }
  0x16   : > { %v210_v28 = vor.u32 %v209_v19, %v206_v18  ;;  %v2236_v34 = vld [vmem:[%s2178_s29 + $0x24] sm:$0x1]  ;;  %v232_v35 = vshrl.u32 %v2215_v26, 16  ;;  %v235_v36 = vshll.u32 %v2215_v26, 16  ;;  %v241_v37 = vshll.u32 %v2218_v27, 16  ;;  %v2083_v18 = vld [vmem:[%s2568_s1 + $0x8] sm:$0xff]  }
  0x17   : > { %v224_v33 = vor.u32 %v223_v24, %v220_v21  ;;  %v246_v39 = vshrl.u32 %v2221_v29, 16  ;;  %v249_v40 = vshll.u32 %v2221_v29, 16  ;;  %v255_v41 = vshll.u32 %v2224_v30, 16  ;;  %v2254_v57 = vld [vmem:[%s2178_s29 + $0x28] sm:$0xf] }
  0x18   : > { %v211_v38 = vrot.slane %v210_v28, 4  ;;  %v234_v43 = vrot.slane %v232_v35, 4  ;;  %v237_v44 = vrot.slane %v235_v36, 5  ;;  %v243_v46 = vrot.slane %v241_v37, 5  ;;  %v2257_v61 = vld [vmem:[%s2178_s29 + $0x2c] sm:$0x1] }
  0x19   : > { %v225_v42 = vrot.slane %v224_v33, 4  ;;  %v248_v47 = vrot.slane %v246_v39, 4  ;;  %v251_v48 = vrot.slane %v249_v40, 5  ;;  %v260_v51 = vshrl.u32 %v2227_v31, 16  ;;  %v2269_v13 = vld [vmem:[%s2178_s29 + $0x30] sm:$0xf] }
  0x1a   : > { %v216_v45 = vsel %vm2231_vm2, %v211_v38, %v215_v20  ;;  %v238_v50 = vor.u32 %v237_v44, %v234_v43  ;;  %v263_v52 = vshll.u32 %v2227_v31, 16  ;;  %v257_v55 = vrot.slane %v255_v41, 5  ;;  %v2272_v14 = vld [vmem:[%s2178_s29 + $0x34] sm:$0x1]  ;;  %v2084_v20 = vld [vmem:[%s2568_s1 + $0xa8] sm:$0xff]  }
  0x1b   : > { %v230_v49 = vsel %vm2231_vm2, %v225_v42, %v229_v25  ;;  %v252_v54 = vor.u32 %v251_v48, %v248_v47  ;;  %v269_v56 = vshll.u32 %v2236_v34, 16  ;;  %v262_v59 = vrot.slane %v260_v51, 4  ;;  %v2292_v36 = vld [vmem:[%s2178_s29 + $0x38] sm:$0xf]  ;;  %v2295_v37 = vld [vmem:[%s2178_s29 + $0x3c] sm:$0x1] }
  0x1c   : > { %v1584_v53 = vcombine.low %v216_v45, %v230_v49  ;;  %v239_v58 = vrot.slane %v238_v50, 4  ;;  %v265_v60 = vrot.slane %v263_v52, 5  ;;  %v274_v0 = vshrl.u32 %v2254_v57, 16  ;;  %v2298_v38 = vld [vmem:[%s2178_s29 + $0x40] sm:$0xf]  ;;  %v2085_v40 = vld [vmem:[%s2568_s1 + $0x10] sm:$0xff]  }
  0x1d   : > { %v253_v62 = vrot.slane %v252_v54, 4  ;;  %v271_v63 = vrot.slane %v269_v56, 5  ;;  %v277_v3 = vshll.u32 %v2254_v57, 16  ;;  %v283_v4 = vshll.u32 %v2257_v61, 16  ;;  %v2305_v44 = vld [vmem:[%s2178_s29 + $0x44] sm:$0x1] }
  0x1e   : > { %1856 = vmatprep.mubr.msk.bf16.mxu1 %vm360_vm3, %v1584_v53  ;;  %v244_v1 = vsel %vm2231_vm2, %v239_v58, %v243_v46  ;;  %v266_v2 = vor.u32 %v265_v60, %v262_v59  ;;  %v576_v5 = vrot.slane %v2196_v11, 5  ;;  %v276_v12 = vrot.slane %v274_v0, 4  ;;  %v2086_v54 = vld [vmem:[%s2568_s1 + $0xb0] sm:$0xff]  }
  0x1f   : > { %v258_v6 = vsel %vm2231_vm2, %v253_v62, %v257_v55  ;;  %v1664_v10 = vcombine.low %v230_v49, %v244_v1  ;;  %v580_v17 = vrot.slane %v2218_v27, 5  ;;  %v279_v19 = vrot.slane %v277_v3, 5 }
  0x20   : > { %v267_v15 = vrot.slane %v266_v2, 4  ;;  %v2274_v16 = vcombine.low %v244_v1, %v258_v6  ;;  %v285_v21 = vrot.slane %v283_v4, 5  ;;  %v288_v24 = vshrl.u32 %v2269_v13, 16 }
  0x21   : > { %1920 = vmatprep.mubr.msk.bf16.mxu0 %vm360_vm3, %v1664_v10  ;;  %v291_v25 = vshll.u32 %v2269_v13, 16  ;;  %v297_v28 = vshll.u32 %v2272_v14, 16  ;;  %v280_v35 = vor.u32 %v279_v19, %v276_v12  ;;  %v302_v46 = vshrl.u32 %v2292_v36, 16 }
  0x22   : > { %v272_v33 = vsel %vm2231_vm2, %v267_v15, %v271_v63  ;;  %1857 = vmatmul.mubr.msk.bf16.vlgmr.msra.gmra.mrb[0].mxu1 %vm360_vm3, %v2274_v16  ;;  %v290_v41 = vrot.slane %v288_v24, 4  ;;  %v305_v47 = vshll.u32 %v2292_v36, 16  ;;  %v311_v48 = vshll.u32 %v2295_v37, 16  ;;  %v2088_v15 = vld [vmem:[%s2568_s1 + $0xb8] sm:$0xff]  }
  0x23   : > { %v1665_v39 = vcombine.low %v258_v6, %v272_v33  ;;  %1865 = vmatpush3.bf16.msra.mxu1 %v2207_v22  ;;  %v293_v42 = vrot.slane %v291_v25, 5  ;;  %v299_v43 = vrot.slane %v297_v28, 5  ;;  %v281_v45 = vrot.slane %v280_v35, 4 }
  0x24   : > { %1866 = vmatprep.subr.bf16.mxu1 %v2083_v18  ;;  %v857_v49 = vshrl.u32 %v2298_v38, 16  ;;  %v860_v50 = vshll.u32 %v2298_v38, 16  ;;  %v866_v51 = vshll.u32 %v2305_v44, 16  ;;  %v584_v52 = vrot.slane %v2224_v30, 5 }
  0x25   : > { %1921 = vmatmul.mubr.msk.bf16.vlgmr.msra.gmra.mrb[0].mxu0 %vm360_vm3, %v1665_v39  ;;  %v294_v22 = vor.u32 %v293_v42, %v290_v41  ;;  %v286_v53 = vsel %vm2231_vm2, %v281_v45, %v285_v21  ;;  %v304_v55 = vrot.slane %v302_v46, 4  ;;  %v307_v56 = vrot.slane %v305_v47, 5  ;;  %v2394_v46 = vld [vmem:[%s2178_s29 + $0x48] sm:$0xf] }
  0x26   : > { %1929 = vmatpush3.bf16.msra.mxu0 %v2212_v23  ;;  %v2321_v58 = vcombine.low %v272_v33, %v286_v53  ;;  %v859_v60 = vrot.slane %v857_v49, 4  ;;  %v862_v62 = vrot.slane %v860_v50, 5  ;;  %v2087_v23 = vld [vmem:[%s2568_s1 + $0x18] sm:$0xff]   ;;  %v313_v63 = vrot.slane %v311_v48, 5 }
  0x27   : > { %1930 = vmatprep.subr.bf16.mxu0 %v2084_v20  ;;  %1867 = vmatpush3.bf16.msra.mxu1 %v2083_v18  ;;  %v295_v59 = vrot.slane %v294_v22, 4  ;;  %v308_v30 = vor.u32 %v307_v56, %v304_v55  ;;  %v1609_v1 = vrot.slane %v2190_v9, 9  ;;  %v868_v4 = vrot.slane %v866_v51, 5  ;;  %v2094_v56 = vld [vmem:[%s2568_s1 + $0xc8] sm:$0xff]  }
  0x28   : > { %1868 = vmatprep.subr.bf16.mxu1 %v2085_v40  ;;  %1860 = vmatprep.mubr.msk.bf16.mxu1 %vm360_vm3, %v2321_v58  ;;  %v863_v3 = vor.u32 %v862_v62, %v859_v60  ;;  %v1610_v6 = vrot.slane %v2215_v26, 9  ;;  %v1611_v21 = vrot.slane %v2221_v29, 9  ;;  %v588_v24 = vrot.slane %v2236_v34, 5  ;;  %v2090_v34 = vld [vmem:[%s2568_s1 + $0x40] sm:$0xff]  }
  0x29   : > { %v300_v2 = vsel %vm2231_vm2, %v295_v59, %v299_v43  ;;  %v309_v12 = vrot.slane %v308_v30, 4  ;;  %v2345_v19 = vsel %vm2328_vm6, %v1609_v1, %v576_v5  ;;  %v1612_v11 = vrot.slane %v2227_v31, 9  ;;  %v2096_v30 = vld [vmem:[%s2568_s1 + $0x50] sm:$0xff]  }
  0x2a   : > { %1931 = vmatpush3.bf16.msra.mxu0 %v2084_v20  ;;  %v1666_v10 = vcombine.low %v286_v53, %v300_v2  ;;  %v864_v18 = vrot.slane %v863_v3, 4  ;;  %v2351_v20 = vsel %vm2328_vm6, %v1610_v6, %v580_v17  ;;  %v1596_v17 = vcombine.low %v2184_v7, %v2190_v9 }
  0x2b   : > { %1932 = vmatprep.subr.bf16.mxu0 %v2086_v54  ;;  %1869 = vmatpush3.bf16.msra.mxu1 %v2085_v40  ;;  %v314_v25 = vsel %vm2231_vm2, %v309_v12, %v313_v63  ;;  %v1685_v33 = vcombine.low %v2345_v19, %v2351_v20  ;;  %v572_v35 = vrot.slane %v2187_v8, 5  ;;  %v2378_v39 = vsel %vm2328_vm6, %v1611_v21, %v584_v52  ;;  %v2091_v40 = vld [vmem:[%s2568_s1 + $0xc0] sm:$0xff]   ;;  %v2100_v21 = vld [vmem:[%s2568_s1 + $0xd8] sm:$0xff]  }
  0x2c   : > { %1924 = vmatprep.mubr.msk.bf16.mxu0 %vm360_vm3, %v1666_v10  ;;  %1870 = vmatprep.subr.bf16.mxu1 %v2087_v23  ;;  %v2359_v5 = vcombine.low %v300_v2, %v314_v25  ;;  %v2363_v27 = vsel %vm2231_vm2, %v864_v18, %v868_v4  ;;  %v1613_v41 = vrot.slane %v2254_v57, 9  ;;  %v2387_v8 = vsel %vm2328_vm6, %v1612_v11, %v588_v24  ;;  %v2097_v2 = vld [vmem:[%s2568_s1 + $0xd0] sm:$0xff]   ;;  %v2102_v11 = vld [vmem:[%s2568_s1 + $0xe0] sm:$0xff]  }
  0x2d   : > { %v1667_v28 = vcombine.low %v314_v25, %v2363_v27  ;;  %v592_v42 = vrot.slane %v2257_v61, 5  ;;  %v1614_v43 = vrot.slane %v2269_v13, 9  ;;  %v596_v45 = vrot.slane %v2272_v14, 5  ;;  %v2093_v61 = vld [vmem:[%s2568_s1 + $0x48] sm:$0xff]   ;;  %v2101_v25 = vld [vmem:[%s2568_s1 + $0x60] sm:$0xff]  }
  0x2e   : > { %1933 = vmatpush3.bf16.msra.mxu0 %v2086_v54  ;;  %1861 = vmatmul.mubr.msk.bf16.gmra.mrb[4].mxu1 %vm360_vm3, %v2359_v5  ;;  %v1686_v47 = vcombine.low %v2378_v39, %v2387_v8  ;;  %v1597_v48 = vcombine.low %v2215_v26, %v2221_v29  ;;  %v2405_v14 = vld [vmem:[%s2178_s29 + $0x4c] sm:$0x1]  ;;  %v1615_v22 = vrot.slane %v2292_v36, 9  ;;  %v600_v49 = vrot.slane %v2295_v37, 5 }
  0x2f   : > { %1934 = vmatprep.subr.bf16.mxu0 %v2088_v15  ;;  %1925 = vmatmul.mubr.msk.bf16.gmra.mrb[4].mxu0 %vm360_vm3, %v1667_v28  ;;  %v593_v50 = vsel %vm2328_vm6, %v1613_v41, %v592_v42  ;;  %v2413_v51 = vsel %vm2328_vm6, %v1614_v43, %v596_v45  ;;  %v1676_v52 = vrot.slane %v2298_v38, 9  ;;  %v1234_v53 = vshrl.u32 %v2394_v46, 16  ;;  %v2109_v41 = vld [vmem:[%s2568_s1 + $0xf8] sm:$0xff]   ;;  %v2111_v42 = vld [vmem:[%s2568_s1 + $0x100] sm:$0xff]  }
  0x30   : > { %1871 = vmatpush3.bf16.msra.mxu1 %v2087_v23  ;;  %1872 = vmatprep.mubr.msk.bf16.mxu1 %vm360_vm3, %v1596_v17  ;;  %v996_v54 = vrot.slane %v2305_v44, 5  ;;  %v1237_v55 = vshll.u32 %v2394_v46, 16  ;;  %v1598_v37 = vcombine.low %v2227_v31, %v2254_v57  ;;  %v1687_v60 = vcombine.low %v593_v50, %v2413_v51  ;;  %v2103_v17 = vld [vmem:[%s2568_s1 + $0x68] sm:$0xff]  }
  0x31   : > { %1880 = vmatprep.subr.bf16.mxu1 %v2090_v34  ;;  %1936 = vmatprep.mubr.msk.bf16.mxu0 %vm360_vm3, %v1685_v33  ;;  %v1236_v59 = vrot.slane %v1234_v53, 4  ;;  %v1608_v62 = vrot.slane %v2184_v7, 9  ;;  %v1243_v44 = vshll.u32 %v2405_v14, 16  ;;  %v601_v63 = vsel %vm2328_vm6, %v1615_v22, %v600_v49  ;;  %v2106_v33 = vld [vmem:[%s2568_s1 + $0xf0] sm:$0xff]  }
  0x32   : > { %1935 = vmatpush3.bf16.msra.mxu0 %v2088_v15  ;;  %v1239_v23 = vrot.slane %v1237_v55, 5  ;;  %v2436_v1 = vsel %vm2328_vm6, %v1676_v52, %v996_v54  ;;  %v1599_v4 = vcombine.low %v2269_v13, %v2292_v36  ;;  %v2099_v15 = vld [vmem:[%s2568_s1 + $0x58] sm:$0xff]   ;;  %v2484_v28 = vcombine.low %v2387_v8, %v593_v50  ;;  %v1749_v54 = vld [vmem:[%s2569_s2] ss:$0 sm:$0xff] }
  0x33   : > { %1944 = vmatprep.subr.bf16.mxu0 %v2091_v40  ;;  %v2442_v3 = vrot.slane %v1243_v44, 5  ;;  %v573_v6 = vsel %vm2328_vm6, %v1608_v62, %v572_v35  ;;  %v1688_v12 = vcombine.low %v601_v63, %v2436_v1  ;;  %v1627_v35 = vcombine.low %v2413_v51, %v601_v63 }
  0x34   : > { %v1240_v7 = vor.u32 %v1239_v23, %v1236_v59  ;;  %v1624_v24 = vcombine.low %v573_v6, %v2345_v19  ;;  %v2474_v19 = vcombine.low %v2351_v20, %v2378_v39  ;;  %v2105_v20 = vld [vmem:[%s2568_s1 + $0x70] sm:$0xff]   ;;  %v1705_v39 = vcombine.low %v2298_v38, %v2394_v46 }
  0x35   : > { %v1644_v8 = vcombine.low %v2190_v9, %v2215_v26  ;;  %v1645_v9 = vcombine.low %v2221_v29, %v2227_v31  ;;  %v2113_v26 = vld [vmem:[%s2568_s1 + $0x108] sm:$0xff]   ;;  %v1646_v43 = vcombine.low %v2254_v57, %v2269_v13  ;;  %v2115_v29 = vld [vmem:[%s2568_s1 + $0x110] sm:$0xff]   ;;  %v1647_v31 = vcombine.low %v2292_v36, %v2298_v38 }
  0x36   : > { %1873 = vmatmul.mubr.msk.bf16.vlgmr.msra.gmra.mrb[0].mxu1 %vm360_vm3, %v1597_v48  ;;  %v2449_v10 = vrot.slane %v1240_v7, 4  ;;  %v1731_v57 = vrot.slane %v2394_v46, 9  ;;  %v1361_v13 = vrot.slane %v2405_v14, 5 }
  0x37   : > { %1881 = vmatpush3.bf16.msra.mxu1 %v2090_v34  ;;  %1937 = vmatmul.mubr.msk.bf16.vlgmr.msra.gmra.mrb[0].mxu0 %vm360_vm3, %v1686_v47  ;;  %v2104_v34 = vld [vmem:[%s2568_s1 + $0xe8] sm:$0xff]  }
  0x38   : > { %1945 = vmatpush3.bf16.msra.mxu0 %v2091_v40  ;;  %1882 = vmatprep.subr.bf16.mxu1 %v2093_v61  ;;  %v1246_v18 = vsel %vm2231_vm2, %v2449_v10, %v2442_v3  ;;  %v2108_v40 = vld [vmem:[%s2568_s1 + $0x78] sm:$0xff]   ;;  %v1362_v36 = vsel %vm2328_vm6, %v1731_v57, %v1361_v13 }
  0x39   : > { %1946 = vmatprep.subr.bf16.mxu0 %v2094_v56  ;;  %1876 = vmatprep.mubr.msk.bf16.mxu1 %vm360_vm3, %v1598_v37  ;;  %v1740_v32 = vcombine.low %v2436_v1, %v1362_v36 }
  0x3a   : > { %1940 = vmatprep.mubr.msk.bf16.mxu0 %vm360_vm3, %v1687_v60 }
  0x3b   : > { %1883 = vmatpush3.bf16.msra.mxu1 %v2093_v61 }
  0x3c   : > { %1947 = vmatpush3.bf16.msra.mxu0 %v2094_v56  ;;  %1884 = vmatprep.subr.bf16.mxu1 %v2096_v30 }
  0x3d   : > { %1948 = vmatprep.subr.bf16.mxu0 %v2097_v2 }
  0x3e   : > { %1877 = vmatmul.mubr.msk.bf16.gmra.mrb[4].mxu1 %vm360_vm3, %v1599_v4 }
  0x3f   : > { %1885 = vmatpush3.bf16.msra.mxu1 %v2096_v30  ;;  %1941 = vmatmul.mubr.msk.bf16.gmra.mrb[4].mxu0 %vm360_vm3, %v1688_v12 }
  0x40   : > { %1949 = vmatpush3.bf16.msra.mxu0 %v2097_v2  ;;  %1886 = vmatprep.subr.bf16.mxu1 %v2099_v15 }
  0x41   : > { %1950 = vmatprep.subr.bf16.mxu0 %v2100_v21  ;;  %1888 = vmatprep.mubr.msk.bf16.mxu1 %vm360_vm3, %v1624_v24 }
  0x42   : > { %1952 = vmatprep.mubr.msk.bf16.mxu0 %vm360_vm3, %v1597_v48 }
  0x43   : > { %1887 = vmatpush3.bf16.msra.mxu1 %v2099_v15 }
  0x44   : > { %1951 = vmatpush3.bf16.msra.mxu0 %v2100_v21  ;;  %1896 = vmatprep.subr.bf16.mxu1 %v2101_v25 }
  0x45   : > { %1960 = vmatprep.subr.bf16.mxu0 %v2102_v11 }
  0x46   : > { %1889 = vmatmul.mubr.msk.bf16.vlgmr.msra.gmra.mrb[0].mxu1 %vm360_vm3, %v2474_v19 }
  0x47   : > { %1897 = vmatpush3.bf16.msra.mxu1 %v2101_v25  ;;  %1953 = vmatmul.mubr.msk.bf16.vlgmr.msra.gmra.mrb[0].mxu0 %vm360_vm3, %v1598_v37 }
  0x48   : > { %1961 = vmatpush3.bf16.msra.mxu0 %v2102_v11  ;;  %1898 = vmatprep.subr.bf16.mxu1 %v2103_v17 }
  0x49   : > { %1962 = vmatprep.subr.bf16.mxu0 %v2104_v34  ;;  %1892 = vmatprep.mubr.msk.bf16.mxu1 %vm360_vm3, %v2484_v28 }
  0x4a   : > { %1956 = vmatprep.mubr.msk.bf16.mxu0 %vm360_vm3, %v1599_v4 }
  0x4b   : > { %1899 = vmatpush3.bf16.msra.mxu1 %v2103_v17 }
  0x4c   : > { %1963 = vmatpush3.bf16.msra.mxu0 %v2104_v34  ;;  %1900 = vmatprep.subr.bf16.mxu1 %v2105_v20 }
  0x4d   : > { %1964 = vmatprep.subr.bf16.mxu0 %v2106_v33 }
  0x4e   : > { %1893 = vmatmul.mubr.msk.bf16.gmra.mrb[4].mxu1 %vm360_vm3, %v1627_v35 }
  0x4f   : > { %1901 = vmatpush3.bf16.msra.mxu1 %v2105_v20  ;;  %1957 = vmatmul.mubr.msk.bf16.gmra.mrb[4].mxu0 %vm360_vm3, %v1705_v39 }
  0x50   : > { %1965 = vmatpush3.bf16.msra.mxu0 %v2106_v33  ;;  %1902 = vmatprep.subr.bf16.mxu1 %v2108_v40 }
  0x51   : > { %1966 = vmatprep.subr.bf16.mxu0 %v2109_v41  ;;  %1904 = vmatprep.mubr.msk.bf16.mxu1 %vm360_vm3, %v1644_v8 }
  0x52   : > { %1968 = vmatprep.mubr.msk.bf16.mxu0 %vm360_vm3, %v2274_v16  ;;  %v1722_v16 = vcombine.low %v2363_v27, %v1246_v18 }
  0x53   : > { %1903 = vmatpush3.bf16.msra.mxu1 %v2108_v40 }
  0x54   : > { %1967 = vmatpush3.bf16.msra.mxu0 %v2109_v41  ;;  %1992 = vmatprep.subr.bf16.mxu1 %v2111_v42 }
  0x55   : > { %1976 = vmatprep.subr.bf16.mxu0 %v2111_v42 }
  0x56   : > { %1905 = vmatmul.mubr.msk.bf16.vlgmr.msra.gmra.mrb[0].mxu1 %vm360_vm3, %v1645_v9 }
  0x57   : > { %1969 = vmatmul.mubr.msk.bf16.vlgmr.msra.gmra.mrb[0].mxu0 %vm360_vm3, %v2321_v58  ;;  %1996 = vmatpush3.bf16.msra.mxu1 %v2111_v42  ;;  %v2117_v58 = vld [vmem:[%s2568_s1 + $0x118] sm:$0xff]  }
  0x58   : > { %1977 = vmatpush3.bf16.msra.mxu0 %v2111_v42  ;;  %1993 = vmatprep.subr.bf16.mxu1 %v2113_v26 }
  0x59   : > { %1978 = vmatprep.subr.bf16.mxu0 %v2113_v26  ;;  %1908 = vmatprep.mubr.msk.bf16.mxu1 %vm360_vm3, %v1646_v43 }
  0x5a   : > { %1972 = vmatprep.mubr.msk.bf16.mxu0 %vm360_vm3, %v2359_v5 }
  0x5b   : > { %1997 = vmatpush3.bf16.msra.mxu1 %v2113_v26 }
  0x5c   : > { %1979 = vmatpush3.bf16.msra.mxu0 %v2113_v26  ;;  %1994 = vmatprep.subr.bf16.mxu1 %v2115_v29 }
  0x5d   : > { %1980 = vmatprep.subr.bf16.mxu0 %v2115_v29 }
  0x5e   : > { %1909 = vmatmul.mubr.msk.bf16.gmra.mrb[4].mxu1 %vm360_vm3, %v1647_v31 }
  0x5f   : > { %1973 = vmatmul.mubr.msk.bf16.gmra.mrb[4].mxu0 %vm360_vm3, %v1722_v16  ;;  %1998 = vmatpush3.bf16.msra.mxu1 %v2115_v29 }
  0x60   : > { %1981 = vmatpush3.bf16.msra.mxu0 %v2115_v29  ;;  %1995 = vmatprep.subr.bf16.mxu1 %v2117_v58 }
  0x61   : > { %1982 = vmatprep.subr.bf16.mxu0 %v2117_v58  ;;  %1984 = vmatprep.mubr.msk.bf16.mxu0 %vm360_vm3, %v2474_v19 }
  0x62   : > { %1988 = vmatprep.mubr.msk.bf16.mxu1 %vm360_vm3, %v1627_v35 }
  0x63   : > { %1999 = vmatpush3.bf16.msra.mxu1 %v2117_v58 }
  0x64   : > { %1983 = vmatpush3.bf16.msra.mxu0 %v2117_v58 }
  0x66   : > { %1989 = vmatmul.mubr.msk.bf16.vlgmr.msra.gmra.mrb[8].mxu1 %vm360_vm3, %v1740_v32 }
  0x67   : > { %1985 = vmatmul.mubr.msk.bf16.vlgmr.msra.gmra.mrb[0].mxu0 %vm360_vm3, %v2484_v28 }
 0x129   : > { %v1906_v38 = vpop.f32.mrb[0].mxu1 }
 0x12a   : > { %v817_v0 = vpop.f32.mrb[1].mxu1 }
 0x12b   : > { %v1907_v5 = vpop.f32.mrb[2].mxu1 }
 0x12c   : > { %v820_v27 = vpop.f32.mrb[3].mxu1 }
 0x131   : > { %v1910_v45 = vpop.f32.mrb[4].mxu1 }
 0x132   : > { %v1974_v46 = vpop.f32.mrb[4].mxu0  ;;  %v833_v47 = vpop.f32.mrb[5].mxu1 }
 0x133   : > { %v2004_v48 = vadd.f32 %v1974_v46, %v1910_v45  ;;  %v1335_v61 = vpop.f32.mrb[5].mxu0  ;;  %v1911_v14 = vpop.f32.mrb[6].mxu1 }
 0x134   : > { %v2006_v22 = vadd.f32 %v1335_v61, %v833_v47  ;;  %v1975_v49 = vpop.f32.mrb[6].mxu0  ;;  %v836_v50 = vpop.f32.mrb[7].mxu1 }
 0x135   : > { %v2008_v51 = vadd.f32 %v1975_v49, %v1911_v14  ;;  %v1338_v52 = vpop.f32.mrb[7].mxu0 }
 0x136   : > { %v2010_v53 = vadd.f32 %v1338_v52, %v836_v50 }
 0x139   : > { %v1990_v55 = vpop.f32.mrb[8].mxu1 }
 0x13a   : > { %v1986_v56 = vpop.f32.mrb[0].mxu0  ;;  %v2005_v37 = vadd.f32 %v2004_v48, %v1990_v55  ;;  %v1451_v59 = vpop.f32.mrb[9].mxu1 }
 0x13b   : > { %v2000_v60 = vadd.f32 %v1986_v56, %v1906_v38  ;;  %v1435_v62 = vpop.f32.mrb[1].mxu0  ;;  %v2007_v23 = vadd.f32 %v2006_v22, %v1451_v59  ;;  %v1991_v44 = vpop.f32.mrb[10].mxu1 }
 0x13c   : > { %v1487_v30 = vadd.f32 %v2005_v37, %v1749_v54  ;;  %v2001_v63 = vadd.f32 %v1435_v62, %v817_v0  ;;  %v1987_v1 = vpop.f32.mrb[2].mxu0  ;;  %v2009_v7 = vadd.f32 %v2008_v51, %v1991_v44  ;;  %v1454_v2 = vpop.f32.mrb[11].mxu1 }
 0x13d   : > { %v1483_v3 = vadd.f32 %v2000_v60, %v1749_v54  ;;  %v1485_v4 = vadd.f32 %v2007_v23, %v1749_v54  ;;  %v2002_v6 = vadd.f32 %v1987_v1, %v1907_v5  ;;  %v1438_v10 = vpop.f32.mrb[3].mxu0  ;;  %v2011_v12 = vadd.f32 %v2010_v53, %v1454_v2 }
 0x13e   : > { %v1481_v15 = vadd.f32 %v2001_v63, %v1749_v54  ;;  %v1488_v18 = vadd.f32 %v2009_v7, %v1749_v54  ;;  %v2003_v21 = vadd.f32 %v1438_v10, %v820_v27  ;;  %v1495_v11 = vmax.f32 %v1487_v30, 0.0 }
 0x13f   : > { %v1484_v24 = vadd.f32 %v2002_v6, %v1749_v54  ;;  %v1486_v25 = vadd.f32 %v2011_v12, %v1749_v54  ;;  %v1491_v34 = vmax.f32 %v1483_v3, 0.0  ;;  %v1493_v28 = vmax.f32 %v1485_v4, 0.0 }
 0x140   : > { %v1496_v19 = vmax.f32 %v1488_v18, 0.0  ;;  %v1482_v17 = vadd.f32 %v2003_v21, %v1749_v54  ;;  %v1489_v35 = vmax.f32 %v1481_v15, 0.0 }
 0x141   : > { %v1492_v20 = vmax.f32 %v1484_v24, 0.0  ;;  %v1494_v33 = vmax.f32 %v1486_v25, 0.0 }
 0x142   : > { %v1771_v39 = vpack.c.bf16 %v1496_v19, %v1495_v11  ;;  %v1490_v40 = vmax.f32 %v1482_v17, 0.0 }
 0x143   : > { %v1761_v41 = vpack.c.bf16 %v1492_v20, %v1491_v34  ;;  %v1766_v8 = vpack.c.bf16 %v1494_v33, %v1493_v28 }
 0x144   : > { %1775 = vst [vmem:[%s170_s20 + $0x18] sm:$0xff] %v1771_v39   ;;  %v1756_v42 = vpack.c.bf16 %v1490_v40, %v1489_v35 }
 0x145   : > { %1773 = vst [vmem:[%s170_s20 + $0x8] sm:$0xff] %v1761_v41   ;;  %1774 = vst [vmem:[%s170_s20 + $0x10] sm:$0xff] %v1766_v8  }
 0x146   : > { %1757 = vst [vmem:[%s170_s20] sm:$0xff] %v1756_v42  }
 0x147 PF: > { %s13_s12 = sadd.s32 1, %s2124_s12  }
 0x148   : > { %p10_p4 = scmp.ge.s32.totalorder %s13_s12, 6  }
 0x14a   :  { %12 = sbr.rel (!%p10_p4) target bundleno = 1 (0x1), region = 70 }

// kernel: sr_loss.17
= control target key start
LH: loop header
LB: loop body
LE: loop exit
PB: predicated region body
PF: predicated region fallthrough
CT: control target
= control target key end

     0   :  { %s2525_s12 = smov 0   ;;  %s3213_s0 = inlined_call_operand.vmem [shape: bf16[4,6,6,128], index: 0, kind: input, shape index: {}]   ;;  %s3214_s1 = inlined_call_operand.vmem [shape: bf16[3,3,128,256], index: 1, kind: input, shape index: {}]   ;;  %s3215_s2 = inlined_call_operand.vmem [shape: f32[1,256], index: 2, kind: input, shape index: {}]   ;;  %s3216_s3 = inlined_call_operand.vmem [shape: bf16[4,4,4,256], index: 3, kind: output, shape index: {}]  }
   0x1 LB: > { %s1930_s13 = sadd.s32 4294967295, %s2501_s12   ;;  %p1934_p0 = scmp.ge.s32.totalorder %s2501_s12, 1  ;;  %s2501_s12 = sphi %s2525_s12, %s13_s12  }
   0x2   : > { %p137_p1 = scmp.lt.s32.totalorder %s2501_s12, 5 }
   0x4   : > { %p138_p2 = pnand %p1934_p0, %p137_p1 }
   0x5   : > { %v2274_v0 = vld [vmem:[%s3214_s1 + $0x84] ss:$8 sps:$4 sm:$0xff] (!%p138_p2)   ;;  %v2503_v2 = vmov (!%p138_p2), 0   ;;  %v2278_v3 = vld [vmem:[%s3214_s1 + $0x80] ss:$8 sps:$4 sm:$0xff] (!%p138_p2)   ;;  %p161_p3 = scmp.lt.s32.totalorder (!%p138_p2), %s1930_s13, 3  ;;  %v201_v21 = vlaneseq (!%p138_p2) }
   0x6   : > { %141 = sbr.rel (%p138_p2) target bundleno = 405 (0x195), region = 32  ;;  %v2276_v1 = vld [vmem:[%s3214_s1 + $0x204] ss:$8 sps:$4 sm:$0xff] (!%p138_p2)   ;;  %440 = vmatprep.mubr.bf16.mxu1 (!%p138_p2), %v2503_v2  ;;  %1109 = vmatprep.mubr.bf16.mxu0 (!%p138_p2), %v2503_v2  ;;  %v2279_v4 = vld [vmem:[%s3214_s1 + $0x200] ss:$8 sps:$4 sm:$0xff] (!%p138_p2)   ;;  %vm592_vm5 = vcmask (!%p138_p2), 1040384  }
   0x7   : > { %408 = vmatprep.subr.bf16.mxu1 (!%p138_p2), %v2274_v0  ;;  %1077 = vmatprep.subr.bf16.mxu0 (!%p138_p2), %v2276_v1  ;;  %v2280_v5 = vld [vmem:[%s3214_s1 + $0x94] ss:$8 sps:$4 sm:$0xff] (!%p138_p2)   ;;  %v2284_v7 = vld [vmem:[%s3214_s1 + $0x90] ss:$8 sps:$4 sm:$0xff] (!%p138_p2)   ;;  %v2286_v9 = vld [vmem:[%s3214_s1 + $0xa4] ss:$8 sps:$4 sm:$0xff] (!%p138_p2)  }
   0x8   : > { %409 = vmatpush1.bf16.msra.mxu1 (!%p138_p2), %v2278_v3  ;;  %1078 = vmatpush1.bf16.msra.mxu0 (!%p138_p2), %v2279_v4  ;;  %v2282_v6 = vld [vmem:[%s3214_s1 + $0x214] ss:$8 sps:$4 sm:$0xff] (!%p138_p2)   ;;  %v2285_v8 = vld [vmem:[%s3214_s1 + $0x210] ss:$8 sps:$4 sm:$0xff] (!%p138_p2)   ;;  %v2288_v10 = vld [vmem:[%s3214_s1 + $0x224] ss:$8 sps:$4 sm:$0xff] (!%p138_p2)  }
   0x9   : > { %410 = vmatprep.subr.bf16.mxu1 (!%p138_p2), %v2280_v5  ;;  %1079 = vmatprep.subr.bf16.mxu0 (!%p138_p2), %v2282_v6  ;;  %v2290_v11 = vld [vmem:[%s3214_s1 + $0xa0] ss:$8 sps:$4 sm:$0xff] (!%p138_p2)   ;;  %v2292_v13 = vld [vmem:[%s3214_s1 + $0xb4] ss:$8 sps:$4 sm:$0xff] (!%p138_p2)   ;;  %v2296_v15 = vld [vmem:[%s3214_s1 + $0xb0] ss:$8 sps:$4 sm:$0xff] (!%p138_p2)  }
   0xa   : > { %v2291_v12 = vld [vmem:[%s3214_s1 + $0x220] ss:$8 sps:$4 sm:$0xff] (!%p138_p2)   ;;  %v2294_v14 = vld [vmem:[%s3214_s1 + $0x234] ss:$8 sps:$4 sm:$0xff] (!%p138_p2)   ;;  %v2297_v16 = vld [vmem:[%s3214_s1 + $0x230] ss:$8 sps:$4 sm:$0xff] (!%p138_p2)  }
   0xb   : > { %v2298_v17 = vld [vmem:[%s3214_s1 + $0xc4] ss:$8 sps:$4 sm:$0xff] (!%p138_p2)   ;;  %v2504_v19 = vmov (!%p138_p2), 1983009808   ;;  %v2302_v22 = vld [vmem:[%s3214_s1 + $0xc0] ss:$8 sps:$4 sm:$0xff] (!%p138_p2)  }
   0xc   : > { %411 = vmatpush1.bf16.msra.mxu1 (!%p138_p2), %v2284_v7  ;;  %1080 = vmatpush1.bf16.msra.mxu0 (!%p138_p2), %v2285_v8  ;;  %v2300_v18 = vld [vmem:[%s3214_s1 + $0x244] ss:$8 sps:$4 sm:$0xff] (!%p138_p2)   ;;  %v199_v20 = vunpack.c.l.s4 (!%p138_p2), %v2504_v19  ;;  %v2303_v23 = vld [vmem:[%s3214_s1 + $0x240] ss:$8 sps:$4 sm:$0xff] (!%p138_p2)   ;;  %v2304_v24 = vld [vmem:[%s3214_s1 + $0xd4] ss:$8 sps:$4 sm:$0xff] (!%p138_p2)  }
   0xd   : > { %412 = vmatprep.subr.bf16.mxu1 %v2286_v9  ;;  %1081 = vmatprep.subr.bf16.mxu0 %v2288_v10  ;;  %s3226_s13 = smov (!%p161_p3, %s1930_s13), 3  ;;  %v2306_v25 = vld [vmem:[%s3214_s1 + $0x254] ss:$8 sps:$4 sm:$0xff]   ;;  %v2608_v27 = vshrl.u32 %v201_v21, 7  ;;  %vm230_vm0 = vsmask.f32 1280 }
   0xe   : > { %s2263_s6 = smul.u32 24, %s3226_s13  ;;  %v200_v26 = vunpack.c.0.s8 %v199_v20  ;;  %v2308_v28 = vld [vmem:[%s3214_s1 + $0xd0] ss:$8 sps:$4 sm:$0xff]   ;;  %vm231_vm1 = vsmask.f32 3336  ;;  %vm593_vm6 = vcmask 1042434  }
   0xf   : > { %v2309_v29 = vld [vmem:[%s3214_s1 + $0x250] ss:$8 sps:$4 sm:$0xff]   ;;  %v2310_v30 = vld [vmem:[%s3214_s1 + $0xe4] ss:$8 sps:$4 sm:$0xff]   ;;  %vm233_vm2 = vsmask.f32 5392  ;;  %vm2700_vm4 = vmor %vm230_vm0, %vm231_vm1 }
  0x10   : > { %413 = vmatpush1.bf16.msra.mxu1 %v2290_v11  ;;  %1082 = vmatpush1.bf16.msra.mxu0 %v2291_v12  ;;  %v2312_v31 = vld [vmem:[%s3214_s1 + $0x264] ss:$8 sps:$4 sm:$0xff]   ;;  %s2625_s19 = scalar_lea.vmem %s3213_s0, %s2263_s6  ;;  %v2628_v32 = vsub.s32 %v200_v26, %v2608_v27  ;;  %v2314_v33 = vld [vmem:[%s3214_s1 + $0xe0] ss:$8 sps:$4 sm:$0xff]   ;;  %vm235_vm3 = vsmask.f32 7448  ;;  %vm2721_vm7 = vmor %vm2700_vm4, %vm233_vm2 }
  0x11   : > { %414 = vmatprep.subr.bf16.mxu1 %v2292_v13  ;;  %1083 = vmatprep.subr.bf16.mxu0 %v2294_v14  ;;  %v2315_v34 = vld [vmem:[%s3214_s1 + $0x260] ss:$8 sps:$4 sm:$0xff]   ;;  %v2316_v35 = vld [vmem:[%s3214_s1 + $0xf4] ss:$8 sps:$4 sm:$0xff]   ;;  %v2643_v37 = vld [vmem:[%s2625_s19 + $0x4] sm:$0x7] }
  0x12   : > { %v2640_v36 = vld [vmem:[%s2625_s19] sm:$0x7]  ;;  %v2646_v38 = vld [vmem:[%s2625_s19 + $0x8] sm:$0x7]  ;;  %v2318_v39 = vld [vmem:[%s3214_s1 + $0x274] ss:$8 sps:$4 sm:$0xff]   ;;  %v2660_v42 = vrot.slane %v2643_v37, %v2628_v32 }
  0x13   : > { %v2652_v40 = vld [vmem:[%s2625_s19 + $0xc] sm:$0x7]  ;;  %v2656_v41 = vrot.slane %v2640_v36, %v2628_v32  ;;  %v2664_v43 = vrot.slane %v2646_v38, %v2628_v32  ;;  %v2667_v44 = vld [vmem:[%s2625_s19 + $0x10] sm:$0x7]  ;;  %vm2731_vm8 = vmor %vm2721_vm7, %vm235_vm3  ;;  %vm595_vm10 = vcmask 1044484   ;;  %vm597_vm12 = vcmask 1046534  }
  0x14   : > { %415 = vmatpush1.bf16.msra.mxu1 %v2296_v15  ;;  %1084 = vmatpush1.bf16.msra.mxu0 %v2297_v16  ;;  %v2320_v45 = vld [vmem:[%s3214_s1 + $0xf0] ss:$8 sps:$4 sm:$0xff]   ;;  %v2677_v47 = vrot.slane %v2652_v40, %v2628_v32  ;;  %v2681_v48 = vrot.slane %v2667_v44, %v2628_v32  ;;  %v2324_v49 = vld [vmem:[%s3214_s1 + $0x4] ss:$8 sps:$4 sm:$0xff]   ;;  %v2692_v51 = vcombine.high %v2660_v42, %v2660_v42  ;;  %v252_v58 = vshrl.u32 %v2660_v42, 16  ;;  %vm594_vm9 = vmor %vm592_vm5, %vm593_vm6  ;;  %s2230_s6 = sshll.u32 %s3226_s13, 4 }
  0x15   : > { %416 = vmatprep.subr.bf16.mxu1 %v2298_v17  ;;  %1085 = vmatprep.subr.bf16.mxu0 %v2300_v18  ;;  %v2321_v46 = vld [vmem:[%s3214_s1 + $0x270] ss:$8 sps:$4 sm:$0xff]   ;;  %v2688_v50 = vcombine.high %v2656_v41, %v2656_v41  ;;  %v2696_v52 = vcombine.high %v2664_v43, %v2664_v43  ;;  %v238_v54 = vshrl.u32 %v2656_v41, 16  ;;  %v2327_v55 = vld [vmem:[%s3214_s1 + $0x284] ss:$8 sps:$4 sm:$0xff]   ;;  %v241_v57 = vshll.u32 %v2656_v41, 16  ;;  %vm596_vm11 = vmor %vm594_vm9, %vm595_vm10  ;;  %s170_s9 = scalar_lea.vmem %s3216_s3, %s2230_s6 }
  0x16   : > { %v2710_v56 = vcombine.high %v2677_v47, %v2677_v47  ;;  %v255_v59 = vshll.u32 %v2660_v42, 16  ;;  %v261_v62 = vshll.u32 %v2692_v51, 16  ;;  %v266_v63 = vshrl.u32 %v2664_v43, 16  ;;  %vm2784_vm13 = vmor %vm596_vm11, %vm597_vm12 }
  0x17   : > { %v240_v60 = vrot.slane %v238_v54, 6  ;;  %v247_v61 = vshll.u32 %v2688_v50, 16  ;;  %v243_v1 = vrot.slane %v241_v57, 7  ;;  %v254_v3 = vrot.slane %v252_v58, 6 }
  0x18   : > { %417 = vmatpush1.bf16.msra.mxu1 %v2302_v22  ;;  %1086 = vmatpush1.bf16.msra.mxu0 %v2303_v23  ;;  %v257_v4 = vrot.slane %v255_v59, 7  ;;  %v269_v5 = vshll.u32 %v2664_v43, 16  ;;  %v263_v7 = vrot.slane %v261_v62, 7  ;;  %v268_v8 = vrot.slane %v266_v63, 6 }
  0x19   : > { %418 = vmatprep.subr.bf16.mxu1 %v2304_v24  ;;  %1087 = vmatprep.subr.bf16.mxu0 %v2306_v25  ;;  %v249_v6 = vrot.slane %v247_v61, 7  ;;  %v275_v9 = vshll.u32 %v2696_v52, 16  ;;  %v244_v10 = vor.u32 %v243_v1, %v240_v60  ;;  %v280_v13 = vshrl.u32 %v2677_v47, 16 }
  0x1a   : > { %v258_v11 = vor.u32 %v257_v4, %v254_v3  ;;  %v271_v12 = vrot.slane %v269_v5, 7  ;;  %v283_v16 = vshll.u32 %v2677_v47, 16  ;;  %v289_v17 = vshll.u32 %v2710_v56, 16 }
  0x1b   : > { %v277_v15 = vrot.slane %v275_v9, 7  ;;  %v2739_v18 = vcombine.high %v2681_v48, %v2681_v48  ;;  %v245_v19 = vrot.slane %v244_v10, 2  ;;  %v282_v22 = vrot.slane %v280_v13, 6  ;;  %v2322_v13 = vld [vmem:[%s3214_s1] ss:$8 sps:$4 sm:$0xff]  }
  0x1c   : > { %419 = vmatpush1.bf16.msra.mxu1 %v2308_v28  ;;  %1088 = vmatpush1.bf16.msra.mxu0 %v2309_v29  ;;  %v259_v20 = vrot.slane %v258_v11, 2  ;;  %v272_v21 = vor.u32 %v271_v12, %v268_v8  ;;  %v285_v23 = vrot.slane %v283_v16, 7  ;;  %v291_v24 = vrot.slane %v289_v17, 7 }
  0x1d   : > { %420 = vmatprep.subr.bf16.mxu1 %v2310_v30  ;;  %1089 = vmatprep.subr.bf16.mxu0 %v2312_v31  ;;  %v949_v25 = vshrl.u32 %v2681_v48, 16  ;;  %v952_v26 = vshll.u32 %v2681_v48, 16  ;;  %v250_v28 = vsel %vm2731_vm8, %v245_v19, %v249_v6  ;;  %v958_v31 = vshll.u32 %v2739_v18, 16 }
  0x1e   : > { %v264_v29 = vsel %vm2731_vm8, %v259_v20, %v263_v7  ;;  %v273_v30 = vrot.slane %v272_v21, 2  ;;  %v795_v16 = vcombine.low %v2643_v37, %v2646_v38  ;;  %v2330_v21 = vld [vmem:[%s3214_s1 + $0x14] ss:$8 sps:$4 sm:$0xff]   ;;  %v605_v14 = vrot.slane %v2692_v51, 7 }
  0x20   : > { %421 = vmatpush1.bf16.msra.mxu1 %v2314_v33  ;;  %1090 = vmatpush1.bf16.msra.mxu0 %v2315_v34  ;;  %v286_v33 = vor.u32 %v285_v23, %v282_v22  ;;  %v310_v34 = vcombine.low %v250_v28, %v264_v29  ;;  %v796_v23 = vcombine.low %v2652_v40, %v2667_v44  ;;  %v2363_v22 = vld [vmem:[%s3214_s1 + $0x2e4] ss:$8 sps:$4 sm:$0xff]  }
  0x21   : > { %422 = vmatprep.subr.bf16.mxu1 %v2316_v35  ;;  %1091 = vmatprep.subr.bf16.mxu0 %v2318_v39  ;;  %v177_v35 = vld [vmem:[%s2625_s19 + $0x14] sm:$0x7]  ;;  %v951_v39 = vrot.slane %v949_v25, 6  ;;  %v2795_v25 = vrot.slane %v795_v16, %v2628_v32  ;;  %v2349_v16 = vld [vmem:[%s3214_s1 + $0x2c0] ss:$8 sps:$4 sm:$0xff]  }
  0x22   : > { %v287_v53 = vrot.slane %v286_v33, 2  ;;  %v318_v62 = vrot.slane %v310_v34, %v2628_v32  ;;  %v1308_v0 = vcombine.low %v2667_v44, %v177_v35  ;;  %v1989_v44 = vrot.slane %v2677_v47, 9  ;;  %v2336_v47 = vld [vmem:[%s3214_s1 + $0x24] ss:$8 sps:$4 sm:$0xff]  }
  0x23   : > { %v1987_v33 = vrot.slane %v2660_v42, 9  ;;  %v1986_v42 = vrot.slane %v2656_v41, 9  ;;  %v2824_v51 = vrot.slane %v796_v23, %v2628_v32  ;;  %v2339_v41 = vld [vmem:[%s3214_s1 + $0x2a4] ss:$8 sps:$4 sm:$0xff]   ;;  %v451_v23 = vcombine.low %v2640_v36, %v2643_v37  ;;  %v2361_v36 = vld [vmem:[%s3214_s1 + $0x2e0] ss:$8 sps:$4 sm:$0xff]  }
  0x24   : > { %423 = vmatpush1.bf16.msra.mxu1 %v2320_v45  ;;  %1092 = vmatpush1.bf16.msra.mxu0 %v2321_v46  ;;  %v954_v45 = vrot.slane %v952_v26, 7  ;;  %v278_v46 = vsel %vm2731_vm8, %v273_v30, %v277_v15  ;;  %v292_v61 = vsel %vm2731_vm8, %v287_v53, %v291_v24  ;;  %v2771_v8 = vrot.slane %v1308_v0, %v2628_v32  ;;  %v2369_v37 = vld [vmem:[%s3214_s1 + $0x2f4] ss:$8 sps:$4 sm:$0xff]  }
  0x25   : > { %549 = vmatprep.subr.bf16.mxu1 %v2324_v49  ;;  %1243 = vmatprep.subr.bf16.mxu0 %v2327_v55  ;;  %v2752_v49 = vrot.slane %v177_v35, %v2628_v32  ;;  %v960_v55 = vrot.slane %v958_v31, 7  ;;  %v979_v57 = vcombine.low %v264_v29, %v278_v46  ;;  %v311_v1 = vcombine.low %v278_v46, %v292_v61  ;;  %v2333_v29 = vld [vmem:[%s3214_s1 + $0x294] ss:$8 sps:$4 sm:$0xff]  }
  0x26   : > { %v955_v54 = vor.u32 %v954_v45, %v951_v39  ;;  %v1988_v15 = vrot.slane %v2664_v43, 9  ;;  %v2325_v43 = vld [vmem:[%s3214_s1 + $0x280] ss:$8 sps:$4 sm:$0xff]   ;;  %v609_v24 = vrot.slane %v2696_v52, 7  ;;  %v613_v30 = vrot.slane %v2710_v56, 7 }
  0x27   : > { %v2756_v58 = vcombine.high %v2752_v49, %v2752_v49  ;;  %v1454_v59 = vshrl.u32 %v2752_v49, 16  ;;  %v1457_v60 = vshll.u32 %v2752_v49, 16  ;;  %v987_v7 = vrot.slane %v979_v57, %v2628_v32  ;;  %v2328_v52 = vld [vmem:[%s3214_s1 + $0x10] ss:$8 sps:$4 sm:$0xff]  }
  0x28   : > { %v956_v63 = vrot.slane %v955_v54, 2  ;;  %v325_v9 = vrot.slane %v311_v1, %v2628_v32  ;;  %v2812_v34 = vsel %vm2784_vm13, %v1988_v15, %v609_v24  ;;  %v2819_v56 = vsel %vm2784_vm13, %v1989_v44, %v613_v30  ;;  %v2331_v39 = vld [vmem:[%s3214_s1 + $0x290] ss:$8 sps:$4 sm:$0xff]   ;;  %v2345_v1 = vld [vmem:[%s3214_s1 + $0x2b4] ss:$8 sps:$4 sm:$0xff]  }
  0x29   : > { %v1456_v3 = vrot.slane %v1454_v59, 6  ;;  %v1459_v4 = vrot.slane %v1457_v60, 7  ;;  %v1463_v5 = vshll.u32 %v2756_v58, 16  ;;  %v2086_v35 = vrot.slane %v2681_v48, 9  ;;  %v2354_v15 = vld [vmem:[%s3214_s1 + $0x54] ss:$8 sps:$4 sm:$0xff]  }
  0x2a   : > { %v961_v6 = vsel %vm2731_vm8, %v956_v63, %v960_v55  ;;  %v326_v17 = vcombine.low %v318_v62, %v325_v9  ;;  %v1126_v45 = vrot.slane %v2739_v18, 7  ;;  %v601_v46 = vrot.slane %v2688_v50, 7  ;;  %v2334_v50 = vld [vmem:[%s3214_s1 + $0x20] ss:$8 sps:$4 sm:$0xff]   ;;  %v2364_v44 = vld [vmem:[%s3214_s1 + $0x70] ss:$8 sps:$4 sm:$0xff]  }
  0x2b   : > { %v980_v10 = vcombine.low %v292_v61, %v961_v6  ;;  %v1460_v11 = vor.u32 %v1459_v4, %v1456_v3  ;;  %v1465_v12 = vrot.slane %v1463_v5, 7  ;;  %v633_v53 = vcombine.low %v2812_v34, %v2819_v56  ;;  %v2337_v63 = vld [vmem:[%s3214_s1 + $0x2a0] ss:$8 sps:$4 sm:$0xff]   ;;  %v2340_v5 = vld [vmem:[%s3214_s1 + $0x30] ss:$8 sps:$4 sm:$0xff]  }
  0x2c   : > { %441 = vmatmul.mubr.bf16.vlgmr.msra.gmra.mrb[0].mxu1 %v326_v17  ;;  %v811_v54 = vcombine.low %v2795_v25, %v2824_v51  ;;  %v2183_v55 = vrot.slane %v2752_v49, 9  ;;  %v606_v18 = vsel %vm2784_vm13, %v1987_v33, %v605_v14  ;;  %v602_v57 = vsel %vm2784_vm13, %v1986_v42, %v601_v46  ;;  %v2342_v49 = vld [vmem:[%s3214_s1 + $0x34] ss:$8 sps:$4 sm:$0xff]   ;;  %v2358_v24 = vld [vmem:[%s3214_s1 + $0x60] ss:$8 sps:$4 sm:$0xff]  }
  0x2d   : > { %v994_v19 = vrot.slane %v980_v10, %v2628_v32  ;;  %v1461_v20 = vrot.slane %v1460_v11, 2  ;;  %550 = vmatpush1.bf16.msra.mxu1 %v2322_v13  ;;  %581 = vmatprep.mubr.bf16.mxu1 %v2503_v2  ;;  %v1623_v60 = vrot.slane %v2756_v58, 7  ;;  %v632_v61 = vcombine.low %v602_v57, %v606_v18  ;;  %v2343_v10 = vld [vmem:[%s3214_s1 + $0x2b0] ss:$8 sps:$4 sm:$0xff]   ;;  %v2351_v11 = vld [vmem:[%s3214_s1 + $0x2c4] ss:$8 sps:$4 sm:$0xff]  }
  0x2e   : > { %551 = vmatprep.subr.bf16.mxu1 %v2330_v21  ;;  %v2855_v62 = vrot.slane %v633_v53, %v2628_v32  ;;  %v1127_v0 = vsel %vm2784_vm13, %v2086_v35, %v1126_v45  ;;  %v2346_v13 = vld [vmem:[%s3214_s1 + $0x40] ss:$8 sps:$4 sm:$0xff]   ;;  %v2357_v17 = vld [vmem:[%s3214_s1 + $0x2d4] ss:$8 sps:$4 sm:$0xff]   ;;  %v2355_v21 = vld [vmem:[%s3214_s1 + $0x2d0] ss:$8 sps:$4 sm:$0xff]  }
  0x2f   : > { %v995_v26 = vcombine.low %v987_v7, %v994_v19  ;;  %v1466_v28 = vsel %vm2731_vm8, %v1461_v20, %v1465_v12  ;;  %v1624_v58 = vsel %vm2784_vm13, %v2183_v55, %v1623_v60  ;;  %v2868_v3 = vrot.slane %v632_v61, %v2628_v32  ;;  %v2352_v19 = vld [vmem:[%s3214_s1 + $0x50] ss:$8 sps:$4 sm:$0xff]   ;;  %v2360_v20 = vld [vmem:[%s3214_s1 + $0x64] ss:$8 sps:$4 sm:$0xff]   ;;  %v2373_v35 = vld [vmem:[%s3214_s1 + $0x300] ss:$8 sps:$4 sm:$0xff]  }
  0x30   : > { %v1484_v31 = vcombine.low %v961_v6, %v1466_v28  ;;  %v1642_v4 = vcombine.low %v1127_v0, %v1624_v58  ;;  %v2348_v6 = vld [vmem:[%s3214_s1 + $0x44] ss:$8 sps:$4 sm:$0xff]   ;;  %v1145_v28 = vcombine.low %v606_v18, %v2812_v34  ;;  %v2367_v33 = vld [vmem:[%s3214_s1 + $0x2f0] ss:$8 sps:$4 sm:$0xff]   ;;  %v2383_v42 = vld [vmem:[%s3214_s1 + $0x314] ss:$8 sps:$4 sm:$0xff]  }
  0x31   : > { %1110 = vmatmul.mubr.bf16.vlgmr.msra.gmra.mrb[0].mxu0 %v995_v26  ;;  %552 = vmatpush1.bf16.msra.mxu1 %v2328_v52  ;;  %v648_v7 = vcombine.low %v2868_v3, %v2855_v62  ;;  %v2366_v26 = vld [vmem:[%s3214_s1 + $0x74] ss:$8 sps:$4 sm:$0xff]   ;;  %v2372_v30 = vld [vmem:[%s3214_s1 + $0x104] ss:$8 sps:$4 sm:$0xff]   ;;  %v2381_v46 = vld [vmem:[%s3214_s1 + $0x310] ss:$8 sps:$4 sm:$0xff]  }
  0x32   : > { %1244 = vmatpush1.bf16.msra.mxu0 %v2325_v43  ;;  %1275 = vmatprep.mubr.bf16.mxu0 %v2503_v2  ;;  %v1491_v48 = vrot.slane %v1484_v31, %v2628_v32  ;;  %v452_v43 = vcombine.low %v2646_v38, %v2652_v40  ;;  %v459_v38 = vrot.slane %v451_v23, %v2628_v32  ;;  %v2375_v14 = vld [vmem:[%s3214_s1 + $0x304] ss:$8 sps:$4 sm:$0xff]   ;;  %v2387_v55 = vld [vmem:[%s3214_s1 + $0x320] ss:$8 sps:$4 sm:$0xff]   ;;  %v2390_v18 = vld [vmem:[%s3214_s1 + $0x130] ss:$8 sps:$4 sm:$0xff]  }
  0x33   : > { %1245 = vmatprep.subr.bf16.mxu0 %v2333_v29  ;;  %553 = vmatprep.subr.bf16.mxu1 %v2336_v47  ;;  %v1146_v29 = vcombine.low %v2819_v56, %v1127_v0  ;;  %v1153_v31 = vrot.slane %v1145_v28, %v2628_v32  ;;  %v2370_v47 = vld [vmem:[%s3214_s1 + $0x100] ss:$8 sps:$4 sm:$0xff]   ;;  %v2386_v45 = vld [vmem:[%s3214_s1 + $0x124] ss:$8 sps:$4 sm:$0xff]   ;;  %v2393_v60 = vld [vmem:[%s3214_s1 + $0x330] ss:$8 sps:$4 sm:$0xff]  }
  0x34   : > { %v2848_v59 = vcombine.low %v325_v9, %v1491_v48  ;;  %v2879_v9 = vrot.slane %v1642_v4, %v2628_v32  ;;  %v2933_v40 = vrot.slane %v452_v43, %v2628_v32  ;;  %v2389_v53 = vld [vmem:[%s3214_s1 + $0x324] ss:$8 sps:$4 sm:$0xff]   ;;  %v2384_v48 = vld [vmem:[%s3214_s1 + $0x120] ss:$8 sps:$4 sm:$0xff]   ;;  %v2407_v58 = vld [vmem:[%s3214_s1 + $0x354] ss:$8 sps:$4 sm:$0xff]  }
  0x35   : > { %554 = vmatpush1.bf16.msra.mxu1 %v2334_v50  ;;  %v1160_v52 = vrot.slane %v1146_v29, %v2628_v32  ;;  %v2380_v32 = vld [vmem:[%s3214_s1 + $0x114] ss:$8 sps:$4 sm:$0xff]   ;;  %v2398_v57 = vld [vmem:[%s3214_s1 + $0x144] ss:$8 sps:$4 sm:$0xff]   ;;  %v2396_v61 = vld [vmem:[%s3214_s1 + $0x140] ss:$8 sps:$4 sm:$0xff]  }
  0x36   : > { %1246 = vmatpush1.bf16.msra.mxu0 %v2331_v39  ;;  %555 = vmatprep.subr.bf16.mxu1 %v2342_v49  ;;  %v1650_v12 = vcombine.low %v2855_v62, %v2879_v9  ;;  %v467_v34 = vcombine.low %v459_v38, %v2933_v40  ;;  %v2378_v39 = vld [vmem:[%s3214_s1 + $0x110] ss:$8 sps:$4 sm:$0xff]   ;;  %v2395_v50 = vld [vmem:[%s3214_s1 + $0x334] ss:$8 sps:$4 sm:$0xff]   ;;  %v2401_v49 = vld [vmem:[%s3214_s1 + $0x344] ss:$8 sps:$4 sm:$0xff]  }
  0x37   : > { %1247 = vmatprep.subr.bf16.mxu0 %v2339_v41  ;;  %v1161_v56 = vcombine.low %v1153_v31, %v1160_v52  ;;  %v2392_v41 = vld [vmem:[%s3214_s1 + $0x134] ss:$8 sps:$4 sm:$0xff]   ;;  %v2399_v0 = vld [vmem:[%s3214_s1 + $0x340] ss:$8 sps:$4 sm:$0xff]   ;;  %v2410_v4 = vld [vmem:[%s3214_s1 + $0x164] ss:$8 sps:$4 sm:$0xff]  }
  0x38   : > { %v2429_v23 = vld [vmem:[%s3214_s1 + $0x194] ss:$8 sps:$4 sm:$0xff]   ;;  %v2423_v43 = vld [vmem:[%s3214_s1 + $0x380] ss:$8 sps:$4 sm:$0xff]   ;;  %v2430_v3 = vld [vmem:[%s3214_s1 + $0x390] ss:$8 sps:$4 sm:$0xff]  }
  0x39   : > { %556 = vmatpush1.bf16.msra.mxu1 %v2340_v5  ;;  %v2405_v5 = vld [vmem:[%s3214_s1 + $0x350] ss:$8 sps:$4 sm:$0xff]   ;;  %v2433_v28 = vld [vmem:[%s3214_s1 + $0x1a0] ss:$8 sps:$4 sm:$0xff]   ;;  %v2441_v29 = vld [vmem:[%s3214_s1 + $0x1b4] ss:$8 sps:$4 sm:$0xff]  }
  0x3a   : > { %1248 = vmatpush1.bf16.msra.mxu0 %v2337_v63  ;;  %557 = vmatprep.subr.bf16.mxu1 %v2348_v6  ;;  %v2404_v63 = vld [vmem:[%s3214_s1 + $0x154] ss:$8 sps:$4 sm:$0xff]   ;;  %v2413_v6 = vld [vmem:[%s3214_s1 + $0x364] ss:$8 sps:$4 sm:$0xff]   ;;  %v2439_v38 = vld [vmem:[%s3214_s1 + $0x1b0] ss:$8 sps:$4 sm:$0xff]  }
  0x3b   : > { %1249 = vmatprep.subr.bf16.mxu0 %v2345_v1  ;;  %v2402_v1 = vld [vmem:[%s3214_s1 + $0x150] ss:$8 sps:$4 sm:$0xff]   ;;  %v2445_v31 = vld [vmem:[%s3214_s1 + $0x1c0] ss:$8 sps:$4 sm:$0xff]   ;;  %v2453_v52 = vld [vmem:[%s3214_s1 + $0x1d4] ss:$8 sps:$4 sm:$0xff]  }
  0x3c   : > { %v2479_v25 = vld [vmem:[%s3214_s1 + $0x424] ss:$8 sps:$4 sm:$0xff]   ;;  %v2477_v51 = vld [vmem:[%s3214_s1 + $0x420] ss:$8 sps:$4 sm:$0xff]  }
  0x3d   : > { %558 = vmatpush1.bf16.msra.mxu1 %v2346_v13  ;;  %v2411_v13 = vld [vmem:[%s3214_s1 + $0x360] ss:$8 sps:$4 sm:$0xff]  }
  0x3e   : > { %1250 = vmatpush1.bf16.msra.mxu0 %v2343_v10  ;;  %559 = vmatprep.subr.bf16.mxu1 %v2354_v15  ;;  %v2408_v10 = vld [vmem:[%s3214_s1 + $0x160] ss:$8 sps:$4 sm:$0xff]   ;;  %v2419_v15 = vld [vmem:[%s3214_s1 + $0x374] ss:$8 sps:$4 sm:$0xff]  }
  0x3f   : > { %1251 = vmatprep.subr.bf16.mxu0 %v2351_v11  ;;  %v2416_v11 = vld [vmem:[%s3214_s1 + $0x174] ss:$8 sps:$4 sm:$0xff]  }
  0x41   : > { %560 = vmatpush1.bf16.msra.mxu1 %v2352_v19  ;;  %v2417_v19 = vld [vmem:[%s3214_s1 + $0x370] ss:$8 sps:$4 sm:$0xff]  }
  0x42   : > { %1252 = vmatpush1.bf16.msra.mxu0 %v2349_v16  ;;  %561 = vmatprep.subr.bf16.mxu1 %v2360_v20  ;;  %v2414_v16 = vld [vmem:[%s3214_s1 + $0x170] ss:$8 sps:$4 sm:$0xff]   ;;  %v2425_v20 = vld [vmem:[%s3214_s1 + $0x384] ss:$8 sps:$4 sm:$0xff]  }
  0x43   : > { %1253 = vmatprep.subr.bf16.mxu0 %v2357_v17  ;;  %v2422_v17 = vld [vmem:[%s3214_s1 + $0x184] ss:$8 sps:$4 sm:$0xff]  }
  0x45   : > { %562 = vmatpush1.bf16.msra.mxu1 %v2358_v24  ;;  %v2432_v24 = vld [vmem:[%s3214_s1 + $0x394] ss:$8 sps:$4 sm:$0xff]  }
  0x46   : > { %1254 = vmatpush1.bf16.msra.mxu0 %v2355_v21  ;;  %563 = vmatprep.subr.bf16.mxu1 %v2366_v26  ;;  %v2420_v21 = vld [vmem:[%s3214_s1 + $0x180] ss:$8 sps:$4 sm:$0xff]   ;;  %v2435_v26 = vld [vmem:[%s3214_s1 + $0x1a4] ss:$8 sps:$4 sm:$0xff]  }
  0x47   : > { %1255 = vmatprep.subr.bf16.mxu0 %v2363_v22  ;;  %v1316_v22 = vcombine.low %v2933_v40, %v2771_v8  ;;  %v2427_v8 = vld [vmem:[%s3214_s1 + $0x190] ss:$8 sps:$4 sm:$0xff]   ;;  %v2447_v40 = vld [vmem:[%s3214_s1 + $0x1c4] ss:$8 sps:$4 sm:$0xff]  }
  0x49   : > { %564 = vmatpush1.bf16.msra.mxu1 %v2364_v44  ;;  %v2442_v44 = vld [vmem:[%s3214_s1 + $0x3b0] ss:$8 sps:$4 sm:$0xff]  }
  0x4a   : > { %1256 = vmatpush1.bf16.msra.mxu0 %v2361_v36  ;;  %730 = vmatprep.subr.bf16.mxu1 %v2372_v30  ;;  %v2436_v36 = vld [vmem:[%s3214_s1 + $0x3a0] ss:$8 sps:$4 sm:$0xff]   ;;  %v2450_v30 = vld [vmem:[%s3214_s1 + $0x3c4] ss:$8 sps:$4 sm:$0xff]  }
  0x4b   : > { %1257 = vmatprep.subr.bf16.mxu0 %v2369_v37  ;;  %v2444_v37 = vld [vmem:[%s3214_s1 + $0x3b4] ss:$8 sps:$4 sm:$0xff]  }
  0x4c   : > { %582 = vmatmul.mubr.bf16.vlgmr.msra.gmra.mrb[0].mxu1 %v467_v34  ;;  %v2451_v34 = vld [vmem:[%s3214_s1 + $0x1d0] ss:$8 sps:$4 sm:$0xff]  }
  0x4d   : > { %731 = vmatpush1.bf16.msra.mxu1 %v2370_v47  ;;  %762 = vmatprep.mubr.bf16.mxu1 %v2503_v2  ;;  %v2459_v47 = vld [vmem:[%s3214_s1 + $0x1e4] ss:$8 sps:$4 sm:$0xff]  }
  0x4e   : > { %1258 = vmatpush1.bf16.msra.mxu0 %v2367_v33  ;;  %732 = vmatprep.subr.bf16.mxu1 %v2380_v32  ;;  %v2448_v33 = vld [vmem:[%s3214_s1 + $0x3c0] ss:$8 sps:$4 sm:$0xff]   ;;  %v2462_v32 = vld [vmem:[%s3214_s1 + $0x3e4] ss:$8 sps:$4 sm:$0xff]  }
  0x4f   : > { %1398 = vmatprep.subr.bf16.mxu0 %v2375_v14  ;;  %v2456_v14 = vld [vmem:[%s3214_s1 + $0x3d4] ss:$8 sps:$4 sm:$0xff]  }
  0x51   : > { %1276 = vmatmul.mubr.bf16.vlgmr.msra.gmra.mrb[0].mxu0 %v1161_v56  ;;  %733 = vmatpush1.bf16.msra.mxu1 %v2378_v39  ;;  %v2454_v56 = vld [vmem:[%s3214_s1 + $0x3d0] ss:$8 sps:$4 sm:$0xff]   ;;  %v2460_v39 = vld [vmem:[%s3214_s1 + $0x3e0] ss:$8 sps:$4 sm:$0xff]  }
  0x52   : > { %1399 = vmatpush1.bf16.msra.mxu0 %v2373_v35  ;;  %1430 = vmatprep.mubr.bf16.mxu0 %v2503_v2  ;;  %v2457_v35 = vld [vmem:[%s3214_s1 + $0x1e0] ss:$8 sps:$4 sm:$0xff]  }
  0x53   : > { %1400 = vmatprep.subr.bf16.mxu0 %v2383_v42  ;;  %734 = vmatprep.subr.bf16.mxu1 %v2386_v45  ;;  %v2465_v42 = vld [vmem:[%s3214_s1 + $0x1f4] ss:$8 sps:$4 sm:$0xff]  }
  0x54   : > { %v2468_v45 = vld [vmem:[%s3214_s1 + $0x3f4] ss:$8 sps:$4 sm:$0xff]  }
  0x55   : > { %735 = vmatpush1.bf16.msra.mxu1 %v2384_v48  ;;  %v2473_v48 = vld [vmem:[%s3214_s1 + $0x404] ss:$8 sps:$4 sm:$0xff]  }
  0x56   : > { %1401 = vmatpush1.bf16.msra.mxu0 %v2381_v46  ;;  %736 = vmatprep.subr.bf16.mxu1 %v2392_v41  ;;  %v2463_v46 = vld [vmem:[%s3214_s1 + $0x1f0] ss:$8 sps:$4 sm:$0xff]   ;;  %v2471_v41 = vld [vmem:[%s3214_s1 + $0x400] ss:$8 sps:$4 sm:$0xff]  }
  0x57   : > { %1402 = vmatprep.subr.bf16.mxu0 %v2389_v53  ;;  %v2466_v53 = vld [vmem:[%s3214_s1 + $0x3f0] ss:$8 sps:$4 sm:$0xff]  }
  0x59   : > { %737 = vmatpush1.bf16.msra.mxu1 %v2390_v18  ;;  %v2483_v18 = vld [vmem:[%s3214_s1 + $0x440] ss:$8 sps:$4 sm:$0xff]  }
  0x5a   : > { %1403 = vmatpush1.bf16.msra.mxu0 %v2387_v55  ;;  %738 = vmatprep.subr.bf16.mxu1 %v2398_v57  ;;  %v2476_v55 = vld [vmem:[%s3214_s1 + $0x414] ss:$8 sps:$4 sm:$0xff]  }
  0x5b   : > { %1404 = vmatprep.subr.bf16.mxu0 %v2395_v50  ;;  %v2474_v50 = vld [vmem:[%s3214_s1 + $0x410] ss:$8 sps:$4 sm:$0xff]   ;;  %v2488_v57 = vld [vmem:[%s3214_s1 + $0x454] ss:$8 sps:$4 sm:$0xff]  }
  0x5d   : > { %739 = vmatpush1.bf16.msra.mxu1 %v2396_v61  ;;  %v2489_v61 = vld [vmem:[%s3214_s1 + $0x460] ss:$8 sps:$4 sm:$0xff]  }
  0x5e   : > { %1405 = vmatpush1.bf16.msra.mxu0 %v2393_v60  ;;  %740 = vmatprep.subr.bf16.mxu1 %v2404_v63  ;;  %v2486_v60 = vld [vmem:[%s3214_s1 + $0x450] ss:$8 sps:$4 sm:$0xff]   ;;  %v2494_v63 = vld [vmem:[%s3214_s1 + $0x474] ss:$8 sps:$4 sm:$0xff]  }
  0x5f   : > { %1406 = vmatprep.subr.bf16.mxu0 %v2401_v49  ;;  %v2491_v49 = vld [vmem:[%s3214_s1 + $0x464] ss:$8 sps:$4 sm:$0xff]  }
  0x61   : > { %741 = vmatpush1.bf16.msra.mxu1 %v2402_v1 }
  0x62   : > { %1407 = vmatpush1.bf16.msra.mxu0 %v2399_v0  ;;  %742 = vmatprep.subr.bf16.mxu1 %v2410_v4  ;;  %v2492_v0 = vld [vmem:[%s3214_s1 + $0x470] ss:$8 sps:$4 sm:$0xff]  }
  0x63   : > { %1408 = vmatprep.subr.bf16.mxu0 %v2407_v58 }
  0x65   : > { %743 = vmatpush1.bf16.msra.mxu1 %v2408_v10  ;;  %v1779_v10 = vld [vmem:[%s3215_s2] sm:$0x3] }
  0x66   : > { %1409 = vmatpush1.bf16.msra.mxu0 %v2405_v5  ;;  %744 = vmatprep.subr.bf16.mxu1 %v2416_v11  ;;  %v1787_v11 = vsub.s32 1, %v2608_v27 }
  0x67   : > { %1410 = vmatprep.subr.bf16.mxu0 %v2413_v6  ;;  %v1783_v6 = vsub.s32 0, %v2608_v27 }
  0x69   : > { %745 = vmatpush1.bf16.msra.mxu1 %v2414_v16  ;;  %v1788_v16 = vrot.slane %v1779_v10, %v1787_v11 }
  0x6a   : > { %1411 = vmatpush1.bf16.msra.mxu0 %v2411_v13  ;;  %893 = vmatprep.subr.bf16.mxu1 %v2422_v17  ;;  %v1784_v13 = vrot.slane %v1779_v10, %v1783_v6 }
  0x6b   : > { %1412 = vmatprep.subr.bf16.mxu0 %v2419_v15 }
  0x6c   : > { %763 = vmatmul.mubr.bf16.vlgmr.msra.gmra.mrb[0].mxu1 %v648_v7  ;;  %v2438_v7 = vld [vmem:[%s3214_s1 + $0x3a4] ss:$8 sps:$4 sm:$0xff]  }
  0x6d   : > { %894 = vmatpush1.bf16.msra.mxu1 %v2420_v21  ;;  %925 = vmatprep.mubr.bf16.mxu1 %v2503_v2 }
  0x6e   : > { %1413 = vmatpush1.bf16.msra.mxu0 %v2417_v19  ;;  %895 = vmatprep.subr.bf16.mxu1 %v2429_v23 }
  0x6f   : > { %1574 = vmatprep.subr.bf16.mxu0 %v2425_v20 }
  0x71   : > { %1431 = vmatmul.mubr.bf16.vlgmr.msra.gmra.mrb[0].mxu0 %v1316_v22  ;;  %896 = vmatpush1.bf16.msra.mxu1 %v2427_v8 }
  0x72   : > { %1575 = vmatpush1.bf16.msra.mxu0 %v2423_v43  ;;  %1606 = vmatprep.mubr.bf16.mxu0 %v2503_v2 }
  0x73   : > { %1576 = vmatprep.subr.bf16.mxu0 %v2432_v24  ;;  %897 = vmatprep.subr.bf16.mxu1 %v2435_v26 }
  0x75   : > { %898 = vmatpush1.bf16.msra.mxu1 %v2433_v28 }
  0x76   : > { %1577 = vmatpush1.bf16.msra.mxu0 %v2430_v3  ;;  %899 = vmatprep.subr.bf16.mxu1 %v2441_v29 }
  0x77   : > { %1578 = vmatprep.subr.bf16.mxu0 %v2438_v7 }
  0x79   : > { %900 = vmatpush1.bf16.msra.mxu1 %v2439_v38 }
  0x7a   : > { %1579 = vmatpush1.bf16.msra.mxu0 %v2436_v36  ;;  %901 = vmatprep.subr.bf16.mxu1 %v2447_v40 }
  0x7b   : > { %1580 = vmatprep.subr.bf16.mxu0 %v2444_v37 }
  0x7d   : > { %902 = vmatpush1.bf16.msra.mxu1 %v2445_v31 }
  0x7e   : > { %1581 = vmatpush1.bf16.msra.mxu0 %v2442_v44  ;;  %903 = vmatprep.subr.bf16.mxu1 %v2453_v52 }
  0x7f   : > { %1582 = vmatprep.subr.bf16.mxu0 %v2450_v30 }
  0x81   : > { %904 = vmatpush1.bf16.msra.mxu1 %v2451_v34 }
  0x82   : > { %1583 = vmatpush1.bf16.msra.mxu0 %v2448_v33  ;;  %905 = vmatprep.subr.bf16.mxu1 %v2459_v47 }
  0x83   : > { %1584 = vmatprep.subr.bf16.mxu0 %v2456_v14 }
  0x85   : > { %906 = vmatpush1.bf16.msra.mxu1 %v2457_v35 }
  0x86   : > { %1585 = vmatpush1.bf16.msra.mxu0 %v2454_v56  ;;  %907 = vmatprep.subr.bf16.mxu1 %v2465_v42 }
  0x87   : > { %1586 = vmatprep.subr.bf16.mxu0 %v2462_v32 }
  0x89   : > { %908 = vmatpush1.bf16.msra.mxu1 %v2463_v46 }
  0x8a   : > { %1587 = vmatpush1.bf16.msra.mxu0 %v2460_v39 }
  0x8b   : > { %1588 = vmatprep.subr.bf16.mxu0 %v2468_v45 }
  0x8c   : > { %926 = vmatmul.mubr.bf16.vlgmr.msra.gmra.mrb[0].mxu1 %v811_v54  ;;  %v2482_v54 = vld [vmem:[%s3214_s1 + $0x434] ss:$8 sps:$4 sm:$0xff]  }
  0x8e   : > { %1589 = vmatpush1.bf16.msra.mxu0 %v2466_v53 }
  0x8f   : > { %1732 = vmatprep.subr.bf16.mxu0 %v2473_v48 }
  0x91   : > { %1607 = vmatmul.mubr.bf16.vlgmr.msra.gmra.mrb[0].mxu0 %v2848_v59  ;;  %v2485_v59 = vld [vmem:[%s3214_s1 + $0x444] ss:$8 sps:$4 sm:$0xff]  }
  0x92   : > { %1733 = vmatpush1.bf16.msra.mxu0 %v2471_v41  ;;  %1764 = vmatprep.mubr.bf16.mxu0 %v2503_v2  ;;  %v2480_v2 = vld [vmem:[%s3214_s1 + $0x430] ss:$8 sps:$4 sm:$0xff]  }
  0x93   : > { %1734 = vmatprep.subr.bf16.mxu0 %v2476_v55 }
  0x96   : > { %1735 = vmatpush1.bf16.msra.mxu0 %v2474_v50 }
  0x97   : > { %1736 = vmatprep.subr.bf16.mxu0 %v2479_v25 }
  0x9a   : > { %1737 = vmatpush1.bf16.msra.mxu0 %v2477_v51 }
  0x9b   : > { %1738 = vmatprep.subr.bf16.mxu0 %v2482_v54 }
  0x9e   : > { %1739 = vmatpush1.bf16.msra.mxu0 %v2480_v2 }
  0x9f   : > { %1740 = vmatprep.subr.bf16.mxu0 %v2485_v59 }
  0xa2   : > { %1741 = vmatpush1.bf16.msra.mxu0 %v2483_v18 }
  0xa3   : > { %1742 = vmatprep.subr.bf16.mxu0 %v2488_v57 }
  0xa6   : > { %1743 = vmatpush1.bf16.msra.mxu0 %v2486_v60 }
  0xa7   : > { %1744 = vmatprep.subr.bf16.mxu0 %v2491_v49 }
  0xaa   : > { %1745 = vmatpush1.bf16.msra.mxu0 %v2489_v61 }
  0xab   : > { %1746 = vmatprep.subr.bf16.mxu0 %v2494_v63 }
  0xae   : > { %1747 = vmatpush1.bf16.msra.mxu0 %v2492_v0 }
  0xb1   : > { %1765 = vmatmul.mubr.bf16.vlgmr.msra.gmra.mrb[0].mxu0 %v1650_v12 }
 0x15f   : > { %v927_v58 = vpop.f32.mrb[0].mxu1 }
 0x160   : > { %v929_v1 = vpop.f32.mrb[1].mxu1 }
 0x161   : > { %v931_v4 = vpop.f32.mrb[2].mxu1 }
 0x162   : > { %v933_v5 = vpop.f32.mrb[3].mxu1 }
 0x184   : > { %v1766_v15 = vpop.f32.mrb[0].mxu0 }
 0x185   : > { %v2231_v17 = vadd.f32 %v1766_v15, %v927_v58  ;;  %v1768_v19 = vpop.f32.mrb[1].mxu0 }
 0x186   : > { %v2232_v62 = vadd.f32 %v1768_v19, %v929_v1  ;;  %v1770_v9 = vpop.f32.mrb[2].mxu0 }
 0x187   : > { %v1791_v12 = vadd.f32 %v2231_v17, %v1784_v13  ;;  %v2233_v20 = vadd.f32 %v1770_v9, %v931_v4  ;;  %v1772_v21 = vpop.f32.mrb[3].mxu0 }
 0x188   : > { %v1792_v22 = vadd.f32 %v2232_v62, %v1788_v16  ;;  %v2234_v23 = vadd.f32 %v1772_v21, %v933_v5 }
 0x189   : > { %v1795_v43 = vmax.f32 %v1791_v12, 0.0  ;;  %v1793_v24 = vadd.f32 %v2233_v20, %v1784_v13 }
 0x18a   : > { %v1796_v8 = vmax.f32 %v1792_v22, 0.0  ;;  %v1794_v26 = vadd.f32 %v2234_v23, %v1788_v16 }
 0x18b   : > { %v1797_v3 = vmax.f32 %v1793_v24, 0.0 }
 0x18c   : > { %v1803_v7 = vcombine.low %v1795_v43, %v1796_v8  ;;  %v1804_v27 = vcombine.high %v1795_v43, %v1796_v8  ;;  %v2216_v28 = vcombine.low %v1796_v8, %v1796_v8  ;;  %v2217_v29 = vcombine.high %v1796_v8, %v1796_v8 }
 0x18d   : > { %v1798_v36 = vmax.f32 %v1794_v26, 0.0 }
 0x18e   : > { %v2220_v37 = vpack.c.bf16 %v2216_v28, %v1803_v7  ;;  %v2221_v38 = vpack.c.bf16 %v2217_v29, %v1804_v27 }
 0x18f   : > { %v1805_v40 = vcombine.low %v1797_v3, %v1798_v36  ;;  %v1806_v44 = vcombine.high %v1797_v3, %v1798_v36  ;;  %v2218_v30 = vcombine.low %v1798_v36, %v1798_v36  ;;  %v2219_v31 = vcombine.high %v1798_v36, %v1798_v36 }
 0x190   : > { %2224 = vst.sshfl [vmem:[%s170_s9] sm:$0x33 pattern:$0x76325410] %v2220_v37 }
 0x191   : > { %2225 = vst.sshfl [vmem:[%s170_s9 + $0x4] sm:$0x33 pattern:$0x76325410] %v2221_v38  ;;  %v2222_v52 = vpack.c.bf16 %v2218_v30, %v1805_v40  ;;  %v2223_v33 = vpack.c.bf16 %v2219_v31, %v1806_v44 }
 0x193   : > { %2226 = vst.sshfl [vmem:[%s170_s9 + $0x8] sm:$0x33 pattern:$0x76325410] %v2222_v52 }
 0x194   : > { %2227 = vst.sshfl [vmem:[%s170_s9 + $0xc] sm:$0x33 pattern:$0x76325410] %v2223_v33 }
 0x195 PF: > { %s13_s12 = sadd.s32 1, %s2501_s12  }
 0x196   : > { %p10_p4 = scmp.ge.s32.totalorder %s13_s12, 6  }
 0x198   :  { %12 = sbr.rel (!%p10_p4) target bundleno = 1 (0x1), region = 70 }

// kernel: sr_loss.16
= control target key start
LH: loop header
LB: loop body
LE: loop exit
PB: predicated region body
PF: predicated region fallthrough
CT: control target
= control target key end

     0   :  { %s2707_s15 = smov 0   ;;  %s3224_s0 = inlined_call_operand.vmem [shape: bf16[4,10,10,128], index: 0, kind: input, shape index: {}]   ;;  %s3225_s1 = inlined_call_operand.vmem [shape: bf16[3,3,128,128], index: 1, kind: input, shape index: {}]   ;;  %s3226_s2 = inlined_call_operand.vmem [shape: f32[1,128], index: 2, kind: input, shape index: {}]   ;;  %s3227_s3 = inlined_call_operand.vmem [shape: bf16[4,8,8,128], index: 3, kind: output, shape index: {0}]   ;;  %s3228_s4 = inlined_call_operand.vmem [shape: bf16[4,4,4,128], index: 4, kind: output, shape index: {1}]  }
   0x1 LB: > { %s1905_s16 = sadd.s32 4294967295, %s2680_s15   ;;  %p1909_p0 = scmp.ge.s32.totalorder %s2680_s15, 1  ;;  %s2680_s15 = sphi %s2707_s15, %s15_s15  }
   0x2   : > { %p165_p1 = scmp.lt.s32.totalorder %s2680_s15, 5 }
   0x4   : > { %p166_p2 = pnand %p1909_p0, %p165_p1 }
   0x5   : > { %v2593_v0 = vld [vmem:[%s3225_s1 + $0x40] sm:$0xff] (!%p166_p2)   ;;  %p196_p3 = scmp.lt.s32.totalorder (!%p166_p2), %s1905_s16, 3  ;;  %v2595_v2 = vld [vmem:[%s3225_s1 + $0x48] sm:$0xff] (!%p166_p2)   ;;  %v2597_v4 = vld [vmem:[%s3225_s1 + $0x50] sm:$0xff] (!%p166_p2)   ;;  %vm248_vm0 = vsmask.f32 (!%p166_p2), 3328 }
   0x6   : > { %169 = sbr.rel (%p166_p2) target bundleno = 406 (0x196), region = 32  ;;  %v2594_v1 = vld [vmem:[%s3225_s1 + $0x100] sm:$0xff] (!%p166_p2)   ;;  %2288 = vmatprep.subr.bf16.mxu1 (!%p166_p2), %v2593_v0  ;;  %v2596_v3 = vld [vmem:[%s3225_s1 + $0x108] sm:$0xff] (!%p166_p2)   ;;  %v2598_v5 = vld [vmem:[%s3225_s1 + $0x110] sm:$0xff] (!%p166_p2)   ;;  %vm249_vm1 = vsmask.f32 (!%p166_p2), 7440 }
   0x7   : > { %2384 = vmatprep.subr.bf16.mxu0 (!%p166_p2), %v2594_v1  ;;  %2289 = vmatpush3.bf16.msra.mxu1 (!%p166_p2), %v2593_v0  ;;  %v2599_v6 = vld [vmem:[%s3225_s1 + $0x58] sm:$0xff] (!%p166_p2)   ;;  %v2601_v8 = vld [vmem:[%s3225_s1 + $0x60] sm:$0xff] (!%p166_p2)   ;;  %v2603_v10 = vld [vmem:[%s3225_s1 + $0x68] sm:$0xff] (!%p166_p2)   ;;  %vm654_vm3 = vcmask (!%p166_p2), 1042432   ;;  %vm655_vm4 = vcmask (!%p166_p2), 1046532  }
   0x8   : > { %2385 = vmatpush3.bf16.msra.mxu0 (!%p166_p2), %v2594_v1  ;;  %2290 = vmatprep.subr.bf16.mxu1 (!%p166_p2), %v2595_v2  ;;  %v2600_v7 = vld [vmem:[%s3225_s1 + $0x118] sm:$0xff] (!%p166_p2)   ;;  %v2602_v9 = vld [vmem:[%s3225_s1 + $0x120] sm:$0xff] (!%p166_p2)   ;;  %v2604_v14 = vld [vmem:[%s3225_s1 + $0x128] sm:$0xff] (!%p166_p2)  }
   0x9   : > { %2386 = vmatprep.subr.bf16.mxu0 (!%p166_p2), %v2596_v3  ;;  %v2605_v22 = vld [vmem:[%s3225_s1 + $0x70] sm:$0xff] (!%p166_p2)   ;;  %v2607_v38 = vld [vmem:[%s3225_s1 + $0x78] sm:$0xff] (!%p166_p2)   ;;  %vm2804_vm2 = vmor (!%p166_p2), %vm248_vm0, %vm249_vm1 }
   0xa   : > { %v2606_v23 = vld [vmem:[%s3225_s1 + $0x130] sm:$0xff] (!%p166_p2)   ;;  %v2608_v48 = vld [vmem:[%s3225_s1 + $0x138] sm:$0xff] (!%p166_p2)   ;;  %v2609_v62 = vld [vmem:[%s3225_s1] sm:$0xff] (!%p166_p2)  }
   0xb   : > { %2291 = vmatpush3.bf16.msra.mxu1 (!%p166_p2), %v2595_v2  ;;  %vm2917_vm5 = vmor (!%p166_p2), %vm654_vm3, %vm655_vm4  ;;  %v2637_v39 = vld [vmem:[%s3225_s1 + $0xa8] sm:$0xff] (!%p166_p2)  }
   0xc   : > { %2387 = vmatpush3.bf16.msra.mxu0 (!%p166_p2), %v2596_v3  ;;  %2292 = vmatprep.subr.bf16.mxu1 (!%p166_p2), %v2597_v4  ;;  %v2610_v3 = vld [vmem:[%s3225_s1 + $0x140] sm:$0xff] (!%p166_p2)  }
   0xd   : > { %s3234_s16 = smov (!%p196_p3, %s1905_s16), 3  ;;  %2388 = vmatprep.subr.bf16.mxu0 %v2598_v5 }
   0xe   : > { %s2584_s7 = smul.u32 80, %s3234_s16  ;;  %s2155_s24 = sshll.u32 %s3234_s16, 5 }
   0xf   : > { %2293 = vmatpush3.bf16.msra.mxu1 %v2597_v4  ;;  %s205_s27 = scalar_lea.vmem %s3227_s3, %s2155_s24  ;;  %s2156_s28 = sshll.u32 %s3234_s16, 3 }
  0x10   : > { %2389 = vmatpush3.bf16.msra.mxu0 %v2598_v5  ;;  %2294 = vmatprep.subr.bf16.mxu1 %v2599_v6  ;;  %s2751_s14 = scalar_lea.vmem %s3224_s0, %s2584_s7  ;;  %s210_s5 = scalar_lea.vmem %s3228_s4, %s2156_s28 }
  0x11   : > { %2390 = vmatprep.subr.bf16.mxu0 %v2600_v7  ;;  %v2757_v11 = vld [vmem:[%s2751_s14] sm:$0xf]  ;;  %v2760_v12 = vld [vmem:[%s2751_s14 + $0x4] sm:$0x1]  ;;  %v2763_v13 = vld [vmem:[%s2751_s14 + $0x8] sm:$0xf] }
  0x12   : > { %v2769_v15 = vld [vmem:[%s2751_s14 + $0xc] sm:$0x1]  ;;  %v252_v16 = vshrl.u32 %v2757_v11, 16  ;;  %v255_v17 = vshll.u32 %v2757_v11, 16  ;;  %v261_v18 = vshll.u32 %v2760_v12, 16  ;;  %v266_v19 = vshrl.u32 %v2763_v13, 16 }
  0x13   : > { %2295 = vmatpush3.bf16.msra.mxu1 %v2599_v6  ;;  %v269_v20 = vshll.u32 %v2763_v13, 16  ;;  %v275_v21 = vshll.u32 %v2769_v15, 16  ;;  %v2784_v30 = vld [vmem:[%s2751_s14 + $0x10] sm:$0xf]  ;;  %v2787_v31 = vld [vmem:[%s2751_s14 + $0x14] sm:$0x1] }
  0x14   : > { %2391 = vmatpush3.bf16.msra.mxu0 %v2600_v7  ;;  %2296 = vmatprep.subr.bf16.mxu1 %v2601_v8  ;;  %v254_v24 = vrot.slane %v252_v16, 4  ;;  %v257_v25 = vrot.slane %v255_v17, 5  ;;  %v263_v26 = vrot.slane %v261_v18, 5  ;;  %v268_v27 = vrot.slane %v266_v19, 4  ;;  %v2790_v33 = vld [vmem:[%s2751_s14 + $0x18] sm:$0xf] }
  0x15   : > { %2392 = vmatprep.subr.bf16.mxu0 %v2602_v9  ;;  %v271_v28 = vrot.slane %v269_v20, 5  ;;  %v277_v29 = vrot.slane %v275_v21, 5  ;;  %v2793_v34 = vld [vmem:[%s2751_s14 + $0x1c] sm:$0x1]  ;;  %v280_v35 = vshrl.u32 %v2784_v30, 16  ;;  %v283_v36 = vshll.u32 %v2784_v30, 16 }
  0x16   : > { %v258_v32 = vor.u32 %v257_v25, %v254_v24  ;;  %v2007_v37 = vcombine.low %v2763_v13, %v2784_v30  ;;  %v289_v41 = vshll.u32 %v2787_v31, 16  ;;  %v294_v42 = vshrl.u32 %v2790_v33, 16  ;;  %v2816_v52 = vld [vmem:[%s2751_s14 + $0x20] sm:$0xf]  ;;  %v2821_v56 = vld [vmem:[%s2751_s14 + $0x24] sm:$0x1] }
  0x17   : > { %2297 = vmatpush3.bf16.msra.mxu1 %v2601_v8  ;;  %v272_v40 = vor.u32 %v271_v28, %v268_v27  ;;  %v297_v43 = vshll.u32 %v2790_v33, 16  ;;  %v282_v45 = vrot.slane %v280_v35, 4  ;;  %v285_v46 = vrot.slane %v283_v36, 5  ;;  %v2611_v17 = vld [vmem:[%s3225_s1 + $0x8] sm:$0xff]   ;;  %v2615_v35 = vld [vmem:[%s3225_s1 + $0x18] sm:$0xff]  }
  0x18   : > { %2393 = vmatpush3.bf16.msra.mxu0 %v2602_v9  ;;  %2298 = vmatprep.subr.bf16.mxu1 %v2603_v10  ;;  %v259_v44 = vrot.slane %v258_v32, 4  ;;  %v303_v47 = vshll.u32 %v2793_v34, 16  ;;  %v296_v50 = vrot.slane %v294_v42, 4  ;;  %v291_v55 = vrot.slane %v289_v41, 5  ;;  %v2612_v24 = vld [vmem:[%s3225_s1 + $0x148] sm:$0xff]   ;;  %v2614_v32 = vld [vmem:[%s3225_s1 + $0x150] sm:$0xff]  }
  0x19   : > { %2394 = vmatprep.subr.bf16.mxu0 %v2604_v14  ;;  %v273_v49 = vrot.slane %v272_v40, 4  ;;  %v299_v51 = vrot.slane %v297_v43, 5  ;;  %v286_v54 = vor.u32 %v285_v46, %v282_v45  ;;  %v308_v60 = vshrl.u32 %v2816_v52, 16  ;;  %v2857_v25 = vld [vmem:[%s2751_s14 + $0x28] sm:$0xf] }
  0x1a   : > { %v264_v53 = vsel %vm2804_vm2, %v259_v44, %v263_v26  ;;  %v305_v59 = vrot.slane %v303_v47, 5  ;;  %v311_v0 = vshll.u32 %v2816_v52, 16  ;;  %v317_v1 = vshll.u32 %v2821_v56, 16  ;;  %v2861_v27 = vld [vmem:[%s2751_s14 + $0x2c] sm:$0x1] }
  0x1b   : > { %2299 = vmatpush3.bf16.msra.mxu1 %v2603_v10  ;;  %v278_v57 = vsel %vm2804_vm2, %v273_v49, %v277_v29  ;;  %v300_v58 = vor.u32 %v299_v51, %v296_v50  ;;  %v287_v63 = vrot.slane %v286_v54, 4  ;;  %v310_v4 = vrot.slane %v308_v60, 4  ;;  %v2876_v42 = vld [vmem:[%s2751_s14 + $0x34] sm:$0x1]  ;;  %v2616_v54 = vld [vmem:[%s3225_s1 + $0x158] sm:$0xff]  }
  0x1c   : > { %2395 = vmatpush3.bf16.msra.mxu0 %v2604_v14  ;;  %2300 = vmatprep.subr.bf16.mxu1 %v2605_v22  ;;  %v1931_v61 = vcombine.low %v264_v53, %v278_v57  ;;  %v313_v6 = vrot.slane %v311_v0, 5  ;;  %v2008_v7 = vcombine.low %v2790_v33, %v2816_v52  ;;  %v319_v16 = vrot.slane %v317_v1, 5  ;;  %v2885_v53 = vld [vmem:[%s2751_s14 + $0x38] sm:$0xf]  ;;  %v2900_v0 = vld [vmem:[%s2751_s14 + $0x40] sm:$0xf] }
  0x1d   : > { %2396 = vmatprep.subr.bf16.mxu0 %v2606_v23  ;;  %v301_v2 = vrot.slane %v300_v58, 4  ;;  %v292_v5 = vsel %vm2804_vm2, %v287_v63, %v291_v55  ;;  %v663_v19 = vrot.slane %v2769_v15, 5  ;;  %v667_v20 = vrot.slane %v2787_v31, 5  ;;  %v2617_v55 = vld [vmem:[%s3225_s1 + $0x20] sm:$0xff]   ;;  %v2894_v58 = vld [vmem:[%s2751_s14 + $0x3c] sm:$0x1] }
  0x1e   : > { %2304 = vmatprep.mubr.bf16.mxu1 %v1931_v61  ;;  %v2035_v9 = vcombine.low %v278_v57, %v292_v5  ;;  %v314_v14 = vor.u32 %v313_v6, %v310_v4  ;;  %v1956_v26 = vrot.slane %v2763_v13, 9  ;;  %v322_v28 = vshrl.u32 %v2857_v25, 16  ;;  %v2903_v1 = vld [vmem:[%s2751_s14 + $0x44] sm:$0x1]  ;;  %v2620_v15 = vld [vmem:[%s3225_s1 + $0x168] sm:$0xff]  }
  0x1f   : > { %2301 = vmatpush3.bf16.msra.mxu1 %v2605_v22  ;;  %v306_v8 = vsel %vm2804_vm2, %v301_v2, %v305_v59  ;;  %v2613_v22 = vld [vmem:[%s3225_s1 + $0x10] sm:$0xff]   ;;  %v325_v29 = vshll.u32 %v2857_v25, 16  ;;  %v331_v36 = vshll.u32 %v2861_v27, 16  ;;  %v345_v45 = vshll.u32 %v2876_v42, 16 }
  0x20   : > { %2397 = vmatpush3.bf16.msra.mxu0 %v2606_v23  ;;  %2302 = vmatprep.subr.bf16.mxu1 %v2607_v38  ;;  %v2840_v10 = vcombine.low %v292_v5, %v306_v8  ;;  %v315_v18 = vrot.slane %v314_v14, 4  ;;  %v324_v40 = vrot.slane %v322_v28, 4  ;;  %v1957_v46 = vrot.slane %v2784_v30, 9  ;;  %v2619_v28 = vld [vmem:[%s3225_s1 + $0x28] sm:$0xff]  }
  0x21   : > { %2398 = vmatprep.subr.bf16.mxu0 %v2608_v48  ;;  %2400 = vmatprep.mubr.bf16.mxu0 %v2035_v9  ;;  %v327_v41 = vrot.slane %v325_v29, 5  ;;  %v333_v49 = vrot.slane %v331_v36, 5  ;;  %v347_v57 = vrot.slane %v345_v45, 5  ;;  %v350_v59 = vshrl.u32 %v2885_v53, 16 }
  0x22   : > { %v320_v21 = vsel %vm2804_vm2, %v315_v18, %v319_v16  ;;  %v353_v60 = vshll.u32 %v2885_v53, 16  ;;  %v359_v63 = vshll.u32 %v2894_v58, 16  ;;  %v992_v4 = vshrl.u32 %v2900_v0, 16  ;;  %v2618_v16 = vld [vmem:[%s3225_s1 + $0x160] sm:$0xff]  }
  0x23   : > { %2303 = vmatpush3.bf16.msra.mxu1 %v2607_v38  ;;  %v2036_v23 = vcombine.low %v306_v8, %v320_v21  ;;  %v2873_v38 = vld [vmem:[%s2751_s14 + $0x30] sm:$0xf]  ;;  %v352_v2 = vrot.slane %v350_v59, 4  ;;  %v995_v5 = vshll.u32 %v2900_v0, 16  ;;  %v1001_v14 = vshll.u32 %v2903_v1, 16  ;;  %v2626_v59 = vld [vmem:[%s3225_s1 + $0x80] sm:$0xff]  }
  0x24   : > { %2399 = vmatpush3.bf16.msra.mxu0 %v2608_v48  ;;  %2312 = vmatprep.subr.bf16.mxu1 %v2609_v62  ;;  %v336_v43 = vshrl.u32 %v2873_v38, 16  ;;  %v339_v44 = vshll.u32 %v2873_v38, 16  ;;  %v2009_v47 = vcombine.low %v2857_v25, %v2873_v38  ;;  %v328_v48 = vor.u32 %v327_v41, %v324_v40 }
  0x25   : > { %2408 = vmatprep.subr.bf16.mxu0 %v2610_v3  ;;  %v361_v9 = vrot.slane %v359_v63, 5  ;;  %v1003_v41 = vrot.slane %v1001_v14, 5  ;;  %v2939_v45 = vsel %vm2917_vm5, %v1956_v26, %v663_v19  ;;  %v659_v26 = vrot.slane %v2760_v12, 5  ;;  %v2985_v63 = vld [vmem:[%s2751_s14 + $0x48] sm:$0xf]  ;;  %v2627_v14 = vld [vmem:[%s3225_s1 + $0x180] sm:$0xff]  }
  0x26   : > { %2305 = vmatmul.mubr.bf16.vlgmr.msra.gmra.mrb[0].mxu1 %v2840_v10  ;;  %v338_v50 = vrot.slane %v336_v43, 4  ;;  %v341_v51 = vrot.slane %v339_v44, 5  ;;  %v329_v61 = vrot.slane %v328_v48, 4  ;;  %v2945_v48 = vsel %vm2917_vm5, %v1957_v46, %v667_v20 }
  0x27   : > { %2313 = vmatpush3.bf16.msra.mxu1 %v2609_v62  ;;  %2401 = vmatmul.mubr.bf16.vlgmr.msra.gmra.mrb[0].mxu0 %v2036_v23  ;;  %v997_v23 = vrot.slane %v995_v5, 5  ;;  %v2064_v20 = vcombine.low %v2939_v45, %v2945_v48  ;;  %v671_v46 = vrot.slane %v2793_v34, 5  ;;  %v1958_v12 = vrot.slane %v2790_v33, 9  ;;  %v231_v5 = vld [vmem:[%s2751_s14 + $0x4c] sm:$0x1] }
  0x28   : > { %2314 = vmatprep.subr.bf16.mxu1 %v2611_v17  ;;  %2409 = vmatpush3.bf16.msra.mxu0 %v2610_v3  ;;  %v342_v62 = vor.u32 %v341_v51, %v338_v50  ;;  %v355_v3 = vrot.slane %v353_v60, 5  ;;  %v334_v6 = vsel %vm2804_vm2, %v329_v61, %v333_v49  ;;  %v2621_v49 = vld [vmem:[%s3225_s1 + $0x30] sm:$0xff]   ;;  %v675_v51 = vrot.slane %v2821_v56, 5 }
  0x29   : > { %2410 = vmatprep.subr.bf16.mxu0 %v2612_v24  ;;  %v1959_v34 = vrot.slane %v2816_v52, 9  ;;  %v1955_v56 = vrot.slane %v2757_v11, 9  ;;  %v1960_v60 = vrot.slane %v2857_v25, 9  ;;  %v679_v61 = vrot.slane %v2861_v27, 5  ;;  %v2629_v27 = vld [vmem:[%s3225_s1 + $0x88] sm:$0xff]  }
  0x2a   : > { %v343_v8 = vrot.slane %v342_v62, 4  ;;  %v356_v18 = vor.u32 %v355_v3, %v352_v2  ;;  %v1961_v62 = vrot.slane %v2873_v38, 9  ;;  %v1155_v2 = vrot.slane %v2903_v1, 5 }
  0x2b   : > { %2315 = vmatpush3.bf16.msra.mxu1 %v2611_v17  ;;  %v2913_v17 = vcombine.low %v320_v21, %v334_v6  ;;  %v2010_v21 = vcombine.low %v2885_v53, %v2900_v0  ;;  %v2991_v3 = vcombine.low %v2784_v30, %v2790_v33  ;;  %v3005_v1 = vsel %vm2917_vm5, %v1958_v12, %v671_v46  ;;  %v2654_v30 = vld [vmem:[%s3225_s1 + $0x1e0] sm:$0xff]   ;;  %v2669_v33 = vld [vmem:[%s3225_s1 + $0x218] sm:$0xff]  }
  0x2c   : > { %2316 = vmatprep.subr.bf16.mxu1 %v2613_v22  ;;  %2411 = vmatpush3.bf16.msra.mxu0 %v2612_v24  ;;  %v348_v29 = vsel %vm2804_vm2, %v343_v8, %v347_v57  ;;  %v357_v36 = vrot.slane %v356_v18, 4  ;;  %v2624_v57 = vld [vmem:[%s3225_s1 + $0x178] sm:$0xff]   ;;  %v3001_v8 = vcombine.low %v2816_v52, %v2857_v25  ;;  %v3052_v46 = vcombine.low %v2873_v38, %v2885_v53  ;;  %v2635_v24 = vld [vmem:[%s3225_s1 + $0xa0] sm:$0xff]   ;;  %v2672_v25 = vld [vmem:[%s3225_s1 + $0x230] sm:$0xff]  }
  0x2d   : > { %2412 = vmatprep.subr.bf16.mxu0 %v2614_v32  ;;  %2308 = vmatprep.mubr.bf16.mxu1 %v2913_v17  ;;  %v2670_v52 = vld [vmem:[%s3225_s1 + $0x220] sm:$0xff]   ;;  %v2673_v38 = vld [vmem:[%s3225_s1 + $0x238] sm:$0xff]  }
  0x2e   : > { %v362_v43 = vsel %vm2804_vm2, %v357_v36, %v361_v9  ;;  %v1604_v9 = vrot.slane %v231_v5, 5  ;;  %v1450_v36 = vshll.u32 %v2985_v63, 16 }
  0x2f   : > { %2317 = vmatpush3.bf16.msra.mxu1 %v2613_v22  ;;  %v994_v22 = vrot.slane %v992_v4, 4  ;;  %v2950_v50 = vcombine.low %v348_v29, %v362_v43  ;;  %v683_v4 = vrot.slane %v2876_v42, 5  ;;  %v3009_v42 = vsel %vm2917_vm5, %v1959_v34, %v675_v51  ;;  %v2632_v34 = vld [vmem:[%s3225_s1 + $0x190] sm:$0xff]  }
  0x30   : > { %2318 = vmatprep.subr.bf16.mxu1 %v2615_v35  ;;  %2413 = vmatpush3.bf16.msra.mxu0 %v2614_v32  ;;  %v1943_v32 = vcombine.low %v2757_v11, %v2763_v13  ;;  %v2047_v11 = vrot.slane %v2900_v0, 9  ;;  %v2655_v13 = vld [vmem:[%s3225_s1 + $0xe8] sm:$0xff]  }
  0x31   : > { %2414 = vmatprep.subr.bf16.mxu0 %v2616_v54  ;;  %v998_v40 = vor.u32 %v997_v23, %v994_v22  ;;  %2309 = vmatmul.mubr.bf16.gmra.mrb[4].mxu1 %v2950_v50  ;;  %v1447_v22 = vshrl.u32 %v2985_v63, 16  ;;  %v2631_v23 = vld [vmem:[%s3225_s1 + $0x90] sm:$0xff]  }
  0x32   : > { %2328 = vmatprep.mubr.bf16.mxu1 %v1943_v32 }
  0x33   : > { %2319 = vmatpush3.bf16.msra.mxu1 %v2615_v35  ;;  %v2037_v35 = vcombine.low %v334_v6, %v348_v29  ;;  %v999_v44 = vrot.slane %v998_v40, 4  ;;  %v2126_v6 = vrot.slane %v2985_v63, 9  ;;  %v3033_v29 = vsel %vm2917_vm5, %v1961_v62, %v683_v4  ;;  %v2643_v62 = vld [vmem:[%s3225_s1 + $0xb8] sm:$0xff]  }
  0x34   : > { %2320 = vmatprep.subr.bf16.mxu1 %v2617_v55  ;;  %2415 = vmatpush3.bf16.msra.mxu0 %v2616_v54  ;;  %v2623_v54 = vld [vmem:[%s3225_s1 + $0x38] sm:$0xff]   ;;  %v2065_v40 = vcombine.low %v3005_v1, %v3009_v42  ;;  %v1449_v32 = vrot.slane %v1447_v22, 4  ;;  %v3103_v4 = vcombine.low %v2945_v48, %v3005_v1  ;;  %v2649_v48 = vld [vmem:[%s3225_s1 + $0xd0] sm:$0xff]   ;;  %v2653_v22 = vld [vmem:[%s3225_s1 + $0xe0] sm:$0xff]  }
  0x35   : > { %2404 = vmatprep.mubr.bf16.mxu0 %v2037_v35  ;;  %2416 = vmatprep.subr.bf16.mxu0 %v2618_v16  ;;  %v2957_v31 = vsel %vm2804_vm2, %v999_v44, %v1003_v41  ;;  %v3020_v18 = vsel %vm2917_vm5, %v2126_v6, %v1604_v9  ;;  %v1962_v41 = vrot.slane %v2885_v53, 9  ;;  %v660_v44 = vsel %vm2917_vm5, %v1955_v56, %v659_v26  ;;  %v2647_v6 = vld [vmem:[%s3225_s1 + $0xc8] sm:$0xff]  }
  0x36   : > { %v2038_v19 = vcombine.low %v362_v43, %v2957_v31  ;;  %v687_v43 = vrot.slane %v2894_v58, 5  ;;  %v1979_v58 = vcombine.low %v660_v44, %v2939_v45  ;;  %v2648_v9 = vld [vmem:[%s3225_s1 + $0x1c8] sm:$0xff]  }
  0x37   : > { %2321 = vmatpush3.bf16.msra.mxu1 %v2617_v55  ;;  %v2622_v55 = vld [vmem:[%s3225_s1 + $0x170] sm:$0xff]  }
  0x38   : > { %2322 = vmatprep.subr.bf16.mxu1 %v2619_v28  ;;  %2417 = vmatpush3.bf16.msra.mxu0 %v2618_v16  ;;  %v3016_v16 = vsel %vm2917_vm5, %v2047_v11, %v1155_v2  ;;  %v2641_v11 = vld [vmem:[%s3225_s1 + $0x1b0] sm:$0xff]   ;;  %v2645_v2 = vld [vmem:[%s3225_s1 + $0xc0] sm:$0xff]  }
  0x39   : > { %2418 = vmatprep.subr.bf16.mxu0 %v2620_v15  ;;  %2405 = vmatmul.mubr.bf16.gmra.mrb[4].mxu0 %v2038_v19  ;;  %v2143_v35 = vcombine.low %v3016_v16, %v3020_v18 }
  0x3a   : > { %2424 = vmatprep.mubr.bf16.mxu0 %v2064_v20  ;;  %v1456_v20 = vshll.u32 %v231_v5, 16 }
  0x3b   : > { %2323 = vmatpush3.bf16.msra.mxu1 %v2619_v28  ;;  %v3029_v28 = vsel %vm2917_vm5, %v1960_v60, %v679_v61  ;;  %v2640_v60 = vld [vmem:[%s3225_s1 + $0xb0] sm:$0xff]   ;;  %v2638_v61 = vld [vmem:[%s3225_s1 + $0x1a8] sm:$0xff]  }
  0x3c   : > { %2324 = vmatprep.subr.bf16.mxu1 %v2621_v49  ;;  %2419 = vmatpush3.bf16.msra.mxu0 %v2620_v15  ;;  %v2630_v15 = vld [vmem:[%s3225_s1 + $0x188] sm:$0xff]   ;;  %v2066_v19 = vcombine.low %v3029_v28, %v3033_v29  ;;  %v1458_v26 = vrot.slane %v1456_v20, 5  ;;  %v3107_v5 = vcombine.low %v3009_v42, %v3029_v28  ;;  %v2651_v42 = vld [vmem:[%s3225_s1 + $0xd8] sm:$0xff]  }
  0x3d   : > { %2420 = vmatprep.subr.bf16.mxu0 %v2622_v55  ;;  %v2660_v28 = vld [vmem:[%s3225_s1 + $0xf8] sm:$0xff]  }
  0x3f   : > { %2325 = vmatpush3.bf16.msra.mxu1 %v2621_v49  ;;  %v1452_v49 = vrot.slane %v1450_v36, 5  ;;  %v2661_v36 = vld [vmem:[%s3225_s1 + $0x1f8] sm:$0xff]  }
  0x40   : > { %2326 = vmatprep.subr.bf16.mxu1 %v2623_v54  ;;  %2421 = vmatpush3.bf16.msra.mxu0 %v2622_v55  ;;  %v688_v55 = vsel %vm2917_vm5, %v1962_v41, %v687_v43  ;;  %v2668_v41 = vld [vmem:[%s3225_s1 + $0x210] sm:$0xff]  }
  0x41   : > { %2422 = vmatprep.subr.bf16.mxu0 %v2624_v57  ;;  %v1453_v51 = vor.u32 %v1452_v49, %v1449_v32  ;;  %v2067_v56 = vcombine.low %v688_v55, %v3016_v16  ;;  %v3124_v1 = vcombine.low %v3033_v29, %v688_v55  ;;  %v2664_v29 = vld [vmem:[%s3225_s1 + $0x200] sm:$0xff]  }
  0x43   : > { %2327 = vmatpush3.bf16.msra.mxu1 %v2623_v54  ;;  %v2633_v54 = vld [vmem:[%s3225_s1 + $0x98] sm:$0xff]   ;;  %v1454_v12 = vrot.slane %v1453_v51, 4 }
  0x44   : > { %2336 = vmatprep.subr.bf16.mxu1 %v2626_v59  ;;  %2423 = vmatpush3.bf16.msra.mxu0 %v2624_v57 }
  0x45   : > { %2432 = vmatprep.subr.bf16.mxu0 %v2627_v14  ;;  %v1459_v45 = vsel %vm2804_vm2, %v1454_v12, %v1458_v26 }
  0x46   : > { %2329 = vmatmul.mubr.bf16.vlgmr.msra.gmra.mrb[0].mxu1 %v2991_v3  ;;  %v3068_v57 = vcombine.low %v2957_v31, %v1459_v45  ;;  %v2636_v31 = vld [vmem:[%s3225_s1 + $0x1a0] sm:$0xff]  }
  0x47   : > { %2337 = vmatpush3.bf16.msra.mxu1 %v2626_v59  ;;  %2332 = vmatprep.mubr.bf16.mxu1 %v3001_v8  ;;  %v2634_v59 = vld [vmem:[%s3225_s1 + $0x198] sm:$0xff]  }
  0x48   : > { %2338 = vmatprep.subr.bf16.mxu1 %v2629_v27  ;;  %2425 = vmatmul.mubr.bf16.vlgmr.msra.gmra.mrb[0].mxu0 %v2065_v40  ;;  %v2665_v40 = vld [vmem:[%s3225_s1 + $0x208] sm:$0xff]  }
  0x49   : > { %2433 = vmatpush3.bf16.msra.mxu0 %v2627_v14  ;;  %2428 = vmatprep.mubr.bf16.mxu0 %v2066_v19  ;;  %v2650_v14 = vld [vmem:[%s3225_s1 + $0x1d0] sm:$0xff]  }
  0x4a   : > { %2434 = vmatprep.subr.bf16.mxu0 %v2630_v15 }
  0x4b   : > { %2339 = vmatpush3.bf16.msra.mxu1 %v2629_v27  ;;  %v2646_v27 = vld [vmem:[%s3225_s1 + $0x1c0] sm:$0xff]  }
  0x4c   : > { %2340 = vmatprep.subr.bf16.mxu1 %v2631_v23 }
  0x4d   : > { %2435 = vmatpush3.bf16.msra.mxu0 %v2630_v15 }
  0x4e   : > { %2333 = vmatmul.mubr.bf16.gmra.mrb[4].mxu1 %v3052_v46  ;;  %2436 = vmatprep.subr.bf16.mxu0 %v2632_v34 }
  0x4f   : > { %2341 = vmatpush3.bf16.msra.mxu1 %v2631_v23  ;;  %2352 = vmatprep.mubr.bf16.mxu1 %v1979_v58  ;;  %v2652_v23 = vld [vmem:[%s3225_s1 + $0x1d8] sm:$0xff]  }
  0x50   : > { %2342 = vmatprep.subr.bf16.mxu1 %v2633_v54  ;;  %2429 = vmatmul.mubr.bf16.gmra.mrb[4].mxu0 %v2067_v56 }
  0x51   : > { %2437 = vmatpush3.bf16.msra.mxu0 %v2632_v34  ;;  %2448 = vmatprep.mubr.bf16.mxu0 %v2991_v3  ;;  %v2644_v3 = vld [vmem:[%s3225_s1 + $0x1b8] sm:$0xff]  }
  0x52   : > { %2438 = vmatprep.subr.bf16.mxu0 %v2634_v59 }
  0x53   : > { %2343 = vmatpush3.bf16.msra.mxu1 %v2633_v54 }
  0x54   : > { %2344 = vmatprep.subr.bf16.mxu1 %v2635_v24 }
  0x55   : > { %2439 = vmatpush3.bf16.msra.mxu0 %v2634_v59 }
  0x56   : > { %2440 = vmatprep.subr.bf16.mxu0 %v2636_v31 }
  0x57   : > { %2345 = vmatpush3.bf16.msra.mxu1 %v2635_v24 }
  0x58   : > { %2346 = vmatprep.subr.bf16.mxu1 %v2637_v39 }
  0x59   : > { %2441 = vmatpush3.bf16.msra.mxu0 %v2636_v31 }
  0x5a   : > { %2442 = vmatprep.subr.bf16.mxu0 %v2638_v61 }
  0x5b   : > { %2347 = vmatpush3.bf16.msra.mxu1 %v2637_v39 }
  0x5c   : > { %2348 = vmatprep.subr.bf16.mxu1 %v2640_v60 }
  0x5d   : > { %2443 = vmatpush3.bf16.msra.mxu0 %v2638_v61 }
  0x5e   : > { %2444 = vmatprep.subr.bf16.mxu0 %v2641_v11 }
  0x5f   : > { %2349 = vmatpush3.bf16.msra.mxu1 %v2640_v60 }
  0x60   : > { %2350 = vmatprep.subr.bf16.mxu1 %v2643_v62 }
  0x61   : > { %2445 = vmatpush3.bf16.msra.mxu0 %v2641_v11 }
  0x62   : > { %2446 = vmatprep.subr.bf16.mxu0 %v2644_v3 }
  0x63   : > { %2351 = vmatpush3.bf16.msra.mxu1 %v2643_v62 }
  0x64   : > { %2360 = vmatprep.subr.bf16.mxu1 %v2645_v2 }
  0x65   : > { %2447 = vmatpush3.bf16.msra.mxu0 %v2644_v3 }
  0x66   : > { %2353 = vmatmul.mubr.bf16.vlgmr.msra.gmra.mrb[0].mxu1 %v3103_v4  ;;  %2456 = vmatprep.subr.bf16.mxu0 %v2646_v27 }
  0x67   : > { %2361 = vmatpush3.bf16.msra.mxu1 %v2645_v2  ;;  %2356 = vmatprep.mubr.bf16.mxu1 %v3107_v5 }
  0x68   : > { %2362 = vmatprep.subr.bf16.mxu1 %v2647_v6  ;;  %2449 = vmatmul.mubr.bf16.vlgmr.msra.gmra.mrb[0].mxu0 %v3001_v8  ;;  %v2092_v8 = vcombine.low %v2900_v0, %v2985_v63  ;;  %v2656_v63 = vld [vmem:[%s3225_s1 + $0x1e8] sm:$0xff]  }
  0x69   : > { %2457 = vmatpush3.bf16.msra.mxu0 %v2646_v27  ;;  %2452 = vmatprep.mubr.bf16.mxu0 %v3052_v46 }
  0x6a   : > { %2458 = vmatprep.subr.bf16.mxu0 %v2648_v9 }
  0x6b   : > { %2363 = vmatpush3.bf16.msra.mxu1 %v2647_v6 }
  0x6c   : > { %2364 = vmatprep.subr.bf16.mxu1 %v2649_v48 }
  0x6d   : > { %2459 = vmatpush3.bf16.msra.mxu0 %v2648_v9 }
  0x6e   : > { %2357 = vmatmul.mubr.bf16.gmra.mrb[4].mxu1 %v3124_v1  ;;  %2460 = vmatprep.subr.bf16.mxu0 %v2650_v14 }
  0x6f   : > { %2365 = vmatpush3.bf16.msra.mxu1 %v2649_v48  ;;  %2376 = vmatprep.mubr.bf16.mxu1 %v2007_v37  ;;  %v2657_v37 = vld [vmem:[%s3225_s1 + $0xf0] sm:$0xff]  }
  0x70   : > { %2366 = vmatprep.subr.bf16.mxu1 %v2651_v42  ;;  %2453 = vmatmul.mubr.bf16.gmra.mrb[4].mxu0 %v2092_v8 }
  0x71   : > { %2461 = vmatpush3.bf16.msra.mxu0 %v2650_v14  ;;  %2472 = vmatprep.mubr.bf16.mxu0 %v2840_v10  ;;  %v2659_v10 = vld [vmem:[%s3225_s1 + $0x1f0] sm:$0xff]  }
  0x72   : > { %2462 = vmatprep.subr.bf16.mxu0 %v2652_v23 }
  0x73   : > { %2367 = vmatpush3.bf16.msra.mxu1 %v2651_v42 }
  0x74   : > { %2368 = vmatprep.subr.bf16.mxu1 %v2653_v22 }
  0x75   : > { %2463 = vmatpush3.bf16.msra.mxu0 %v2652_v23 }
  0x76   : > { %2464 = vmatprep.subr.bf16.mxu0 %v2654_v30 }
  0x77   : > { %2369 = vmatpush3.bf16.msra.mxu1 %v2653_v22 }
  0x78   : > { %2370 = vmatprep.subr.bf16.mxu1 %v2655_v13 }
  0x79   : > { %2465 = vmatpush3.bf16.msra.mxu0 %v2654_v30 }
  0x7a   : > { %2466 = vmatprep.subr.bf16.mxu0 %v2656_v63 }
  0x7b   : > { %2371 = vmatpush3.bf16.msra.mxu1 %v2655_v13 }
  0x7c   : > { %2372 = vmatprep.subr.bf16.mxu1 %v2657_v37 }
  0x7d   : > { %2467 = vmatpush3.bf16.msra.mxu0 %v2656_v63 }
  0x7e   : > { %2468 = vmatprep.subr.bf16.mxu0 %v2659_v10 }
  0x7f   : > { %2373 = vmatpush3.bf16.msra.mxu1 %v2657_v37 }
  0x80   : > { %2374 = vmatprep.subr.bf16.mxu1 %v2660_v28 }
  0x81   : > { %2469 = vmatpush3.bf16.msra.mxu0 %v2659_v10 }
  0x82   : > { %2470 = vmatprep.subr.bf16.mxu0 %v2661_v36 }
  0x83   : > { %2375 = vmatpush3.bf16.msra.mxu1 %v2660_v28 }
  0x84   : > { %2504 = vmatprep.subr.bf16.mxu1 %v2664_v29 }
  0x85   : > { %2471 = vmatpush3.bf16.msra.mxu0 %v2661_v36 }
  0x86   : > { %2377 = vmatmul.mubr.bf16.vlgmr.msra.gmra.mrb[0].mxu1 %v2008_v7  ;;  %2480 = vmatprep.subr.bf16.mxu0 %v2664_v29  ;;  %v2671_v7 = vld [vmem:[%s3225_s1 + $0x228] sm:$0xff]  }
  0x87   : > { %2512 = vmatpush3.bf16.msra.mxu1 %v2664_v29  ;;  %2380 = vmatprep.mubr.bf16.mxu1 %v2009_v47 }
  0x88   : > { %2505 = vmatprep.subr.bf16.mxu1 %v2665_v40  ;;  %2473 = vmatmul.mubr.bf16.vlgmr.msra.gmra.mrb[0].mxu0 %v2913_v17 }
  0x89   : > { %2481 = vmatpush3.bf16.msra.mxu0 %v2664_v29  ;;  %2476 = vmatprep.mubr.bf16.mxu0 %v2950_v50 }
  0x8a   : > { %2482 = vmatprep.subr.bf16.mxu0 %v2665_v40 }
  0x8b   : > { %2513 = vmatpush3.bf16.msra.mxu1 %v2665_v40 }
  0x8c   : > { %2506 = vmatprep.subr.bf16.mxu1 %v2668_v41 }
  0x8d   : > { %2483 = vmatpush3.bf16.msra.mxu0 %v2665_v40 }
  0x8e   : > { %2381 = vmatmul.mubr.bf16.gmra.mrb[4].mxu1 %v2010_v21  ;;  %2484 = vmatprep.subr.bf16.mxu0 %v2668_v41 }
  0x8f   : > { %2514 = vmatpush3.bf16.msra.mxu1 %v2668_v41  ;;  %2500 = vmatprep.mubr.bf16.mxu1 %v3124_v1 }
  0x90   : > { %2507 = vmatprep.subr.bf16.mxu1 %v2669_v33  ;;  %2477 = vmatmul.mubr.bf16.gmra.mrb[4].mxu0 %v3068_v57 }
  0x91   : > { %2485 = vmatpush3.bf16.msra.mxu0 %v2668_v41  ;;  %2496 = vmatprep.mubr.bf16.mxu0 %v3103_v4 }
  0x92   : > { %2486 = vmatprep.subr.bf16.mxu0 %v2669_v33 }
  0x93   : > { %2515 = vmatpush3.bf16.msra.mxu1 %v2669_v33 }
  0x94   : > { %2508 = vmatprep.subr.bf16.mxu1 %v2670_v52 }
  0x95   : > { %2487 = vmatpush3.bf16.msra.mxu0 %v2669_v33 }
  0x96   : > { %2488 = vmatprep.subr.bf16.mxu0 %v2670_v52 }
  0x97   : > { %2516 = vmatpush3.bf16.msra.mxu1 %v2670_v52 }
  0x98   : > { %2509 = vmatprep.subr.bf16.mxu1 %v2671_v7 }
  0x99   : > { %2489 = vmatpush3.bf16.msra.mxu0 %v2670_v52 }
  0x9a   : > { %2490 = vmatprep.subr.bf16.mxu0 %v2671_v7 }
  0x9b   : > { %2517 = vmatpush3.bf16.msra.mxu1 %v2671_v7 }
  0x9c   : > { %2510 = vmatprep.subr.bf16.mxu1 %v2672_v25 }
  0x9d   : > { %2491 = vmatpush3.bf16.msra.mxu0 %v2671_v7 }
  0x9e   : > { %2492 = vmatprep.subr.bf16.mxu0 %v2672_v25 }
  0x9f   : > { %2518 = vmatpush3.bf16.msra.mxu1 %v2672_v25 }
  0xa0   : > { %2511 = vmatprep.subr.bf16.mxu1 %v2673_v38 }
  0xa1   : > { %2493 = vmatpush3.bf16.msra.mxu0 %v2672_v25 }
  0xa2   : > { %2494 = vmatprep.subr.bf16.mxu0 %v2673_v38 }
  0xa3   : > { %2519 = vmatpush3.bf16.msra.mxu1 %v2673_v38 }
  0xa5   : > { %2495 = vmatpush3.bf16.msra.mxu0 %v2673_v38 }
  0xa6   : > { %2501 = vmatmul.mubr.bf16.vlgmr.msra.gmra.mrb[8].mxu1 %v2143_v35  ;;  %v2152_v35 = vld [vmem:[%s3226_s2] ss:$0 sm:$0xff] }
  0xa8   : > { %2497 = vmatmul.mubr.bf16.vlgmr.msra.gmra.mrb[0].mxu0 %v3107_v5 }
 0x159   : > { %v2378_v47 = vpop.f32.mrb[0].mxu1 }
 0x15a   : > { %v952_v53 = vpop.f32.mrb[1].mxu1 }
 0x15b   : > { %v2379_v0 = vpop.f32.mrb[2].mxu1 }
 0x15c   : > { %v955_v17 = vpop.f32.mrb[3].mxu1 }
 0x161   : > { %v2382_v21 = vpop.f32.mrb[4].mxu1 }
 0x162   : > { %v968_v50 = vpop.f32.mrb[5].mxu1 }
 0x163   : > { %v2383_v32 = vpop.f32.mrb[6].mxu1  ;;  %v2478_v44 = vpop.f32.mrb[4].mxu0 }
 0x164   : > { %v971_v43 = vpop.f32.mrb[7].mxu1  ;;  %v2524_v49 = vadd.f32 %v2478_v44, %v2382_v21  ;;  %v1578_v15 = vpop.f32.mrb[5].mxu0 }
 0x165   : > { %v2526_v19 = vadd.f32 %v1578_v15, %v968_v50  ;;  %v2479_v20 = vpop.f32.mrb[6].mxu0 }
 0x166   : > { %v2528_v46 = vadd.f32 %v2479_v20, %v2383_v32  ;;  %v1581_v16 = vpop.f32.mrb[7].mxu0 }
 0x167   : > { %v2530_v18 = vadd.f32 %v1581_v16, %v971_v43 }
 0x179   : > { %v2502_v51 = vpop.f32.mrb[8].mxu1 }
 0x17a   : > { %v2525_v58 = vadd.f32 %v2524_v49, %v2502_v51  ;;  %v1724_v26 = vpop.f32.mrb[9].mxu1 }
 0x17b   : > { %v2527_v54 = vadd.f32 %v2526_v19, %v1724_v26  ;;  %v2503_v55 = vpop.f32.mrb[10].mxu1  ;;  %v2498_v24 = vpop.f32.mrb[0].mxu0 }
 0x17c   : > { %v1760_v12 = vadd.f32 %v2525_v58, %v2152_v35  ;;  %v2529_v34 = vadd.f32 %v2528_v46, %v2503_v55  ;;  %v1727_v45 = vpop.f32.mrb[11].mxu1  ;;  %v2520_v39 = vadd.f32 %v2498_v24, %v2378_v47  ;;  %v1708_v60 = vpop.f32.mrb[1].mxu0 }
 0x17d   : > { %v1758_v56 = vadd.f32 %v2527_v54, %v2152_v35  ;;  %v2531_v57 = vadd.f32 %v2530_v18, %v1727_v45  ;;  %v2521_v62 = vadd.f32 %v1708_v60, %v952_v53  ;;  %v2499_v2 = vpop.f32.mrb[2].mxu0 }
 0x17e   : > { %v1761_v59 = vadd.f32 %v2529_v34, %v2152_v35  ;;  %v1784_v31 = vmax.f32 %v1760_v12, 0.0  ;;  %v1756_v5 = vadd.f32 %v2520_v39, %v2152_v35  ;;  %v2522_v6 = vadd.f32 %v2499_v2, %v2379_v0  ;;  %v1711_v27 = vpop.f32.mrb[3].mxu0 }
 0x17f   : > { %v1759_v61 = vadd.f32 %v2531_v57, %v2152_v35  ;;  %v1782_v11 = vmax.f32 %v1758_v56, 0.0  ;;  %v1754_v1 = vadd.f32 %v2521_v62, %v2152_v35  ;;  %v2523_v14 = vadd.f32 %v1711_v27, %v955_v17 }
 0x180   : > { %v2175_v3 = vpack.c.bf16 %v1761_v59, %v1760_v12  ;;  %v1785_v4 = vmax.f32 %v1761_v59, 0.0  ;;  %v1757_v8 = vadd.f32 %v2522_v6, %v2152_v35  ;;  %v1780_v13 = vmax.f32 %v1756_v5, 0.0 }
 0x181   : > { %v2170_v48 = vpack.c.bf16 %v1759_v61, %v1758_v56  ;;  %v1783_v9 = vmax.f32 %v1759_v61, 0.0  ;;  %v1755_v23 = vadd.f32 %v2523_v14, %v2152_v35  ;;  %v1778_v63 = vmax.f32 %v1754_v1, 0.0 }
 0x182   : > { %2179 = vst [vmem:[%s205_s27 + $0x18] sm:$0xff] %v2175_v3   ;;  %v1789_v42 = vmax.f32 %v1784_v31, %v1785_v4  ;;  %v2165_v30 = vpack.c.bf16 %v1757_v8, %v1756_v5  ;;  %v1781_v37 = vmax.f32 %v1757_v8, 0.0 }
 0x183   : > { %2178 = vst [vmem:[%s205_s27 + $0x10] sm:$0xff] %v2170_v48   ;;  %v1788_v22 = vmax.f32 %v1782_v11, %v1783_v9  ;;  %v2160_v28 = vpack.c.bf16 %v1755_v23, %v1754_v1  ;;  %v1779_v10 = vmax.f32 %v1755_v23, 0.0 }
 0x184   : > { %1793 = vst [vmem:[#allocation2 + $0x18] sm:$0xff] %v1789_v42  ;;  %2177 = vst [vmem:[%s205_s27 + $0x8] sm:$0xff] %v2165_v30   ;;  %v1787_v29 = vmax.f32 %v1780_v13, %v1781_v37 }
 0x185   : > { %1792 = vst [vmem:[#allocation2 + $0x10] sm:$0xff] %v1788_v22  ;;  %2161 = vst [vmem:[%s205_s27] sm:$0xff] %v2160_v28   ;;  %v1786_v36 = vmax.f32 %v1778_v63, %v1779_v10 }
 0x186   : > { %1791 = vst [vmem:[#allocation2 + $0x8] sm:$0xff] %v1787_v29 }
 0x187   : > { %1790 = vst [vmem:[#allocation2] sm:$0xff] %v1786_v36 }
 0x18c   : > { %v1796_v40 = vld [vmem:[#allocation2 + $0x10] ss:$2 sm:$0xff]  ;;  %v1800_v41 = vld [vmem:[#allocation2 + $0x11] ss:$2 sm:$0xff] }
 0x18d   : > { %v1802_v33 = vmax.f32 %v1796_v40, %v1800_v41 }
 0x18e   : > { %v1794_v25 = vld [vmem:[#allocation2] ss:$2 sm:$0xff]  ;;  %v1798_v38 = vld [vmem:[#allocation2 + $0x1] ss:$2 sm:$0xff] }
 0x18f   : > { %v1806_v52 = vcombine.high %v1802_v33, %v1802_v33  ;;  %v1811_v7 = vpack.c.bf16 %v1802_v33, %v1802_v33  ;;  %v1801_v53 = vmax.f32 %v1794_v25, %v1798_v38 }
 0x191   : > { %v1812_v47 = vpack.c.bf16 %v1806_v52, %v1806_v52  ;;  %1815 = vst [vmem:[%s210_s5 + $0x4] sm:$0x3] %v1811_v7  ;;  %v1805_v0 = vcombine.high %v1801_v53, %v1801_v53  ;;  %v1809_v17 = vpack.c.bf16 %v1801_v53, %v1801_v53 }
 0x193   : > { %1816 = vst [vmem:[%s210_s5 + $0x6] sm:$0x3] %v1812_v47  ;;  %v1810_v21 = vpack.c.bf16 %v1805_v0, %v1805_v0  ;;  %1813 = vst [vmem:[%s210_s5] sm:$0x3] %v1809_v17 }
 0x195   : > { %1814 = vst [vmem:[%s210_s5 + $0x2] sm:$0x3] %v1810_v21 }
 0x196 PF: > { %s15_s15 = sadd.s32 1, %s2680_s15  }
 0x197   : > { %p12_p4 = scmp.ge.s32.totalorder %s15_s15, 6  }
 0x199   :  { %14 = sbr.rel (!%p12_p4) target bundleno = 1 (0x1), region = 85 }

// kernel: sr_loss.23
= control target key start
LH: loop header
LB: loop body
LE: loop exit
PB: predicated region body
PF: predicated region fallthrough
CT: control target
= control target key end

     0   :  { %s376_s9 = smov 0   ;;  %s378_s10 = smov 0   ;;  %s412_s0 = inlined_call_operand.vmem [shape: bf16[16,512], index: 0, kind: input, shape index: {}]   ;;  %s413_s1 = inlined_call_operand.vmem [shape: bf16[16,512], index: 1, kind: input, shape index: {}]   ;;  %s414_s2 = inlined_call_operand.vmem [shape: f32[2,1,1], index: 2, kind: output, shape index: {}]  }
   0x1   :  { %s380_s11 = smov 0  }
   0x2 LB: > { %s24_s12 = sadd.s32 1, %s354_s10  ;;  %p300_p0 = scmp.ge.s32.totalorder %s358_s11, 1  ;;  %s358_s11 = sphi %s380_s11, %s12_s11   ;;  %s354_s10 = sphi %s378_s10, %s416_s10   ;;  %s350_s9 = sphi %s376_s9, %s415_s9  }
   0x3   : > { %p26_p1 = scmp.ge.s32.totalorder %s24_s12, 2  ;;  %p142_p2 = scmp.lt.s32.totalorder %s358_s11, 3 }
   0x5   : > { %s418_s12 = smov (%p26_p1, %s24_s12), 0  ;;  %p143_p3 = pnand %p300_p0, %p142_p2 }
   0x6   : > { %p170_p4 = scmp.lt.s32.totalorder (!%p143_p3), %s350_s9, 1  ;;  %vm190_vm0 = vcmask (!%p143_p3), 0   ;;  %v360_v23 = vmov (!%p143_p3), 0.0  }
   0x7   : > { %146 = sbr.rel (%p143_p3) target bundleno = 239 (0xef), region = 28 }
   0xe   : > { %s420_s9 = smov (!%p170_p4, %s350_s9), 1 }
   0xf   : > { %s307_s13 = sshll.u32 %s420_s9, 4  ;;  %s185_s22 = scalar_lea.vmem %s414_s2, %s420_s9 }
  0x10   : > { %s174_s16 = scalar_lea.vmem %s412_s0, %s307_s13  ;;  %s181_s19 = scalar_lea.vmem %s413_s1, %s307_s13  ;;  %191 = vst.msk [vmem:[%s185_s22] sm:$0x1] %vm190_vm0, %v360_v23 }
  0x11   : > { %v192_v0 = vld [vmem:[%s174_s16] sm:$0xff]  ;;  %v193_v1 = vld [vmem:[%s174_s16 + $0x8] sm:$0xff] }
  0x12   : > { %v198_v2 = vld [vmem:[%s181_s19] sm:$0xff]  ;;  %v194_v3 = vunpack.c.l.bf16 %v192_v0  ;;  %v195_v4 = vunpack.c.h.bf16 %v192_v0  ;;  %v196_v5 = vunpack.c.l.bf16 %v193_v1  ;;  %v197_v6 = vunpack.c.h.bf16 %v193_v1  ;;  %v199_v7 = vld [vmem:[%s181_s19 + $0x8] sm:$0xff] }
  0x13   : > { %v200_v8 = vunpack.c.l.bf16 %v198_v2  ;;  %v201_v9 = vunpack.c.h.bf16 %v198_v2  ;;  %v202_v10 = vunpack.c.l.bf16 %v199_v7  ;;  %v203_v11 = vunpack.c.h.bf16 %v199_v7 }
  0x15   : > { %v204_v12 = vsub.f32 %v194_v3, %v200_v8  ;;  %v205_v13 = vsub.f32 %v195_v4, %v201_v9  ;;  %v206_v14 = vsub.f32 %v196_v5, %v202_v10  ;;  %v207_v15 = vsub.f32 %v197_v6, %v203_v11 }
  0x17   : > { %v208_v16 = vand.u32 2147483647, %v204_v12  ;;  %v209_v17 = vand.u32 2147483647, %v205_v13  ;;  %v210_v18 = vand.u32 2147483647, %v206_v14 }
  0x18   : > { %v211_v19 = vand.u32 2147483647, %v207_v15  ;;  %v212_v31 = vld [vmem:[%s185_s22] sm:$0x1] }
  0x19   : > { %v213_v20 = vadd.f32 %v209_v17, %v208_v16 }
  0x1b   : > { %v214_v21 = vadd.f32 %v213_v20, %v210_v18 }
  0x1d   : > { %v215_v22 = vadd.f32 %v214_v21, %v211_v19 }
  0x1f   : > { %216 = vadd.xlane.f32.xlu0 %v215_v22 }
  0xac   : > { %v217_v24 = vpop.xlane.xlu0 %216 }
  0xad   : > { %v218_v25 = vrot.slane %v217_v24, 4 }
  0xaf   : > { %v219_v26 = vadd.f32 %v218_v25, %v217_v24 }
  0xb1   : > { %v220_v27 = vrot.slane %v219_v26, 2 }
  0xb3   : > { %v221_v28 = vadd.f32 %v220_v27, %v219_v26 }
  0xb5   : > { %v222_v29 = vrot.slane %v221_v28, 1 }
  0xb7   : > { %v223_v30 = vadd.f32 %v222_v29, %v221_v28 }
  0xb9   : > { %309 = vpush %v223_v30 }
  0xea   : > { %s310_s23 = spop %309 }
  0xeb   : > { %v225_v32 = vstv %s310_s23 }
  0xec   : > { %v226_v33 = vadd.f32 %v225_v32, %v212_v31 }
  0xee   : > { %228 = vst.msk [vmem:[%s185_s22] sm:$0x1] %vm190_vm0, %v226_v33 }
  0xef PF: > { %s12_s11 = sadd.s32 1, %s358_s11   ;;  %s415_s9 = smov %s354_s10 }
  0xf0   : > { %p9_p5 = scmp.ge.s32.totalorder %s12_s11, 4   ;;  %s416_s10 = smov %s418_s12 }
  0xf2   :  { %11 = sbr.rel (!%p9_p5) target bundleno = 2 (0x2), region = 65 }

// kernel: sr_loss.20
= control target key start
LH: loop header
LB: loop body
LE: loop exit
PB: predicated region body
PF: predicated region fallthrough
CT: control target
= control target key end

     0   :  { %s3894_s12 = smov 0   ;;  %s5041_s0 = inlined_call_operand.vmem [shape: bf16[4,6,6,256], index: 0, kind: input, shape index: {}]   ;;  %s5042_s1 = inlined_call_operand.vmem [shape: bf16[3,3,256,256], index: 1, kind: input, shape index: {}]   ;;  %s5043_s2 = inlined_call_operand.vmem [shape: f32[1,256], index: 2, kind: input, shape index: {}]   ;;  %s5044_s3 = inlined_call_operand.vmem [shape: bf16[4,4,4,256], index: 3, kind: output, shape index: {}]  }
   0x1 LB: > { %s2807_s13 = sadd.s32 4294967295, %s3871_s12   ;;  %p2811_p0 = scmp.ge.s32.totalorder %s3871_s12, 1  ;;  %s3871_s12 = sphi %s3894_s12, %s13_s12  }
   0x2   : > { %p137_p1 = scmp.lt.s32.totalorder %s3871_s12, 5 }
   0x4   : > { %p138_p2 = pnand %p2811_p0, %p137_p1 }
   0x5   : > { %v3428_v0 = vld [vmem:[%s5042_s1 + $0x104] ss:$8 sps:$4 sm:$0xff] (!%p138_p2)   ;;  %v3432_v2 = vld [vmem:[%s5042_s1 + $0x100] ss:$8 sps:$4 sm:$0xff] (!%p138_p2)   ;;  %v3434_v4 = vld [vmem:[%s5042_s1 + $0x114] ss:$8 sps:$4 sm:$0xff] (!%p138_p2)   ;;  %v346_v44 = vlaneseq (!%p138_p2) }
   0x6   : > { %141 = sbr.rel (%p138_p2) target bundleno = 554 (0x22a), region = 32  ;;  %v3430_v1 = vld [vmem:[%s5042_s1 + $0x404] ss:$8 sps:$4 sm:$0xff] (!%p138_p2)   ;;  %521 = vmatprep.subr.bf16.mxu1 (!%p138_p2), %v3428_v0  ;;  %v3433_v3 = vld [vmem:[%s5042_s1 + $0x400] ss:$8 sps:$4 sm:$0xff] (!%p138_p2)   ;;  %p161_p3 = scmp.lt.s32.totalorder (!%p138_p2), %s2807_s13, 3 }
   0x7   : > { %1566 = vmatprep.subr.bf16.mxu0 (!%p138_p2), %v3430_v1  ;;  %522 = vmatpush1.bf16.msra.mxu1 (!%p138_p2), %v3432_v2  ;;  %v3436_v5 = vld [vmem:[%s5042_s1 + $0x414] ss:$8 sps:$4 sm:$0xff] (!%p138_p2)   ;;  %v3438_v6 = vld [vmem:[%s5042_s1 + $0x110] ss:$8 sps:$4 sm:$0xff] (!%p138_p2)   ;;  %v3440_v8 = vld [vmem:[%s5042_s1 + $0x124] ss:$8 sps:$4 sm:$0xff] (!%p138_p2)  }
   0x8   : > { %1567 = vmatpush1.bf16.msra.mxu0 (!%p138_p2), %v3433_v3  ;;  %523 = vmatprep.subr.bf16.mxu1 (!%p138_p2), %v3434_v4  ;;  %v3439_v7 = vld [vmem:[%s5042_s1 + $0x410] ss:$8 sps:$4 sm:$0xff] (!%p138_p2)   ;;  %v3442_v9 = vld [vmem:[%s5042_s1 + $0x424] ss:$8 sps:$4 sm:$0xff] (!%p138_p2)   ;;  %v3444_v10 = vld [vmem:[%s5042_s1 + $0x120] ss:$8 sps:$4 sm:$0xff] (!%p138_p2)  }
   0x9   : > { %1568 = vmatprep.subr.bf16.mxu0 (!%p138_p2), %v3436_v5  ;;  %v3445_v11 = vld [vmem:[%s5042_s1 + $0x420] ss:$8 sps:$4 sm:$0xff] (!%p138_p2)   ;;  %v3446_v12 = vld [vmem:[%s5042_s1 + $0x134] ss:$8 sps:$4 sm:$0xff] (!%p138_p2)   ;;  %v3450_v14 = vld [vmem:[%s5042_s1 + $0x130] ss:$8 sps:$4 sm:$0xff] (!%p138_p2)  }
   0xa   : > { %v3448_v13 = vld [vmem:[%s5042_s1 + $0x434] ss:$8 sps:$4 sm:$0xff] (!%p138_p2)   ;;  %v3451_v15 = vld [vmem:[%s5042_s1 + $0x430] ss:$8 sps:$4 sm:$0xff] (!%p138_p2)   ;;  %v3452_v16 = vld [vmem:[%s5042_s1 + $0x144] ss:$8 sps:$4 sm:$0xff] (!%p138_p2)  }
   0xb   : > { %524 = vmatpush1.bf16.msra.mxu1 (!%p138_p2), %v3438_v6  ;;  %v3454_v17 = vld [vmem:[%s5042_s1 + $0x444] ss:$8 sps:$4 sm:$0xff] (!%p138_p2)   ;;  %v3456_v18 = vld [vmem:[%s5042_s1 + $0x140] ss:$8 sps:$4 sm:$0xff] (!%p138_p2)   ;;  %v3458_v20 = vld [vmem:[%s5042_s1 + $0x154] ss:$8 sps:$4 sm:$0xff] (!%p138_p2)  }
   0xc   : > { %1569 = vmatpush1.bf16.msra.mxu0 (!%p138_p2), %v3439_v7  ;;  %525 = vmatprep.subr.bf16.mxu1 (!%p138_p2), %v3440_v8  ;;  %v3457_v19 = vld [vmem:[%s5042_s1 + $0x440] ss:$8 sps:$4 sm:$0xff] (!%p138_p2)   ;;  %v3460_v21 = vld [vmem:[%s5042_s1 + $0x454] ss:$8 sps:$4 sm:$0xff] (!%p138_p2)   ;;  %v3462_v22 = vld [vmem:[%s5042_s1 + $0x150] ss:$8 sps:$4 sm:$0xff] (!%p138_p2)  }
   0xd   : > { %1570 = vmatprep.subr.bf16.mxu0 %v3442_v9  ;;  %v3463_v23 = vld [vmem:[%s5042_s1 + $0x450] ss:$8 sps:$4 sm:$0xff]   ;;  %v3464_v24 = vld [vmem:[%s5042_s1 + $0x164] ss:$8 sps:$4 sm:$0xff]   ;;  %v3468_v26 = vld [vmem:[%s5042_s1 + $0x160] ss:$8 sps:$4 sm:$0xff]  }
   0xe   : > { %v3466_v25 = vld [vmem:[%s5042_s1 + $0x464] ss:$8 sps:$4 sm:$0xff]   ;;  %v3469_v27 = vld [vmem:[%s5042_s1 + $0x460] ss:$8 sps:$4 sm:$0xff]   ;;  %v3470_v28 = vld [vmem:[%s5042_s1 + $0x174] ss:$8 sps:$4 sm:$0xff]  }
   0xf   : > { %526 = vmatpush1.bf16.msra.mxu1 %v3444_v10  ;;  %v3472_v29 = vld [vmem:[%s5042_s1 + $0x474] ss:$8 sps:$4 sm:$0xff]   ;;  %v3474_v30 = vld [vmem:[%s5042_s1 + $0x170] ss:$8 sps:$4 sm:$0xff]   ;;  %v3476_v32 = vld [vmem:[%s5042_s1 + $0x184] ss:$8 sps:$4 sm:$0xff]  }
  0x10   : > { %1571 = vmatpush1.bf16.msra.mxu0 %v3445_v11  ;;  %527 = vmatprep.subr.bf16.mxu1 %v3446_v12  ;;  %v3475_v31 = vld [vmem:[%s5042_s1 + $0x470] ss:$8 sps:$4 sm:$0xff]   ;;  %v3478_v33 = vld [vmem:[%s5042_s1 + $0x484] ss:$8 sps:$4 sm:$0xff]   ;;  %v3480_v34 = vld [vmem:[%s5042_s1 + $0x180] ss:$8 sps:$4 sm:$0xff]  }
  0x11   : > { %1572 = vmatprep.subr.bf16.mxu0 %v3448_v13  ;;  %v3481_v35 = vld [vmem:[%s5042_s1 + $0x480] ss:$8 sps:$4 sm:$0xff]   ;;  %v3482_v36 = vld [vmem:[%s5042_s1 + $0x194] ss:$8 sps:$4 sm:$0xff]   ;;  %s5058_s13 = smov (!%p161_p3, %s2807_s13), 3  ;;  %v4052_v50 = vshrl.u32 %v346_v44, 7 }
  0x12   : > { %v3484_v37 = vld [vmem:[%s5042_s1 + $0x494] ss:$8 sps:$4 sm:$0xff]   ;;  %v3486_v38 = vld [vmem:[%s5042_s1 + $0x190] ss:$8 sps:$4 sm:$0xff]   ;;  %v3488_v40 = vld [vmem:[%s5042_s1 + $0x1a4] ss:$8 sps:$4 sm:$0xff]  }
  0x13   : > { %528 = vmatpush1.bf16.msra.mxu1 %v3450_v14  ;;  %v3487_v39 = vld [vmem:[%s5042_s1 + $0x490] ss:$8 sps:$4 sm:$0xff]   ;;  %s3418_s21 = smul.u32 48, %s5058_s13  ;;  %v3490_v41 = vld [vmem:[%s5042_s1 + $0x4a4] ss:$8 sps:$4 sm:$0xff]   ;;  %vm787_vm5 = vcmask 1040384  }
  0x14   : > { %1573 = vmatpush1.bf16.msra.mxu0 %v3451_v15  ;;  %529 = vmatprep.subr.bf16.mxu1 %v3452_v16  ;;  %v3873_v42 = vmov 1983009808   ;;  %vm245_vm0 = vsmask.f32 1280  ;;  %v3492_v45 = vld [vmem:[%s5042_s1 + $0x1a0] ss:$8 sps:$4 sm:$0xff]  }
  0x15   : > { %1574 = vmatprep.subr.bf16.mxu0 %v3454_v17  ;;  %v344_v43 = vunpack.c.l.s4 %v3873_v42  ;;  %v3493_v46 = vld [vmem:[%s5042_s1 + $0x4a0] ss:$8 sps:$4 sm:$0xff]   ;;  %vm246_vm1 = vsmask.f32 3336  ;;  %v3494_v47 = vld [vmem:[%s5042_s1 + $0x1b4] ss:$8 sps:$4 sm:$0xff]   ;;  %s4047_s5 = scalar_lea.vmem %s5041_s0, %s3418_s21 }
  0x16   : > { %vm248_vm2 = vsmask.f32 5392  ;;  %v3496_v48 = vld [vmem:[%s5042_s1 + $0x4b4] ss:$8 sps:$4 sm:$0xff]   ;;  %v3498_v51 = vld [vmem:[%s5042_s1 + $0x1b0] ss:$8 sps:$4 sm:$0xff]   ;;  %vm4071_vm4 = vmor %vm245_vm0, %vm246_vm1 }
  0x17   : > { %530 = vmatpush1.bf16.msra.mxu1 %v3456_v18  ;;  %v345_v49 = vunpack.c.0.s8 %v344_v43  ;;  %v3499_v52 = vld [vmem:[%s5042_s1 + $0x4b0] ss:$8 sps:$4 sm:$0xff]   ;;  %vm250_vm3 = vsmask.f32 7448  ;;  %v3500_v53 = vld [vmem:[%s5042_s1 + $0x1c4] ss:$8 sps:$4 sm:$0xff]   ;;  %vm4109_vm7 = vmor %vm4071_vm4, %vm248_vm2 }
  0x18   : > { %1575 = vmatpush1.bf16.msra.mxu0 %v3457_v19  ;;  %531 = vmatprep.subr.bf16.mxu1 %v3458_v20  ;;  %v3502_v54 = vld [vmem:[%s5042_s1 + $0x4c4] ss:$8 sps:$4 sm:$0xff]   ;;  %vm788_vm6 = vcmask 1042434   ;;  %v3504_v2 = vld [vmem:[%s5042_s1 + $0x1c0] ss:$8 sps:$4 sm:$0xff]   ;;  %vm790_vm8 = vcmask 1044484   ;;  %vm4135_vm9 = vmor %vm4109_vm7, %vm250_vm3 }
  0x19   : > { %1576 = vmatprep.subr.bf16.mxu0 %v3460_v21  ;;  %v4067_v55 = vld.sshfl [vmem:[%s4047_s5] sm:$0x5f pattern:$0x76325410]  ;;  %v4094_v1 = vsub.s32 %v345_v49, %v4052_v50  ;;  %v3506_v14 = vld [vmem:[%s5042_s1 + $0x1d4] ss:$8 sps:$4 sm:$0xff]   ;;  %vm4175_vm11 = vmor %vm787_vm5, %vm788_vm6 }
  0x1a   : > { %v4076_v57 = vld.sshfl [vmem:[%s4047_s5 + $0x8] sm:$0x5f pattern:$0x76325410]  ;;  %v4080_v58 = vcombine.high %v4067_v55, %v4067_v55  ;;  %v253_v59 = vshrl.u32 %v4067_v55, 16  ;;  %v256_v60 = vshll.u32 %v4067_v55, 16  ;;  %vm4203_vm12 = vmor %vm4175_vm11, %vm790_vm8 }
  0x1b   : > { %532 = vmatpush1.bf16.msra.mxu1 %v3462_v22  ;;  %v4085_v61 = vld.sshfl [vmem:[%s4047_s5 + $0x10] sm:$0x5f pattern:$0x76325410]  ;;  %v4089_v62 = vcombine.high %v4076_v57, %v4076_v57  ;;  %v267_v63 = vshrl.u32 %v4076_v57, 16  ;;  %v270_v0 = vshll.u32 %v4076_v57, 16  ;;  %v564_v8 = vcombine.low %v4067_v55, %v4076_v57 }
  0x1c   : > { %1577 = vmatpush1.bf16.msra.mxu0 %v3463_v23  ;;  %533 = vmatprep.subr.bf16.mxu1 %v3464_v24  ;;  %v4100_v3 = vld.sshfl [vmem:[%s4047_s5 + $0x18] sm:$0x5f pattern:$0x76325410]  ;;  %v4104_v4 = vcombine.high %v4085_v61, %v4085_v61  ;;  %v255_v6 = vrot.slane %v253_v59, 6  ;;  %v258_v7 = vrot.slane %v256_v60, 7 }
  0x1d   : > { %1578 = vmatprep.subr.bf16.mxu0 %v3466_v25  ;;  %v3505_v9 = vld [vmem:[%s5042_s1 + $0x4c0] ss:$8 sps:$4 sm:$0xff]   ;;  %v4120_v10 = vcombine.high %v4100_v3, %v4100_v3  ;;  %v262_v11 = vshll.u32 %v4080_v58, 16  ;;  %v269_v12 = vrot.slane %v267_v63, 6  ;;  %v272_v13 = vrot.slane %v270_v0, 7  ;;  %s3385_s10 = sshll.u32 %s5058_s13, 4 }
  0x1e   : > { %v259_v15 = vor.u32 %v258_v7, %v255_v6  ;;  %v276_v16 = vshll.u32 %v4089_v62, 16  ;;  %v281_v17 = vshrl.u32 %v4085_v61, 16  ;;  %v284_v18 = vshll.u32 %v4085_v61, 16  ;;  %v3508_v19 = vld [vmem:[%s5042_s1 + $0x4d4] ss:$8 sps:$4 sm:$0xff]   ;;  %s170_s15 = scalar_lea.vmem %s5044_s3, %s3385_s10 }
  0x1f   : > { %534 = vmatpush1.bf16.msra.mxu1 %v3468_v26  ;;  %v264_v21 = vrot.slane %v262_v11, 7  ;;  %v273_v22 = vor.u32 %v272_v13, %v269_v12  ;;  %v290_v23 = vshll.u32 %v4104_v4, 16  ;;  %v295_v24 = vshrl.u32 %v4100_v3, 16  ;;  %v3510_v25 = vld [vmem:[%s5042_s1 + $0x1d0] ss:$8 sps:$4 sm:$0xff]  }
  0x20   : > { %1579 = vmatpush1.bf16.msra.mxu0 %v3469_v27  ;;  %535 = vmatprep.subr.bf16.mxu1 %v3470_v28  ;;  %vm792_vm10 = vcmask 1046534   ;;  %v3511_v26 = vld [vmem:[%s5042_s1 + $0x4d0] ss:$8 sps:$4 sm:$0xff]   ;;  %v260_v27 = vrot.slane %v259_v15, 2  ;;  %v278_v28 = vrot.slane %v276_v16, 7  ;;  %v2915_v20 = vrot.slane %v4067_v55, 9 }
  0x21   : > { %1580 = vmatprep.subr.bf16.mxu0 %v3472_v29  ;;  %v283_v29 = vrot.slane %v281_v17, 6  ;;  %v4165_v44 = vld.sshfl [vmem:[%s4047_s5 + $0x28] sm:$0x5f pattern:$0x76325410]  ;;  %vm4233_vm13 = vmor %vm4203_vm12, %vm792_vm10 }
  0x22   : > { %v4188_v63 = vcombine.high %v4165_v44, %v4165_v44  ;;  %v3518_v0 = vld [vmem:[%s5042_s1 + $0x1f4] ss:$8 sps:$4 sm:$0xff]   ;;  %v2139_v6 = vshrl.u32 %v4165_v44, 16  ;;  %v2142_v13 = vshll.u32 %v4165_v44, 16 }
  0x23   : > { %536 = vmatpush1.bf16.msra.mxu1 %v3474_v30  ;;  %v286_v30 = vrot.slane %v284_v18, 7  ;;  %v3520_v7 = vld [vmem:[%s5042_s1 + $0x4f4] ss:$8 sps:$4 sm:$0xff]   ;;  %v4212_v18 = vrot.slane %v564_v8, %v4094_v1  ;;  %v3523_v8 = vld [vmem:[%s5042_s1 + $0x4f0] ss:$8 sps:$4 sm:$0xff]  }
  0x24   : > { %1581 = vmatpush1.bf16.msra.mxu0 %v3475_v31  ;;  %537 = vmatprep.subr.bf16.mxu1 %v3476_v32  ;;  %v3512_v31 = vld [vmem:[%s5042_s1 + $0x1e4] ss:$8 sps:$4 sm:$0xff]   ;;  %v2141_v16 = vrot.slane %v2139_v6, 6  ;;  %v2148_v17 = vshll.u32 %v4188_v63, 16  ;;  %v3535_v55 = vld [vmem:[%s5042_s1 + $0x514] ss:$8 sps:$4 sm:$0xff]  }
  0x25   : > { %1582 = vmatprep.subr.bf16.mxu0 %v3478_v33  ;;  %v3514_v32 = vld [vmem:[%s5042_s1 + $0x4e4] ss:$8 sps:$4 sm:$0xff]   ;;  %v274_v33 = vrot.slane %v273_v22, 2 }
  0x27   : > { %538 = vmatpush1.bf16.msra.mxu1 %v3480_v34  ;;  %v292_v34 = vrot.slane %v290_v23, 7  ;;  %v279_v42 = vsel %vm4135_vm9, %v274_v33, %v278_v28  ;;  %v2144_v23 = vrot.slane %v2142_v13, 7 }
  0x28   : > { %1583 = vmatpush1.bf16.msra.mxu0 %v3481_v35  ;;  %539 = vmatprep.subr.bf16.mxu1 %v3482_v36  ;;  %v297_v35 = vrot.slane %v295_v24, 6  ;;  %v298_v36 = vshll.u32 %v4100_v3, 16 }
  0x29   : > { %1584 = vmatprep.subr.bf16.mxu0 %v3484_v37  ;;  %v265_v37 = vsel %vm4135_vm9, %v260_v27, %v264_v21 }
  0x2a   : > { %v300_v43 = vrot.slane %v298_v36, 7  ;;  %v341_v49 = vcombine.low %v265_v37, %v279_v42 }
  0x2b   : > { %540 = vmatpush1.bf16.msra.mxu1 %v3486_v38  ;;  %v287_v38 = vor.u32 %v286_v30, %v283_v29  ;;  %v2150_v29 = vrot.slane %v2148_v17, 7  ;;  %v3811_v30 = vld [vmem:[%s5042_s1 + $0x7f4] ss:$8 sps:$4 sm:$0xff]  }
  0x2c   : > { %1585 = vmatpush1.bf16.msra.mxu0 %v3487_v39  ;;  %541 = vmatprep.subr.bf16.mxu1 %v3488_v40  ;;  %v304_v39 = vshll.u32 %v4120_v10, 16  ;;  %v4158_v40 = vld.sshfl [vmem:[%s4047_s5 + $0x20] sm:$0x5f pattern:$0x76325410]  ;;  %v301_v56 = vor.u32 %v300_v43, %v297_v35  ;;  %v349_v22 = vrot.slane %v341_v49, %v4094_v1  ;;  %v800_v35 = vrot.slane %v4089_v62, 7 }
  0x2d   : > { %1586 = vmatprep.subr.bf16.mxu0 %v3490_v41  ;;  %v565_v41 = vcombine.low %v4085_v61, %v4100_v3 }
  0x2f   : > { %542 = vmatpush1.bf16.msra.mxu1 %v3492_v45  ;;  %v4169_v45 = vcombine.high %v4158_v40, %v4158_v40  ;;  %v4221_v24 = vrot.slane %v565_v41, %v4094_v1 }
  0x30   : > { %1587 = vmatpush1.bf16.msra.mxu0 %v3493_v46  ;;  %543 = vmatprep.subr.bf16.mxu1 %v3494_v47  ;;  %v1340_v46 = vshrl.u32 %v4158_v40, 16  ;;  %v288_v47 = vrot.slane %v287_v38, 2  ;;  %v2917_v38 = vrot.slane %v4085_v61, 9 }
  0x31   : > { %1588 = vmatprep.subr.bf16.mxu0 %v3496_v48  ;;  %v306_v48 = vrot.slane %v304_v39, 7  ;;  %v1349_v60 = vshll.u32 %v4169_v45, 16  ;;  %v581_v33 = vcombine.high %v4212_v18, %v4221_v24  ;;  %v804_v39 = vrot.slane %v4104_v4, 7 }
  0x32   : > { %v1342_v59 = vrot.slane %v1340_v46, 6  ;;  %v3524_v46 = vld [vmem:[%s5042_s1] ss:$8 sps:$4 sm:$0xff]  }
  0x33   : > { %544 = vmatpush1.bf16.msra.mxu1 %v3498_v51  ;;  %v1343_v51 = vshll.u32 %v4158_v40, 16  ;;  %v1351_v11 = vrot.slane %v1349_v60, 7  ;;  %v4264_v4 = vsel %vm4233_vm13, %v2917_v38, %v804_v39  ;;  %v3527_v60 = vld [vmem:[%s5042_s1 + $0x500] ss:$8 sps:$4 sm:$0xff]   ;;  %v3566_v39 = vld [vmem:[%s5042_s1 + $0x70] ss:$8 sps:$4 sm:$0xff]  }
  0x34   : > { %1589 = vmatpush1.bf16.msra.mxu0 %v3499_v52  ;;  %545 = vmatprep.subr.bf16.mxu1 %v3500_v53  ;;  %v3516_v53 = vld [vmem:[%s5042_s1 + $0x1e0] ss:$8 sps:$4 sm:$0xff]   ;;  %v808_v52 = vrot.slane %v4120_v10, 7 }
  0x35   : > { %1590 = vmatprep.subr.bf16.mxu0 %v3502_v54  ;;  %v3517_v54 = vld [vmem:[%s5042_s1 + $0x4e0] ss:$8 sps:$4 sm:$0xff]   ;;  %v1345_v5 = vrot.slane %v1343_v51, 7  ;;  %v3532_v51 = vld [vmem:[%s5042_s1 + $0x14] ss:$8 sps:$4 sm:$0xff]  }
  0x36   : > { %v3563_v38 = vld [vmem:[%s5042_s1 + $0x560] ss:$8 sps:$4 sm:$0xff]  }
  0x37   : > { %546 = vmatpush1.bf16.msra.mxu1 %v3504_v2  ;;  %v293_v2 = vsel %vm4135_vm9, %v288_v47, %v292_v34  ;;  %v1346_v15 = vor.u32 %v1345_v5, %v1342_v59  ;;  %v2916_v34 = vrot.slane %v4076_v57, 9  ;;  %v580_v57 = vcombine.low %v4212_v18, %v4221_v24  ;;  %v3629_v18 = vld [vmem:[%s5042_s1 + $0x610] ss:$8 sps:$4 sm:$0xff]  }
  0x38   : > { %1591 = vmatpush1.bf16.msra.mxu0 %v3505_v9  ;;  %547 = vmatprep.subr.bf16.mxu1 %v3506_v14  ;;  %v302_v9 = vrot.slane %v301_v56, 2  ;;  %v1386_v12 = vcombine.low %v279_v42, %v293_v2  ;;  %v2918_v47 = vrot.slane %v4100_v3, 9  ;;  %v1615_v3 = vrot.slane %v4169_v45, 7  ;;  %v3530_v45 = vld [vmem:[%s5042_s1 + $0x10] ss:$8 sps:$4 sm:$0xff]  }
  0x39   : > { %1592 = vmatprep.subr.bf16.mxu0 %v3508_v19  ;;  %v3522_v19 = vld [vmem:[%s5042_s1 + $0x1f0] ss:$8 sps:$4 sm:$0xff]   ;;  %v1347_v27 = vrot.slane %v1346_v15, 2  ;;  %v4253_v43 = vsel %vm4233_vm13, %v2916_v34, %v800_v35  ;;  %v3536_v15 = vld [vmem:[%s5042_s1 + $0x20] ss:$8 sps:$4 sm:$0xff]  }
  0x3a   : > { %v307_v21 = vsel %vm4135_vm9, %v302_v9, %v306_v48  ;;  %v1394_v28 = vrot.slane %v1386_v12, %v4094_v1  ;;  %v1650_v56 = vcombine.low %v4253_v43, %v4264_v4  ;;  %v4286_v10 = vsel %vm4233_vm13, %v2918_v47, %v808_v52  ;;  %v3533_v12 = vld [vmem:[%s5042_s1 + $0x510] ss:$8 sps:$4 sm:$0xff]   ;;  %v3560_v34 = vld [vmem:[%s5042_s1 + $0x60] ss:$8 sps:$4 sm:$0xff]   ;;  %v3565_v35 = vld [vmem:[%s5042_s1 + $0x564] ss:$8 sps:$4 sm:$0xff]  }
  0x3b   : > { %548 = vmatpush1.bf16.msra.mxu1 %v3510_v25  ;;  %v342_v25 = vcombine.low %v293_v2, %v307_v21  ;;  %v1352_v37 = vsel %vm4135_vm9, %v1347_v27, %v1351_v11  ;;  %v796_v2 = vrot.slane %v4080_v58, 7  ;;  %v3538_v58 = vld [vmem:[%s5042_s1 + $0x24] ss:$8 sps:$4 sm:$0xff]   ;;  %v1918_v11 = vcombine.low %v4158_v40, %v4165_v44  ;;  %v3544_v44 = vld [vmem:[%s5042_s1 + $0x34] ss:$8 sps:$4 sm:$0xff]  }
  0x3c   : > { %1593 = vmatpush1.bf16.msra.mxu0 %v3511_v26  ;;  %549 = vmatprep.subr.bf16.mxu1 %v3512_v31  ;;  %v3526_v26 = vld [vmem:[%s5042_s1 + $0x4] ss:$8 sps:$4 sm:$0xff]   ;;  %v2145_v31 = vor.u32 %v2144_v23, %v2141_v16  ;;  %v1387_v41 = vcombine.low %v307_v21, %v1352_v37  ;;  %v4300_v6 = vrot.slane %v1650_v56, %v4094_v1  ;;  %v3542_v21 = vld [vmem:[%s5042_s1 + $0x30] ss:$8 sps:$4 sm:$0xff]   ;;  %v3556_v27 = vld [vmem:[%s5042_s1 + $0x54] ss:$8 sps:$4 sm:$0xff]  }
  0x3d   : > { %1594 = vmatprep.subr.bf16.mxu0 %v3514_v32  ;;  %v3529_v32 = vld [vmem:[%s5042_s1 + $0x504] ss:$8 sps:$4 sm:$0xff]   ;;  %v4245_v36 = vrot.slane %v342_v25, %v4094_v1  ;;  %v4309_v9 = vsel %vm4233_vm13, %v2915_v20, %v796_v2  ;;  %v4320_v14 = vrot.slane %v1918_v11, %v4094_v1  ;;  %v3548_v25 = vld [vmem:[%s5042_s1 + $0x40] ss:$8 sps:$4 sm:$0xff]   ;;  %v3580_v47 = vld [vmem:[%s5042_s1 + $0x94] ss:$8 sps:$4 sm:$0xff]  }
  0x3e   : > { %v2146_v42 = vrot.slane %v2145_v31, 2  ;;  %v1401_v48 = vrot.slane %v1387_v41, %v4094_v1  ;;  %v3550_v23 = vld [vmem:[%s5042_s1 + $0x44] ss:$8 sps:$4 sm:$0xff]   ;;  %v3559_v31 = vld [vmem:[%s5042_s1 + $0x554] ss:$8 sps:$4 sm:$0xff]  }
  0x3f   : > { %550 = vmatpush1.bf16.msra.mxu1 %v3516_v53  ;;  %v358_v62 = vcombine.high %v349_v22, %v4245_v36  ;;  %v357_v61 = vcombine.low %v349_v22, %v4245_v36  ;;  %v3112_v53 = vrot.slane %v4158_v40, 9  ;;  %v3541_v40 = vld [vmem:[%s5042_s1 + $0x524] ss:$8 sps:$4 sm:$0xff]   ;;  %v1926_v17 = vcombine.low %v4221_v24, %v4320_v14  ;;  %v3547_v22 = vld [vmem:[%s5042_s1 + $0x534] ss:$8 sps:$4 sm:$0xff]  }
  0x40   : > { %1595 = vmatpush1.bf16.msra.mxu0 %v3517_v54  ;;  %551 = vmatprep.subr.bf16.mxu1 %v3518_v0  ;;  %v2151_v49 = vsel %vm4135_vm9, %v2146_v42, %v2150_v29  ;;  %v1403_v59 = vcombine.high %v1394_v28, %v1401_v48  ;;  %v1402_v0 = vcombine.low %v1394_v28, %v1401_v48  ;;  %v3551_v28 = vld [vmem:[%s5042_s1 + $0x540] ss:$8 sps:$4 sm:$0xff]   ;;  %v3554_v29 = vld [vmem:[%s5042_s1 + $0x50] ss:$8 sps:$4 sm:$0xff]   ;;  %v3571_v41 = vld [vmem:[%s5042_s1 + $0x574] ss:$8 sps:$4 sm:$0xff]  }
  0x41   : > { %1596 = vmatprep.subr.bf16.mxu0 %v3520_v7  ;;  %553 = vmatprep.mubr.bf16.mxu1 %v358_v62  ;;  %v4275_v54 = vcombine.low %v1352_v37, %v2151_v49  ;;  %v4297_v5 = vsel %vm4233_vm13, %v3112_v53, %v1615_v3  ;;  %v3568_v37 = vld [vmem:[%s5042_s1 + $0x74] ss:$8 sps:$4 sm:$0xff]   ;;  %v3574_v42 = vld [vmem:[%s5042_s1 + $0x84] ss:$8 sps:$4 sm:$0xff]   ;;  %v3569_v62 = vld [vmem:[%s5042_s1 + $0x570] ss:$8 sps:$4 sm:$0xff]  }
  0x42   : > { %1598 = vmatprep.mubr.bf16.mxu0 %v1403_v59  ;;  %v1651_v7 = vcombine.low %v4286_v10, %v4297_v5  ;;  %v3575_v48 = vld [vmem:[%s5042_s1 + $0x580] ss:$8 sps:$4 sm:$0xff]   ;;  %v3578_v49 = vld [vmem:[%s5042_s1 + $0x90] ss:$8 sps:$4 sm:$0xff]   ;;  %v3586_v52 = vld [vmem:[%s5042_s1 + $0xa4] ss:$8 sps:$4 sm:$0xff]  }
  0x43   : > { %552 = vmatpush1.bf16.msra.mxu1 %v3522_v19  ;;  %v3539_v19 = vld [vmem:[%s5042_s1 + $0x520] ss:$8 sps:$4 sm:$0xff]   ;;  %v3581_v53 = vld [vmem:[%s5042_s1 + $0x590] ss:$8 sps:$4 sm:$0xff]   ;;  %v3589_v56 = vld [vmem:[%s5042_s1 + $0x5a4] ss:$8 sps:$4 sm:$0xff]  }
  0x44   : > { %1597 = vmatpush1.bf16.msra.mxu0 %v3523_v8  ;;  %744 = vmatprep.subr.bf16.mxu1 %v3526_v26  ;;  %v4317_v13 = vrot.slane %v1651_v7, %v4094_v1  ;;  %v3545_v8 = vld [vmem:[%s5042_s1 + $0x530] ss:$8 sps:$4 sm:$0xff]   ;;  %v3553_v26 = vld [vmem:[%s5042_s1 + $0x544] ss:$8 sps:$4 sm:$0xff]   ;;  %v3584_v3 = vld [vmem:[%s5042_s1 + $0xa0] ss:$8 sps:$4 sm:$0xff]  }
  0x45   : > { %1830 = vmatprep.subr.bf16.mxu0 %v3529_v32  ;;  %v3562_v32 = vld [vmem:[%s5042_s1 + $0x64] ss:$8 sps:$4 sm:$0xff]   ;;  %v3592_v20 = vld [vmem:[%s5042_s1 + $0xb4] ss:$8 sps:$4 sm:$0xff]   ;;  %v3587_v59 = vld [vmem:[%s5042_s1 + $0x5a0] ss:$8 sps:$4 sm:$0xff]  }
  0x46   : > { %554 = vmatmul.mubr.bf16.vlgmr.msra.gmra.mrb[0].mxu1 %v357_v61  ;;  %v1667_v16 = vcombine.high %v4300_v6, %v4317_v13  ;;  %v3577_v61 = vld [vmem:[%s5042_s1 + $0x584] ss:$8 sps:$4 sm:$0xff]   ;;  %v3604_v7 = vld [vmem:[%s5042_s1 + $0xd4] ss:$8 sps:$4 sm:$0xff]   ;;  %v3599_v11 = vld [vmem:[%s5042_s1 + $0x5c0] ss:$8 sps:$4 sm:$0xff]  }
  0x47   : > { %745 = vmatpush1.bf16.msra.mxu1 %v3524_v46  ;;  %776 = vmatprep.mubr.bf16.mxu1 %v581_v33  ;;  %v3557_v33 = vld [vmem:[%s5042_s1 + $0x550] ss:$8 sps:$4 sm:$0xff]   ;;  %v3572_v46 = vld [vmem:[%s5042_s1 + $0x80] ss:$8 sps:$4 sm:$0xff]   ;;  %v3598_v2 = vld [vmem:[%s5042_s1 + $0xc4] ss:$8 sps:$4 sm:$0xff]  }
  0x48   : > { %746 = vmatprep.subr.bf16.mxu1 %v3532_v51  ;;  %1599 = vmatmul.mubr.bf16.vlgmr.msra.gmra.mrb[0].mxu0 %v1402_v0  ;;  %v3583_v51 = vld [vmem:[%s5042_s1 + $0x594] ss:$8 sps:$4 sm:$0xff]  }
  0x49   : > { %1831 = vmatpush1.bf16.msra.mxu0 %v3527_v60  ;;  %1862 = vmatprep.mubr.bf16.mxu0 %v1667_v16  ;;  %v3590_v60 = vld [vmem:[%s5042_s1 + $0xb0] ss:$8 sps:$4 sm:$0xff]   ;;  %v3595_v0 = vld [vmem:[%s5042_s1 + $0x5b4] ss:$8 sps:$4 sm:$0xff]   ;;  %v3608_v16 = vld [vmem:[%s5042_s1 + $0xe0] ss:$8 sps:$4 sm:$0xff]  }
  0x4a   : > { %1832 = vmatprep.subr.bf16.mxu0 %v3535_v55  ;;  %v3596_v55 = vld [vmem:[%s5042_s1 + $0xc0] ss:$8 sps:$4 sm:$0xff]  }
  0x4b   : > { %747 = vmatpush1.bf16.msra.mxu1 %v3530_v45  ;;  %v3593_v45 = vld [vmem:[%s5042_s1 + $0x5b0] ss:$8 sps:$4 sm:$0xff]  }
  0x4c   : > { %748 = vmatprep.subr.bf16.mxu1 %v3538_v58  ;;  %v3601_v58 = vld [vmem:[%s5042_s1 + $0x5c4] ss:$8 sps:$4 sm:$0xff]  }
  0x4d   : > { %1833 = vmatpush1.bf16.msra.mxu0 %v3533_v12  ;;  %v3602_v12 = vld [vmem:[%s5042_s1 + $0xd0] ss:$8 sps:$4 sm:$0xff]  }
  0x4e   : > { %1834 = vmatprep.subr.bf16.mxu0 %v3541_v40  ;;  %v3610_v40 = vld [vmem:[%s5042_s1 + $0xe4] ss:$8 sps:$4 sm:$0xff]  }
  0x4f   : > { %749 = vmatpush1.bf16.msra.mxu1 %v3536_v15  ;;  %v3607_v15 = vld [vmem:[%s5042_s1 + $0x5d4] ss:$8 sps:$4 sm:$0xff]  }
  0x50   : > { %750 = vmatprep.subr.bf16.mxu1 %v3544_v44  ;;  %v3605_v44 = vld [vmem:[%s5042_s1 + $0x5d0] ss:$8 sps:$4 sm:$0xff]  }
  0x51   : > { %1835 = vmatpush1.bf16.msra.mxu0 %v3539_v19  ;;  %v3613_v19 = vld [vmem:[%s5042_s1 + $0x5e4] ss:$8 sps:$4 sm:$0xff]  }
  0x52   : > { %1836 = vmatprep.subr.bf16.mxu0 %v3547_v22  ;;  %v844_v22 = vcombine.low %v4264_v4, %v4286_v10 }
  0x53   : > { %751 = vmatpush1.bf16.msra.mxu1 %v3542_v21  ;;  %v3616_v21 = vld [vmem:[%s5042_s1 + $0xf4] ss:$8 sps:$4 sm:$0xff]  }
  0x54   : > { %752 = vmatprep.subr.bf16.mxu1 %v3550_v23  ;;  %v843_v23 = vcombine.low %v4309_v9, %v4253_v43  ;;  %v3622_v43 = vld [vmem:[%s5042_s1 + $0x204] ss:$8 sps:$4 sm:$0xff]   ;;  %v4499_v10 = vrot.slane %v844_v22, %v4094_v1  ;;  %v3617_v9 = vld [vmem:[%s5042_s1 + $0x5f0] ss:$8 sps:$4 sm:$0xff]   ;;  %v3688_v22 = vld [vmem:[%s5042_s1 + $0x2b4] ss:$8 sps:$4 sm:$0xff]  }
  0x55   : > { %1837 = vmatpush1.bf16.msra.mxu0 %v3545_v8  ;;  %v3611_v8 = vld [vmem:[%s5042_s1 + $0x5e0] ss:$8 sps:$4 sm:$0xff]  }
  0x56   : > { %1838 = vmatprep.subr.bf16.mxu0 %v3553_v26  ;;  %v3619_v26 = vld [vmem:[%s5042_s1 + $0x5f4] ss:$8 sps:$4 sm:$0xff]   ;;  %v4496_v4 = vrot.slane %v843_v23, %v4094_v1  ;;  %v3683_v23 = vld [vmem:[%s5042_s1 + $0x6a0] ss:$8 sps:$4 sm:$0xff]  }
  0x57   : > { %753 = vmatpush1.bf16.msra.mxu1 %v3548_v25  ;;  %v3614_v25 = vld [vmem:[%s5042_s1 + $0xf0] ss:$8 sps:$4 sm:$0xff]  }
  0x58   : > { %754 = vmatprep.subr.bf16.mxu1 %v3556_v27  ;;  %v3620_v27 = vld [vmem:[%s5042_s1 + $0x200] ss:$8 sps:$4 sm:$0xff]  }
  0x59   : > { %1839 = vmatpush1.bf16.msra.mxu0 %v3551_v28  ;;  %v3625_v28 = vld [vmem:[%s5042_s1 + $0x604] ss:$8 sps:$4 sm:$0xff]  }
  0x5a   : > { %1840 = vmatprep.subr.bf16.mxu0 %v3559_v31  ;;  %v860_v31 = vcombine.high %v4496_v4, %v4499_v10 }
  0x5b   : > { %755 = vmatpush1.bf16.msra.mxu1 %v3554_v29  ;;  %v3628_v29 = vld [vmem:[%s5042_s1 + $0x214] ss:$8 sps:$4 sm:$0xff]  }
  0x5c   : > { %756 = vmatprep.subr.bf16.mxu1 %v3562_v32  ;;  %v1666_v32 = vcombine.low %v4300_v6, %v4317_v13  ;;  %v3631_v6 = vld [vmem:[%s5042_s1 + $0x614] ss:$8 sps:$4 sm:$0xff]   ;;  %v3634_v13 = vld [vmem:[%s5042_s1 + $0x224] ss:$8 sps:$4 sm:$0xff]  }
  0x5d   : > { %1841 = vmatpush1.bf16.msra.mxu0 %v3557_v33  ;;  %v3623_v33 = vld [vmem:[%s5042_s1 + $0x600] ss:$8 sps:$4 sm:$0xff]  }
  0x5e   : > { %1842 = vmatprep.subr.bf16.mxu0 %v3565_v35  ;;  %v3626_v35 = vld [vmem:[%s5042_s1 + $0x210] ss:$8 sps:$4 sm:$0xff]  }
  0x5f   : > { %757 = vmatpush1.bf16.msra.mxu1 %v3560_v34  ;;  %v1927_v34 = vcombine.high %v4221_v24, %v4320_v14  ;;  %v3736_v24 = vld [vmem:[%s5042_s1 + $0x334] ss:$8 sps:$4 sm:$0xff]   ;;  %v3731_v14 = vld [vmem:[%s5042_s1 + $0x720] ss:$8 sps:$4 sm:$0xff]  }
  0x60   : > { %758 = vmatprep.subr.bf16.mxu1 %v3568_v37  ;;  %v3637_v37 = vld [vmem:[%s5042_s1 + $0x624] ss:$8 sps:$4 sm:$0xff]  }
  0x61   : > { %1843 = vmatpush1.bf16.msra.mxu0 %v3563_v38  ;;  %v3640_v38 = vld [vmem:[%s5042_s1 + $0x234] ss:$8 sps:$4 sm:$0xff]  }
  0x62   : > { %1844 = vmatprep.subr.bf16.mxu0 %v3571_v41  ;;  %v3638_v41 = vld [vmem:[%s5042_s1 + $0x230] ss:$8 sps:$4 sm:$0xff]  }
  0x63   : > { %759 = vmatpush1.bf16.msra.mxu1 %v3566_v39  ;;  %v3635_v39 = vld [vmem:[%s5042_s1 + $0x620] ss:$8 sps:$4 sm:$0xff]  }
  0x64   : > { %760 = vmatprep.subr.bf16.mxu1 %v3574_v42  ;;  %v3643_v42 = vld [vmem:[%s5042_s1 + $0x634] ss:$8 sps:$4 sm:$0xff]  }
  0x65   : > { %1845 = vmatpush1.bf16.msra.mxu0 %v3569_v62  ;;  %v3646_v62 = vld [vmem:[%s5042_s1 + $0x244] ss:$8 sps:$4 sm:$0xff]  }
  0x66   : > { %1846 = vmatprep.subr.bf16.mxu0 %v3577_v61  ;;  %v3644_v61 = vld [vmem:[%s5042_s1 + $0x240] ss:$8 sps:$4 sm:$0xff]  }
  0x67   : > { %761 = vmatpush1.bf16.msra.mxu1 %v3572_v46  ;;  %v3641_v46 = vld [vmem:[%s5042_s1 + $0x630] ss:$8 sps:$4 sm:$0xff]  }
  0x68   : > { %762 = vmatprep.subr.bf16.mxu1 %v3580_v47  ;;  %v3649_v47 = vld [vmem:[%s5042_s1 + $0x644] ss:$8 sps:$4 sm:$0xff]  }
  0x69   : > { %1847 = vmatpush1.bf16.msra.mxu0 %v3575_v48  ;;  %v3652_v48 = vld [vmem:[%s5042_s1 + $0x254] ss:$8 sps:$4 sm:$0xff]  }
  0x6a   : > { %1848 = vmatprep.subr.bf16.mxu0 %v3583_v51  ;;  %v3650_v51 = vld [vmem:[%s5042_s1 + $0x250] ss:$8 sps:$4 sm:$0xff]  }
  0x6b   : > { %763 = vmatpush1.bf16.msra.mxu1 %v3578_v49  ;;  %v3647_v49 = vld [vmem:[%s5042_s1 + $0x640] ss:$8 sps:$4 sm:$0xff]  }
  0x6c   : > { %764 = vmatprep.subr.bf16.mxu1 %v3586_v52  ;;  %v3655_v52 = vld [vmem:[%s5042_s1 + $0x654] ss:$8 sps:$4 sm:$0xff]  }
  0x6d   : > { %1849 = vmatpush1.bf16.msra.mxu0 %v3581_v53  ;;  %v3658_v53 = vld [vmem:[%s5042_s1 + $0x264] ss:$8 sps:$4 sm:$0xff]  }
  0x6e   : > { %1850 = vmatprep.subr.bf16.mxu0 %v3589_v56  ;;  %v3656_v56 = vld [vmem:[%s5042_s1 + $0x260] ss:$8 sps:$4 sm:$0xff]  }
  0x6f   : > { %765 = vmatpush1.bf16.msra.mxu1 %v3584_v3  ;;  %v3653_v3 = vld [vmem:[%s5042_s1 + $0x650] ss:$8 sps:$4 sm:$0xff]  }
  0x70   : > { %766 = vmatprep.subr.bf16.mxu1 %v3592_v20  ;;  %v3661_v20 = vld [vmem:[%s5042_s1 + $0x664] ss:$8 sps:$4 sm:$0xff]  }
  0x71   : > { %1851 = vmatpush1.bf16.msra.mxu0 %v3587_v59  ;;  %v3664_v59 = vld [vmem:[%s5042_s1 + $0x274] ss:$8 sps:$4 sm:$0xff]  }
  0x72   : > { %1852 = vmatprep.subr.bf16.mxu0 %v3595_v0  ;;  %v3662_v0 = vld [vmem:[%s5042_s1 + $0x270] ss:$8 sps:$4 sm:$0xff]  }
  0x73   : > { %767 = vmatpush1.bf16.msra.mxu1 %v3590_v60  ;;  %v3659_v60 = vld [vmem:[%s5042_s1 + $0x660] ss:$8 sps:$4 sm:$0xff]  }
  0x74   : > { %768 = vmatprep.subr.bf16.mxu1 %v3598_v2  ;;  %v3667_v2 = vld [vmem:[%s5042_s1 + $0x674] ss:$8 sps:$4 sm:$0xff]  }
  0x75   : > { %1853 = vmatpush1.bf16.msra.mxu0 %v3593_v45  ;;  %v3670_v45 = vld [vmem:[%s5042_s1 + $0x284] ss:$8 sps:$4 sm:$0xff]  }
  0x76   : > { %1854 = vmatprep.subr.bf16.mxu0 %v3601_v58  ;;  %v3668_v58 = vld [vmem:[%s5042_s1 + $0x280] ss:$8 sps:$4 sm:$0xff]  }
  0x77   : > { %769 = vmatpush1.bf16.msra.mxu1 %v3596_v55  ;;  %v3665_v55 = vld [vmem:[%s5042_s1 + $0x670] ss:$8 sps:$4 sm:$0xff]  }
  0x78   : > { %770 = vmatprep.subr.bf16.mxu1 %v3604_v7  ;;  %v3673_v7 = vld [vmem:[%s5042_s1 + $0x684] ss:$8 sps:$4 sm:$0xff]  }
  0x79   : > { %1855 = vmatpush1.bf16.msra.mxu0 %v3599_v11  ;;  %v3676_v11 = vld [vmem:[%s5042_s1 + $0x294] ss:$8 sps:$4 sm:$0xff]  }
  0x7a   : > { %1856 = vmatprep.subr.bf16.mxu0 %v3607_v15  ;;  %v3674_v15 = vld [vmem:[%s5042_s1 + $0x290] ss:$8 sps:$4 sm:$0xff]  }
  0x7b   : > { %771 = vmatpush1.bf16.msra.mxu1 %v3602_v12  ;;  %v3671_v12 = vld [vmem:[%s5042_s1 + $0x680] ss:$8 sps:$4 sm:$0xff]  }
  0x7c   : > { %772 = vmatprep.subr.bf16.mxu1 %v3610_v40  ;;  %v3679_v40 = vld [vmem:[%s5042_s1 + $0x694] ss:$8 sps:$4 sm:$0xff]  }
  0x7d   : > { %1857 = vmatpush1.bf16.msra.mxu0 %v3605_v44  ;;  %v3682_v44 = vld [vmem:[%s5042_s1 + $0x2a4] ss:$8 sps:$4 sm:$0xff]  }
  0x7e   : > { %1858 = vmatprep.subr.bf16.mxu0 %v3613_v19  ;;  %v3680_v19 = vld [vmem:[%s5042_s1 + $0x2a0] ss:$8 sps:$4 sm:$0xff]  }
  0x7f   : > { %773 = vmatpush1.bf16.msra.mxu1 %v3608_v16  ;;  %v3677_v16 = vld [vmem:[%s5042_s1 + $0x690] ss:$8 sps:$4 sm:$0xff]  }
  0x80   : > { %774 = vmatprep.subr.bf16.mxu1 %v3616_v21  ;;  %v3685_v21 = vld [vmem:[%s5042_s1 + $0x6a4] ss:$8 sps:$4 sm:$0xff]  }
  0x81   : > { %1859 = vmatpush1.bf16.msra.mxu0 %v3611_v8  ;;  %v3686_v8 = vld [vmem:[%s5042_s1 + $0x2b0] ss:$8 sps:$4 sm:$0xff]  }
  0x82   : > { %1860 = vmatprep.subr.bf16.mxu0 %v3619_v26  ;;  %v3694_v26 = vld [vmem:[%s5042_s1 + $0x2c4] ss:$8 sps:$4 sm:$0xff]  }
  0x83   : > { %775 = vmatpush1.bf16.msra.mxu1 %v3614_v25  ;;  %v3691_v25 = vld [vmem:[%s5042_s1 + $0x6b4] ss:$8 sps:$4 sm:$0xff]  }
  0x84   : > { %1023 = vmatprep.subr.bf16.mxu1 %v3622_v43  ;;  %v3689_v43 = vld [vmem:[%s5042_s1 + $0x6b0] ss:$8 sps:$4 sm:$0xff]  }
  0x85   : > { %1861 = vmatpush1.bf16.msra.mxu0 %v3617_v9  ;;  %v3692_v9 = vld [vmem:[%s5042_s1 + $0x2c0] ss:$8 sps:$4 sm:$0xff]  }
  0x86   : > { %777 = vmatmul.mubr.bf16.vlgmr.msra.gmra.mrb[0].mxu1 %v580_v57  ;;  %2090 = vmatprep.subr.bf16.mxu0 %v3625_v28  ;;  %v3632_v57 = vld [vmem:[%s5042_s1 + $0x220] ss:$8 sps:$4 sm:$0xff]   ;;  %v3700_v28 = vld [vmem:[%s5042_s1 + $0x2d4] ss:$8 sps:$4 sm:$0xff]  }
  0x87   : > { %1024 = vmatpush1.bf16.msra.mxu1 %v3620_v27  ;;  %1055 = vmatprep.mubr.bf16.mxu1 %v860_v31  ;;  %v3697_v27 = vld [vmem:[%s5042_s1 + $0x6c4] ss:$8 sps:$4 sm:$0xff]   ;;  %v3698_v31 = vld [vmem:[%s5042_s1 + $0x2d0] ss:$8 sps:$4 sm:$0xff]  }
  0x88   : > { %1025 = vmatprep.subr.bf16.mxu1 %v3628_v29  ;;  %1863 = vmatmul.mubr.bf16.vlgmr.msra.gmra.mrb[0].mxu0 %v1666_v32  ;;  %v3695_v29 = vld [vmem:[%s5042_s1 + $0x6c0] ss:$8 sps:$4 sm:$0xff]   ;;  %v3703_v32 = vld [vmem:[%s5042_s1 + $0x6d4] ss:$8 sps:$4 sm:$0xff]  }
  0x89   : > { %2091 = vmatpush1.bf16.msra.mxu0 %v3623_v33  ;;  %2122 = vmatprep.mubr.bf16.mxu0 %v1927_v34  ;;  %v3706_v33 = vld [vmem:[%s5042_s1 + $0x2e4] ss:$8 sps:$4 sm:$0xff]   ;;  %v3701_v34 = vld [vmem:[%s5042_s1 + $0x6d0] ss:$8 sps:$4 sm:$0xff]  }
  0x8a   : > { %2092 = vmatprep.subr.bf16.mxu0 %v3631_v6  ;;  %v3709_v6 = vld [vmem:[%s5042_s1 + $0x6e4] ss:$8 sps:$4 sm:$0xff]  }
  0x8b   : > { %1026 = vmatpush1.bf16.msra.mxu1 %v3626_v35  ;;  %v3704_v35 = vld [vmem:[%s5042_s1 + $0x2e0] ss:$8 sps:$4 sm:$0xff]  }
  0x8c   : > { %1027 = vmatprep.subr.bf16.mxu1 %v3634_v13  ;;  %v3712_v13 = vld [vmem:[%s5042_s1 + $0x2f4] ss:$8 sps:$4 sm:$0xff]  }
  0x8d   : > { %2093 = vmatpush1.bf16.msra.mxu0 %v3629_v18  ;;  %v3860_v18 = vld.sshfl [vmem:[%s4047_s5 + $0x8] sm:$0x5f pattern:$0x76325410] }
  0x8e   : > { %2094 = vmatprep.subr.bf16.mxu0 %v3637_v37 }
  0x8f   : > { %1028 = vmatpush1.bf16.msra.mxu1 %v3632_v57  ;;  %v3861_v57 = vld.sshfl [vmem:[%s4047_s5 + $0x10] sm:$0x5f pattern:$0x76325410] }
  0x90   : > { %1029 = vmatprep.subr.bf16.mxu1 %v3640_v38  ;;  %v1111_v37 = vcombine.low %v3860_v18, %v3861_v57  ;;  %v3862_v38 = vld.sshfl [vmem:[%s4047_s5 + $0x18] sm:$0x5f pattern:$0x76325410]  ;;  %v3776_v18 = vld [vmem:[%s5042_s1 + $0x3a0] ss:$8 sps:$4 sm:$0xff]  }
  0x91   : > { %2095 = vmatpush1.bf16.msra.mxu0 %v3635_v39  ;;  %v3863_v39 = vld.sshfl [vmem:[%s4047_s5 + $0x20] sm:$0x5f pattern:$0x76325410] }
  0x92   : > { %2096 = vmatprep.subr.bf16.mxu0 %v3643_v42  ;;  %v3707_v42 = vld [vmem:[%s5042_s1 + $0x6e0] ss:$8 sps:$4 sm:$0xff]   ;;  %v3781_v57 = vld [vmem:[%s5042_s1 + $0x7a4] ss:$8 sps:$4 sm:$0xff]  }
  0x93   : > { %1030 = vmatpush1.bf16.msra.mxu1 %v3638_v41  ;;  %v1112_v41 = vcombine.low %v3862_v38, %v3863_v39  ;;  %v3779_v38 = vld [vmem:[%s5042_s1 + $0x7a0] ss:$8 sps:$4 sm:$0xff]   ;;  %v3782_v39 = vld [vmem:[%s5042_s1 + $0x3b0] ss:$8 sps:$4 sm:$0xff]  }
  0x94   : > { %1031 = vmatprep.subr.bf16.mxu1 %v3646_v62  ;;  %v3710_v62 = vld [vmem:[%s5042_s1 + $0x2f0] ss:$8 sps:$4 sm:$0xff]  }
  0x95   : > { %2097 = vmatpush1.bf16.msra.mxu0 %v3641_v46  ;;  %v3715_v46 = vld [vmem:[%s5042_s1 + $0x6f4] ss:$8 sps:$4 sm:$0xff]  }
  0x96   : > { %2098 = vmatprep.subr.bf16.mxu0 %v3649_v47  ;;  %v4707_v47 = vrot.slane %v1111_v37, %v4094_v1  ;;  %v3784_v37 = vld [vmem:[%s5042_s1 + $0x3b4] ss:$8 sps:$4 sm:$0xff]  }
  0x97   : > { %1032 = vmatpush1.bf16.msra.mxu1 %v3644_v61  ;;  %v3718_v61 = vld [vmem:[%s5042_s1 + $0x304] ss:$8 sps:$4 sm:$0xff]  }
  0x98   : > { %1033 = vmatprep.subr.bf16.mxu1 %v3652_v48  ;;  %v4710_v48 = vrot.slane %v1112_v41, %v4094_v1  ;;  %v3787_v41 = vld [vmem:[%s5042_s1 + $0x7b4] ss:$8 sps:$4 sm:$0xff]  }
  0x99   : > { %2099 = vmatpush1.bf16.msra.mxu0 %v3647_v49  ;;  %v3713_v49 = vld [vmem:[%s5042_s1 + $0x6f0] ss:$8 sps:$4 sm:$0xff]  }
  0x9a   : > { %2100 = vmatprep.subr.bf16.mxu0 %v3655_v52  ;;  %v4719_v52 = vrot.slane %v4275_v54, %v4094_v1  ;;  %v3719_v54 = vld [vmem:[%s5042_s1 + $0x700] ss:$8 sps:$4 sm:$0xff]  }
  0x9b   : > { %1034 = vmatpush1.bf16.msra.mxu1 %v3650_v51  ;;  %v859_v51 = vcombine.low %v4496_v4, %v4499_v10  ;;  %v1128_v4 = vcombine.high %v4707_v47, %v4710_v48 }
  0x9c   : > { %1035 = vmatprep.subr.bf16.mxu1 %v3658_v53  ;;  %v3716_v53 = vld [vmem:[%s5042_s1 + $0x300] ss:$8 sps:$4 sm:$0xff]  }
  0x9d   : > { %2101 = vmatpush1.bf16.msra.mxu0 %v3653_v3  ;;  %v3721_v3 = vld [vmem:[%s5042_s1 + $0x704] ss:$8 sps:$4 sm:$0xff]  }
  0x9e   : > { %2102 = vmatprep.subr.bf16.mxu0 %v3661_v20  ;;  %v2194_v20 = vcombine.high %v4245_v36, %v4719_v52 }
  0x9f   : > { %1036 = vmatpush1.bf16.msra.mxu1 %v3656_v56  ;;  %v3724_v56 = vld [vmem:[%s5042_s1 + $0x314] ss:$8 sps:$4 sm:$0xff]  }
  0xa0   : > { %1037 = vmatprep.subr.bf16.mxu1 %v3664_v59  ;;  %v3722_v59 = vld [vmem:[%s5042_s1 + $0x310] ss:$8 sps:$4 sm:$0xff]  }
  0xa1   : > { %2103 = vmatpush1.bf16.msra.mxu0 %v3659_v60  ;;  %v3727_v60 = vld [vmem:[%s5042_s1 + $0x714] ss:$8 sps:$4 sm:$0xff]  }
  0xa2   : > { %2104 = vmatprep.subr.bf16.mxu0 %v3667_v2  ;;  %v3725_v2 = vld [vmem:[%s5042_s1 + $0x710] ss:$8 sps:$4 sm:$0xff]  }
  0xa3   : > { %1038 = vmatpush1.bf16.msra.mxu1 %v3662_v0  ;;  %v3730_v0 = vld [vmem:[%s5042_s1 + $0x324] ss:$8 sps:$4 sm:$0xff]  }
  0xa4   : > { %1039 = vmatprep.subr.bf16.mxu1 %v3670_v45  ;;  %v3728_v45 = vld [vmem:[%s5042_s1 + $0x320] ss:$8 sps:$4 sm:$0xff]  }
  0xa5   : > { %2105 = vmatpush1.bf16.msra.mxu0 %v3665_v55  ;;  %v3733_v55 = vld [vmem:[%s5042_s1 + $0x724] ss:$8 sps:$4 sm:$0xff]  }
  0xa6   : > { %2106 = vmatprep.subr.bf16.mxu0 %v3673_v7  ;;  %v3742_v7 = vld [vmem:[%s5042_s1 + $0x344] ss:$8 sps:$4 sm:$0xff]  }
  0xa7   : > { %1040 = vmatpush1.bf16.msra.mxu1 %v3668_v58  ;;  %v3739_v58 = vld [vmem:[%s5042_s1 + $0x734] ss:$8 sps:$4 sm:$0xff]  }
  0xa8   : > { %1041 = vmatprep.subr.bf16.mxu1 %v3676_v11  ;;  %v3737_v11 = vld [vmem:[%s5042_s1 + $0x730] ss:$8 sps:$4 sm:$0xff]  }
  0xa9   : > { %2107 = vmatpush1.bf16.msra.mxu0 %v3671_v12  ;;  %v3740_v12 = vld [vmem:[%s5042_s1 + $0x340] ss:$8 sps:$4 sm:$0xff]  }
  0xaa   : > { %2108 = vmatprep.subr.bf16.mxu0 %v3679_v40  ;;  %v3748_v40 = vld [vmem:[%s5042_s1 + $0x354] ss:$8 sps:$4 sm:$0xff]  }
  0xab   : > { %1042 = vmatpush1.bf16.msra.mxu1 %v3674_v15  ;;  %v3745_v15 = vld [vmem:[%s5042_s1 + $0x744] ss:$8 sps:$4 sm:$0xff]  }
  0xac   : > { %1043 = vmatprep.subr.bf16.mxu1 %v3682_v44  ;;  %v3743_v44 = vld [vmem:[%s5042_s1 + $0x740] ss:$8 sps:$4 sm:$0xff]  }
  0xad   : > { %2109 = vmatpush1.bf16.msra.mxu0 %v3677_v16  ;;  %v3746_v16 = vld [vmem:[%s5042_s1 + $0x350] ss:$8 sps:$4 sm:$0xff]  }
  0xae   : > { %2110 = vmatprep.subr.bf16.mxu0 %v3685_v21  ;;  %v3754_v21 = vld [vmem:[%s5042_s1 + $0x364] ss:$8 sps:$4 sm:$0xff]  }
  0xaf   : > { %1044 = vmatpush1.bf16.msra.mxu1 %v3680_v19  ;;  %v3751_v19 = vld [vmem:[%s5042_s1 + $0x754] ss:$8 sps:$4 sm:$0xff]  }
  0xb0   : > { %1045 = vmatprep.subr.bf16.mxu1 %v3688_v22  ;;  %v3749_v22 = vld [vmem:[%s5042_s1 + $0x750] ss:$8 sps:$4 sm:$0xff]  }
  0xb1   : > { %2111 = vmatpush1.bf16.msra.mxu0 %v3683_v23  ;;  %v3752_v23 = vld [vmem:[%s5042_s1 + $0x360] ss:$8 sps:$4 sm:$0xff]  }
  0xb2   : > { %2112 = vmatprep.subr.bf16.mxu0 %v3691_v25  ;;  %v3760_v25 = vld [vmem:[%s5042_s1 + $0x374] ss:$8 sps:$4 sm:$0xff]  }
  0xb3   : > { %1046 = vmatpush1.bf16.msra.mxu1 %v3686_v8  ;;  %v3757_v8 = vld [vmem:[%s5042_s1 + $0x764] ss:$8 sps:$4 sm:$0xff]  }
  0xb4   : > { %1047 = vmatprep.subr.bf16.mxu1 %v3694_v26  ;;  %v3755_v26 = vld [vmem:[%s5042_s1 + $0x760] ss:$8 sps:$4 sm:$0xff]  }
  0xb5   : > { %2113 = vmatpush1.bf16.msra.mxu0 %v3689_v43  ;;  %v3758_v43 = vld [vmem:[%s5042_s1 + $0x370] ss:$8 sps:$4 sm:$0xff]  }
  0xb6   : > { %2114 = vmatprep.subr.bf16.mxu0 %v3697_v27  ;;  %v3766_v27 = vld [vmem:[%s5042_s1 + $0x384] ss:$8 sps:$4 sm:$0xff]  }
  0xb7   : > { %1048 = vmatpush1.bf16.msra.mxu1 %v3692_v9  ;;  %v3763_v9 = vld [vmem:[%s5042_s1 + $0x774] ss:$8 sps:$4 sm:$0xff]  }
  0xb8   : > { %1049 = vmatprep.subr.bf16.mxu1 %v3700_v28  ;;  %v3761_v28 = vld [vmem:[%s5042_s1 + $0x770] ss:$8 sps:$4 sm:$0xff]  }
  0xb9   : > { %2115 = vmatpush1.bf16.msra.mxu0 %v3695_v29  ;;  %v3764_v29 = vld [vmem:[%s5042_s1 + $0x380] ss:$8 sps:$4 sm:$0xff]  }
  0xba   : > { %2116 = vmatprep.subr.bf16.mxu0 %v3703_v32  ;;  %v3772_v32 = vld [vmem:[%s5042_s1 + $0x394] ss:$8 sps:$4 sm:$0xff]  }
  0xbb   : > { %1050 = vmatpush1.bf16.msra.mxu1 %v3698_v31  ;;  %v3769_v31 = vld [vmem:[%s5042_s1 + $0x784] ss:$8 sps:$4 sm:$0xff]  }
  0xbc   : > { %1051 = vmatprep.subr.bf16.mxu1 %v3706_v33  ;;  %v3767_v33 = vld [vmem:[%s5042_s1 + $0x780] ss:$8 sps:$4 sm:$0xff]  }
  0xbd   : > { %2117 = vmatpush1.bf16.msra.mxu0 %v3701_v34  ;;  %v3770_v34 = vld [vmem:[%s5042_s1 + $0x390] ss:$8 sps:$4 sm:$0xff]  }
  0xbe   : > { %2118 = vmatprep.subr.bf16.mxu0 %v3709_v6  ;;  %v3778_v6 = vld [vmem:[%s5042_s1 + $0x3a4] ss:$8 sps:$4 sm:$0xff]  }
  0xbf   : > { %1052 = vmatpush1.bf16.msra.mxu1 %v3704_v35  ;;  %v3775_v35 = vld [vmem:[%s5042_s1 + $0x794] ss:$8 sps:$4 sm:$0xff]  }
  0xc0   : > { %1053 = vmatprep.subr.bf16.mxu1 %v3712_v13  ;;  %v3773_v13 = vld [vmem:[%s5042_s1 + $0x790] ss:$8 sps:$4 sm:$0xff]  }
  0xc1   : > { %2119 = vmatpush1.bf16.msra.mxu0 %v3707_v42  ;;  %v3790_v42 = vld [vmem:[%s5042_s1 + $0x3c4] ss:$8 sps:$4 sm:$0xff]  }
  0xc2   : > { %2120 = vmatprep.subr.bf16.mxu0 %v3715_v46  ;;  %v3788_v46 = vld [vmem:[%s5042_s1 + $0x3c0] ss:$8 sps:$4 sm:$0xff]  }
  0xc3   : > { %1054 = vmatpush1.bf16.msra.mxu1 %v3710_v62  ;;  %v3785_v62 = vld [vmem:[%s5042_s1 + $0x7b0] ss:$8 sps:$4 sm:$0xff]  }
  0xc4   : > { %1291 = vmatprep.subr.bf16.mxu1 %v3718_v61  ;;  %v3793_v61 = vld [vmem:[%s5042_s1 + $0x7c4] ss:$8 sps:$4 sm:$0xff]  }
  0xc5   : > { %2121 = vmatpush1.bf16.msra.mxu0 %v3713_v49  ;;  %v3796_v49 = vld [vmem:[%s5042_s1 + $0x3d4] ss:$8 sps:$4 sm:$0xff]  }
  0xc6   : > { %1056 = vmatmul.mubr.bf16.vlgmr.msra.gmra.mrb[0].mxu1 %v859_v51  ;;  %2357 = vmatprep.subr.bf16.mxu0 %v3721_v3  ;;  %v3791_v51 = vld [vmem:[%s5042_s1 + $0x7c0] ss:$8 sps:$4 sm:$0xff]   ;;  %v3799_v3 = vld [vmem:[%s5042_s1 + $0x7d4] ss:$8 sps:$4 sm:$0xff]  }
  0xc7   : > { %1292 = vmatpush1.bf16.msra.mxu1 %v3716_v53  ;;  %1323 = vmatprep.mubr.bf16.mxu1 %v1128_v4  ;;  %v3794_v53 = vld [vmem:[%s5042_s1 + $0x3d0] ss:$8 sps:$4 sm:$0xff]  }
  0xc8   : > { %1293 = vmatprep.subr.bf16.mxu1 %v3724_v56  ;;  %2123 = vmatmul.mubr.bf16.vlgmr.msra.gmra.mrb[0].mxu0 %v1926_v17  ;;  %v3734_v17 = vld [vmem:[%s5042_s1 + $0x330] ss:$8 sps:$4 sm:$0xff]   ;;  %v3864_v56 = vld.sshfl [vmem:[%s4047_s5 + $0x28] sm:$0x5f pattern:$0x76325410] }
  0xc9   : > { %2358 = vmatpush1.bf16.msra.mxu0 %v3719_v54  ;;  %2389 = vmatprep.mubr.bf16.mxu0 %v2194_v20  ;;  %v3306_v4 = vrot.slane %v3864_v56, 9  ;;  %v2406_v54 = vrot.slane %v4188_v63, 7  ;;  %v3802_v20 = vld [vmem:[%s5042_s1 + $0x3e4] ss:$8 sps:$4 sm:$0xff]  }
  0xca   : > { %2359 = vmatprep.subr.bf16.mxu0 %v3727_v60  ;;  %v3800_v60 = vld [vmem:[%s5042_s1 + $0x3e0] ss:$8 sps:$4 sm:$0xff]   ;;  %v3805_v63 = vld [vmem:[%s5042_s1 + $0x7e4] ss:$8 sps:$4 sm:$0xff]  }
  0xcb   : > { %1294 = vmatpush1.bf16.msra.mxu1 %v3722_v59  ;;  %v3797_v59 = vld [vmem:[%s5042_s1 + $0x7d0] ss:$8 sps:$4 sm:$0xff]  }
  0xcc   : > { %1295 = vmatprep.subr.bf16.mxu1 %v3730_v0  ;;  %v2407_v0 = vsel %vm4233_vm13, %v3306_v4, %v2406_v54 }
  0xcd   : > { %2360 = vmatpush1.bf16.msra.mxu0 %v3725_v2  ;;  %v3808_v2 = vld [vmem:[%s5042_s1 + $0x3f4] ss:$8 sps:$4 sm:$0xff]  }
  0xce   : > { %2361 = vmatprep.subr.bf16.mxu0 %v3733_v55  ;;  %v2441_v55 = vcombine.low %v4297_v5, %v2407_v0 }
  0xcf   : > { %1296 = vmatpush1.bf16.msra.mxu1 %v3728_v45  ;;  %v3803_v45 = vld [vmem:[%s5042_s1 + $0x7e0] ss:$8 sps:$4 sm:$0xff]  }
  0xd0   : > { %1297 = vmatprep.subr.bf16.mxu1 %v3736_v24  ;;  %v3806_v24 = vld [vmem:[%s5042_s1 + $0x3f0] ss:$8 sps:$4 sm:$0xff]   ;;  %v4925_v5 = vrot.slane %v2441_v55, %v4094_v1  ;;  %v3817_v1 = vld [vmem:[%s5042_s1 + $0x814] ss:$8 sps:$4 sm:$0xff]  }
  0xd1   : > { %2362 = vmatpush1.bf16.msra.mxu0 %v3731_v14  ;;  %v3809_v14 = vld [vmem:[%s5042_s1 + $0x7f0] ss:$8 sps:$4 sm:$0xff]  }
  0xd2   : > { %2363 = vmatprep.subr.bf16.mxu0 %v3739_v58  ;;  %v3814_v58 = vld [vmem:[%s5042_s1 + $0x804] ss:$8 sps:$4 sm:$0xff]  }
  0xd3   : > { %1298 = vmatpush1.bf16.msra.mxu1 %v3734_v17  ;;  %v1127_v17 = vcombine.low %v4707_v47, %v4710_v48  ;;  %v2450_v47 = vcombine.high %v4499_v10, %v4925_v5  ;;  %v3820_v48 = vld [vmem:[%s5042_s1 + $0x824] ss:$8 sps:$4 sm:$0xff]  }
  0xd4   : > { %1299 = vmatprep.subr.bf16.mxu1 %v3742_v7  ;;  %v2193_v7 = vcombine.low %v4245_v36, %v4719_v52  ;;  %v3815_v36 = vld [vmem:[%s5042_s1 + $0x810] ss:$8 sps:$4 sm:$0xff]   ;;  %v3818_v52 = vld [vmem:[%s5042_s1 + $0x820] ss:$8 sps:$4 sm:$0xff]  }
  0xd5   : > { %2364 = vmatpush1.bf16.msra.mxu0 %v3737_v11  ;;  %v3812_v11 = vld [vmem:[%s5042_s1 + $0x800] ss:$8 sps:$4 sm:$0xff]  }
  0xd6   : > { %2365 = vmatprep.subr.bf16.mxu0 %v3745_v15  ;;  %v3821_v15 = vld [vmem:[%s5042_s1 + $0x830] ss:$8 sps:$4 sm:$0xff]  }
  0xd7   : > { %1300 = vmatpush1.bf16.msra.mxu1 %v3740_v12  ;;  %v3823_v12 = vld [vmem:[%s5042_s1 + $0x834] ss:$8 sps:$4 sm:$0xff]  }
  0xd8   : > { %1301 = vmatprep.subr.bf16.mxu1 %v3748_v40  ;;  %v3826_v40 = vld [vmem:[%s5042_s1 + $0x844] ss:$8 sps:$4 sm:$0xff]  }
  0xd9   : > { %2366 = vmatpush1.bf16.msra.mxu0 %v3743_v44  ;;  %v3824_v44 = vld [vmem:[%s5042_s1 + $0x840] ss:$8 sps:$4 sm:$0xff]  }
  0xda   : > { %2367 = vmatprep.subr.bf16.mxu0 %v3751_v19  ;;  %v3827_v19 = vld [vmem:[%s5042_s1 + $0x850] ss:$8 sps:$4 sm:$0xff]  }
  0xdb   : > { %1302 = vmatpush1.bf16.msra.mxu1 %v3746_v16  ;;  %v3829_v16 = vld [vmem:[%s5042_s1 + $0x854] ss:$8 sps:$4 sm:$0xff]  }
  0xdc   : > { %1303 = vmatprep.subr.bf16.mxu1 %v3754_v21  ;;  %v3832_v21 = vld [vmem:[%s5042_s1 + $0x864] ss:$8 sps:$4 sm:$0xff]  }
  0xdd   : > { %2368 = vmatpush1.bf16.msra.mxu0 %v3749_v22  ;;  %v3830_v22 = vld [vmem:[%s5042_s1 + $0x860] ss:$8 sps:$4 sm:$0xff]  }
  0xde   : > { %2369 = vmatprep.subr.bf16.mxu0 %v3757_v8  ;;  %v3833_v8 = vld [vmem:[%s5042_s1 + $0x870] ss:$8 sps:$4 sm:$0xff]  }
  0xdf   : > { %1304 = vmatpush1.bf16.msra.mxu1 %v3752_v23  ;;  %v3835_v23 = vld [vmem:[%s5042_s1 + $0x874] ss:$8 sps:$4 sm:$0xff]  }
  0xe0   : > { %1305 = vmatprep.subr.bf16.mxu1 %v3760_v25  ;;  %v3838_v25 = vld [vmem:[%s5042_s1 + $0x884] ss:$8 sps:$4 sm:$0xff]  }
  0xe1   : > { %2370 = vmatpush1.bf16.msra.mxu0 %v3755_v26  ;;  %v3836_v26 = vld [vmem:[%s5042_s1 + $0x880] ss:$8 sps:$4 sm:$0xff]  }
  0xe2   : > { %2371 = vmatprep.subr.bf16.mxu0 %v3763_v9  ;;  %v3839_v9 = vld [vmem:[%s5042_s1 + $0x890] ss:$8 sps:$4 sm:$0xff]  }
  0xe3   : > { %1306 = vmatpush1.bf16.msra.mxu1 %v3758_v43  ;;  %v3841_v43 = vld [vmem:[%s5042_s1 + $0x894] ss:$8 sps:$4 sm:$0xff]  }
  0xe4   : > { %1307 = vmatprep.subr.bf16.mxu1 %v3766_v27  ;;  %v3844_v27 = vld [vmem:[%s5042_s1 + $0x8a4] ss:$8 sps:$4 sm:$0xff]  }
  0xe5   : > { %2372 = vmatpush1.bf16.msra.mxu0 %v3761_v28  ;;  %v3842_v28 = vld [vmem:[%s5042_s1 + $0x8a0] ss:$8 sps:$4 sm:$0xff]  }
  0xe6   : > { %2373 = vmatprep.subr.bf16.mxu0 %v3769_v31  ;;  %v3845_v31 = vld [vmem:[%s5042_s1 + $0x8b0] ss:$8 sps:$4 sm:$0xff]  }
  0xe7   : > { %1308 = vmatpush1.bf16.msra.mxu1 %v3764_v29  ;;  %v3847_v29 = vld [vmem:[%s5042_s1 + $0x8b4] ss:$8 sps:$4 sm:$0xff]  }
  0xe8   : > { %1309 = vmatprep.subr.bf16.mxu1 %v3772_v32  ;;  %v3850_v32 = vld [vmem:[%s5042_s1 + $0x8c4] ss:$8 sps:$4 sm:$0xff]  }
  0xe9   : > { %2374 = vmatpush1.bf16.msra.mxu0 %v3767_v33  ;;  %v3848_v33 = vld [vmem:[%s5042_s1 + $0x8c0] ss:$8 sps:$4 sm:$0xff]  }
  0xea   : > { %2375 = vmatprep.subr.bf16.mxu0 %v3775_v35  ;;  %v3851_v35 = vld [vmem:[%s5042_s1 + $0x8d0] ss:$8 sps:$4 sm:$0xff]  }
  0xeb   : > { %1310 = vmatpush1.bf16.msra.mxu1 %v3770_v34  ;;  %v3853_v34 = vld [vmem:[%s5042_s1 + $0x8d4] ss:$8 sps:$4 sm:$0xff]  }
  0xec   : > { %1311 = vmatprep.subr.bf16.mxu1 %v3778_v6  ;;  %v3856_v6 = vld [vmem:[%s5042_s1 + $0x8e4] ss:$8 sps:$4 sm:$0xff]  }
  0xed   : > { %2376 = vmatpush1.bf16.msra.mxu0 %v3773_v13  ;;  %v3854_v13 = vld [vmem:[%s5042_s1 + $0x8e0] ss:$8 sps:$4 sm:$0xff]  }
  0xee   : > { %2377 = vmatprep.subr.bf16.mxu0 %v3781_v57  ;;  %v3857_v57 = vld [vmem:[%s5042_s1 + $0x8f0] ss:$8 sps:$4 sm:$0xff]  }
  0xef   : > { %1312 = vmatpush1.bf16.msra.mxu1 %v3776_v18  ;;  %v3859_v18 = vld [vmem:[%s5042_s1 + $0x8f4] ss:$8 sps:$4 sm:$0xff]  }
  0xf0   : > { %1313 = vmatprep.subr.bf16.mxu1 %v3784_v37  ;;  %v2449_v37 = vcombine.low %v4499_v10, %v4925_v5 }
  0xf1   : > { %2378 = vmatpush1.bf16.msra.mxu0 %v3779_v38 }
  0xf2   : > { %2379 = vmatprep.subr.bf16.mxu0 %v3787_v41 }
  0xf3   : > { %1314 = vmatpush1.bf16.msra.mxu1 %v3782_v39 }
  0xf4   : > { %1315 = vmatprep.subr.bf16.mxu1 %v3790_v42 }
  0xf5   : > { %2380 = vmatpush1.bf16.msra.mxu0 %v3785_v62  ;;  %v2664_v62 = vsub.s32 0, %v4052_v50 }
  0xf6   : > { %2381 = vmatprep.subr.bf16.mxu0 %v3793_v61  ;;  %v2668_v61 = vsub.s32 1, %v4052_v50 }
  0xf7   : > { %1316 = vmatpush1.bf16.msra.mxu1 %v3788_v46  ;;  %v2660_v46 = vld [vmem:[%s5043_s2] sm:$0x3] }
  0xf8   : > { %1317 = vmatprep.subr.bf16.mxu1 %v3796_v49  ;;  %v2665_v49 = vrot.slane %v2660_v46, %v2664_v62 }
  0xf9   : > { %2382 = vmatpush1.bf16.msra.mxu0 %v3791_v51 }
  0xfa   : > { %2383 = vmatprep.subr.bf16.mxu0 %v3799_v3 }
  0xfb   : > { %1318 = vmatpush1.bf16.msra.mxu1 %v3794_v53  ;;  %v2669_v53 = vrot.slane %v2660_v46, %v2668_v61 }
  0xfc   : > { %1319 = vmatprep.subr.bf16.mxu1 %v3802_v20 }
  0xfd   : > { %2384 = vmatpush1.bf16.msra.mxu0 %v3797_v59 }
  0xfe   : > { %2385 = vmatprep.subr.bf16.mxu0 %v3805_v63 }
  0xff   : > { %1320 = vmatpush1.bf16.msra.mxu1 %v3800_v60 }
 0x100   : > { %1321 = vmatprep.subr.bf16.mxu1 %v3808_v2 }
 0x101   : > { %2386 = vmatpush1.bf16.msra.mxu0 %v3803_v45 }
 0x102   : > { %2387 = vmatprep.subr.bf16.mxu0 %v3811_v30 }
 0x103   : > { %1322 = vmatpush1.bf16.msra.mxu1 %v3806_v24 }
 0x105   : > { %2388 = vmatpush1.bf16.msra.mxu0 %v3809_v14 }
 0x106   : > { %1324 = vmatmul.mubr.bf16.vlgmr.msra.gmra.mrb[0].mxu1 %v1127_v17  ;;  %2613 = vmatprep.subr.bf16.mxu0 %v3814_v58 }
 0x108   : > { %2390 = vmatmul.mubr.bf16.vlgmr.msra.gmra.mrb[0].mxu0 %v2193_v7 }
 0x109   : > { %2614 = vmatpush1.bf16.msra.mxu0 %v3812_v11  ;;  %2645 = vmatprep.mubr.bf16.mxu0 %v2450_v47 }
 0x10a   : > { %2615 = vmatprep.subr.bf16.mxu0 %v3817_v1 }
 0x10d   : > { %2616 = vmatpush1.bf16.msra.mxu0 %v3815_v36 }
 0x10e   : > { %2617 = vmatprep.subr.bf16.mxu0 %v3820_v48 }
 0x111   : > { %2618 = vmatpush1.bf16.msra.mxu0 %v3818_v52 }
 0x112   : > { %2619 = vmatprep.subr.bf16.mxu0 %v3823_v12 }
 0x115   : > { %2620 = vmatpush1.bf16.msra.mxu0 %v3821_v15 }
 0x116   : > { %2621 = vmatprep.subr.bf16.mxu0 %v3826_v40 }
 0x119   : > { %2622 = vmatpush1.bf16.msra.mxu0 %v3824_v44 }
 0x11a   : > { %2623 = vmatprep.subr.bf16.mxu0 %v3829_v16 }
 0x11d   : > { %2624 = vmatpush1.bf16.msra.mxu0 %v3827_v19 }
 0x11e   : > { %2625 = vmatprep.subr.bf16.mxu0 %v3832_v21 }
 0x121   : > { %2626 = vmatpush1.bf16.msra.mxu0 %v3830_v22 }
 0x122   : > { %2627 = vmatprep.subr.bf16.mxu0 %v3835_v23 }
 0x125   : > { %2628 = vmatpush1.bf16.msra.mxu0 %v3833_v8 }
 0x126   : > { %2629 = vmatprep.subr.bf16.mxu0 %v3838_v25 }
 0x129   : > { %2630 = vmatpush1.bf16.msra.mxu0 %v3836_v26 }
 0x12a   : > { %2631 = vmatprep.subr.bf16.mxu0 %v3841_v43 }
 0x12d   : > { %2632 = vmatpush1.bf16.msra.mxu0 %v3839_v9 }
 0x12e   : > { %2633 = vmatprep.subr.bf16.mxu0 %v3844_v27 }
 0x131   : > { %2634 = vmatpush1.bf16.msra.mxu0 %v3842_v28 }
 0x132   : > { %2635 = vmatprep.subr.bf16.mxu0 %v3847_v29 }
 0x135   : > { %2636 = vmatpush1.bf16.msra.mxu0 %v3845_v31 }
 0x136   : > { %2637 = vmatprep.subr.bf16.mxu0 %v3850_v32 }
 0x139   : > { %2638 = vmatpush1.bf16.msra.mxu0 %v3848_v33 }
 0x13a   : > { %2639 = vmatprep.subr.bf16.mxu0 %v3853_v34 }
 0x13d   : > { %2640 = vmatpush1.bf16.msra.mxu0 %v3851_v35 }
 0x13e   : > { %2641 = vmatprep.subr.bf16.mxu0 %v3856_v6 }
 0x141   : > { %2642 = vmatpush1.bf16.msra.mxu0 %v3854_v13 }
 0x142   : > { %2643 = vmatprep.subr.bf16.mxu0 %v3859_v18 }
 0x145   : > { %2644 = vmatpush1.bf16.msra.mxu0 %v3857_v57 }
 0x148   : > { %2646 = vmatmul.mubr.bf16.vlgmr.msra.gmra.mrb[0].mxu0 %v2449_v37 }
 0x1d9   : > { %v1325_v38 = vpop.f32.mrb[0].mxu1 }
 0x1da   : > { %v1327_v39 = vpop.f32.mrb[1].mxu1 }
 0x1db   : > { %v1329_v41 = vpop.f32.mrb[2].mxu1 }
 0x1dc   : > { %v1331_v42 = vpop.f32.mrb[3].mxu1 }
 0x21b   : > { %v2647_v51 = vpop.f32.mrb[0].mxu0 }
 0x21c   : > { %v3386_v3 = vadd.f32 %v2647_v51, %v1325_v38  ;;  %v2649_v10 = vpop.f32.mrb[1].mxu0 }
 0x21d   : > { %v3387_v56 = vadd.f32 %v2649_v10, %v1327_v39  ;;  %v2651_v4 = vpop.f32.mrb[2].mxu0 }
 0x21e   : > { %v2672_v54 = vadd.f32 %v3386_v3, %v2665_v49  ;;  %v3388_v20 = vadd.f32 %v2651_v4, %v1329_v41  ;;  %v2653_v59 = vpop.f32.mrb[3].mxu0 }
 0x21f   : > { %v2673_v60 = vadd.f32 %v3387_v56, %v2669_v53  ;;  %v3389_v63 = vadd.f32 %v2653_v59, %v1331_v42 }
 0x220   : > { %v2674_v0 = vadd.f32 %v3388_v20, %v2665_v49 }
 0x221   : > { %v2680_v2 = vcombine.low %v2672_v54, %v2673_v60  ;;  %v2681_v45 = vcombine.high %v2672_v54, %v2673_v60  ;;  %v3371_v55 = vcombine.low %v2673_v60, %v2673_v60  ;;  %v3372_v24 = vcombine.high %v2673_v60, %v2673_v60 }
 0x222   : > { %v2675_v50 = vadd.f32 %v3389_v63, %v2669_v53 }
 0x223   : > { %v3375_v30 = vpack.c.bf16 %v3371_v55, %v2680_v2  ;;  %v3376_v14 = vpack.c.bf16 %v3372_v24, %v2681_v45 }
 0x224   : > { %v2682_v17 = vcombine.low %v2674_v0, %v2675_v50  ;;  %v2683_v5 = vcombine.high %v2674_v0, %v2675_v50  ;;  %v3373_v58 = vcombine.low %v2675_v50, %v2675_v50  ;;  %v3374_v7 = vcombine.high %v2675_v50, %v2675_v50 }
 0x225   : > { %3379 = vst.sshfl [vmem:[%s170_s15] sm:$0x33 pattern:$0x76325410] %v3375_v30 }
 0x226   : > { %3380 = vst.sshfl [vmem:[%s170_s15 + $0x4] sm:$0x33 pattern:$0x76325410] %v3376_v14  ;;  %v3377_v11 = vpack.c.bf16 %v3373_v58, %v2682_v17  ;;  %v3378_v47 = vpack.c.bf16 %v3374_v7, %v2683_v5 }
 0x228   : > { %3381 = vst.sshfl [vmem:[%s170_s15 + $0x8] sm:$0x33 pattern:$0x76325410] %v3377_v11 }
 0x229   : > { %3382 = vst.sshfl [vmem:[%s170_s15 + $0xc] sm:$0x33 pattern:$0x76325410] %v3378_v47 }
 0x22a PF: > { %s13_s12 = sadd.s32 1, %s3871_s12  }
 0x22b   : > { %p10_p4 = scmp.ge.s32.totalorder %s13_s12, 6  }
 0x22d   :  { %12 = sbr.rel (!%p10_p4) target bundleno = 1 (0x1), region = 70 }

// kernel: sr_loss.18
= control target key start
LH: loop header
LB: loop body
LE: loop exit
PB: predicated region body
PF: predicated region fallthrough
CT: control target
= control target key end

     0   :  { %s3898_s12 = smov 0   ;;  %s5045_s0 = inlined_call_operand.vmem [shape: bf16[4,6,6,256], index: 0, kind: input, shape index: {}]   ;;  %s5046_s1 = inlined_call_operand.vmem [shape: bf16[3,3,256,256], index: 1, kind: input, shape index: {}]   ;;  %s5047_s2 = inlined_call_operand.vmem [shape: f32[1,256], index: 2, kind: input, shape index: {}]   ;;  %s5048_s3 = inlined_call_operand.vmem [shape: bf16[4,4,4,256], index: 3, kind: output, shape index: {}]  }
   0x1 LB: > { %s2811_s13 = sadd.s32 4294967295, %s3875_s12   ;;  %p2815_p0 = scmp.ge.s32.totalorder %s3875_s12, 1  ;;  %s3875_s12 = sphi %s3898_s12, %s13_s12  }
   0x2   : > { %p137_p1 = scmp.lt.s32.totalorder %s3875_s12, 5 }
   0x4   : > { %p138_p2 = pnand %p2815_p0, %p137_p1 }
   0x5   : > { %v3432_v0 = vld [vmem:[%s5046_s1 + $0x104] ss:$8 sps:$4 sm:$0xff] (!%p138_p2)   ;;  %v3436_v2 = vld [vmem:[%s5046_s1 + $0x100] ss:$8 sps:$4 sm:$0xff] (!%p138_p2)   ;;  %v3438_v4 = vld [vmem:[%s5046_s1 + $0x114] ss:$8 sps:$4 sm:$0xff] (!%p138_p2)   ;;  %v346_v44 = vlaneseq (!%p138_p2) }
   0x6   : > { %141 = sbr.rel (%p138_p2) target bundleno = 556 (0x22c), region = 32  ;;  %v3434_v1 = vld [vmem:[%s5046_s1 + $0x404] ss:$8 sps:$4 sm:$0xff] (!%p138_p2)   ;;  %521 = vmatprep.subr.bf16.mxu1 (!%p138_p2), %v3432_v0  ;;  %v3437_v3 = vld [vmem:[%s5046_s1 + $0x400] ss:$8 sps:$4 sm:$0xff] (!%p138_p2)   ;;  %p161_p3 = scmp.lt.s32.totalorder (!%p138_p2), %s2811_s13, 3 }
   0x7   : > { %1566 = vmatprep.subr.bf16.mxu0 (!%p138_p2), %v3434_v1  ;;  %522 = vmatpush1.bf16.msra.mxu1 (!%p138_p2), %v3436_v2  ;;  %v3440_v5 = vld [vmem:[%s5046_s1 + $0x414] ss:$8 sps:$4 sm:$0xff] (!%p138_p2)   ;;  %v3442_v6 = vld [vmem:[%s5046_s1 + $0x110] ss:$8 sps:$4 sm:$0xff] (!%p138_p2)   ;;  %v3444_v8 = vld [vmem:[%s5046_s1 + $0x124] ss:$8 sps:$4 sm:$0xff] (!%p138_p2)  }
   0x8   : > { %1567 = vmatpush1.bf16.msra.mxu0 (!%p138_p2), %v3437_v3  ;;  %523 = vmatprep.subr.bf16.mxu1 (!%p138_p2), %v3438_v4  ;;  %v3443_v7 = vld [vmem:[%s5046_s1 + $0x410] ss:$8 sps:$4 sm:$0xff] (!%p138_p2)   ;;  %v3446_v9 = vld [vmem:[%s5046_s1 + $0x424] ss:$8 sps:$4 sm:$0xff] (!%p138_p2)   ;;  %v3448_v10 = vld [vmem:[%s5046_s1 + $0x120] ss:$8 sps:$4 sm:$0xff] (!%p138_p2)  }
   0x9   : > { %1568 = vmatprep.subr.bf16.mxu0 (!%p138_p2), %v3440_v5  ;;  %v3449_v11 = vld [vmem:[%s5046_s1 + $0x420] ss:$8 sps:$4 sm:$0xff] (!%p138_p2)   ;;  %v3450_v12 = vld [vmem:[%s5046_s1 + $0x134] ss:$8 sps:$4 sm:$0xff] (!%p138_p2)   ;;  %v3454_v14 = vld [vmem:[%s5046_s1 + $0x130] ss:$8 sps:$4 sm:$0xff] (!%p138_p2)  }
   0xa   : > { %v3452_v13 = vld [vmem:[%s5046_s1 + $0x434] ss:$8 sps:$4 sm:$0xff] (!%p138_p2)   ;;  %v3455_v15 = vld [vmem:[%s5046_s1 + $0x430] ss:$8 sps:$4 sm:$0xff] (!%p138_p2)   ;;  %v3456_v16 = vld [vmem:[%s5046_s1 + $0x144] ss:$8 sps:$4 sm:$0xff] (!%p138_p2)  }
   0xb   : > { %524 = vmatpush1.bf16.msra.mxu1 (!%p138_p2), %v3442_v6  ;;  %v3458_v17 = vld [vmem:[%s5046_s1 + $0x444] ss:$8 sps:$4 sm:$0xff] (!%p138_p2)   ;;  %v3460_v18 = vld [vmem:[%s5046_s1 + $0x140] ss:$8 sps:$4 sm:$0xff] (!%p138_p2)   ;;  %v3462_v20 = vld [vmem:[%s5046_s1 + $0x154] ss:$8 sps:$4 sm:$0xff] (!%p138_p2)  }
   0xc   : > { %1569 = vmatpush1.bf16.msra.mxu0 (!%p138_p2), %v3443_v7  ;;  %525 = vmatprep.subr.bf16.mxu1 (!%p138_p2), %v3444_v8  ;;  %v3461_v19 = vld [vmem:[%s5046_s1 + $0x440] ss:$8 sps:$4 sm:$0xff] (!%p138_p2)   ;;  %v3464_v21 = vld [vmem:[%s5046_s1 + $0x454] ss:$8 sps:$4 sm:$0xff] (!%p138_p2)   ;;  %v3466_v22 = vld [vmem:[%s5046_s1 + $0x150] ss:$8 sps:$4 sm:$0xff] (!%p138_p2)  }
   0xd   : > { %1570 = vmatprep.subr.bf16.mxu0 %v3446_v9  ;;  %v3467_v23 = vld [vmem:[%s5046_s1 + $0x450] ss:$8 sps:$4 sm:$0xff]   ;;  %v3468_v24 = vld [vmem:[%s5046_s1 + $0x164] ss:$8 sps:$4 sm:$0xff]   ;;  %v3472_v26 = vld [vmem:[%s5046_s1 + $0x160] ss:$8 sps:$4 sm:$0xff]  }
   0xe   : > { %v3470_v25 = vld [vmem:[%s5046_s1 + $0x464] ss:$8 sps:$4 sm:$0xff]   ;;  %v3473_v27 = vld [vmem:[%s5046_s1 + $0x460] ss:$8 sps:$4 sm:$0xff]   ;;  %v3474_v28 = vld [vmem:[%s5046_s1 + $0x174] ss:$8 sps:$4 sm:$0xff]  }
   0xf   : > { %526 = vmatpush1.bf16.msra.mxu1 %v3448_v10  ;;  %v3476_v29 = vld [vmem:[%s5046_s1 + $0x474] ss:$8 sps:$4 sm:$0xff]   ;;  %v3478_v30 = vld [vmem:[%s5046_s1 + $0x170] ss:$8 sps:$4 sm:$0xff]   ;;  %v3480_v32 = vld [vmem:[%s5046_s1 + $0x184] ss:$8 sps:$4 sm:$0xff]  }
  0x10   : > { %1571 = vmatpush1.bf16.msra.mxu0 %v3449_v11  ;;  %527 = vmatprep.subr.bf16.mxu1 %v3450_v12  ;;  %v3479_v31 = vld [vmem:[%s5046_s1 + $0x470] ss:$8 sps:$4 sm:$0xff]   ;;  %v3482_v33 = vld [vmem:[%s5046_s1 + $0x484] ss:$8 sps:$4 sm:$0xff]   ;;  %v3484_v34 = vld [vmem:[%s5046_s1 + $0x180] ss:$8 sps:$4 sm:$0xff]  }
  0x11   : > { %1572 = vmatprep.subr.bf16.mxu0 %v3452_v13  ;;  %v3485_v35 = vld [vmem:[%s5046_s1 + $0x480] ss:$8 sps:$4 sm:$0xff]   ;;  %v3486_v36 = vld [vmem:[%s5046_s1 + $0x194] ss:$8 sps:$4 sm:$0xff]   ;;  %s5062_s13 = smov (!%p161_p3, %s2811_s13), 3  ;;  %v4056_v50 = vshrl.u32 %v346_v44, 7 }
  0x12   : > { %v3488_v37 = vld [vmem:[%s5046_s1 + $0x494] ss:$8 sps:$4 sm:$0xff]   ;;  %v3490_v38 = vld [vmem:[%s5046_s1 + $0x190] ss:$8 sps:$4 sm:$0xff]   ;;  %v3492_v40 = vld [vmem:[%s5046_s1 + $0x1a4] ss:$8 sps:$4 sm:$0xff]  }
  0x13   : > { %528 = vmatpush1.bf16.msra.mxu1 %v3454_v14  ;;  %v3491_v39 = vld [vmem:[%s5046_s1 + $0x490] ss:$8 sps:$4 sm:$0xff]   ;;  %s3422_s21 = smul.u32 48, %s5062_s13  ;;  %v3494_v41 = vld [vmem:[%s5046_s1 + $0x4a4] ss:$8 sps:$4 sm:$0xff]   ;;  %vm787_vm5 = vcmask 1040384  }
  0x14   : > { %1573 = vmatpush1.bf16.msra.mxu0 %v3455_v15  ;;  %529 = vmatprep.subr.bf16.mxu1 %v3456_v16  ;;  %v3877_v42 = vmov 1983009808   ;;  %vm245_vm0 = vsmask.f32 1280  ;;  %v3496_v45 = vld [vmem:[%s5046_s1 + $0x1a0] ss:$8 sps:$4 sm:$0xff]  }
  0x15   : > { %1574 = vmatprep.subr.bf16.mxu0 %v3458_v17  ;;  %v344_v43 = vunpack.c.l.s4 %v3877_v42  ;;  %v3497_v46 = vld [vmem:[%s5046_s1 + $0x4a0] ss:$8 sps:$4 sm:$0xff]   ;;  %vm246_vm1 = vsmask.f32 3336  ;;  %v3498_v47 = vld [vmem:[%s5046_s1 + $0x1b4] ss:$8 sps:$4 sm:$0xff]   ;;  %s4051_s5 = scalar_lea.vmem %s5045_s0, %s3422_s21 }
  0x16   : > { %vm248_vm2 = vsmask.f32 5392  ;;  %v3500_v48 = vld [vmem:[%s5046_s1 + $0x4b4] ss:$8 sps:$4 sm:$0xff]   ;;  %v3502_v51 = vld [vmem:[%s5046_s1 + $0x1b0] ss:$8 sps:$4 sm:$0xff]   ;;  %vm4075_vm4 = vmor %vm245_vm0, %vm246_vm1 }
  0x17   : > { %530 = vmatpush1.bf16.msra.mxu1 %v3460_v18  ;;  %v345_v49 = vunpack.c.0.s8 %v344_v43  ;;  %v3503_v52 = vld [vmem:[%s5046_s1 + $0x4b0] ss:$8 sps:$4 sm:$0xff]   ;;  %vm250_vm3 = vsmask.f32 7448  ;;  %v3504_v53 = vld [vmem:[%s5046_s1 + $0x1c4] ss:$8 sps:$4 sm:$0xff]   ;;  %vm4113_vm7 = vmor %vm4075_vm4, %vm248_vm2 }
  0x18   : > { %1575 = vmatpush1.bf16.msra.mxu0 %v3461_v19  ;;  %531 = vmatprep.subr.bf16.mxu1 %v3462_v20  ;;  %v3506_v54 = vld [vmem:[%s5046_s1 + $0x4c4] ss:$8 sps:$4 sm:$0xff]   ;;  %vm788_vm6 = vcmask 1042434   ;;  %v3508_v2 = vld [vmem:[%s5046_s1 + $0x1c0] ss:$8 sps:$4 sm:$0xff]   ;;  %vm790_vm8 = vcmask 1044484   ;;  %vm4139_vm9 = vmor %vm4113_vm7, %vm250_vm3 }
  0x19   : > { %1576 = vmatprep.subr.bf16.mxu0 %v3464_v21  ;;  %v4071_v55 = vld.sshfl [vmem:[%s4051_s5] sm:$0x5f pattern:$0x76325410]  ;;  %v4098_v1 = vsub.s32 %v345_v49, %v4056_v50  ;;  %v3510_v14 = vld [vmem:[%s5046_s1 + $0x1d4] ss:$8 sps:$4 sm:$0xff]   ;;  %vm4179_vm11 = vmor %vm787_vm5, %vm788_vm6 }
  0x1a   : > { %v4080_v57 = vld.sshfl [vmem:[%s4051_s5 + $0x8] sm:$0x5f pattern:$0x76325410]  ;;  %v4084_v58 = vcombine.high %v4071_v55, %v4071_v55  ;;  %v253_v59 = vshrl.u32 %v4071_v55, 16  ;;  %v256_v60 = vshll.u32 %v4071_v55, 16  ;;  %vm4207_vm12 = vmor %vm4179_vm11, %vm790_vm8 }
  0x1b   : > { %532 = vmatpush1.bf16.msra.mxu1 %v3466_v22  ;;  %v4089_v61 = vld.sshfl [vmem:[%s4051_s5 + $0x10] sm:$0x5f pattern:$0x76325410]  ;;  %v4093_v62 = vcombine.high %v4080_v57, %v4080_v57  ;;  %v267_v63 = vshrl.u32 %v4080_v57, 16  ;;  %v270_v0 = vshll.u32 %v4080_v57, 16  ;;  %v564_v8 = vcombine.low %v4071_v55, %v4080_v57 }
  0x1c   : > { %1577 = vmatpush1.bf16.msra.mxu0 %v3467_v23  ;;  %533 = vmatprep.subr.bf16.mxu1 %v3468_v24  ;;  %v4104_v3 = vld.sshfl [vmem:[%s4051_s5 + $0x18] sm:$0x5f pattern:$0x76325410]  ;;  %v4108_v4 = vcombine.high %v4089_v61, %v4089_v61  ;;  %v255_v6 = vrot.slane %v253_v59, 6  ;;  %v258_v7 = vrot.slane %v256_v60, 7 }
  0x1d   : > { %1578 = vmatprep.subr.bf16.mxu0 %v3470_v25  ;;  %v3509_v9 = vld [vmem:[%s5046_s1 + $0x4c0] ss:$8 sps:$4 sm:$0xff]   ;;  %v4124_v10 = vcombine.high %v4104_v3, %v4104_v3  ;;  %v262_v11 = vshll.u32 %v4084_v58, 16  ;;  %v269_v12 = vrot.slane %v267_v63, 6  ;;  %v272_v13 = vrot.slane %v270_v0, 7  ;;  %s3389_s10 = sshll.u32 %s5062_s13, 4 }
  0x1e   : > { %v259_v15 = vor.u32 %v258_v7, %v255_v6  ;;  %v276_v16 = vshll.u32 %v4093_v62, 16  ;;  %v281_v17 = vshrl.u32 %v4089_v61, 16  ;;  %v284_v18 = vshll.u32 %v4089_v61, 16  ;;  %v3512_v19 = vld [vmem:[%s5046_s1 + $0x4d4] ss:$8 sps:$4 sm:$0xff]   ;;  %s170_s15 = scalar_lea.vmem %s5048_s3, %s3389_s10 }
  0x1f   : > { %534 = vmatpush1.bf16.msra.mxu1 %v3472_v26  ;;  %v264_v21 = vrot.slane %v262_v11, 7  ;;  %v273_v22 = vor.u32 %v272_v13, %v269_v12  ;;  %v290_v23 = vshll.u32 %v4108_v4, 16  ;;  %v295_v24 = vshrl.u32 %v4104_v3, 16  ;;  %v3514_v25 = vld [vmem:[%s5046_s1 + $0x1d0] ss:$8 sps:$4 sm:$0xff]  }
  0x20   : > { %1579 = vmatpush1.bf16.msra.mxu0 %v3473_v27  ;;  %535 = vmatprep.subr.bf16.mxu1 %v3474_v28  ;;  %vm792_vm10 = vcmask 1046534   ;;  %v3515_v26 = vld [vmem:[%s5046_s1 + $0x4d0] ss:$8 sps:$4 sm:$0xff]   ;;  %v260_v27 = vrot.slane %v259_v15, 2  ;;  %v278_v28 = vrot.slane %v276_v16, 7  ;;  %v2919_v20 = vrot.slane %v4071_v55, 9 }
  0x21   : > { %1580 = vmatprep.subr.bf16.mxu0 %v3476_v29  ;;  %v283_v29 = vrot.slane %v281_v17, 6  ;;  %v4169_v44 = vld.sshfl [vmem:[%s4051_s5 + $0x28] sm:$0x5f pattern:$0x76325410]  ;;  %vm4237_vm13 = vmor %vm4207_vm12, %vm792_vm10 }
  0x22   : > { %v4192_v63 = vcombine.high %v4169_v44, %v4169_v44  ;;  %v3522_v0 = vld [vmem:[%s5046_s1 + $0x1f4] ss:$8 sps:$4 sm:$0xff]   ;;  %v2139_v6 = vshrl.u32 %v4169_v44, 16  ;;  %v2142_v13 = vshll.u32 %v4169_v44, 16 }
  0x23   : > { %536 = vmatpush1.bf16.msra.mxu1 %v3478_v30  ;;  %v286_v30 = vrot.slane %v284_v18, 7  ;;  %v3524_v7 = vld [vmem:[%s5046_s1 + $0x4f4] ss:$8 sps:$4 sm:$0xff]   ;;  %v4216_v18 = vrot.slane %v564_v8, %v4098_v1  ;;  %v3527_v8 = vld [vmem:[%s5046_s1 + $0x4f0] ss:$8 sps:$4 sm:$0xff]  }
  0x24   : > { %1581 = vmatpush1.bf16.msra.mxu0 %v3479_v31  ;;  %537 = vmatprep.subr.bf16.mxu1 %v3480_v32  ;;  %v3516_v31 = vld [vmem:[%s5046_s1 + $0x1e4] ss:$8 sps:$4 sm:$0xff]   ;;  %v2141_v16 = vrot.slane %v2139_v6, 6  ;;  %v2148_v17 = vshll.u32 %v4192_v63, 16  ;;  %v3539_v55 = vld [vmem:[%s5046_s1 + $0x514] ss:$8 sps:$4 sm:$0xff]  }
  0x25   : > { %1582 = vmatprep.subr.bf16.mxu0 %v3482_v33  ;;  %v3518_v32 = vld [vmem:[%s5046_s1 + $0x4e4] ss:$8 sps:$4 sm:$0xff]   ;;  %v274_v33 = vrot.slane %v273_v22, 2 }
  0x27   : > { %538 = vmatpush1.bf16.msra.mxu1 %v3484_v34  ;;  %v292_v34 = vrot.slane %v290_v23, 7  ;;  %v279_v42 = vsel %vm4139_vm9, %v274_v33, %v278_v28  ;;  %v2144_v23 = vrot.slane %v2142_v13, 7 }
  0x28   : > { %1583 = vmatpush1.bf16.msra.mxu0 %v3485_v35  ;;  %539 = vmatprep.subr.bf16.mxu1 %v3486_v36  ;;  %v297_v35 = vrot.slane %v295_v24, 6  ;;  %v298_v36 = vshll.u32 %v4104_v3, 16 }
  0x29   : > { %1584 = vmatprep.subr.bf16.mxu0 %v3488_v37  ;;  %v265_v37 = vsel %vm4139_vm9, %v260_v27, %v264_v21 }
  0x2a   : > { %v300_v43 = vrot.slane %v298_v36, 7  ;;  %v341_v49 = vcombine.low %v265_v37, %v279_v42 }
  0x2b   : > { %540 = vmatpush1.bf16.msra.mxu1 %v3490_v38  ;;  %v287_v38 = vor.u32 %v286_v30, %v283_v29  ;;  %v2150_v29 = vrot.slane %v2148_v17, 7  ;;  %v3815_v30 = vld [vmem:[%s5046_s1 + $0x7f4] ss:$8 sps:$4 sm:$0xff]  }
  0x2c   : > { %1585 = vmatpush1.bf16.msra.mxu0 %v3491_v39  ;;  %541 = vmatprep.subr.bf16.mxu1 %v3492_v40  ;;  %v304_v39 = vshll.u32 %v4124_v10, 16  ;;  %v4162_v40 = vld.sshfl [vmem:[%s4051_s5 + $0x20] sm:$0x5f pattern:$0x76325410]  ;;  %v301_v56 = vor.u32 %v300_v43, %v297_v35  ;;  %v349_v22 = vrot.slane %v341_v49, %v4098_v1  ;;  %v800_v35 = vrot.slane %v4093_v62, 7 }
  0x2d   : > { %1586 = vmatprep.subr.bf16.mxu0 %v3494_v41  ;;  %v565_v41 = vcombine.low %v4089_v61, %v4104_v3 }
  0x2f   : > { %542 = vmatpush1.bf16.msra.mxu1 %v3496_v45  ;;  %v4173_v45 = vcombine.high %v4162_v40, %v4162_v40  ;;  %v4225_v24 = vrot.slane %v565_v41, %v4098_v1 }
  0x30   : > { %1587 = vmatpush1.bf16.msra.mxu0 %v3497_v46  ;;  %543 = vmatprep.subr.bf16.mxu1 %v3498_v47  ;;  %v1340_v46 = vshrl.u32 %v4162_v40, 16  ;;  %v288_v47 = vrot.slane %v287_v38, 2  ;;  %v2921_v38 = vrot.slane %v4089_v61, 9 }
  0x31   : > { %1588 = vmatprep.subr.bf16.mxu0 %v3500_v48  ;;  %v306_v48 = vrot.slane %v304_v39, 7  ;;  %v1349_v60 = vshll.u32 %v4173_v45, 16  ;;  %v581_v33 = vcombine.high %v4216_v18, %v4225_v24  ;;  %v804_v39 = vrot.slane %v4108_v4, 7 }
  0x32   : > { %v1342_v59 = vrot.slane %v1340_v46, 6  ;;  %v3528_v46 = vld [vmem:[%s5046_s1] ss:$8 sps:$4 sm:$0xff]  }
  0x33   : > { %544 = vmatpush1.bf16.msra.mxu1 %v3502_v51  ;;  %v1343_v51 = vshll.u32 %v4162_v40, 16  ;;  %v1351_v11 = vrot.slane %v1349_v60, 7  ;;  %v4268_v4 = vsel %vm4237_vm13, %v2921_v38, %v804_v39  ;;  %v3531_v60 = vld [vmem:[%s5046_s1 + $0x500] ss:$8 sps:$4 sm:$0xff]   ;;  %v3570_v39 = vld [vmem:[%s5046_s1 + $0x70] ss:$8 sps:$4 sm:$0xff]  }
  0x34   : > { %1589 = vmatpush1.bf16.msra.mxu0 %v3503_v52  ;;  %545 = vmatprep.subr.bf16.mxu1 %v3504_v53  ;;  %v3520_v53 = vld [vmem:[%s5046_s1 + $0x1e0] ss:$8 sps:$4 sm:$0xff]   ;;  %v808_v52 = vrot.slane %v4124_v10, 7 }
  0x35   : > { %1590 = vmatprep.subr.bf16.mxu0 %v3506_v54  ;;  %v3521_v54 = vld [vmem:[%s5046_s1 + $0x4e0] ss:$8 sps:$4 sm:$0xff]   ;;  %v1345_v5 = vrot.slane %v1343_v51, 7  ;;  %v3536_v51 = vld [vmem:[%s5046_s1 + $0x14] ss:$8 sps:$4 sm:$0xff]  }
  0x36   : > { %v3567_v38 = vld [vmem:[%s5046_s1 + $0x560] ss:$8 sps:$4 sm:$0xff]  }
  0x37   : > { %546 = vmatpush1.bf16.msra.mxu1 %v3508_v2  ;;  %v293_v2 = vsel %vm4139_vm9, %v288_v47, %v292_v34  ;;  %v1346_v15 = vor.u32 %v1345_v5, %v1342_v59  ;;  %v2920_v34 = vrot.slane %v4080_v57, 9  ;;  %v580_v57 = vcombine.low %v4216_v18, %v4225_v24  ;;  %v3633_v18 = vld [vmem:[%s5046_s1 + $0x610] ss:$8 sps:$4 sm:$0xff]  }
  0x38   : > { %1591 = vmatpush1.bf16.msra.mxu0 %v3509_v9  ;;  %547 = vmatprep.subr.bf16.mxu1 %v3510_v14  ;;  %v302_v9 = vrot.slane %v301_v56, 2  ;;  %v1386_v12 = vcombine.low %v279_v42, %v293_v2  ;;  %v2922_v47 = vrot.slane %v4104_v3, 9  ;;  %v1615_v3 = vrot.slane %v4173_v45, 7  ;;  %v3534_v45 = vld [vmem:[%s5046_s1 + $0x10] ss:$8 sps:$4 sm:$0xff]  }
  0x39   : > { %1592 = vmatprep.subr.bf16.mxu0 %v3512_v19  ;;  %v3526_v19 = vld [vmem:[%s5046_s1 + $0x1f0] ss:$8 sps:$4 sm:$0xff]   ;;  %v1347_v27 = vrot.slane %v1346_v15, 2  ;;  %v4257_v43 = vsel %vm4237_vm13, %v2920_v34, %v800_v35  ;;  %v3540_v15 = vld [vmem:[%s5046_s1 + $0x20] ss:$8 sps:$4 sm:$0xff]  }
  0x3a   : > { %v307_v21 = vsel %vm4139_vm9, %v302_v9, %v306_v48  ;;  %v1394_v28 = vrot.slane %v1386_v12, %v4098_v1  ;;  %v1650_v56 = vcombine.low %v4257_v43, %v4268_v4  ;;  %v4290_v10 = vsel %vm4237_vm13, %v2922_v47, %v808_v52  ;;  %v3537_v12 = vld [vmem:[%s5046_s1 + $0x510] ss:$8 sps:$4 sm:$0xff]   ;;  %v3564_v34 = vld [vmem:[%s5046_s1 + $0x60] ss:$8 sps:$4 sm:$0xff]   ;;  %v3569_v35 = vld [vmem:[%s5046_s1 + $0x564] ss:$8 sps:$4 sm:$0xff]  }
  0x3b   : > { %548 = vmatpush1.bf16.msra.mxu1 %v3514_v25  ;;  %v342_v25 = vcombine.low %v293_v2, %v307_v21  ;;  %v1352_v37 = vsel %vm4139_vm9, %v1347_v27, %v1351_v11  ;;  %v796_v2 = vrot.slane %v4084_v58, 7  ;;  %v3542_v58 = vld [vmem:[%s5046_s1 + $0x24] ss:$8 sps:$4 sm:$0xff]   ;;  %v1918_v11 = vcombine.low %v4162_v40, %v4169_v44  ;;  %v3548_v44 = vld [vmem:[%s5046_s1 + $0x34] ss:$8 sps:$4 sm:$0xff]  }
  0x3c   : > { %1593 = vmatpush1.bf16.msra.mxu0 %v3515_v26  ;;  %549 = vmatprep.subr.bf16.mxu1 %v3516_v31  ;;  %v3530_v26 = vld [vmem:[%s5046_s1 + $0x4] ss:$8 sps:$4 sm:$0xff]   ;;  %v2145_v31 = vor.u32 %v2144_v23, %v2141_v16  ;;  %v1387_v41 = vcombine.low %v307_v21, %v1352_v37  ;;  %v4304_v6 = vrot.slane %v1650_v56, %v4098_v1  ;;  %v3546_v21 = vld [vmem:[%s5046_s1 + $0x30] ss:$8 sps:$4 sm:$0xff]   ;;  %v3560_v27 = vld [vmem:[%s5046_s1 + $0x54] ss:$8 sps:$4 sm:$0xff]  }
  0x3d   : > { %1594 = vmatprep.subr.bf16.mxu0 %v3518_v32  ;;  %v3533_v32 = vld [vmem:[%s5046_s1 + $0x504] ss:$8 sps:$4 sm:$0xff]   ;;  %v4249_v36 = vrot.slane %v342_v25, %v4098_v1  ;;  %v4313_v9 = vsel %vm4237_vm13, %v2919_v20, %v796_v2  ;;  %v4324_v14 = vrot.slane %v1918_v11, %v4098_v1  ;;  %v3552_v25 = vld [vmem:[%s5046_s1 + $0x40] ss:$8 sps:$4 sm:$0xff]   ;;  %v3584_v47 = vld [vmem:[%s5046_s1 + $0x94] ss:$8 sps:$4 sm:$0xff]  }
  0x3e   : > { %v2146_v42 = vrot.slane %v2145_v31, 2  ;;  %v1401_v48 = vrot.slane %v1387_v41, %v4098_v1  ;;  %v3554_v23 = vld [vmem:[%s5046_s1 + $0x44] ss:$8 sps:$4 sm:$0xff]   ;;  %v3563_v31 = vld [vmem:[%s5046_s1 + $0x554] ss:$8 sps:$4 sm:$0xff]  }
  0x3f   : > { %550 = vmatpush1.bf16.msra.mxu1 %v3520_v53  ;;  %v358_v62 = vcombine.high %v349_v22, %v4249_v36  ;;  %v357_v61 = vcombine.low %v349_v22, %v4249_v36  ;;  %v3116_v53 = vrot.slane %v4162_v40, 9  ;;  %v3545_v40 = vld [vmem:[%s5046_s1 + $0x524] ss:$8 sps:$4 sm:$0xff]   ;;  %v1926_v17 = vcombine.low %v4225_v24, %v4324_v14  ;;  %v3551_v22 = vld [vmem:[%s5046_s1 + $0x534] ss:$8 sps:$4 sm:$0xff]  }
  0x40   : > { %1595 = vmatpush1.bf16.msra.mxu0 %v3521_v54  ;;  %551 = vmatprep.subr.bf16.mxu1 %v3522_v0  ;;  %v2151_v49 = vsel %vm4139_vm9, %v2146_v42, %v2150_v29  ;;  %v1403_v59 = vcombine.high %v1394_v28, %v1401_v48  ;;  %v1402_v0 = vcombine.low %v1394_v28, %v1401_v48  ;;  %v3555_v28 = vld [vmem:[%s5046_s1 + $0x540] ss:$8 sps:$4 sm:$0xff]   ;;  %v3558_v29 = vld [vmem:[%s5046_s1 + $0x50] ss:$8 sps:$4 sm:$0xff]   ;;  %v3575_v41 = vld [vmem:[%s5046_s1 + $0x574] ss:$8 sps:$4 sm:$0xff]  }
  0x41   : > { %1596 = vmatprep.subr.bf16.mxu0 %v3524_v7  ;;  %553 = vmatprep.mubr.bf16.mxu1 %v358_v62  ;;  %v4279_v54 = vcombine.low %v1352_v37, %v2151_v49  ;;  %v4301_v5 = vsel %vm4237_vm13, %v3116_v53, %v1615_v3  ;;  %v3572_v37 = vld [vmem:[%s5046_s1 + $0x74] ss:$8 sps:$4 sm:$0xff]   ;;  %v3578_v42 = vld [vmem:[%s5046_s1 + $0x84] ss:$8 sps:$4 sm:$0xff]   ;;  %v3573_v62 = vld [vmem:[%s5046_s1 + $0x570] ss:$8 sps:$4 sm:$0xff]  }
  0x42   : > { %1598 = vmatprep.mubr.bf16.mxu0 %v1403_v59  ;;  %v1651_v7 = vcombine.low %v4290_v10, %v4301_v5  ;;  %v3579_v48 = vld [vmem:[%s5046_s1 + $0x580] ss:$8 sps:$4 sm:$0xff]   ;;  %v3582_v49 = vld [vmem:[%s5046_s1 + $0x90] ss:$8 sps:$4 sm:$0xff]   ;;  %v3590_v52 = vld [vmem:[%s5046_s1 + $0xa4] ss:$8 sps:$4 sm:$0xff]  }
  0x43   : > { %552 = vmatpush1.bf16.msra.mxu1 %v3526_v19  ;;  %v3543_v19 = vld [vmem:[%s5046_s1 + $0x520] ss:$8 sps:$4 sm:$0xff]   ;;  %v3585_v53 = vld [vmem:[%s5046_s1 + $0x590] ss:$8 sps:$4 sm:$0xff]   ;;  %v3593_v56 = vld [vmem:[%s5046_s1 + $0x5a4] ss:$8 sps:$4 sm:$0xff]  }
  0x44   : > { %1597 = vmatpush1.bf16.msra.mxu0 %v3527_v8  ;;  %744 = vmatprep.subr.bf16.mxu1 %v3530_v26  ;;  %v4321_v13 = vrot.slane %v1651_v7, %v4098_v1  ;;  %v3549_v8 = vld [vmem:[%s5046_s1 + $0x530] ss:$8 sps:$4 sm:$0xff]   ;;  %v3557_v26 = vld [vmem:[%s5046_s1 + $0x544] ss:$8 sps:$4 sm:$0xff]   ;;  %v3588_v3 = vld [vmem:[%s5046_s1 + $0xa0] ss:$8 sps:$4 sm:$0xff]  }
  0x45   : > { %1830 = vmatprep.subr.bf16.mxu0 %v3533_v32  ;;  %v3566_v32 = vld [vmem:[%s5046_s1 + $0x64] ss:$8 sps:$4 sm:$0xff]   ;;  %v3596_v20 = vld [vmem:[%s5046_s1 + $0xb4] ss:$8 sps:$4 sm:$0xff]   ;;  %v3591_v59 = vld [vmem:[%s5046_s1 + $0x5a0] ss:$8 sps:$4 sm:$0xff]  }
  0x46   : > { %554 = vmatmul.mubr.bf16.vlgmr.msra.gmra.mrb[0].mxu1 %v357_v61  ;;  %v1667_v16 = vcombine.high %v4304_v6, %v4321_v13  ;;  %v3581_v61 = vld [vmem:[%s5046_s1 + $0x584] ss:$8 sps:$4 sm:$0xff]   ;;  %v3608_v7 = vld [vmem:[%s5046_s1 + $0xd4] ss:$8 sps:$4 sm:$0xff]   ;;  %v3603_v11 = vld [vmem:[%s5046_s1 + $0x5c0] ss:$8 sps:$4 sm:$0xff]  }
  0x47   : > { %745 = vmatpush1.bf16.msra.mxu1 %v3528_v46  ;;  %776 = vmatprep.mubr.bf16.mxu1 %v581_v33  ;;  %v3561_v33 = vld [vmem:[%s5046_s1 + $0x550] ss:$8 sps:$4 sm:$0xff]   ;;  %v3576_v46 = vld [vmem:[%s5046_s1 + $0x80] ss:$8 sps:$4 sm:$0xff]   ;;  %v3602_v2 = vld [vmem:[%s5046_s1 + $0xc4] ss:$8 sps:$4 sm:$0xff]  }
  0x48   : > { %746 = vmatprep.subr.bf16.mxu1 %v3536_v51  ;;  %1599 = vmatmul.mubr.bf16.vlgmr.msra.gmra.mrb[0].mxu0 %v1402_v0  ;;  %v3587_v51 = vld [vmem:[%s5046_s1 + $0x594] ss:$8 sps:$4 sm:$0xff]  }
  0x49   : > { %1831 = vmatpush1.bf16.msra.mxu0 %v3531_v60  ;;  %1862 = vmatprep.mubr.bf16.mxu0 %v1667_v16  ;;  %v3594_v60 = vld [vmem:[%s5046_s1 + $0xb0] ss:$8 sps:$4 sm:$0xff]   ;;  %v3599_v0 = vld [vmem:[%s5046_s1 + $0x5b4] ss:$8 sps:$4 sm:$0xff]   ;;  %v3612_v16 = vld [vmem:[%s5046_s1 + $0xe0] ss:$8 sps:$4 sm:$0xff]  }
  0x4a   : > { %1832 = vmatprep.subr.bf16.mxu0 %v3539_v55  ;;  %v3600_v55 = vld [vmem:[%s5046_s1 + $0xc0] ss:$8 sps:$4 sm:$0xff]  }
  0x4b   : > { %747 = vmatpush1.bf16.msra.mxu1 %v3534_v45  ;;  %v3597_v45 = vld [vmem:[%s5046_s1 + $0x5b0] ss:$8 sps:$4 sm:$0xff]  }
  0x4c   : > { %748 = vmatprep.subr.bf16.mxu1 %v3542_v58  ;;  %v3605_v58 = vld [vmem:[%s5046_s1 + $0x5c4] ss:$8 sps:$4 sm:$0xff]  }
  0x4d   : > { %1833 = vmatpush1.bf16.msra.mxu0 %v3537_v12  ;;  %v3606_v12 = vld [vmem:[%s5046_s1 + $0xd0] ss:$8 sps:$4 sm:$0xff]  }
  0x4e   : > { %1834 = vmatprep.subr.bf16.mxu0 %v3545_v40  ;;  %v3614_v40 = vld [vmem:[%s5046_s1 + $0xe4] ss:$8 sps:$4 sm:$0xff]  }
  0x4f   : > { %749 = vmatpush1.bf16.msra.mxu1 %v3540_v15  ;;  %v3611_v15 = vld [vmem:[%s5046_s1 + $0x5d4] ss:$8 sps:$4 sm:$0xff]  }
  0x50   : > { %750 = vmatprep.subr.bf16.mxu1 %v3548_v44  ;;  %v3609_v44 = vld [vmem:[%s5046_s1 + $0x5d0] ss:$8 sps:$4 sm:$0xff]  }
  0x51   : > { %1835 = vmatpush1.bf16.msra.mxu0 %v3543_v19  ;;  %v3617_v19 = vld [vmem:[%s5046_s1 + $0x5e4] ss:$8 sps:$4 sm:$0xff]  }
  0x52   : > { %1836 = vmatprep.subr.bf16.mxu0 %v3551_v22  ;;  %v844_v22 = vcombine.low %v4268_v4, %v4290_v10 }
  0x53   : > { %751 = vmatpush1.bf16.msra.mxu1 %v3546_v21  ;;  %v3620_v21 = vld [vmem:[%s5046_s1 + $0xf4] ss:$8 sps:$4 sm:$0xff]  }
  0x54   : > { %752 = vmatprep.subr.bf16.mxu1 %v3554_v23  ;;  %v843_v23 = vcombine.low %v4313_v9, %v4257_v43  ;;  %v3626_v43 = vld [vmem:[%s5046_s1 + $0x204] ss:$8 sps:$4 sm:$0xff]   ;;  %v4503_v10 = vrot.slane %v844_v22, %v4098_v1  ;;  %v3621_v9 = vld [vmem:[%s5046_s1 + $0x5f0] ss:$8 sps:$4 sm:$0xff]   ;;  %v3692_v22 = vld [vmem:[%s5046_s1 + $0x2b4] ss:$8 sps:$4 sm:$0xff]  }
  0x55   : > { %1837 = vmatpush1.bf16.msra.mxu0 %v3549_v8  ;;  %v3615_v8 = vld [vmem:[%s5046_s1 + $0x5e0] ss:$8 sps:$4 sm:$0xff]  }
  0x56   : > { %1838 = vmatprep.subr.bf16.mxu0 %v3557_v26  ;;  %v3623_v26 = vld [vmem:[%s5046_s1 + $0x5f4] ss:$8 sps:$4 sm:$0xff]   ;;  %v4500_v4 = vrot.slane %v843_v23, %v4098_v1  ;;  %v3687_v23 = vld [vmem:[%s5046_s1 + $0x6a0] ss:$8 sps:$4 sm:$0xff]  }
  0x57   : > { %753 = vmatpush1.bf16.msra.mxu1 %v3552_v25  ;;  %v3618_v25 = vld [vmem:[%s5046_s1 + $0xf0] ss:$8 sps:$4 sm:$0xff]  }
  0x58   : > { %754 = vmatprep.subr.bf16.mxu1 %v3560_v27  ;;  %v3624_v27 = vld [vmem:[%s5046_s1 + $0x200] ss:$8 sps:$4 sm:$0xff]  }
  0x59   : > { %1839 = vmatpush1.bf16.msra.mxu0 %v3555_v28  ;;  %v3629_v28 = vld [vmem:[%s5046_s1 + $0x604] ss:$8 sps:$4 sm:$0xff]  }
  0x5a   : > { %1840 = vmatprep.subr.bf16.mxu0 %v3563_v31  ;;  %v860_v31 = vcombine.high %v4500_v4, %v4503_v10 }
  0x5b   : > { %755 = vmatpush1.bf16.msra.mxu1 %v3558_v29  ;;  %v3632_v29 = vld [vmem:[%s5046_s1 + $0x214] ss:$8 sps:$4 sm:$0xff]  }
  0x5c   : > { %756 = vmatprep.subr.bf16.mxu1 %v3566_v32  ;;  %v1666_v32 = vcombine.low %v4304_v6, %v4321_v13  ;;  %v3635_v6 = vld [vmem:[%s5046_s1 + $0x614] ss:$8 sps:$4 sm:$0xff]   ;;  %v3638_v13 = vld [vmem:[%s5046_s1 + $0x224] ss:$8 sps:$4 sm:$0xff]  }
  0x5d   : > { %1841 = vmatpush1.bf16.msra.mxu0 %v3561_v33  ;;  %v3627_v33 = vld [vmem:[%s5046_s1 + $0x600] ss:$8 sps:$4 sm:$0xff]  }
  0x5e   : > { %1842 = vmatprep.subr.bf16.mxu0 %v3569_v35  ;;  %v3630_v35 = vld [vmem:[%s5046_s1 + $0x210] ss:$8 sps:$4 sm:$0xff]  }
  0x5f   : > { %757 = vmatpush1.bf16.msra.mxu1 %v3564_v34  ;;  %v1927_v34 = vcombine.high %v4225_v24, %v4324_v14  ;;  %v3740_v24 = vld [vmem:[%s5046_s1 + $0x334] ss:$8 sps:$4 sm:$0xff]   ;;  %v3735_v14 = vld [vmem:[%s5046_s1 + $0x720] ss:$8 sps:$4 sm:$0xff]  }
  0x60   : > { %758 = vmatprep.subr.bf16.mxu1 %v3572_v37  ;;  %v3641_v37 = vld [vmem:[%s5046_s1 + $0x624] ss:$8 sps:$4 sm:$0xff]  }
  0x61   : > { %1843 = vmatpush1.bf16.msra.mxu0 %v3567_v38  ;;  %v3644_v38 = vld [vmem:[%s5046_s1 + $0x234] ss:$8 sps:$4 sm:$0xff]  }
  0x62   : > { %1844 = vmatprep.subr.bf16.mxu0 %v3575_v41  ;;  %v3642_v41 = vld [vmem:[%s5046_s1 + $0x230] ss:$8 sps:$4 sm:$0xff]  }
  0x63   : > { %759 = vmatpush1.bf16.msra.mxu1 %v3570_v39  ;;  %v3639_v39 = vld [vmem:[%s5046_s1 + $0x620] ss:$8 sps:$4 sm:$0xff]  }
  0x64   : > { %760 = vmatprep.subr.bf16.mxu1 %v3578_v42  ;;  %v3647_v42 = vld [vmem:[%s5046_s1 + $0x634] ss:$8 sps:$4 sm:$0xff]  }
  0x65   : > { %1845 = vmatpush1.bf16.msra.mxu0 %v3573_v62  ;;  %v3650_v62 = vld [vmem:[%s5046_s1 + $0x244] ss:$8 sps:$4 sm:$0xff]  }
  0x66   : > { %1846 = vmatprep.subr.bf16.mxu0 %v3581_v61  ;;  %v3648_v61 = vld [vmem:[%s5046_s1 + $0x240] ss:$8 sps:$4 sm:$0xff]  }
  0x67   : > { %761 = vmatpush1.bf16.msra.mxu1 %v3576_v46  ;;  %v3645_v46 = vld [vmem:[%s5046_s1 + $0x630] ss:$8 sps:$4 sm:$0xff]  }
  0x68   : > { %762 = vmatprep.subr.bf16.mxu1 %v3584_v47  ;;  %v3653_v47 = vld [vmem:[%s5046_s1 + $0x644] ss:$8 sps:$4 sm:$0xff]  }
  0x69   : > { %1847 = vmatpush1.bf16.msra.mxu0 %v3579_v48  ;;  %v3656_v48 = vld [vmem:[%s5046_s1 + $0x254] ss:$8 sps:$4 sm:$0xff]  }
  0x6a   : > { %1848 = vmatprep.subr.bf16.mxu0 %v3587_v51  ;;  %v3654_v51 = vld [vmem:[%s5046_s1 + $0x250] ss:$8 sps:$4 sm:$0xff]  }
  0x6b   : > { %763 = vmatpush1.bf16.msra.mxu1 %v3582_v49  ;;  %v3651_v49 = vld [vmem:[%s5046_s1 + $0x640] ss:$8 sps:$4 sm:$0xff]  }
  0x6c   : > { %764 = vmatprep.subr.bf16.mxu1 %v3590_v52  ;;  %v3659_v52 = vld [vmem:[%s5046_s1 + $0x654] ss:$8 sps:$4 sm:$0xff]  }
  0x6d   : > { %1849 = vmatpush1.bf16.msra.mxu0 %v3585_v53  ;;  %v3662_v53 = vld [vmem:[%s5046_s1 + $0x264] ss:$8 sps:$4 sm:$0xff]  }
  0x6e   : > { %1850 = vmatprep.subr.bf16.mxu0 %v3593_v56  ;;  %v3660_v56 = vld [vmem:[%s5046_s1 + $0x260] ss:$8 sps:$4 sm:$0xff]  }
  0x6f   : > { %765 = vmatpush1.bf16.msra.mxu1 %v3588_v3  ;;  %v3657_v3 = vld [vmem:[%s5046_s1 + $0x650] ss:$8 sps:$4 sm:$0xff]  }
  0x70   : > { %766 = vmatprep.subr.bf16.mxu1 %v3596_v20  ;;  %v3665_v20 = vld [vmem:[%s5046_s1 + $0x664] ss:$8 sps:$4 sm:$0xff]  }
  0x71   : > { %1851 = vmatpush1.bf16.msra.mxu0 %v3591_v59  ;;  %v3668_v59 = vld [vmem:[%s5046_s1 + $0x274] ss:$8 sps:$4 sm:$0xff]  }
  0x72   : > { %1852 = vmatprep.subr.bf16.mxu0 %v3599_v0  ;;  %v3666_v0 = vld [vmem:[%s5046_s1 + $0x270] ss:$8 sps:$4 sm:$0xff]  }
  0x73   : > { %767 = vmatpush1.bf16.msra.mxu1 %v3594_v60  ;;  %v3663_v60 = vld [vmem:[%s5046_s1 + $0x660] ss:$8 sps:$4 sm:$0xff]  }
  0x74   : > { %768 = vmatprep.subr.bf16.mxu1 %v3602_v2  ;;  %v3671_v2 = vld [vmem:[%s5046_s1 + $0x674] ss:$8 sps:$4 sm:$0xff]  }
  0x75   : > { %1853 = vmatpush1.bf16.msra.mxu0 %v3597_v45  ;;  %v3674_v45 = vld [vmem:[%s5046_s1 + $0x284] ss:$8 sps:$4 sm:$0xff]  }
  0x76   : > { %1854 = vmatprep.subr.bf16.mxu0 %v3605_v58  ;;  %v3672_v58 = vld [vmem:[%s5046_s1 + $0x280] ss:$8 sps:$4 sm:$0xff]  }
  0x77   : > { %769 = vmatpush1.bf16.msra.mxu1 %v3600_v55  ;;  %v3669_v55 = vld [vmem:[%s5046_s1 + $0x670] ss:$8 sps:$4 sm:$0xff]  }
  0x78   : > { %770 = vmatprep.subr.bf16.mxu1 %v3608_v7  ;;  %v3677_v7 = vld [vmem:[%s5046_s1 + $0x684] ss:$8 sps:$4 sm:$0xff]  }
  0x79   : > { %1855 = vmatpush1.bf16.msra.mxu0 %v3603_v11  ;;  %v3680_v11 = vld [vmem:[%s5046_s1 + $0x294] ss:$8 sps:$4 sm:$0xff]  }
  0x7a   : > { %1856 = vmatprep.subr.bf16.mxu0 %v3611_v15  ;;  %v3678_v15 = vld [vmem:[%s5046_s1 + $0x290] ss:$8 sps:$4 sm:$0xff]  }
  0x7b   : > { %771 = vmatpush1.bf16.msra.mxu1 %v3606_v12  ;;  %v3675_v12 = vld [vmem:[%s5046_s1 + $0x680] ss:$8 sps:$4 sm:$0xff]  }
  0x7c   : > { %772 = vmatprep.subr.bf16.mxu1 %v3614_v40  ;;  %v3683_v40 = vld [vmem:[%s5046_s1 + $0x694] ss:$8 sps:$4 sm:$0xff]  }
  0x7d   : > { %1857 = vmatpush1.bf16.msra.mxu0 %v3609_v44  ;;  %v3686_v44 = vld [vmem:[%s5046_s1 + $0x2a4] ss:$8 sps:$4 sm:$0xff]  }
  0x7e   : > { %1858 = vmatprep.subr.bf16.mxu0 %v3617_v19  ;;  %v3684_v19 = vld [vmem:[%s5046_s1 + $0x2a0] ss:$8 sps:$4 sm:$0xff]  }
  0x7f   : > { %773 = vmatpush1.bf16.msra.mxu1 %v3612_v16  ;;  %v3681_v16 = vld [vmem:[%s5046_s1 + $0x690] ss:$8 sps:$4 sm:$0xff]  }
  0x80   : > { %774 = vmatprep.subr.bf16.mxu1 %v3620_v21  ;;  %v3689_v21 = vld [vmem:[%s5046_s1 + $0x6a4] ss:$8 sps:$4 sm:$0xff]  }
  0x81   : > { %1859 = vmatpush1.bf16.msra.mxu0 %v3615_v8  ;;  %v3690_v8 = vld [vmem:[%s5046_s1 + $0x2b0] ss:$8 sps:$4 sm:$0xff]  }
  0x82   : > { %1860 = vmatprep.subr.bf16.mxu0 %v3623_v26  ;;  %v3698_v26 = vld [vmem:[%s5046_s1 + $0x2c4] ss:$8 sps:$4 sm:$0xff]  }
  0x83   : > { %775 = vmatpush1.bf16.msra.mxu1 %v3618_v25  ;;  %v3695_v25 = vld [vmem:[%s5046_s1 + $0x6b4] ss:$8 sps:$4 sm:$0xff]  }
  0x84   : > { %1023 = vmatprep.subr.bf16.mxu1 %v3626_v43  ;;  %v3693_v43 = vld [vmem:[%s5046_s1 + $0x6b0] ss:$8 sps:$4 sm:$0xff]  }
  0x85   : > { %1861 = vmatpush1.bf16.msra.mxu0 %v3621_v9  ;;  %v3696_v9 = vld [vmem:[%s5046_s1 + $0x2c0] ss:$8 sps:$4 sm:$0xff]  }
  0x86   : > { %777 = vmatmul.mubr.bf16.vlgmr.msra.gmra.mrb[0].mxu1 %v580_v57  ;;  %2090 = vmatprep.subr.bf16.mxu0 %v3629_v28  ;;  %v3636_v57 = vld [vmem:[%s5046_s1 + $0x220] ss:$8 sps:$4 sm:$0xff]   ;;  %v3704_v28 = vld [vmem:[%s5046_s1 + $0x2d4] ss:$8 sps:$4 sm:$0xff]  }
  0x87   : > { %1024 = vmatpush1.bf16.msra.mxu1 %v3624_v27  ;;  %1055 = vmatprep.mubr.bf16.mxu1 %v860_v31  ;;  %v3701_v27 = vld [vmem:[%s5046_s1 + $0x6c4] ss:$8 sps:$4 sm:$0xff]   ;;  %v3702_v31 = vld [vmem:[%s5046_s1 + $0x2d0] ss:$8 sps:$4 sm:$0xff]  }
  0x88   : > { %1025 = vmatprep.subr.bf16.mxu1 %v3632_v29  ;;  %1863 = vmatmul.mubr.bf16.vlgmr.msra.gmra.mrb[0].mxu0 %v1666_v32  ;;  %v3699_v29 = vld [vmem:[%s5046_s1 + $0x6c0] ss:$8 sps:$4 sm:$0xff]   ;;  %v3707_v32 = vld [vmem:[%s5046_s1 + $0x6d4] ss:$8 sps:$4 sm:$0xff]  }
  0x89   : > { %2091 = vmatpush1.bf16.msra.mxu0 %v3627_v33  ;;  %2122 = vmatprep.mubr.bf16.mxu0 %v1927_v34  ;;  %v3710_v33 = vld [vmem:[%s5046_s1 + $0x2e4] ss:$8 sps:$4 sm:$0xff]   ;;  %v3705_v34 = vld [vmem:[%s5046_s1 + $0x6d0] ss:$8 sps:$4 sm:$0xff]  }
  0x8a   : > { %2092 = vmatprep.subr.bf16.mxu0 %v3635_v6  ;;  %v3713_v6 = vld [vmem:[%s5046_s1 + $0x6e4] ss:$8 sps:$4 sm:$0xff]  }
  0x8b   : > { %1026 = vmatpush1.bf16.msra.mxu1 %v3630_v35  ;;  %v3708_v35 = vld [vmem:[%s5046_s1 + $0x2e0] ss:$8 sps:$4 sm:$0xff]  }
  0x8c   : > { %1027 = vmatprep.subr.bf16.mxu1 %v3638_v13  ;;  %v3716_v13 = vld [vmem:[%s5046_s1 + $0x2f4] ss:$8 sps:$4 sm:$0xff]  }
  0x8d   : > { %2093 = vmatpush1.bf16.msra.mxu0 %v3633_v18  ;;  %v3864_v18 = vld.sshfl [vmem:[%s4051_s5 + $0x8] sm:$0x5f pattern:$0x76325410] }
  0x8e   : > { %2094 = vmatprep.subr.bf16.mxu0 %v3641_v37 }
  0x8f   : > { %1028 = vmatpush1.bf16.msra.mxu1 %v3636_v57  ;;  %v3865_v57 = vld.sshfl [vmem:[%s4051_s5 + $0x10] sm:$0x5f pattern:$0x76325410] }
  0x90   : > { %1029 = vmatprep.subr.bf16.mxu1 %v3644_v38  ;;  %v1111_v37 = vcombine.low %v3864_v18, %v3865_v57  ;;  %v3866_v38 = vld.sshfl [vmem:[%s4051_s5 + $0x18] sm:$0x5f pattern:$0x76325410]  ;;  %v3780_v18 = vld [vmem:[%s5046_s1 + $0x3a0] ss:$8 sps:$4 sm:$0xff]  }
  0x91   : > { %2095 = vmatpush1.bf16.msra.mxu0 %v3639_v39  ;;  %v3867_v39 = vld.sshfl [vmem:[%s4051_s5 + $0x20] sm:$0x5f pattern:$0x76325410] }
  0x92   : > { %2096 = vmatprep.subr.bf16.mxu0 %v3647_v42  ;;  %v3711_v42 = vld [vmem:[%s5046_s1 + $0x6e0] ss:$8 sps:$4 sm:$0xff]   ;;  %v3785_v57 = vld [vmem:[%s5046_s1 + $0x7a4] ss:$8 sps:$4 sm:$0xff]  }
  0x93   : > { %1030 = vmatpush1.bf16.msra.mxu1 %v3642_v41  ;;  %v1112_v41 = vcombine.low %v3866_v38, %v3867_v39  ;;  %v3783_v38 = vld [vmem:[%s5046_s1 + $0x7a0] ss:$8 sps:$4 sm:$0xff]   ;;  %v3786_v39 = vld [vmem:[%s5046_s1 + $0x3b0] ss:$8 sps:$4 sm:$0xff]  }
  0x94   : > { %1031 = vmatprep.subr.bf16.mxu1 %v3650_v62  ;;  %v3714_v62 = vld [vmem:[%s5046_s1 + $0x2f0] ss:$8 sps:$4 sm:$0xff]  }
  0x95   : > { %2097 = vmatpush1.bf16.msra.mxu0 %v3645_v46  ;;  %v3719_v46 = vld [vmem:[%s5046_s1 + $0x6f4] ss:$8 sps:$4 sm:$0xff]  }
  0x96   : > { %2098 = vmatprep.subr.bf16.mxu0 %v3653_v47  ;;  %v4711_v47 = vrot.slane %v1111_v37, %v4098_v1  ;;  %v3788_v37 = vld [vmem:[%s5046_s1 + $0x3b4] ss:$8 sps:$4 sm:$0xff]  }
  0x97   : > { %1032 = vmatpush1.bf16.msra.mxu1 %v3648_v61  ;;  %v3722_v61 = vld [vmem:[%s5046_s1 + $0x304] ss:$8 sps:$4 sm:$0xff]  }
  0x98   : > { %1033 = vmatprep.subr.bf16.mxu1 %v3656_v48  ;;  %v4714_v48 = vrot.slane %v1112_v41, %v4098_v1  ;;  %v3791_v41 = vld [vmem:[%s5046_s1 + $0x7b4] ss:$8 sps:$4 sm:$0xff]  }
  0x99   : > { %2099 = vmatpush1.bf16.msra.mxu0 %v3651_v49  ;;  %v3717_v49 = vld [vmem:[%s5046_s1 + $0x6f0] ss:$8 sps:$4 sm:$0xff]  }
  0x9a   : > { %2100 = vmatprep.subr.bf16.mxu0 %v3659_v52  ;;  %v4723_v52 = vrot.slane %v4279_v54, %v4098_v1  ;;  %v3723_v54 = vld [vmem:[%s5046_s1 + $0x700] ss:$8 sps:$4 sm:$0xff]  }
  0x9b   : > { %1034 = vmatpush1.bf16.msra.mxu1 %v3654_v51  ;;  %v859_v51 = vcombine.low %v4500_v4, %v4503_v10  ;;  %v1128_v4 = vcombine.high %v4711_v47, %v4714_v48 }
  0x9c   : > { %1035 = vmatprep.subr.bf16.mxu1 %v3662_v53  ;;  %v3720_v53 = vld [vmem:[%s5046_s1 + $0x300] ss:$8 sps:$4 sm:$0xff]  }
  0x9d   : > { %2101 = vmatpush1.bf16.msra.mxu0 %v3657_v3  ;;  %v3725_v3 = vld [vmem:[%s5046_s1 + $0x704] ss:$8 sps:$4 sm:$0xff]  }
  0x9e   : > { %2102 = vmatprep.subr.bf16.mxu0 %v3665_v20  ;;  %v2194_v20 = vcombine.high %v4249_v36, %v4723_v52 }
  0x9f   : > { %1036 = vmatpush1.bf16.msra.mxu1 %v3660_v56  ;;  %v3728_v56 = vld [vmem:[%s5046_s1 + $0x314] ss:$8 sps:$4 sm:$0xff]  }
  0xa0   : > { %1037 = vmatprep.subr.bf16.mxu1 %v3668_v59  ;;  %v3726_v59 = vld [vmem:[%s5046_s1 + $0x310] ss:$8 sps:$4 sm:$0xff]  }
  0xa1   : > { %2103 = vmatpush1.bf16.msra.mxu0 %v3663_v60  ;;  %v3731_v60 = vld [vmem:[%s5046_s1 + $0x714] ss:$8 sps:$4 sm:$0xff]  }
  0xa2   : > { %2104 = vmatprep.subr.bf16.mxu0 %v3671_v2  ;;  %v3729_v2 = vld [vmem:[%s5046_s1 + $0x710] ss:$8 sps:$4 sm:$0xff]  }
  0xa3   : > { %1038 = vmatpush1.bf16.msra.mxu1 %v3666_v0  ;;  %v3734_v0 = vld [vmem:[%s5046_s1 + $0x324] ss:$8 sps:$4 sm:$0xff]  }
  0xa4   : > { %1039 = vmatprep.subr.bf16.mxu1 %v3674_v45  ;;  %v3732_v45 = vld [vmem:[%s5046_s1 + $0x320] ss:$8 sps:$4 sm:$0xff]  }
  0xa5   : > { %2105 = vmatpush1.bf16.msra.mxu0 %v3669_v55  ;;  %v3737_v55 = vld [vmem:[%s5046_s1 + $0x724] ss:$8 sps:$4 sm:$0xff]  }
  0xa6   : > { %2106 = vmatprep.subr.bf16.mxu0 %v3677_v7  ;;  %v3746_v7 = vld [vmem:[%s5046_s1 + $0x344] ss:$8 sps:$4 sm:$0xff]  }
  0xa7   : > { %1040 = vmatpush1.bf16.msra.mxu1 %v3672_v58  ;;  %v3743_v58 = vld [vmem:[%s5046_s1 + $0x734] ss:$8 sps:$4 sm:$0xff]  }
  0xa8   : > { %1041 = vmatprep.subr.bf16.mxu1 %v3680_v11  ;;  %v3741_v11 = vld [vmem:[%s5046_s1 + $0x730] ss:$8 sps:$4 sm:$0xff]  }
  0xa9   : > { %2107 = vmatpush1.bf16.msra.mxu0 %v3675_v12  ;;  %v3744_v12 = vld [vmem:[%s5046_s1 + $0x340] ss:$8 sps:$4 sm:$0xff]  }
  0xaa   : > { %2108 = vmatprep.subr.bf16.mxu0 %v3683_v40  ;;  %v3752_v40 = vld [vmem:[%s5046_s1 + $0x354] ss:$8 sps:$4 sm:$0xff]  }
  0xab   : > { %1042 = vmatpush1.bf16.msra.mxu1 %v3678_v15  ;;  %v3749_v15 = vld [vmem:[%s5046_s1 + $0x744] ss:$8 sps:$4 sm:$0xff]  }
  0xac   : > { %1043 = vmatprep.subr.bf16.mxu1 %v3686_v44  ;;  %v3747_v44 = vld [vmem:[%s5046_s1 + $0x740] ss:$8 sps:$4 sm:$0xff]  }
  0xad   : > { %2109 = vmatpush1.bf16.msra.mxu0 %v3681_v16  ;;  %v3750_v16 = vld [vmem:[%s5046_s1 + $0x350] ss:$8 sps:$4 sm:$0xff]  }
  0xae   : > { %2110 = vmatprep.subr.bf16.mxu0 %v3689_v21  ;;  %v3758_v21 = vld [vmem:[%s5046_s1 + $0x364] ss:$8 sps:$4 sm:$0xff]  }
  0xaf   : > { %1044 = vmatpush1.bf16.msra.mxu1 %v3684_v19  ;;  %v3755_v19 = vld [vmem:[%s5046_s1 + $0x754] ss:$8 sps:$4 sm:$0xff]  }
  0xb0   : > { %1045 = vmatprep.subr.bf16.mxu1 %v3692_v22  ;;  %v3753_v22 = vld [vmem:[%s5046_s1 + $0x750] ss:$8 sps:$4 sm:$0xff]  }
  0xb1   : > { %2111 = vmatpush1.bf16.msra.mxu0 %v3687_v23  ;;  %v3756_v23 = vld [vmem:[%s5046_s1 + $0x360] ss:$8 sps:$4 sm:$0xff]  }
  0xb2   : > { %2112 = vmatprep.subr.bf16.mxu0 %v3695_v25  ;;  %v3764_v25 = vld [vmem:[%s5046_s1 + $0x374] ss:$8 sps:$4 sm:$0xff]  }
  0xb3   : > { %1046 = vmatpush1.bf16.msra.mxu1 %v3690_v8  ;;  %v3761_v8 = vld [vmem:[%s5046_s1 + $0x764] ss:$8 sps:$4 sm:$0xff]  }
  0xb4   : > { %1047 = vmatprep.subr.bf16.mxu1 %v3698_v26  ;;  %v3759_v26 = vld [vmem:[%s5046_s1 + $0x760] ss:$8 sps:$4 sm:$0xff]  }
  0xb5   : > { %2113 = vmatpush1.bf16.msra.mxu0 %v3693_v43  ;;  %v3762_v43 = vld [vmem:[%s5046_s1 + $0x370] ss:$8 sps:$4 sm:$0xff]  }
  0xb6   : > { %2114 = vmatprep.subr.bf16.mxu0 %v3701_v27  ;;  %v3770_v27 = vld [vmem:[%s5046_s1 + $0x384] ss:$8 sps:$4 sm:$0xff]  }
  0xb7   : > { %1048 = vmatpush1.bf16.msra.mxu1 %v3696_v9  ;;  %v3767_v9 = vld [vmem:[%s5046_s1 + $0x774] ss:$8 sps:$4 sm:$0xff]  }
  0xb8   : > { %1049 = vmatprep.subr.bf16.mxu1 %v3704_v28  ;;  %v3765_v28 = vld [vmem:[%s5046_s1 + $0x770] ss:$8 sps:$4 sm:$0xff]  }
  0xb9   : > { %2115 = vmatpush1.bf16.msra.mxu0 %v3699_v29  ;;  %v3768_v29 = vld [vmem:[%s5046_s1 + $0x380] ss:$8 sps:$4 sm:$0xff]  }
  0xba   : > { %2116 = vmatprep.subr.bf16.mxu0 %v3707_v32  ;;  %v3776_v32 = vld [vmem:[%s5046_s1 + $0x394] ss:$8 sps:$4 sm:$0xff]  }
  0xbb   : > { %1050 = vmatpush1.bf16.msra.mxu1 %v3702_v31  ;;  %v3773_v31 = vld [vmem:[%s5046_s1 + $0x784] ss:$8 sps:$4 sm:$0xff]  }
  0xbc   : > { %1051 = vmatprep.subr.bf16.mxu1 %v3710_v33  ;;  %v3771_v33 = vld [vmem:[%s5046_s1 + $0x780] ss:$8 sps:$4 sm:$0xff]  }
  0xbd   : > { %2117 = vmatpush1.bf16.msra.mxu0 %v3705_v34  ;;  %v3774_v34 = vld [vmem:[%s5046_s1 + $0x390] ss:$8 sps:$4 sm:$0xff]  }
  0xbe   : > { %2118 = vmatprep.subr.bf16.mxu0 %v3713_v6  ;;  %v3782_v6 = vld [vmem:[%s5046_s1 + $0x3a4] ss:$8 sps:$4 sm:$0xff]  }
  0xbf   : > { %1052 = vmatpush1.bf16.msra.mxu1 %v3708_v35  ;;  %v3779_v35 = vld [vmem:[%s5046_s1 + $0x794] ss:$8 sps:$4 sm:$0xff]  }
  0xc0   : > { %1053 = vmatprep.subr.bf16.mxu1 %v3716_v13  ;;  %v3777_v13 = vld [vmem:[%s5046_s1 + $0x790] ss:$8 sps:$4 sm:$0xff]  }
  0xc1   : > { %2119 = vmatpush1.bf16.msra.mxu0 %v3711_v42  ;;  %v3794_v42 = vld [vmem:[%s5046_s1 + $0x3c4] ss:$8 sps:$4 sm:$0xff]  }
  0xc2   : > { %2120 = vmatprep.subr.bf16.mxu0 %v3719_v46  ;;  %v3792_v46 = vld [vmem:[%s5046_s1 + $0x3c0] ss:$8 sps:$4 sm:$0xff]  }
  0xc3   : > { %1054 = vmatpush1.bf16.msra.mxu1 %v3714_v62  ;;  %v3789_v62 = vld [vmem:[%s5046_s1 + $0x7b0] ss:$8 sps:$4 sm:$0xff]  }
  0xc4   : > { %1291 = vmatprep.subr.bf16.mxu1 %v3722_v61  ;;  %v3797_v61 = vld [vmem:[%s5046_s1 + $0x7c4] ss:$8 sps:$4 sm:$0xff]  }
  0xc5   : > { %2121 = vmatpush1.bf16.msra.mxu0 %v3717_v49  ;;  %v3800_v49 = vld [vmem:[%s5046_s1 + $0x3d4] ss:$8 sps:$4 sm:$0xff]  }
  0xc6   : > { %1056 = vmatmul.mubr.bf16.vlgmr.msra.gmra.mrb[0].mxu1 %v859_v51  ;;  %2357 = vmatprep.subr.bf16.mxu0 %v3725_v3  ;;  %v3795_v51 = vld [vmem:[%s5046_s1 + $0x7c0] ss:$8 sps:$4 sm:$0xff]   ;;  %v3803_v3 = vld [vmem:[%s5046_s1 + $0x7d4] ss:$8 sps:$4 sm:$0xff]  }
  0xc7   : > { %1292 = vmatpush1.bf16.msra.mxu1 %v3720_v53  ;;  %1323 = vmatprep.mubr.bf16.mxu1 %v1128_v4  ;;  %v3798_v53 = vld [vmem:[%s5046_s1 + $0x3d0] ss:$8 sps:$4 sm:$0xff]  }
  0xc8   : > { %1293 = vmatprep.subr.bf16.mxu1 %v3728_v56  ;;  %2123 = vmatmul.mubr.bf16.vlgmr.msra.gmra.mrb[0].mxu0 %v1926_v17  ;;  %v3738_v17 = vld [vmem:[%s5046_s1 + $0x330] ss:$8 sps:$4 sm:$0xff]   ;;  %v3868_v56 = vld.sshfl [vmem:[%s4051_s5 + $0x28] sm:$0x5f pattern:$0x76325410] }
  0xc9   : > { %2358 = vmatpush1.bf16.msra.mxu0 %v3723_v54  ;;  %2389 = vmatprep.mubr.bf16.mxu0 %v2194_v20  ;;  %v3310_v4 = vrot.slane %v3868_v56, 9  ;;  %v2406_v54 = vrot.slane %v4192_v63, 7  ;;  %v3806_v20 = vld [vmem:[%s5046_s1 + $0x3e4] ss:$8 sps:$4 sm:$0xff]  }
  0xca   : > { %2359 = vmatprep.subr.bf16.mxu0 %v3731_v60  ;;  %v3804_v60 = vld [vmem:[%s5046_s1 + $0x3e0] ss:$8 sps:$4 sm:$0xff]   ;;  %v3809_v63 = vld [vmem:[%s5046_s1 + $0x7e4] ss:$8 sps:$4 sm:$0xff]  }
  0xcb   : > { %1294 = vmatpush1.bf16.msra.mxu1 %v3726_v59  ;;  %v3801_v59 = vld [vmem:[%s5046_s1 + $0x7d0] ss:$8 sps:$4 sm:$0xff]  }
  0xcc   : > { %1295 = vmatprep.subr.bf16.mxu1 %v3734_v0  ;;  %v2407_v0 = vsel %vm4237_vm13, %v3310_v4, %v2406_v54 }
  0xcd   : > { %2360 = vmatpush1.bf16.msra.mxu0 %v3729_v2  ;;  %v3812_v2 = vld [vmem:[%s5046_s1 + $0x3f4] ss:$8 sps:$4 sm:$0xff]  }
  0xce   : > { %2361 = vmatprep.subr.bf16.mxu0 %v3737_v55  ;;  %v2441_v55 = vcombine.low %v4301_v5, %v2407_v0 }
  0xcf   : > { %1296 = vmatpush1.bf16.msra.mxu1 %v3732_v45  ;;  %v3807_v45 = vld [vmem:[%s5046_s1 + $0x7e0] ss:$8 sps:$4 sm:$0xff]  }
  0xd0   : > { %1297 = vmatprep.subr.bf16.mxu1 %v3740_v24  ;;  %v3810_v24 = vld [vmem:[%s5046_s1 + $0x3f0] ss:$8 sps:$4 sm:$0xff]   ;;  %v4929_v5 = vrot.slane %v2441_v55, %v4098_v1  ;;  %v3821_v1 = vld [vmem:[%s5046_s1 + $0x814] ss:$8 sps:$4 sm:$0xff]  }
  0xd1   : > { %2362 = vmatpush1.bf16.msra.mxu0 %v3735_v14  ;;  %v3813_v14 = vld [vmem:[%s5046_s1 + $0x7f0] ss:$8 sps:$4 sm:$0xff]  }
  0xd2   : > { %2363 = vmatprep.subr.bf16.mxu0 %v3743_v58  ;;  %v3818_v58 = vld [vmem:[%s5046_s1 + $0x804] ss:$8 sps:$4 sm:$0xff]  }
  0xd3   : > { %1298 = vmatpush1.bf16.msra.mxu1 %v3738_v17  ;;  %v1127_v17 = vcombine.low %v4711_v47, %v4714_v48  ;;  %v2450_v47 = vcombine.high %v4503_v10, %v4929_v5  ;;  %v3824_v48 = vld [vmem:[%s5046_s1 + $0x824] ss:$8 sps:$4 sm:$0xff]  }
  0xd4   : > { %1299 = vmatprep.subr.bf16.mxu1 %v3746_v7  ;;  %v2193_v7 = vcombine.low %v4249_v36, %v4723_v52  ;;  %v3819_v36 = vld [vmem:[%s5046_s1 + $0x810] ss:$8 sps:$4 sm:$0xff]   ;;  %v3822_v52 = vld [vmem:[%s5046_s1 + $0x820] ss:$8 sps:$4 sm:$0xff]  }
  0xd5   : > { %2364 = vmatpush1.bf16.msra.mxu0 %v3741_v11  ;;  %v3816_v11 = vld [vmem:[%s5046_s1 + $0x800] ss:$8 sps:$4 sm:$0xff]  }
  0xd6   : > { %2365 = vmatprep.subr.bf16.mxu0 %v3749_v15  ;;  %v3825_v15 = vld [vmem:[%s5046_s1 + $0x830] ss:$8 sps:$4 sm:$0xff]  }
  0xd7   : > { %1300 = vmatpush1.bf16.msra.mxu1 %v3744_v12  ;;  %v3827_v12 = vld [vmem:[%s5046_s1 + $0x834] ss:$8 sps:$4 sm:$0xff]  }
  0xd8   : > { %1301 = vmatprep.subr.bf16.mxu1 %v3752_v40  ;;  %v3830_v40 = vld [vmem:[%s5046_s1 + $0x844] ss:$8 sps:$4 sm:$0xff]  }
  0xd9   : > { %2366 = vmatpush1.bf16.msra.mxu0 %v3747_v44  ;;  %v3828_v44 = vld [vmem:[%s5046_s1 + $0x840] ss:$8 sps:$4 sm:$0xff]  }
  0xda   : > { %2367 = vmatprep.subr.bf16.mxu0 %v3755_v19  ;;  %v3831_v19 = vld [vmem:[%s5046_s1 + $0x850] ss:$8 sps:$4 sm:$0xff]  }
  0xdb   : > { %1302 = vmatpush1.bf16.msra.mxu1 %v3750_v16  ;;  %v3833_v16 = vld [vmem:[%s5046_s1 + $0x854] ss:$8 sps:$4 sm:$0xff]  }
  0xdc   : > { %1303 = vmatprep.subr.bf16.mxu1 %v3758_v21  ;;  %v3836_v21 = vld [vmem:[%s5046_s1 + $0x864] ss:$8 sps:$4 sm:$0xff]  }
  0xdd   : > { %2368 = vmatpush1.bf16.msra.mxu0 %v3753_v22  ;;  %v3834_v22 = vld [vmem:[%s5046_s1 + $0x860] ss:$8 sps:$4 sm:$0xff]  }
  0xde   : > { %2369 = vmatprep.subr.bf16.mxu0 %v3761_v8  ;;  %v3837_v8 = vld [vmem:[%s5046_s1 + $0x870] ss:$8 sps:$4 sm:$0xff]  }
  0xdf   : > { %1304 = vmatpush1.bf16.msra.mxu1 %v3756_v23  ;;  %v3839_v23 = vld [vmem:[%s5046_s1 + $0x874] ss:$8 sps:$4 sm:$0xff]  }
  0xe0   : > { %1305 = vmatprep.subr.bf16.mxu1 %v3764_v25  ;;  %v3842_v25 = vld [vmem:[%s5046_s1 + $0x884] ss:$8 sps:$4 sm:$0xff]  }
  0xe1   : > { %2370 = vmatpush1.bf16.msra.mxu0 %v3759_v26  ;;  %v3840_v26 = vld [vmem:[%s5046_s1 + $0x880] ss:$8 sps:$4 sm:$0xff]  }
  0xe2   : > { %2371 = vmatprep.subr.bf16.mxu0 %v3767_v9  ;;  %v3843_v9 = vld [vmem:[%s5046_s1 + $0x890] ss:$8 sps:$4 sm:$0xff]  }
  0xe3   : > { %1306 = vmatpush1.bf16.msra.mxu1 %v3762_v43  ;;  %v3845_v43 = vld [vmem:[%s5046_s1 + $0x894] ss:$8 sps:$4 sm:$0xff]  }
  0xe4   : > { %1307 = vmatprep.subr.bf16.mxu1 %v3770_v27  ;;  %v3848_v27 = vld [vmem:[%s5046_s1 + $0x8a4] ss:$8 sps:$4 sm:$0xff]  }
  0xe5   : > { %2372 = vmatpush1.bf16.msra.mxu0 %v3765_v28  ;;  %v3846_v28 = vld [vmem:[%s5046_s1 + $0x8a0] ss:$8 sps:$4 sm:$0xff]  }
  0xe6   : > { %2373 = vmatprep.subr.bf16.mxu0 %v3773_v31  ;;  %v3849_v31 = vld [vmem:[%s5046_s1 + $0x8b0] ss:$8 sps:$4 sm:$0xff]  }
  0xe7   : > { %1308 = vmatpush1.bf16.msra.mxu1 %v3768_v29  ;;  %v3851_v29 = vld [vmem:[%s5046_s1 + $0x8b4] ss:$8 sps:$4 sm:$0xff]  }
  0xe8   : > { %1309 = vmatprep.subr.bf16.mxu1 %v3776_v32  ;;  %v3854_v32 = vld [vmem:[%s5046_s1 + $0x8c4] ss:$8 sps:$4 sm:$0xff]  }
  0xe9   : > { %2374 = vmatpush1.bf16.msra.mxu0 %v3771_v33  ;;  %v3852_v33 = vld [vmem:[%s5046_s1 + $0x8c0] ss:$8 sps:$4 sm:$0xff]  }
  0xea   : > { %2375 = vmatprep.subr.bf16.mxu0 %v3779_v35  ;;  %v3855_v35 = vld [vmem:[%s5046_s1 + $0x8d0] ss:$8 sps:$4 sm:$0xff]  }
  0xeb   : > { %1310 = vmatpush1.bf16.msra.mxu1 %v3774_v34  ;;  %v3857_v34 = vld [vmem:[%s5046_s1 + $0x8d4] ss:$8 sps:$4 sm:$0xff]  }
  0xec   : > { %1311 = vmatprep.subr.bf16.mxu1 %v3782_v6  ;;  %v3860_v6 = vld [vmem:[%s5046_s1 + $0x8e4] ss:$8 sps:$4 sm:$0xff]  }
  0xed   : > { %2376 = vmatpush1.bf16.msra.mxu0 %v3777_v13  ;;  %v3858_v13 = vld [vmem:[%s5046_s1 + $0x8e0] ss:$8 sps:$4 sm:$0xff]  }
  0xee   : > { %2377 = vmatprep.subr.bf16.mxu0 %v3785_v57  ;;  %v3861_v57 = vld [vmem:[%s5046_s1 + $0x8f0] ss:$8 sps:$4 sm:$0xff]  }
  0xef   : > { %1312 = vmatpush1.bf16.msra.mxu1 %v3780_v18  ;;  %v3863_v18 = vld [vmem:[%s5046_s1 + $0x8f4] ss:$8 sps:$4 sm:$0xff]  }
  0xf0   : > { %1313 = vmatprep.subr.bf16.mxu1 %v3788_v37  ;;  %v2449_v37 = vcombine.low %v4503_v10, %v4929_v5 }
  0xf1   : > { %2378 = vmatpush1.bf16.msra.mxu0 %v3783_v38 }
  0xf2   : > { %2379 = vmatprep.subr.bf16.mxu0 %v3791_v41 }
  0xf3   : > { %1314 = vmatpush1.bf16.msra.mxu1 %v3786_v39 }
  0xf4   : > { %1315 = vmatprep.subr.bf16.mxu1 %v3794_v42 }
  0xf5   : > { %2380 = vmatpush1.bf16.msra.mxu0 %v3789_v62  ;;  %v2664_v62 = vsub.s32 0, %v4056_v50 }
  0xf6   : > { %2381 = vmatprep.subr.bf16.mxu0 %v3797_v61  ;;  %v2668_v61 = vsub.s32 1, %v4056_v50 }
  0xf7   : > { %1316 = vmatpush1.bf16.msra.mxu1 %v3792_v46  ;;  %v2660_v46 = vld [vmem:[%s5047_s2] sm:$0x3] }
  0xf8   : > { %1317 = vmatprep.subr.bf16.mxu1 %v3800_v49  ;;  %v2665_v49 = vrot.slane %v2660_v46, %v2664_v62 }
  0xf9   : > { %2382 = vmatpush1.bf16.msra.mxu0 %v3795_v51 }
  0xfa   : > { %2383 = vmatprep.subr.bf16.mxu0 %v3803_v3 }
  0xfb   : > { %1318 = vmatpush1.bf16.msra.mxu1 %v3798_v53  ;;  %v2669_v53 = vrot.slane %v2660_v46, %v2668_v61 }
  0xfc   : > { %1319 = vmatprep.subr.bf16.mxu1 %v3806_v20 }
  0xfd   : > { %2384 = vmatpush1.bf16.msra.mxu0 %v3801_v59 }
  0xfe   : > { %2385 = vmatprep.subr.bf16.mxu0 %v3809_v63 }
  0xff   : > { %1320 = vmatpush1.bf16.msra.mxu1 %v3804_v60 }
 0x100   : > { %1321 = vmatprep.subr.bf16.mxu1 %v3812_v2 }
 0x101   : > { %2386 = vmatpush1.bf16.msra.mxu0 %v3807_v45 }
 0x102   : > { %2387 = vmatprep.subr.bf16.mxu0 %v3815_v30 }
 0x103   : > { %1322 = vmatpush1.bf16.msra.mxu1 %v3810_v24 }
 0x105   : > { %2388 = vmatpush1.bf16.msra.mxu0 %v3813_v14 }
 0x106   : > { %1324 = vmatmul.mubr.bf16.vlgmr.msra.gmra.mrb[0].mxu1 %v1127_v17  ;;  %2613 = vmatprep.subr.bf16.mxu0 %v3818_v58 }
 0x108   : > { %2390 = vmatmul.mubr.bf16.vlgmr.msra.gmra.mrb[0].mxu0 %v2193_v7 }
 0x109   : > { %2614 = vmatpush1.bf16.msra.mxu0 %v3816_v11  ;;  %2645 = vmatprep.mubr.bf16.mxu0 %v2450_v47 }
 0x10a   : > { %2615 = vmatprep.subr.bf16.mxu0 %v3821_v1 }
 0x10d   : > { %2616 = vmatpush1.bf16.msra.mxu0 %v3819_v36 }
 0x10e   : > { %2617 = vmatprep.subr.bf16.mxu0 %v3824_v48 }
 0x111   : > { %2618 = vmatpush1.bf16.msra.mxu0 %v3822_v52 }
 0x112   : > { %2619 = vmatprep.subr.bf16.mxu0 %v3827_v12 }
 0x115   : > { %2620 = vmatpush1.bf16.msra.mxu0 %v3825_v15 }
 0x116   : > { %2621 = vmatprep.subr.bf16.mxu0 %v3830_v40 }
 0x119   : > { %2622 = vmatpush1.bf16.msra.mxu0 %v3828_v44 }
 0x11a   : > { %2623 = vmatprep.subr.bf16.mxu0 %v3833_v16 }
 0x11d   : > { %2624 = vmatpush1.bf16.msra.mxu0 %v3831_v19 }
 0x11e   : > { %2625 = vmatprep.subr.bf16.mxu0 %v3836_v21 }
 0x121   : > { %2626 = vmatpush1.bf16.msra.mxu0 %v3834_v22 }
 0x122   : > { %2627 = vmatprep.subr.bf16.mxu0 %v3839_v23 }
 0x125   : > { %2628 = vmatpush1.bf16.msra.mxu0 %v3837_v8 }
 0x126   : > { %2629 = vmatprep.subr.bf16.mxu0 %v3842_v25 }
 0x129   : > { %2630 = vmatpush1.bf16.msra.mxu0 %v3840_v26 }
 0x12a   : > { %2631 = vmatprep.subr.bf16.mxu0 %v3845_v43 }
 0x12d   : > { %2632 = vmatpush1.bf16.msra.mxu0 %v3843_v9 }
 0x12e   : > { %2633 = vmatprep.subr.bf16.mxu0 %v3848_v27 }
 0x131   : > { %2634 = vmatpush1.bf16.msra.mxu0 %v3846_v28 }
 0x132   : > { %2635 = vmatprep.subr.bf16.mxu0 %v3851_v29 }
 0x135   : > { %2636 = vmatpush1.bf16.msra.mxu0 %v3849_v31 }
 0x136   : > { %2637 = vmatprep.subr.bf16.mxu0 %v3854_v32 }
 0x139   : > { %2638 = vmatpush1.bf16.msra.mxu0 %v3852_v33 }
 0x13a   : > { %2639 = vmatprep.subr.bf16.mxu0 %v3857_v34 }
 0x13d   : > { %2640 = vmatpush1.bf16.msra.mxu0 %v3855_v35 }
 0x13e   : > { %2641 = vmatprep.subr.bf16.mxu0 %v3860_v6 }
 0x141   : > { %2642 = vmatpush1.bf16.msra.mxu0 %v3858_v13 }
 0x142   : > { %2643 = vmatprep.subr.bf16.mxu0 %v3863_v18 }
 0x145   : > { %2644 = vmatpush1.bf16.msra.mxu0 %v3861_v57 }
 0x148   : > { %2646 = vmatmul.mubr.bf16.vlgmr.msra.gmra.mrb[0].mxu0 %v2449_v37 }
 0x1d9   : > { %v1325_v38 = vpop.f32.mrb[0].mxu1 }
 0x1da   : > { %v1327_v39 = vpop.f32.mrb[1].mxu1 }
 0x1db   : > { %v1329_v41 = vpop.f32.mrb[2].mxu1 }
 0x1dc   : > { %v1331_v42 = vpop.f32.mrb[3].mxu1 }
 0x21b   : > { %v2647_v51 = vpop.f32.mrb[0].mxu0 }
 0x21c   : > { %v3390_v3 = vadd.f32 %v2647_v51, %v1325_v38  ;;  %v2649_v10 = vpop.f32.mrb[1].mxu0 }
 0x21d   : > { %v3391_v56 = vadd.f32 %v2649_v10, %v1327_v39  ;;  %v2651_v4 = vpop.f32.mrb[2].mxu0 }
 0x21e   : > { %v2672_v54 = vadd.f32 %v3390_v3, %v2665_v49  ;;  %v3392_v20 = vadd.f32 %v2651_v4, %v1329_v41  ;;  %v2653_v59 = vpop.f32.mrb[3].mxu0 }
 0x21f   : > { %v2673_v60 = vadd.f32 %v3391_v56, %v2669_v53  ;;  %v3393_v63 = vadd.f32 %v2653_v59, %v1331_v42 }
 0x220   : > { %v2676_v0 = vmax.f32 %v2672_v54, 0.0  ;;  %v2674_v2 = vadd.f32 %v3392_v20, %v2665_v49 }
 0x221   : > { %v2677_v45 = vmax.f32 %v2673_v60, 0.0  ;;  %v2675_v55 = vadd.f32 %v3393_v63, %v2669_v53 }
 0x222   : > { %v2678_v24 = vmax.f32 %v2674_v2, 0.0 }
 0x223   : > { %v2684_v30 = vcombine.low %v2676_v0, %v2677_v45  ;;  %v2685_v50 = vcombine.high %v2676_v0, %v2677_v45  ;;  %v3375_v14 = vcombine.low %v2677_v45, %v2677_v45  ;;  %v3376_v17 = vcombine.high %v2677_v45, %v2677_v45 }
 0x224   : > { %v2679_v5 = vmax.f32 %v2675_v55, 0.0 }
 0x225   : > { %v3379_v58 = vpack.c.bf16 %v3375_v14, %v2684_v30  ;;  %v3380_v7 = vpack.c.bf16 %v3376_v17, %v2685_v50 }
 0x226   : > { %v2686_v11 = vcombine.low %v2678_v24, %v2679_v5  ;;  %v2687_v47 = vcombine.high %v2678_v24, %v2679_v5  ;;  %v3377_v1 = vcombine.low %v2679_v5, %v2679_v5  ;;  %v3378_v36 = vcombine.high %v2679_v5, %v2679_v5 }
 0x227   : > { %3383 = vst.sshfl [vmem:[%s170_s15] sm:$0x33 pattern:$0x76325410] %v3379_v58 }
 0x228   : > { %3384 = vst.sshfl [vmem:[%s170_s15 + $0x4] sm:$0x33 pattern:$0x76325410] %v3380_v7  ;;  %v3381_v48 = vpack.c.bf16 %v3377_v1, %v2686_v11  ;;  %v3382_v52 = vpack.c.bf16 %v3378_v36, %v2687_v47 }
 0x22a   : > { %3385 = vst.sshfl [vmem:[%s170_s15 + $0x8] sm:$0x33 pattern:$0x76325410] %v3381_v48 }
 0x22b   : > { %3386 = vst.sshfl [vmem:[%s170_s15 + $0xc] sm:$0x33 pattern:$0x76325410] %v3382_v52 }
 0x22c PF: > { %s13_s12 = sadd.s32 1, %s3875_s12  }
 0x22d   : > { %p10_p4 = scmp.ge.s32.totalorder %s13_s12, 6  }
 0x22f   :  { %12 = sbr.rel (!%p10_p4) target bundleno = 1 (0x1), region = 70 }

// kernel: sr_loss.22
= control target key start
LH: loop header
LB: loop body
LE: loop exit
PB: predicated region body
PF: predicated region fallthrough
CT: control target
= control target key end

     0   :  { %s412_s9 = smov 0   ;;  %s414_s10 = smov 0   ;;  %s455_s0 = inlined_call_operand.vmem [shape: bf16[32,512], index: 0, kind: input, shape index: {}]   ;;  %s456_s1 = inlined_call_operand.vmem [shape: bf16[32,512], index: 1, kind: input, shape index: {}]   ;;  %s457_s2 = inlined_call_operand.vmem [shape: f32[2,1,1], index: 2, kind: output, shape index: {}]  }
   0x1   :  { %s416_s11 = smov 0  }
   0x2 LB: > { %s24_s12 = sadd.s32 1, %s390_s10  ;;  %p334_p0 = scmp.ge.s32.totalorder %s394_s11, 1  ;;  %s394_s11 = sphi %s416_s11, %s12_s11   ;;  %s390_s10 = sphi %s414_s10, %s459_s10   ;;  %s386_s9 = sphi %s412_s9, %s458_s9  }
   0x3   : > { %p26_p1 = scmp.ge.s32.totalorder %s24_s12, 2  ;;  %p146_p2 = scmp.lt.s32.totalorder %s394_s11, 3 }
   0x5   : > { %s461_s12 = smov (%p26_p1, %s24_s12), 0  ;;  %p147_p3 = pnand %p334_p0, %p146_p2 }
   0x6   : > { %s335_s13 = sshll.u32 (!%p147_p3), %s386_s9, 1  ;;  %p193_p5 = scmp.lt.s32.totalorder (!%p147_p3), %s386_s9, 1  ;;  %vm200_vm0 = vcmask (!%p147_p3), 0   ;;  %v396_v47 = vmov (!%p147_p3), 0.0  }
   0x7   : > { %150 = sbr.rel (%p147_p3) target bundleno = 247 (0xf7), region = 28  ;;  %p177_p4 = scmp.lt.s32.totalorder (!%p147_p3), %s335_s13, 3 }
   0xe   : > { %s463_s13 = smov (!%p177_p4, %s335_s13), 3  ;;  %s465_s9 = smov (!%p193_p5, %s386_s9), 1 }
   0xf   : > { %s343_s14 = sshll.u32 %s463_s13, 4  ;;  %s195_s23 = scalar_lea.vmem %s457_s2, %s465_s9 }
  0x10   : > { %s181_s17 = scalar_lea.vmem %s455_s0, %s343_s14  ;;  %s190_s20 = scalar_lea.vmem %s456_s1, %s343_s14  ;;  %201 = vst.msk [vmem:[%s195_s23] sm:$0x1] %vm200_vm0, %v396_v47 }
  0x11   : > { %v202_v0 = vld [vmem:[%s181_s17] sm:$0xff]  ;;  %v203_v1 = vld [vmem:[%s181_s17 + $0x8] sm:$0xff]  ;;  %v204_v2 = vld [vmem:[%s181_s17 + $0x10] sm:$0xff] }
  0x12   : > { %v206_v3 = vunpack.c.l.bf16 %v202_v0  ;;  %v207_v4 = vunpack.c.h.bf16 %v202_v0  ;;  %v208_v5 = vunpack.c.l.bf16 %v203_v1  ;;  %v209_v6 = vunpack.c.h.bf16 %v203_v1  ;;  %v214_v7 = vld [vmem:[%s190_s20] sm:$0xff]  ;;  %v215_v8 = vld [vmem:[%s190_s20 + $0x8] sm:$0xff]  ;;  %v216_v10 = vld [vmem:[%s190_s20 + $0x10] sm:$0xff] }
  0x13   : > { %v210_v9 = vunpack.c.l.bf16 %v204_v2  ;;  %v205_v11 = vld [vmem:[%s181_s17 + $0x18] sm:$0xff]  ;;  %v218_v13 = vunpack.c.l.bf16 %v214_v7  ;;  %v219_v14 = vunpack.c.h.bf16 %v214_v7  ;;  %v220_v15 = vunpack.c.l.bf16 %v215_v8 }
  0x14   : > { %v217_v12 = vld [vmem:[%s190_s20 + $0x18] sm:$0xff]  ;;  %v221_v16 = vunpack.c.h.bf16 %v215_v8  ;;  %v211_v17 = vunpack.c.h.bf16 %v204_v2  ;;  %v222_v18 = vunpack.c.l.bf16 %v216_v10  ;;  %v223_v19 = vunpack.c.h.bf16 %v216_v10 }
  0x15   : > { %v226_v20 = vsub.f32 %v206_v3, %v218_v13  ;;  %v227_v21 = vsub.f32 %v207_v4, %v219_v14  ;;  %v228_v22 = vsub.f32 %v208_v5, %v220_v15  ;;  %v212_v24 = vunpack.c.l.bf16 %v205_v11 }
  0x16   : > { %v229_v23 = vsub.f32 %v209_v6, %v221_v16  ;;  %v224_v25 = vunpack.c.l.bf16 %v217_v12  ;;  %v230_v26 = vsub.f32 %v210_v9, %v222_v18  ;;  %v213_v30 = vunpack.c.h.bf16 %v205_v11 }
  0x17   : > { %v234_v27 = vand.u32 2147483647, %v226_v20  ;;  %v235_v28 = vand.u32 2147483647, %v227_v21  ;;  %v236_v29 = vand.u32 2147483647, %v228_v22  ;;  %v225_v31 = vunpack.c.h.bf16 %v217_v12 }
  0x18   : > { %v231_v32 = vsub.f32 %v211_v17, %v223_v19  ;;  %v237_v33 = vand.u32 2147483647, %v229_v23  ;;  %v232_v35 = vsub.f32 %v212_v24, %v224_v25  ;;  %v238_v36 = vand.u32 2147483647, %v230_v26  ;;  %v242_v55 = vld [vmem:[%s195_s23] sm:$0x1] }
  0x19   : > { %v243_v34 = vadd.f32 %v235_v28, %v234_v27  ;;  %v233_v38 = vsub.f32 %v213_v30, %v225_v31 }
  0x1a   : > { %v239_v39 = vand.u32 2147483647, %v231_v32  ;;  %v240_v41 = vand.u32 2147483647, %v232_v35 }
  0x1b   : > { %v244_v37 = vadd.f32 %v243_v34, %v236_v29  ;;  %v241_v43 = vand.u32 2147483647, %v233_v38 }
  0x1d   : > { %v245_v40 = vadd.f32 %v244_v37, %v237_v33 }
  0x1f   : > { %v246_v42 = vadd.f32 %v245_v40, %v238_v36 }
  0x21   : > { %v247_v44 = vadd.f32 %v246_v42, %v239_v39 }
  0x23   : > { %v248_v45 = vadd.f32 %v247_v44, %v240_v41 }
  0x25   : > { %v249_v46 = vadd.f32 %v248_v45, %v241_v43 }
  0x27   : > { %250 = vadd.xlane.f32.xlu0 %v249_v46 }
  0xb4   : > { %v251_v48 = vpop.xlane.xlu0 %250 }
  0xb5   : > { %v252_v49 = vrot.slane %v251_v48, 4 }
  0xb7   : > { %v253_v50 = vadd.f32 %v252_v49, %v251_v48 }
  0xb9   : > { %v254_v51 = vrot.slane %v253_v50, 2 }
  0xbb   : > { %v255_v52 = vadd.f32 %v254_v51, %v253_v50 }
  0xbd   : > { %v256_v53 = vrot.slane %v255_v52, 1 }
  0xbf   : > { %v257_v54 = vadd.f32 %v256_v53, %v255_v52 }
  0xc1   : > { %345 = vpush %v257_v54 }
  0xf2   : > { %s346_s24 = spop %345 }
  0xf3   : > { %v259_v56 = vstv %s346_s24 }
  0xf4   : > { %v260_v57 = vadd.f32 %v259_v56, %v242_v55 }
  0xf6   : > { %262 = vst.msk [vmem:[%s195_s23] sm:$0x1] %vm200_vm0, %v260_v57 }
  0xf7 PF: > { %s12_s11 = sadd.s32 1, %s394_s11   ;;  %s458_s9 = smov %s390_s10 }
  0xf8   : > { %p9_p6 = scmp.ge.s32.totalorder %s12_s11, 4   ;;  %s459_s10 = smov %s461_s12 }
  0xfa   :  { %11 = sbr.rel (!%p9_p6) target bundleno = 2 (0x2), region = 65 }

// kernel: sr_loss.21
= control target key start
LH: loop header
LB: loop body
LE: loop exit
PB: predicated region body
PF: predicated region fallthrough
CT: control target
= control target key end

     0   :  { %s460_s9 = smov 0   ;;  %s462_s10 = smov 0   ;;  %s523_s0 = inlined_call_operand.vmem [shape: bf16[64,512], index: 0, kind: input, shape index: {}]   ;;  %s524_s1 = inlined_call_operand.vmem [shape: bf16[64,512], index: 1, kind: input, shape index: {}]   ;;  %s525_s2 = inlined_call_operand.vmem [shape: f32[2,1,1], index: 2, kind: output, shape index: {}]  }
   0x1   :  { %s464_s11 = smov 0  }
   0x2 LB: > { %s24_s12 = sadd.s32 1, %s438_s10  ;;  %p382_p0 = scmp.ge.s32.totalorder %s442_s11, 1  ;;  %s442_s11 = sphi %s464_s11, %s12_s11   ;;  %s438_s10 = sphi %s462_s10, %s527_s10   ;;  %s434_s9 = sphi %s460_s9, %s526_s9  }
   0x3   : > { %p26_p1 = scmp.ge.s32.totalorder %s24_s12, 2  ;;  %p146_p2 = scmp.lt.s32.totalorder %s442_s11, 3 }
   0x5   : > { %s529_s12 = smov (%p26_p1, %s24_s12), 0  ;;  %p147_p3 = pnand %p382_p0, %p146_p2 }
   0x6   : > { %s383_s13 = sshll.u32 (!%p147_p3), %s434_s9, 2  ;;  %p193_p5 = scmp.lt.s32.totalorder (!%p147_p3), %s434_s9, 1  ;;  %vm200_vm0 = vcmask (!%p147_p3), 0  }
   0x7   : > { %150 = sbr.rel (%p147_p3) target bundleno = 263 (0x107), region = 28  ;;  %p177_p4 = scmp.lt.s32.totalorder (!%p147_p3), %s383_s13, 7 }
   0xe   : > { %s531_s13 = smov (!%p177_p4, %s383_s13), 7  ;;  %s533_s9 = smov (!%p193_p5, %s434_s9), 1 }
   0xf   : > { %s391_s14 = sshll.u32 %s531_s13, 4  ;;  %s195_s23 = scalar_lea.vmem %s525_s2, %s533_s9 }
  0x10   : > { %s484_s17 = scalar_lea.vmem %s523_s0, %s391_s14  ;;  %s489_s20 = scalar_lea.vmem %s524_s1, %s391_s14 }
  0x11   : > { %v202_v0 = vld [vmem:[%s484_s17] sm:$0xff]  ;;  %v203_v1 = vld [vmem:[%s484_s17 + $0x8] sm:$0xff]  ;;  %v204_v6 = vld [vmem:[%s484_s17 + $0x10] sm:$0xff] }
  0x12   : > { %v226_v2 = vld [vmem:[%s489_s20] sm:$0xff]  ;;  %v227_v3 = vld [vmem:[%s489_s20 + $0x8] sm:$0xff]  ;;  %v210_v4 = vunpack.c.l.bf16 %v202_v0  ;;  %v211_v5 = vunpack.c.h.bf16 %v202_v0  ;;  %v212_v7 = vunpack.c.l.bf16 %v203_v1  ;;  %v228_v11 = vld [vmem:[%s489_s20 + $0x10] sm:$0xff]  ;;  %v213_v12 = vunpack.c.h.bf16 %v203_v1 }
  0x13   : > { %v234_v8 = vunpack.c.l.bf16 %v226_v2  ;;  %v235_v9 = vunpack.c.h.bf16 %v226_v2  ;;  %v236_v10 = vunpack.c.l.bf16 %v227_v3  ;;  %v237_v13 = vunpack.c.h.bf16 %v227_v3  ;;  %v205_v15 = vld [vmem:[%s484_s17 + $0x18] sm:$0xff]  ;;  %v206_v24 = vld [vmem:[%s484_s17 + $0x20] sm:$0xff]  ;;  %v207_v38 = vld [vmem:[%s484_s17 + $0x28] sm:$0xff] }
  0x14   : > { %v214_v14 = vunpack.c.l.bf16 %v204_v6  ;;  %v229_v16 = vld [vmem:[%s489_s20 + $0x18] sm:$0xff]  ;;  %v238_v17 = vunpack.c.l.bf16 %v228_v11  ;;  %v215_v21 = vunpack.c.h.bf16 %v204_v6  ;;  %v239_v22 = vunpack.c.h.bf16 %v228_v11  ;;  %v230_v32 = vld [vmem:[%s489_s20 + $0x20] sm:$0xff]  ;;  %v231_v44 = vld [vmem:[%s489_s20 + $0x28] sm:$0xff] }
  0x15   : > { %v250_v18 = vsub.f32 %v210_v4, %v234_v8  ;;  %v251_v19 = vsub.f32 %v211_v5, %v235_v9  ;;  %v252_v20 = vsub.f32 %v212_v7, %v236_v10  ;;  %v253_v23 = vsub.f32 %v213_v12, %v237_v13  ;;  %v208_v50 = vld [vmem:[%s484_s17 + $0x30] sm:$0xff]  ;;  %v209_v62 = vld [vmem:[%s484_s17 + $0x38] sm:$0xff] }
  0x16   : > { %v216_v25 = vunpack.c.l.bf16 %v205_v15  ;;  %v240_v26 = vunpack.c.l.bf16 %v229_v16  ;;  %v254_v27 = vsub.f32 %v214_v14, %v238_v17  ;;  %v217_v31 = vunpack.c.h.bf16 %v205_v15  ;;  %v232_v56 = vld [vmem:[%s489_s20 + $0x30] sm:$0xff]  ;;  %v233_v4 = vld [vmem:[%s489_s20 + $0x38] sm:$0xff] }
  0x17   : > { %v266_v28 = vand.u32 2147483647, %v250_v18  ;;  %v267_v29 = vand.u32 2147483647, %v251_v19  ;;  %v268_v30 = vand.u32 2147483647, %v252_v20  ;;  %v241_v33 = vunpack.c.h.bf16 %v229_v16 }
  0x18   : > { %v255_v34 = vsub.f32 %v215_v21, %v239_v22  ;;  %v269_v35 = vand.u32 2147483647, %v253_v23  ;;  %v218_v37 = vunpack.c.l.bf16 %v206_v24  ;;  %v242_v39 = vunpack.c.l.bf16 %v230_v32 }
  0x19   : > { %v283_v36 = vadd.f32 %v267_v29, %v266_v28  ;;  %v256_v40 = vsub.f32 %v216_v25, %v240_v26  ;;  %v270_v41 = vand.u32 2147483647, %v254_v27  ;;  %v219_v43 = vunpack.c.h.bf16 %v206_v24 }
  0x1a   : > { %v243_v45 = vunpack.c.h.bf16 %v230_v32  ;;  %v257_v46 = vsub.f32 %v217_v31, %v241_v33  ;;  %v271_v47 = vand.u32 2147483647, %v255_v34  ;;  %v220_v49 = vunpack.c.l.bf16 %v207_v38 }
  0x1b   : > { %v284_v42 = vadd.f32 %v283_v36, %v268_v30  ;;  %v244_v51 = vunpack.c.l.bf16 %v231_v44  ;;  %v258_v52 = vsub.f32 %v218_v37, %v242_v39  ;;  %v272_v53 = vand.u32 2147483647, %v256_v40 }
  0x1c   : > { %v221_v55 = vunpack.c.h.bf16 %v207_v38  ;;  %v245_v57 = vunpack.c.h.bf16 %v231_v44  ;;  %v259_v58 = vsub.f32 %v219_v43, %v243_v45  ;;  %v273_v59 = vand.u32 2147483647, %v257_v46 }
  0x1d   : > { %v285_v48 = vadd.f32 %v284_v42, %v269_v35  ;;  %v222_v61 = vunpack.c.l.bf16 %v208_v50  ;;  %v246_v63 = vunpack.c.l.bf16 %v232_v56  ;;  %v260_v0 = vsub.f32 %v220_v49, %v244_v51 }
  0x1e   : > { %v274_v1 = vand.u32 2147483647, %v258_v52  ;;  %v223_v3 = vunpack.c.h.bf16 %v208_v50  ;;  %v247_v5 = vunpack.c.h.bf16 %v232_v56  ;;  %v261_v6 = vsub.f32 %v221_v55, %v245_v57 }
  0x1f   : > { %v286_v54 = vadd.f32 %v285_v48, %v270_v41  ;;  %v275_v7 = vand.u32 2147483647, %v259_v58  ;;  %v224_v9 = vunpack.c.l.bf16 %v209_v62  ;;  %v248_v10 = vunpack.c.l.bf16 %v233_v4 }
  0x20   : > { %v262_v11 = vsub.f32 %v222_v61, %v246_v63  ;;  %v276_v12 = vand.u32 2147483647, %v260_v0  ;;  %v225_v14 = vunpack.c.h.bf16 %v209_v62  ;;  %v249_v15 = vunpack.c.h.bf16 %v233_v4 }
  0x21   : > { %v287_v60 = vadd.f32 %v286_v54, %v271_v47  ;;  %v263_v16 = vsub.f32 %v223_v3, %v247_v5  ;;  %v277_v17 = vand.u32 2147483647, %v261_v6  ;;  %v264_v19 = vsub.f32 %v224_v9, %v248_v10 }
  0x22   : > { %v278_v20 = vand.u32 2147483647, %v262_v11  ;;  %v265_v22 = vsub.f32 %v225_v14, %v249_v15  ;;  %v444_v31 = vmov 0.0  }
  0x23   : > { %v288_v2 = vadd.f32 %v287_v60, %v272_v53  ;;  %v279_v23 = vand.u32 2147483647, %v263_v16  ;;  %v280_v25 = vand.u32 2147483647, %v264_v19  ;;  %201 = vst.msk [vmem:[%s195_s23] sm:$0x1] %vm200_vm0, %v444_v31 }
  0x24   : > { %v281_v27 = vand.u32 2147483647, %v265_v22 }
  0x25   : > { %v289_v8 = vadd.f32 %v288_v2, %v273_v59 }
  0x27   : > { %v290_v13 = vadd.f32 %v289_v8, %v274_v1 }
  0x29   : > { %v291_v18 = vadd.f32 %v290_v13, %v275_v7 }
  0x2a   : > { %v282_v39 = vld [vmem:[%s195_s23] sm:$0x1] }
  0x2b   : > { %v292_v21 = vadd.f32 %v291_v18, %v276_v12 }
  0x2d   : > { %v293_v24 = vadd.f32 %v292_v21, %v277_v17 }
  0x2f   : > { %v294_v26 = vadd.f32 %v293_v24, %v278_v20 }
  0x31   : > { %v295_v28 = vadd.f32 %v294_v26, %v279_v23 }
  0x33   : > { %v296_v29 = vadd.f32 %v295_v28, %v280_v25 }
  0x35   : > { %v297_v30 = vadd.f32 %v296_v29, %v281_v27 }
  0x37   : > { %298 = vadd.xlane.f32.xlu0 %v297_v30 }
  0xc4   : > { %v299_v32 = vpop.xlane.xlu0 %298 }
  0xc5   : > { %v300_v33 = vrot.slane %v299_v32, 4 }
  0xc7   : > { %v301_v34 = vadd.f32 %v300_v33, %v299_v32 }
  0xc9   : > { %v302_v35 = vrot.slane %v301_v34, 2 }
  0xcb   : > { %v303_v36 = vadd.f32 %v302_v35, %v301_v34 }
  0xcd   : > { %v304_v37 = vrot.slane %v303_v36, 1 }
  0xcf   : > { %v305_v38 = vadd.f32 %v304_v37, %v303_v36 }
  0xd1   : > { %393 = vpush %v305_v38 }
 0x102   : > { %s394_s24 = spop %393 }
 0x103   : > { %v307_v40 = vstv %s394_s24 }
 0x104   : > { %v308_v41 = vadd.f32 %v307_v40, %v282_v39 }
 0x106   : > { %310 = vst.msk [vmem:[%s195_s23] sm:$0x1] %vm200_vm0, %v308_v41 }
 0x107 PF: > { %s12_s11 = sadd.s32 1, %s442_s11   ;;  %s526_s9 = smov %s438_s10 }
 0x108   : > { %p9_p6 = scmp.ge.s32.totalorder %s12_s11, 4   ;;  %s527_s10 = smov %s529_s12 }
 0x10a   :  { %11 = sbr.rel (!%p9_p6) target bundleno = 2 (0x2), region = 65 }

// kernel: sr_loss.12
= control target key start
LH: loop header
LB: loop body
LE: loop exit
PB: predicated region body
PF: predicated region fallthrough
CT: control target
= control target key end

     0   :  { %s372_s9 = smov 0   ;;  %s374_s10 = smov 0   ;;  %s408_s0 = inlined_call_operand.vmem [shape: f32[16,512], index: 0, kind: input, shape index: {}]   ;;  %s409_s1 = inlined_call_operand.vmem [shape: f32[16,512], index: 1, kind: input, shape index: {}]   ;;  %s410_s2 = inlined_call_operand.vmem [shape: f32[2,1,1], index: 2, kind: output, shape index: {}]  }
   0x1   :  { %s376_s11 = smov 0  }
   0x2 LB: > { %s24_s12 = sadd.s32 1, %s350_s10  ;;  %p296_p0 = scmp.ge.s32.totalorder %s354_s11, 1  ;;  %s354_s11 = sphi %s376_s11, %s12_s11   ;;  %s350_s10 = sphi %s374_s10, %s412_s10   ;;  %s346_s9 = sphi %s372_s9, %s411_s9  }
   0x3   : > { %p26_p1 = scmp.ge.s32.totalorder %s24_s12, 2  ;;  %p142_p2 = scmp.lt.s32.totalorder %s354_s11, 3 }
   0x5   : > { %s414_s12 = smov (%p26_p1, %s24_s12), 0  ;;  %p143_p3 = pnand %p296_p0, %p142_p2 }
   0x6   : > { %p170_p4 = scmp.lt.s32.totalorder (!%p143_p3), %s346_s9, 1  ;;  %vm190_vm0 = vcmask (!%p143_p3), 0   ;;  %v356_v19 = vmov (!%p143_p3), 0.0  }
   0x7   : > { %146 = sbr.rel (%p143_p3) target bundleno = 237 (0xed), region = 28 }
   0xe   : > { %s416_s9 = smov (!%p170_p4, %s346_s9), 1 }
   0xf   : > { %s303_s13 = sshll.u32 %s416_s9, 5  ;;  %s185_s22 = scalar_lea.vmem %s410_s2, %s416_s9 }
  0x10   : > { %s174_s16 = scalar_lea.vmem %s408_s0, %s303_s13  ;;  %s181_s19 = scalar_lea.vmem %s409_s1, %s303_s13  ;;  %191 = vst.msk [vmem:[%s185_s22] sm:$0x1] %vm190_vm0, %v356_v19 }
  0x11   : > { %v192_v0 = vld [vmem:[%s174_s16] sm:$0xff]  ;;  %v193_v1 = vld [vmem:[%s174_s16 + $0x8] sm:$0xff]  ;;  %v194_v2 = vld [vmem:[%s174_s16 + $0x10] sm:$0xff] }
  0x12   : > { %v195_v3 = vld [vmem:[%s174_s16 + $0x18] sm:$0xff]  ;;  %v196_v4 = vld [vmem:[%s181_s19] sm:$0xff]  ;;  %v197_v5 = vld [vmem:[%s181_s19 + $0x8] sm:$0xff] }
  0x13   : > { %v198_v6 = vld [vmem:[%s181_s19 + $0x10] sm:$0xff]  ;;  %v199_v7 = vld [vmem:[%s181_s19 + $0x18] sm:$0xff]  ;;  %v200_v8 = vsub.f32 %v192_v0, %v196_v4  ;;  %v201_v9 = vsub.f32 %v193_v1, %v197_v5 }
  0x14   : > { %v202_v10 = vsub.f32 %v194_v2, %v198_v6  ;;  %v203_v11 = vsub.f32 %v195_v3, %v199_v7 }
  0x15   : > { %v204_v12 = vand.u32 2147483647, %v200_v8  ;;  %v205_v13 = vand.u32 2147483647, %v201_v9 }
  0x16   : > { %v206_v14 = vand.u32 2147483647, %v202_v10  ;;  %v207_v15 = vand.u32 2147483647, %v203_v11 }
  0x17   : > { %v209_v16 = vadd.f32 %v205_v13, %v204_v12  ;;  %v208_v27 = vld [vmem:[%s185_s22] sm:$0x1] }
  0x19   : > { %v210_v17 = vadd.f32 %v209_v16, %v206_v14 }
  0x1b   : > { %v211_v18 = vadd.f32 %v210_v17, %v207_v15 }
  0x1d   : > { %212 = vadd.xlane.f32.xlu0 %v211_v18 }
  0xaa   : > { %v213_v20 = vpop.xlane.xlu0 %212 }
  0xab   : > { %v214_v21 = vrot.slane %v213_v20, 4 }
  0xad   : > { %v215_v22 = vadd.f32 %v214_v21, %v213_v20 }
  0xaf   : > { %v216_v23 = vrot.slane %v215_v22, 2 }
  0xb1   : > { %v217_v24 = vadd.f32 %v216_v23, %v215_v22 }
  0xb3   : > { %v218_v25 = vrot.slane %v217_v24, 1 }
  0xb5   : > { %v219_v26 = vadd.f32 %v218_v25, %v217_v24 }
  0xb7   : > { %305 = vpush %v219_v26 }
  0xe8   : > { %s306_s23 = spop %305 }
  0xe9   : > { %v221_v28 = vstv %s306_s23 }
  0xea   : > { %v222_v29 = vadd.f32 %v221_v28, %v208_v27 }
  0xec   : > { %224 = vst.msk [vmem:[%s185_s22] sm:$0x1] %vm190_vm0, %v222_v29 }
  0xed PF: > { %s12_s11 = sadd.s32 1, %s354_s11   ;;  %s411_s9 = smov %s350_s10 }
  0xee   : > { %p9_p5 = scmp.ge.s32.totalorder %s12_s11, 4   ;;  %s412_s10 = smov %s414_s12 }
  0xf0   :  { %11 = sbr.rel (!%p9_p5) target bundleno = 2 (0x2), region = 65 }

</bundles_post_ra>
